<compile_context>
chip_gen: v7x
topology: tpu7x:2x2x1
jax: 0.10.0
libtpu: 0.0.40
codegen_flags: <defaults>
</compile_context>

<pallas_src>
import jax
import jax.numpy as jnp
from jax import lax
from jax.experimental import pallas as pl
from jax.experimental.pallas import tpu as pltpu

EPS = 1e-5
HDC_CFG = [(256, 32, 1), (32, 32, 2), (32, 64, 5),
           (64, 64, 1), (64, 64, 2), (64, 128, 5)]  # (Cin, Cout, dilation == padding)

_VMEM_LIMIT = 48 * 1024 * 1024  # < 64 MiB (v7x physical); fine on v5e/v6e


# ----------------------------- static helpers ------------------------------

def _taps_for(d, n_pts, kk):
    """Kept (dh, dw) offsets of the dilated 3x3 kernel and their weight indices.

    dh acts on the point axis (size n_pts), dw on the neighbor axis (size kk).
    Taps whose offset is >= the axis extent only ever read zero padding and are
    dropped exactly (e.g. dilation-5 taps on the neighbor axis when k <= 5)."""
    taps, w_idx = [], []
    for kh in range(3):
        for kw in range(3):
            dh, dw = (kh - 1) * d, (kw - 1) * d
            if dh != 0 and abs(dh) >= n_pts:
                continue
            if dw != 0 and abs(dw) >= kk:
                continue
            taps.append((dh, dw))
            w_idx.append(kh * 3 + kw)
    return taps, w_idx


def _shift_rows(x, s):
    """y[r] = x[r + s] with zero fill outside [0, rows); s is a static int."""
    if s == 0:
        return x
    rows, cols = x.shape
    z = jnp.zeros((abs(s), cols), x.dtype)
    if s > 0:
        return jnp.concatenate([x[s:, :], z], axis=0)
    return jnp.concatenate([z, x[:rows + s, :]], axis=0)


# ----------------------------- Pallas kernels ------------------------------

def _pdist_kernel(xt_ref, xc_ref, o_ref):
    # xt: (1, N, C) bf16, xc: (1, C, N) bf16 -> o: (1, N, N)
    # o[i, j] = 2*xi.xj - ||xj||^2  (the per-row-constant -||xi||^2 term is
    # dropped: it cannot change the per-row top-k ordering).
    xt = xt_ref[0]
    inner = lax.dot_general(xt, xt, (((1,), (1,)), ((), ())),
                            preferred_element_type=jnp.float32)       # x x^T on MXU
    xc = xc_ref[0].astype(jnp.float32)                                # (C, N)
    xx_row = jnp.sum(xc * xc, axis=0, keepdims=True)                  # (1, N) = ||xj||^2
    o_ref[0] = 2.0 * inner - xx_row


def _make_attn_graph_kernel(kk, n_pts, c_dim):
    """Fused attention MLP (batched over k*N rows) + softmax over k + graph-feature."""
    nk = kk * n_pts

    def kernel(feat_ref, cent_ref, w1_ref, b1_ref, w2_ref, b2_ref, o_ref):
        feat = feat_ref[0].astype(jnp.float32)                        # (k, N, C) f32
        c = cent_ref[0]                                               # (N, C) f32
        # one matmul pair for all k*N rows (single weight push, full MXU rows)
        dif = (feat - c[None, :, :]).astype(jnp.bfloat16).reshape(nk, c_dim)
        hid = jnp.dot(dif, w1_ref[...], preferred_element_type=jnp.float32) + b1_ref[...]
        hid = jnp.maximum(hid, 0.0).astype(jnp.bfloat16)
        scores = jnp.dot(hid, w2_ref[...], preferred_element_type=jnp.float32) + b2_ref[...]
        scores = scores.reshape(kk, n_pts, 128)
        # softmax over the neighbor axis (leading dim -> cheap VPU reductions)
        m = jnp.max(scores, axis=0, keepdims=True)
        e = jnp.exp(scores - m)
        den = jnp.sum(e, axis=0, keepdims=True)
        wgt = e * pl.reciprocal(den, approx=True)                     # EUP slot
        weighted = feat * wgt                                         # requires C == 128
        first = (weighted - c[None, :, :]).reshape(nk, c_dim)
        o_ref[0, :, pl.ds(0, c_dim)] = first.astype(o_ref.dtype)
        # center half: identical per neighbor -> store slab-by-slab, no big concat
        c_store = c.astype(o_ref.dtype)
        for j in range(kk):
            o_ref[0, pl.ds(j * n_pts, n_pts), pl.ds(c_dim, c_dim)] = c_store
    return kernel


def _make_conv_kernel(kk, n_pts, taps, cout, normalize_input):
    """Fused: [prev BN(train)+ReLU] -> dilated 3x3 conv as ONE wide MXU matmul
    with output-side per-tap shift/mask/accumulate -> partial BN stats."""
    nk = kk * n_pts

    def kernel(x_ref, w_ref, b_ref, scale_ref, shift_ref, y_ref, stats_ref):
        x = x_ref[0]                                                  # (k*N, Cin) bf16
        if normalize_input:  # previous layer's BatchNorm(training) + ReLU, fused
            xf = x.astype(jnp.float32) * scale_ref[...] + shift_ref[...]
            x = jnp.maximum(xf, 0.0).astype(jnp.bfloat16)
        else:
            x = x.astype(jnp.bfloat16)

        # ONE wide matmul for all taps: (kN, Cin) @ (Cin, T*Cout) -> f32 on MXU.
        part_all = jnp.dot(x, w_ref[...], preferred_element_type=jnp.float32)

        # h coordinate of each output row, for the point-axis validity masks.
        need_mask = any(dh != 0 for dh, _ in taps)
        if need_mask:
            hcoord = lax.broadcasted_iota(jnp.int32, (nk, 1), 0) % n_pts

        # Output-side shift + mask on Cout-wide partials, accumulated in f32.
        acc = None
        for t, (dh, dw) in enumerate(taps):
            part = part_all[:, t * cout:(t + 1) * cout]               # (kN, Cout) f32
            shifted = _shift_rows(part, dw * n_pts + dh)              # acc[r] += part[r+s]
            if dh > 0:
                shifted = jnp.where(hcoord < n_pts - dh, shifted, 0.0)
            elif dh < 0:
                shifted = jnp.where(hcoord >= -dh, shifted, 0.0)
            acc = shifted if acc is None else acc + shifted
        y = acc + b_ref[...]                                          # conv bias

        y_ref[0] = y.astype(y_ref.dtype)                              # pre-BN output (bf16)
        s1 = jnp.sum(y, axis=0, keepdims=True)                        # per-block BN partials
        s2 = jnp.sum(y * y, axis=0, keepdims=True)
        stats_ref[0] = jnp.concatenate([s1, s2], axis=0)              # (2, Cout) f32
    return kernel


def _make_bn_relu_max_kernel(kk, n_pts):
    """Final BN(train)+ReLU fused with the max over the k neighbors (per-slab f32)."""
    def kernel(y_ref, scale_ref, shift_ref, o_ref):
        scale, shift = scale_ref[...], shift_ref[...]
        m = None
        for j in range(kk):
            yj = y_ref[0, pl.ds(j * n_pts, n_pts), :].astype(jnp.float32)
            hj = jnp.maximum(yj * scale + shift, 0.0)
            m = hj if m is None else jnp.maximum(m, hj)
        o_ref[0] = m                                                  # (N, 128) f32
    return kernel


# ----------------------------- pallas_call wrappers -------------------------

def pairwise_neg_sqdist(xt_bf16, xc_bf16):
    b, n, c = xt_bf16.shape
    return pl.pallas_call(
        _pdist_kernel,
        out_shape=jax.ShapeDtypeStruct((b, n, n), jnp.float32),
        grid=(b,),
        in_specs=[pl.BlockSpec((1, n, c), lambda i: (i, 0, 0)),
                  pl.BlockSpec((1, c, n), lambda i: (i, 0, 0))],
        out_specs=pl.BlockSpec((1, n, n), lambda i: (i, 0, 0)),
        compiler_params=pltpu.CompilerParams(
            dimension_semantics=("parallel",),
            vmem_limit_bytes=_VMEM_LIMIT),
    )(xt_bf16, xc_bf16)


def knn_idx(x, kk):
    xc = x.astype(jnp.bfloat16)                          # (B, C, N)
    xt = jnp.transpose(x, (0, 2, 1)).astype(jnp.bfloat16)
    pd = pairwise_neg_sqdist(xt, xc)
    return lax.top_k(pd, kk)[1]          # neighbor selection stays in XLA glue


def attn_graph_feature(feature, center, params):
    b, kk, n, c = feature.shape
    kernel = _make_attn_graph_kernel(kk, n, c)
    return pl.pallas_call(
        kernel,
        out_shape=jax.ShapeDtypeStruct((b, kk * n, 2 * c), jnp.bfloat16),
        grid=(b,),
        in_specs=[pl.BlockSpec((1, kk, n, c), lambda i: (i, 0, 0, 0)),
                  pl.BlockSpec((1, n, c), lambda i: (i, 0, 0)),
                  pl.BlockSpec((c, 64), lambda i: (0, 0)),
                  pl.BlockSpec((1, 64), lambda i: (0, 0)),
                  pl.BlockSpec((64, 128), lambda i: (0, 0)),
                  pl.BlockSpec((1, 128), lambda i: (0, 0))],
        out_specs=pl.BlockSpec((1, kk * n, 2 * c), lambda i: (i, 0, 0)),
        compiler_params=pltpu.CompilerParams(
            dimension_semantics=("parallel",),
            vmem_limit_bytes=_VMEM_LIMIT),
    )(feature, center,
      params['aw1'].astype(jnp.bfloat16), params['ab1'],
      params['aw2'].astype(jnp.bfloat16), params['ab2'])


def fused_conv_stats(h, w_all, bias, scale, shift, taps, kk, n_pts, normalize_input):
    b, nk, cin = h.shape
    tcout = w_all.shape[1]
    cout = bias.shape[1]
    kernel = _make_conv_kernel(kk, n_pts, taps, cout, normalize_input)
    return pl.pallas_call(
        kernel,
        out_shape=(jax.ShapeDtypeStruct((b, nk, cout), jnp.bfloat16),
                   jax.ShapeDtypeStruct((b, 2, cout), jnp.float32)),
        grid=(b,),
        in_specs=[pl.BlockSpec((1, nk, cin), lambda i: (i, 0, 0)),
                  pl.BlockSpec((cin, tcout), lambda i: (0, 0)),
                  pl.BlockSpec((1, cout), lambda i: (0, 0)),
                  pl.BlockSpec((1, cin), lambda i: (0, 0)),
                  pl.BlockSpec((1, cin), lambda i: (0, 0))],
        out_specs=(pl.BlockSpec((1, nk, cout), lambda i: (i, 0, 0)),
                   pl.BlockSpec((1, 2, cout), lambda i: (i, 0, 0))),
        compiler_params=pltpu.CompilerParams(
            dimension_semantics=("parallel",),
            vmem_limit_bytes=_VMEM_LIMIT),
    )(h, w_all, bias, scale, shift)


def bn_relu_max(y, scale, shift, kk, n_pts):
    b, nk, c = y.shape
    kernel = _make_bn_relu_max_kernel(kk, n_pts)
    return pl.pallas_call(
        kernel,
        out_shape=jax.ShapeDtypeStruct((b, n_pts, c), jnp.float32),
        grid=(b,),
        in_specs=[pl.BlockSpec((1, nk, c), lambda i: (i, 0, 0)),
                  pl.BlockSpec((1, c), lambda i: (0, 0)),
                  pl.BlockSpec((1, c), lambda i: (0, 0))],
        out_specs=pl.BlockSpec((1, n_pts, c), lambda i: (i, 0, 0)),
        compiler_params=pltpu.CompilerParams(
            dimension_semantics=("parallel",),
            vmem_limit_bytes=_VMEM_LIMIT),
    )(y, scale, shift)


# ----------------------------- glue / forward ------------------------------

def _bn_scale_shift(stats, gamma, beta, n_rows):
    """Fold per-block (sum, sumsq) partials into per-channel BN scale/shift."""
    s = jnp.sum(stats, axis=0)                      # (2, C)
    mean = s[0:1] / n_rows
    var = jnp.maximum(s[1:2] / n_rows - mean * mean, 0.0)   # biased (torch train BN)
    scale = gamma * lax.rsqrt(var + EPS)
    shift = beta - mean * scale
    return scale, shift                             # (1, C) f32 each


def init_params(key, dim):
    n_layers = len(HDC_CFG)
    keys = jax.random.split(key, 4 + 2 * n_layers)
    p = {
        'aw1': jax.random.normal(keys[0], (dim, 64), jnp.float32) / jnp.sqrt(float(dim)),
        'ab1': jax.random.normal(keys[1], (1, 64), jnp.float32) * 0.01,
        'aw2': jax.random.normal(keys[2], (64, 128), jnp.float32) / 8.0,
        'ab2': jax.random.normal(keys[3], (1, 128), jnp.float32) * 0.01,
        'hdc': [],
    }
    for i, (cin, cout, _) in enumerate(HDC_CFG):
        fan_in = 9 * cin
        p['hdc'].append(dict(
            # weight stored as (kh*3+kw, Cin, Cout) -> tap t of the 3x3 kernel
            w=jax.random.normal(keys[4 + 2 * i], (9, cin, cout), jnp.float32)
              / jnp.sqrt(float(fan_in)),
            b=jax.random.normal(keys[5 + 2 * i], (1, cout), jnp.float32) * 0.01,
            g=jnp.ones((1, cout), jnp.float32),      # BN gamma (fresh module)
            beta=jnp.zeros((1, cout), jnp.float32),  # BN beta
        ))
    return p


def edge_conv_forward(x, k, params):
    """x: (B, dim, N) f32 -> (B, 128, N) f32 (same semantics as EdgeConv.forward)."""
    b, c, n = x.shape
    assert c == 128, "PyTorch broadcast in get_graph_feature requires dim == 128"
    kk = min(k, n)

    # ---- knn: Pallas pairwise distances, top-k index selection in glue ----
    idx = knn_idx(x, kk)                                            # (B, N, k)

    # ---- neighbor gather in k-major layout (XLA glue) ----
    xt = jnp.transpose(x, (0, 2, 1))                                # (B, N, C) f32
    idx_t = jnp.transpose(idx, (0, 2, 1))                           # (B, k, N)
    feature = xt[jnp.arange(b)[:, None, None], idx_t]               # (B, k, N, C)
    feature = feature.astype(jnp.bfloat16)

    # ---- fused attention MLP + softmax-over-k + graph-feature concat ----
    h = attn_graph_feature(feature, xt, params)                     # (B, k*N, 256) bf16

    # ---- HDC: 6 dilated 3x3 convs, each fused with the previous BN+ReLU ----
    n_rows = b * n * kk                                             # BN stats population
    scale = jnp.ones((1, 2 * c), jnp.float32)                       # unused for layer 0
    shift = jnp.zeros((1, 2 * c), jnp.float32)
    for li, ((cin, cout, d), lp) in enumerate(zip(HDC_CFG, params['hdc'])):
        taps, w_idx = _taps_for(d, n, kk)
        # fold all kept taps into one wide (Cin, T*Cout) weight -> single matmul
        w_sel = lp['w'][jnp.asarray(w_idx)]                         # (T, Cin, Cout)
        w_all = jnp.transpose(w_sel, (1, 0, 2)).reshape(
            cin, len(taps) * cout).astype(jnp.bfloat16)
        h, stats = fused_conv_stats(h, w_all, lp['b'], scale, shift,
                                    taps, kk, n, normalize_input=(li > 0))
        scale, shift = _bn_scale_shift(stats, lp['g'], lp['beta'], n_rows)

    # ---- last BN + ReLU + max over neighbors, fused ----
    out = bn_relu_max(h, scale, shift, kk, n)                       # (B, N, 128) f32
    return jnp.transpose(out, (0, 2, 1))                            # (B, 128, N)


# ----------------------------- pure-JAX f32 reference ----------------------

def reference_forward(x, k, params, idx):
    """f32 reference with the same math as the PyTorch module (shares knn idx)."""
    b, _, n = x.shape
    xt = jnp.transpose(x, (0, 2, 1))
    feature = xt[jnp.arange(b)[:, None, None], idx]                 # (B, N, k, C)
    center = xt[:, :, None, :]
    diff = feature - center
    hid = jnp.maximum(diff @ params['aw1'] + params['ab1'], 0.0)
    scores = hid @ params['aw2'] + params['ab2']
    wgt = jax.nn.softmax(scores, axis=2)
    a = jnp.concatenate([feature * wgt - center,
                         jnp.broadcast_to(center, feature.shape)], axis=-1)  # NHWC
    for (cin, cout, d), lp in zip(HDC_CFG, params['hdc']):
        w = lp['w'].reshape(3, 3, cin, cout)
        y = lax.conv_general_dilated(a, w, window_strides=(1, 1),
                                     padding=[(d, d), (d, d)], rhs_dilation=(d, d),
                                     dimension_numbers=('NHWC', 'HWIO', 'NHWC'))
        y = y + lp['b'].reshape(1, 1, 1, cout)
        mean = jnp.mean(y, axis=(0, 1, 2))
        var = jnp.mean((y - mean) ** 2, axis=(0, 1, 2))
        y = (y - mean) * lax.rsqrt(var + EPS) * lp['g'][0] + lp['beta'][0]
        a = jnp.maximum(y, 0.0)
    out = jnp.max(a, axis=2)                                        # max over k
    return jnp.transpose(out, (0, 2, 1))                            # (B, 128, N)


# ----------------------------- main ----------------------------------------

if __name__ == "__main__":
    B, DIM, N, K = 2, 128, 16, 4
    key = jax.random.PRNGKey(0)
    kx, kp = jax.random.split(key)
    x = jax.random.normal(kx, (B, DIM, N), jnp.float32)
    params = init_params(kp, DIM)

    fwd = jax.jit(edge_conv_forward, static_argnames=("k",))
    out = jax.block_until_ready(fwd(x, k=K, params=params))
    assert out.shape == (B, 128, N), out.shape
    assert bool(jnp.all(jnp.isfinite(out)))

    # Loose sanity check vs. the pure-JAX f32 reference (same knn indices);
    # the tolerance covers bf16 matmul operands / bf16 inter-layer storage.
    ref = reference_forward(x, K, params, knn_idx(x, min(K, N)))
    assert float(jnp.max(jnp.abs(out - ref))) < 0.5

    print("KERNEL_OK")
</pallas_src>

<mosaic_0001>
module attributes {stable_mosaic.version = 11 : i64} {
  func.func @_pdist_kernel(%arg0: i32, %arg1: memref<1x16x128xbf16, #tpu.memory_space<vmem>>, %arg2: memref<1x128x16xbf16, #tpu.memory_space<vmem>>, %arg3: memref<1x16x16xf32, #tpu.memory_space<vmem>>) attributes {dimension_semantics = [#tpu.dimension_semantics<parallel>], iteration_bounds = array<i64: 2>, scalar_prefetch = 0 : i64, scratch_operands = 0 : i64, tpu.core_type = #tpu.core_type<tc>, window_params = [{transform_indices = @transform_0, window_bounds = array<i64: 1, 16, 128>}, {transform_indices = @transform_1, window_bounds = array<i64: 1, 128, 16>}, {transform_indices = @transform_2, window_bounds = array<i64: 1, 16, 16>}]} {
    %c0 = arith.constant 0 : index
    %c0_0 = arith.constant 0 : index
    %c0_1 = arith.constant 0 : index
    %0 = vector.load %arg1[%c0, %c0_0, %c0_1] : memref<1x16x128xbf16, #tpu.memory_space<vmem>>, vector<1x16x128xbf16>
    %1 = vector.shape_cast %0 : vector<1x16x128xbf16> to vector<16x128xbf16>
    %cst = arith.constant dense<0.000000e+00> : vector<16x16xf32>
    %2 = tpu.matmul %1, %1, %cst {dimension_numbers = #tpu.dot_dimension_numbers<[1], [1], [0], [0], [0, 0, 1, 0], [], []>} : vector<16x128xbf16>, vector<16x128xbf16>, vector<16x16xf32> -> vector<16x16xf32>
    %c0_2 = arith.constant 0 : index
    %c0_3 = arith.constant 0 : index
    %c0_4 = arith.constant 0 : index
    %3 = vector.load %arg2[%c0_2, %c0_3, %c0_4] : memref<1x128x16xbf16, #tpu.memory_space<vmem>>, vector<1x128x16xbf16>
    %4 = vector.shape_cast %3 : vector<1x128x16xbf16> to vector<128x16xbf16>
    %5 = arith.extf %4 : vector<128x16xbf16> to vector<128x16xf32>
    %6 = arith.mulf %5, %5 : vector<128x16xf32>
    %cst_5 = arith.constant dense<0.000000e+00> : vector<16xf32>
    %7 = vector.multi_reduction <add>, %6, %cst_5 [0] : vector<128x16xf32> to vector<16xf32>
    %8 = vector.shape_cast %7 : vector<16xf32> to vector<1x16xf32>
    %cst_6 = arith.constant 2.000000e+00 : f32
    %9 = vector.broadcast %cst_6 : f32 to vector<16x16xf32>
    %10 = arith.mulf %9, %2 : vector<16x16xf32>
    %11 = vector.broadcast %8 : vector<1x16xf32> to vector<16x16xf32>
    %12 = arith.subf %10, %11 : vector<16x16xf32>
    %c0_7 = arith.constant 0 : index
    %c0_8 = arith.constant 0 : index
    %c0_9 = arith.constant 0 : index
    %13 = vector.load %arg3[%c0_7, %c0_8, %c0_9] : memref<1x16x16xf32, #tpu.memory_space<vmem>>, vector<1x16x16xf32>
    %14 = vector.shape_cast %13 : vector<1x16x16xf32> to vector<16x16xf32>
    %15 = vector.shape_cast %12 : vector<16x16xf32> to vector<1x16x16xf32>
    tpu.vector_store %arg3[%c0_7, %c0_8, %c0_9], %15 {strides = array<i32>} : memref<1x16x16xf32, #tpu.memory_space<vmem>>, vector<1x16x16xf32>,
    return
  }
  func.func @transform_0(%arg0: i32) -> (i32, i32, i32) {
    %c0_i32 = arith.constant 0 : i32
    %c0_i32_0 = arith.constant 0 : i32
    %c0_i32_1 = arith.constant 0 : i32
    return %arg0, %c0_i32, %c0_i32_0 : i32, i32, i32
  }
  func.func @transform_1(%arg0: i32) -> (i32, i32, i32) {
    %c0_i32 = arith.constant 0 : i32
    %c0_i32_0 = arith.constant 0 : i32
    %c0_i32_1 = arith.constant 0 : i32
    return %arg0, %c0_i32, %c0_i32_0 : i32, i32, i32
  }
  func.func @transform_2(%arg0: i32) -> (i32, i32, i32) {
    %c0_i32 = arith.constant 0 : i32
    %c0_i32_0 = arith.constant 0 : i32
    %c0_i32_1 = arith.constant 0 : i32
    return %arg0, %c0_i32, %c0_i32_0 : i32, i32, i32
  }
}

module attributes {stable_mosaic.version = 11 : i64} {
  func.func @kernel(%arg0: i32, %arg1: memref<1x4x16x128xbf16, #tpu.memory_space<vmem>>, %arg2: memref<1x16x128xf32, #tpu.memory_space<vmem>>, %arg3: memref<128x64xbf16, #tpu.memory_space<vmem>>, %arg4: memref<1x64xf32, #tpu.memory_space<vmem>>, %arg5: memref<64x128xbf16, #tpu.memory_space<vmem>>, %arg6: memref<1x128xf32, #tpu.memory_space<vmem>>, %arg7: memref<1x64x256xbf16, #tpu.memory_space<vmem>>) attributes {dimension_semantics = [#tpu.dimension_semantics<parallel>], iteration_bounds = array<i64: 2>, scalar_prefetch = 0 : i64, scratch_operands = 0 : i64, tpu.core_type = #tpu.core_type<tc>, window_params = [{transform_indices = @transform_0, window_bounds = array<i64: 1, 4, 16, 128>}, {transform_indices = @transform_1, window_bounds = array<i64: 1, 16, 128>}, {pipeline_mode = #tpu.pipeline_mode<synchronous>, transform_indices = @transform_2, window_bounds = array<i64: 128, 64>}, {pipeline_mode = #tpu.pipeline_mode<synchronous>, transform_indices = @transform_3, window_bounds = array<i64: 1, 64>}, {pipeline_mode = #tpu.pipeline_mode<synchronous>, transform_indices = @transform_4, window_bounds = array<i64: 64, 128>}, {pipeline_mode = #tpu.pipeline_mode<synchronous>, transform_indices = @transform_5, window_bounds = array<i64: 1, 128>}, {transform_indices = @transform_6, window_bounds = array<i64: 1, 64, 256>}]} {
    %c0 = arith.constant 0 : index
    %c0_0 = arith.constant 0 : index
    %c0_1 = arith.constant 0 : index
    %c0_2 = arith.constant 0 : index
    %0 = vector.load %arg1[%c0, %c0_0, %c0_1, %c0_2] : memref<1x4x16x128xbf16, #tpu.memory_space<vmem>>, vector<1x4x16x128xbf16>
    %1 = vector.shape_cast %0 : vector<1x4x16x128xbf16> to vector<4x16x128xbf16>
    %2 = arith.extf %1 : vector<4x16x128xbf16> to vector<4x16x128xf32>
    %c0_3 = arith.constant 0 : index
    %c0_4 = arith.constant 0 : index
    %c0_5 = arith.constant 0 : index
    %3 = vector.load %arg2[%c0_3, %c0_4, %c0_5] : memref<1x16x128xf32, #tpu.memory_space<vmem>>, vector<1x16x128xf32>
    %4 = vector.shape_cast %3 : vector<1x16x128xf32> to vector<16x128xf32>
    %5 = vector.shape_cast %4 : vector<16x128xf32> to vector<1x16x128xf32>
    %6 = vector.broadcast %5 : vector<1x16x128xf32> to vector<4x16x128xf32>
    %7 = arith.subf %2, %6 : vector<4x16x128xf32>
    %8 = arith.truncf %7 : vector<4x16x128xf32> to vector<4x16x128xbf16>
    %9 = vector.shape_cast %8 : vector<4x16x128xbf16> to vector<64x128xbf16>
    %c0_6 = arith.constant 0 : index
    %c0_7 = arith.constant 0 : index
    %10 = vector.load %arg3[%c0_6, %c0_7] : memref<128x64xbf16, #tpu.memory_space<vmem>>, vector<128x64xbf16>
    %cst = arith.constant dense<0.000000e+00> : vector<64x64xf32>
    %11 = tpu.matmul %9, %10, %cst {dimension_numbers = #tpu.dot_dimension_numbers<[1], [0], [0], [1], [0, 0, 1, 1], [], []>} : vector<64x128xbf16>, vector<128x64xbf16>, vector<64x64xf32> -> vector<64x64xf32>
    %c0_8 = arith.constant 0 : index
    %c0_9 = arith.constant 0 : index
    %12 = vector.load %arg4[%c0_8, %c0_9] : memref<1x64xf32, #tpu.memory_space<vmem>>, vector<1x64xf32>
    %13 = vector.broadcast %12 : vector<1x64xf32> to vector<64x64xf32>
    %14 = arith.addf %11, %13 : vector<64x64xf32>
    %cst_10 = arith.constant 0.000000e+00 : f32
    %15 = vector.broadcast %cst_10 : f32 to vector<64x64xf32>
    %16 = arith.maximumf %14, %15 : vector<64x64xf32>
    %17 = arith.truncf %16 : vector<64x64xf32> to vector<64x64xbf16>
    %c0_11 = arith.constant 0 : index
    %c0_12 = arith.constant 0 : index
    %18 = vector.load %arg5[%c0_11, %c0_12] : memref<64x128xbf16, #tpu.memory_space<vmem>>, vector<64x128xbf16>
    %cst_13 = arith.constant dense<0.000000e+00> : vector<64x128xf32>
    %19 = tpu.matmul %17, %18, %cst_13 {dimension_numbers = #tpu.dot_dimension_numbers<[1], [0], [0], [1], [0, 0, 1, 1], [], []>} : vector<64x64xbf16>, vector<64x128xbf16>, vector<64x128xf32> -> vector<64x128xf32>
    %c0_14 = arith.constant 0 : index
    %c0_15 = arith.constant 0 : index
    %20 = vector.load %arg6[%c0_14, %c0_15] : memref<1x128xf32, #tpu.memory_space<vmem>>, vector<1x128xf32>
    %21 = vector.broadcast %20 : vector<1x128xf32> to vector<64x128xf32>
    %22 = arith.addf %19, %21 : vector<64x128xf32>
    %23 = vector.shape_cast %22 : vector<64x128xf32> to vector<4x16x128xf32>
    %cst_16 = arith.constant dense<0xFF800000> : vector<16x128xf32>
    %24 = vector.multi_reduction <maximumf>, %23, %cst_16 [0] : vector<4x16x128xf32> to vector<16x128xf32>
    %25 = vector.shape_cast %24 : vector<16x128xf32> to vector<1x16x128xf32>
    %26 = vector.broadcast %25 : vector<1x16x128xf32> to vector<4x16x128xf32>
    %27 = arith.subf %23, %26 : vector<4x16x128xf32>
    %28 = math.exp %27 : vector<4x16x128xf32>
    %cst_17 = arith.constant dense<0.000000e+00> : vector<16x128xf32>
    %29 = vector.multi_reduction <add>, %28, %cst_17 [0] : vector<4x16x128xf32> to vector<16x128xf32>
    %30 = vector.shape_cast %29 : vector<16x128xf32> to vector<1x16x128xf32>
    %31 = tpu.reciprocal %30 {approx = true} : vector<1x16x128xf32> -> vector<1x16x128xf32>
    %32 = vector.broadcast %31 : vector<1x16x128xf32> to vector<4x16x128xf32>
    %33 = arith.mulf %28, %32 : vector<4x16x128xf32>
    %34 = arith.mulf %2, %33 : vector<4x16x128xf32>
    %35 = vector.shape_cast %4 : vector<16x128xf32> to vector<1x16x128xf32>
    %36 = vector.broadcast %35 : vector<1x16x128xf32> to vector<4x16x128xf32>
    %37 = arith.subf %34, %36 : vector<4x16x128xf32>
    %38 = vector.shape_cast %37 : vector<4x16x128xf32> to vector<64x128xf32>
    %39 = arith.truncf %38 : vector<64x128xf32> to vector<64x128xbf16>
    %c0_18 = arith.constant 0 : index
    %c0_19 = arith.constant 0 : index
    %c0_20 = arith.constant 0 : index
    %40 = vector.load %arg7[%c0_18, %c0_19, %c0_20] : memref<1x64x256xbf16, #tpu.memory_space<vmem>>, vector<1x64x128xbf16>
    %41 = vector.shape_cast %40 : vector<1x64x128xbf16> to vector<64x128xbf16>
    %42 = vector.shape_cast %39 : vector<64x128xbf16> to vector<1x64x128xbf16>
    tpu.vector_store %arg7[%c0_18, %c0_19, %c0_20], %42 {strides = array<i32>} : memref<1x64x256xbf16, #tpu.memory_space<vmem>>, vector<1x64x128xbf16>,
    %43 = arith.truncf %4 : vector<16x128xf32> to vector<16x128xbf16>
    %c0_21 = arith.constant 0 : index
    %c0_22 = arith.constant 0 : index
    %c128 = arith.constant 128 : index
    %44 = vector.load %arg7[%c0_21, %c0_22, %c128] : memref<1x64x256xbf16, #tpu.memory_space<vmem>>, vector<1x16x128xbf16>
    %45 = vector.shape_cast %44 : vector<1x16x128xbf16> to vector<16x128xbf16>
    %46 = vector.shape_cast %43 : vector<16x128xbf16> to vector<1x16x128xbf16>
    tpu.vector_store %arg7[%c0_21, %c0_22, %c128], %46 {strides = array<i32>} : memref<1x64x256xbf16, #tpu.memory_space<vmem>>, vector<1x16x128xbf16>,
    %c0_23 = arith.constant 0 : index
    %c16 = arith.constant 16 : index
    %c128_24 = arith.constant 128 : index
    %47 = vector.load %arg7[%c0_23, %c16, %c128_24] : memref<1x64x256xbf16, #tpu.memory_space<vmem>>, vector<1x16x128xbf16>
    %48 = vector.shape_cast %47 : vector<1x16x128xbf16> to vector<16x128xbf16>
    %49 = vector.shape_cast %43 : vector<16x128xbf16> to vector<1x16x128xbf16>
    tpu.vector_store %arg7[%c0_23, %c16, %c128_24], %49 {strides = array<i32>} : memref<1x64x256xbf16, #tpu.memory_space<vmem>>, vector<1x16x128xbf16>,
    %c0_25 = arith.constant 0 : index
    %c32 = arith.constant 32 : index
    %c128_26 = arith.constant 128 : index
    %50 = vector.load %arg7[%c0_25, %c32, %c128_26] : memref<1x64x256xbf16, #tpu.memory_space<vmem>>, vector<1x16x128xbf16>
    %51 = vector.shape_cast %50 : vector<1x16x128xbf16> to vector<16x128xbf16>
    %52 = vector.shape_cast %43 : vector<16x128xbf16> to vector<1x16x128xbf16>
    tpu.vector_store %arg7[%c0_25, %c32, %c128_26], %52 {strides = array<i32>} : memref<1x64x256xbf16, #tpu.memory_space<vmem>>, vector<1x16x128xbf16>,
    %c0_27 = arith.constant 0 : index
    %c48 = arith.constant 48 : index
    %c128_28 = arith.constant 128 : index
    %53 = vector.load %arg7[%c0_27, %c48, %c128_28] : memref<1x64x256xbf16, #tpu.memory_space<vmem>>, vector<1x16x128xbf16>
    %54 = vector.shape_cast %53 : vector<1x16x128xbf16> to vector<16x128xbf16>
    %55 = vector.shape_cast %43 : vector<16x128xbf16> to vector<1x16x128xbf16>
    tpu.vector_store %arg7[%c0_27, %c48, %c128_28], %55 {strides = array<i32>} : memref<1x64x256xbf16, #tpu.memory_space<vmem>>, vector<1x16x128xbf16>,
    return
  }
  func.func @transform_0(%arg0: i32) -> (i32, i32, i32, i32) {
    %c0_i32 = arith.constant 0 : i32
    %c0_i32_0 = arith.constant 0 : i32
    %c0_i32_1 = arith.constant 0 : i32
    %c0_i32_2 = arith.constant 0 : i32
    return %arg0, %c0_i32, %c0_i32_0, %c0_i32_1 : i32, i32, i32, i32
  }
  func.func @transform_1(%arg0: i32) -> (i32, i32, i32) {
    %c0_i32 = arith.constant 0 : i32
    %c0_i32_0 = arith.constant 0 : i32
    %c0_i32_1 = arith.constant 0 : i32
    return %arg0, %c0_i32, %c0_i32_0 : i32, i32, i32
  }
  func.func @transform_2(%arg0: i32) -> (i32, i32) {
    %c0_i32 = arith.constant 0 : i32
    %c0_i32_0 = arith.constant 0 : i32
    %c0_i32_1 = arith.constant 0 : i32
    return %c0_i32, %c0_i32_0 : i32, i32
  }
  func.func @transform_3(%arg0: i32) -> (i32, i32) {
    %c0_i32 = arith.constant 0 : i32
    %c0_i32_0 = arith.constant 0 : i32
    %c0_i32_1 = arith.constant 0 : i32
    return %c0_i32, %c0_i32_0 : i32, i32
  }
  func.func @transform_4(%arg0: i32) -> (i32, i32) {
    %c0_i32 = arith.constant 0 : i32
    %c0_i32_0 = arith.constant 0 : i32
    %c0_i32_1 = arith.constant 0 : i32
    return %c0_i32, %c0_i32_0 : i32, i32
  }
  func.func @transform_5(%arg0: i32) -> (i32, i32) {
    %c0_i32 = arith.constant 0 : i32
    %c0_i32_0 = arith.constant 0 : i32
    %c0_i32_1 = arith.constant 0 : i32
    return %c0_i32, %c0_i32_0 : i32, i32
  }
  func.func @transform_6(%arg0: i32) -> (i32, i32, i32) {
    %c0_i32 = arith.constant 0 : i32
    %c0_i32_0 = arith.constant 0 : i32
    %c0_i32_1 = arith.constant 0 : i32
    return %arg0, %c0_i32, %c0_i32_0 : i32, i32, i32
  }
}

module attributes {stable_mosaic.version = 11 : i64} {
  func.func @kernel(%arg0: i32, %arg1: memref<1x64x256xbf16, #tpu.memory_space<vmem>>, %arg2: memref<256x288xbf16, #tpu.memory_space<vmem>>, %arg3: memref<1x32xf32, #tpu.memory_space<vmem>>, %arg4: memref<1x256xf32, #tpu.memory_space<vmem>>, %arg5: memref<1x256xf32, #tpu.memory_space<vmem>>, %arg6: memref<1x64x32xbf16, #tpu.memory_space<vmem>>, %arg7: memref<1x2x32xf32, #tpu.memory_space<vmem>>) attributes {dimension_semantics = [#tpu.dimension_semantics<parallel>], iteration_bounds = array<i64: 2>, scalar_prefetch = 0 : i64, scratch_operands = 0 : i64, tpu.core_type = #tpu.core_type<tc>, window_params = [{transform_indices = @transform_0, window_bounds = array<i64: 1, 64, 256>}, {pipeline_mode = #tpu.pipeline_mode<synchronous>, transform_indices = @transform_1, window_bounds = array<i64: 256, 288>}, {pipeline_mode = #tpu.pipeline_mode<synchronous>, transform_indices = @transform_2, window_bounds = array<i64: 1, 32>}, {pipeline_mode = #tpu.pipeline_mode<synchronous>, transform_indices = @transform_3, window_bounds = array<i64: 1, 256>}, {pipeline_mode = #tpu.pipeline_mode<synchronous>, transform_indices = @transform_4, window_bounds = array<i64: 1, 256>}, {transform_indices = @transform_5, window_bounds = array<i64: 1, 64, 32>}, {transform_indices = @transform_6, window_bounds = array<i64: 1, 2, 32>}]} {
    %c0 = arith.constant 0 : index
    %c0_0 = arith.constant 0 : index
    %c0_1 = arith.constant 0 : index
    %0 = vector.load %arg1[%c0, %c0_0, %c0_1] : memref<1x64x256xbf16, #tpu.memory_space<vmem>>, vector<1x64x256xbf16>
    %1 = vector.shape_cast %0 : vector<1x64x256xbf16> to vector<64x256xbf16>
    %c0_2 = arith.constant 0 : index
    %c0_3 = arith.constant 0 : index
    %2 = vector.load %arg2[%c0_2, %c0_3] : memref<256x288xbf16, #tpu.memory_space<vmem>>, vector<256x288xbf16>
    %cst = arith.constant dense<0.000000e+00> : vector<64x288xf32>
    %3 = tpu.matmul %1, %2, %cst {dimension_numbers = #tpu.dot_dimension_numbers<[1], [0], [0], [1], [0, 0, 1, 1], [], []>} : vector<64x256xbf16>, vector<256x288xbf16>, vector<64x288xf32> -> vector<64x288xf32>
    %4 = tpu.iota {dimensions = array<i32: 0>} : vector<64x1xi32>
    %c16_i32 = arith.constant 16 : i32
    %c0_i32 = arith.constant 0 : i32
    %5 = arith.cmpi eq, %c16_i32, %c0_i32 : i32
    %c1_i32 = arith.constant 1 : i32
    %6 = arith.select %5, %c1_i32, %c16_i32 : i32
    %7 = vector.broadcast %6 : i32 to vector<64x1xi32>
    %8 = arith.remsi %4, %7 : vector<64x1xi32>
    %c0_i32_4 = arith.constant 0 : i32
    %9 = vector.broadcast %c0_i32_4 : i32 to vector<64x1xi32>
    %10 = arith.cmpi ne, %8, %9 : vector<64x1xi32>
    %c0_i32_5 = arith.constant 0 : i32
    %11 = vector.broadcast %c0_i32_5 : i32 to vector<64x1xi32>
    %12 = arith.cmpi slt, %8, %11 : vector<64x1xi32>
    %c0_i32_6 = arith.constant 0 : i32
    %13 = arith.cmpi slt, %6, %c0_i32_6 : i32
    %14 = vector.broadcast %13 : i1 to vector<64x1xi1>
    %15 = vector.broadcast %14 : vector<64x1xi1> to vector<64x1xi1>
    %16 = arith.xori %12, %15 : vector<64x1xi1>
    %17 = arith.andi %16, %10 : vector<64x1xi1>
    %18 = vector.broadcast %6 : i32 to vector<64x1xi32>
    %19 = arith.addi %8, %18 : vector<64x1xi32>
    %20 = arith.select %17, %19, %8 : vector<64x1xi1>, vector<64x1xi32>
    %21 = vector.extract_strided_slice %3 {offsets = [0, 0], sizes = [64, 32], strides = [1, 1]} : vector<64x288xf32> to vector<64x32xf32>
    %cst_7 = arith.constant 0.000000e+00 : f32
    %22 = vector.broadcast %cst_7 : f32 to vector<17x32xf32>
    %23 = vector.extract_strided_slice %21 {offsets = [0, 0], sizes = [47, 32], strides = [1, 1]} : vector<64x32xf32> to vector<47x32xf32>
    %24 = tpu.concatenate %22, %23 in 0 : vector<17x32xf32>, vector<47x32xf32> -> vector<64x32xf32>
    %c1_i32_8 = arith.constant 1 : i32
    %25 = vector.broadcast %c1_i32_8 : i32 to vector<64x1xi32>
    %26 = arith.cmpi sge, %20, %25 : vector<64x1xi32>
    %cst_9 = arith.constant 0.000000e+00 : f32
    %27 = vector.shape_cast %26 : vector<64x1xi1> to vector<64x1xi1>
    %28 = vector.broadcast %27 : vector<64x1xi1> to vector<64x32xi1>
    %29 = vector.broadcast %cst_9 : f32 to vector<64x32xf32>
    %30 = arith.select %28, %24, %29 : vector<64x32xi1>, vector<64x32xf32>
    %31 = vector.extract_strided_slice %3 {offsets = [0, 32], sizes = [64, 32], strides = [1, 1]} : vector<64x288xf32> to vector<64x32xf32>
    %cst_10 = arith.constant 0.000000e+00 : f32
    %32 = vector.broadcast %cst_10 : f32 to vector<1x32xf32>
    %33 = vector.extract_strided_slice %31 {offsets = [0, 0], sizes = [63, 32], strides = [1, 1]} : vector<64x32xf32> to vector<63x32xf32>
    %34 = tpu.concatenate %32, %33 in 0 : vector<1x32xf32>, vector<63x32xf32> -> vector<64x32xf32>
    %c1_i32_11 = arith.constant 1 : i32
    %35 = vector.broadcast %c1_i32_11 : i32 to vector<64x1xi32>
    %36 = arith.cmpi sge, %20, %35 : vector<64x1xi32>
    %cst_12 = arith.constant 0.000000e+00 : f32
    %37 = vector.shape_cast %36 : vector<64x1xi1> to vector<64x1xi1>
    %38 = vector.broadcast %37 : vector<64x1xi1> to vector<64x32xi1>
    %39 = vector.broadcast %cst_12 : f32 to vector<64x32xf32>
    %40 = arith.select %38, %34, %39 : vector<64x32xi1>, vector<64x32xf32>
    %41 = arith.addf %30, %40 : vector<64x32xf32>
    %42 = vector.extract_strided_slice %3 {offsets = [0, 64], sizes = [64, 32], strides = [1, 1]} : vector<64x288xf32> to vector<64x32xf32>
    %cst_13 = arith.constant 0.000000e+00 : f32
    %43 = vector.broadcast %cst_13 : f32 to vector<15x32xf32>
    %44 = vector.extract_strided_slice %42 {offsets = [15, 0], sizes = [49, 32], strides = [1, 1]} : vector<64x32xf32> to vector<49x32xf32>
    %45 = tpu.concatenate %44, %43 in 0 : vector<49x32xf32>, vector<15x32xf32> -> vector<64x32xf32>
    %c1_i32_14 = arith.constant 1 : i32
    %46 = vector.broadcast %c1_i32_14 : i32 to vector<64x1xi32>
    %47 = arith.cmpi sge, %20, %46 : vector<64x1xi32>
    %cst_15 = arith.constant 0.000000e+00 : f32
    %48 = vector.shape_cast %47 : vector<64x1xi1> to vector<64x1xi1>
    %49 = vector.broadcast %48 : vector<64x1xi1> to vector<64x32xi1>
    %50 = vector.broadcast %cst_15 : f32 to vector<64x32xf32>
    %51 = arith.select %49, %45, %50 : vector<64x32xi1>, vector<64x32xf32>
    %52 = arith.addf %41, %51 : vector<64x32xf32>
    %53 = vector.extract_strided_slice %3 {offsets = [0, 96], sizes = [64, 32], strides = [1, 1]} : vector<64x288xf32> to vector<64x32xf32>
    %cst_16 = arith.constant 0.000000e+00 : f32
    %54 = vector.broadcast %cst_16 : f32 to vector<16x32xf32>
    %55 = vector.extract_strided_slice %53 {offsets = [0, 0], sizes = [48, 32], strides = [1, 1]} : vector<64x32xf32> to vector<48x32xf32>
    %56 = tpu.concatenate %54, %55 in 0 : vector<16x32xf32>, vector<48x32xf32> -> vector<64x32xf32>
    %57 = arith.addf %52, %56 : vector<64x32xf32>
    %58 = vector.extract_strided_slice %3 {offsets = [0, 128], sizes = [64, 32], strides = [1, 1]} : vector<64x288xf32> to vector<64x32xf32>
    %59 = arith.addf %57, %58 : vector<64x32xf32>
    %60 = vector.extract_strided_slice %3 {offsets = [0, 160], sizes = [64, 32], strides = [1, 1]} : vector<64x288xf32> to vector<64x32xf32>
    %cst_17 = arith.constant 0.000000e+00 : f32
    %61 = vector.broadcast %cst_17 : f32 to vector<16x32xf32>
    %62 = vector.extract_strided_slice %60 {offsets = [16, 0], sizes = [48, 32], strides = [1, 1]} : vector<64x32xf32> to vector<48x32xf32>
    %63 = tpu.concatenate %62, %61 in 0 : vector<48x32xf32>, vector<16x32xf32> -> vector<64x32xf32>
    %64 = arith.addf %59, %63 : vector<64x32xf32>
    %65 = vector.extract_strided_slice %3 {offsets = [0, 192], sizes = [64, 32], strides = [1, 1]} : vector<64x288xf32> to vector<64x32xf32>
    %cst_18 = arith.constant 0.000000e+00 : f32
    %66 = vector.broadcast %cst_18 : f32 to vector<15x32xf32>
    %67 = vector.extract_strided_slice %65 {offsets = [0, 0], sizes = [49, 32], strides = [1, 1]} : vector<64x32xf32> to vector<49x32xf32>
    %68 = tpu.concatenate %66, %67 in 0 : vector<15x32xf32>, vector<49x32xf32> -> vector<64x32xf32>
    %c15_i32 = arith.constant 15 : i32
    %69 = vector.broadcast %c15_i32 : i32 to vector<64x1xi32>
    %70 = arith.cmpi slt, %20, %69 : vector<64x1xi32>
    %cst_19 = arith.constant 0.000000e+00 : f32
    %71 = vector.shape_cast %70 : vector<64x1xi1> to vector<64x1xi1>
    %72 = vector.broadcast %71 : vector<64x1xi1> to vector<64x32xi1>
    %73 = vector.broadcast %cst_19 : f32 to vector<64x32xf32>
    %74 = arith.select %72, %68, %73 : vector<64x32xi1>, vector<64x32xf32>
    %75 = arith.addf %64, %74 : vector<64x32xf32>
    %76 = vector.extract_strided_slice %3 {offsets = [0, 224], sizes = [64, 32], strides = [1, 1]} : vector<64x288xf32> to vector<64x32xf32>
    %cst_20 = arith.constant 0.000000e+00 : f32
    %77 = vector.broadcast %cst_20 : f32 to vector<1x32xf32>
    %78 = vector.extract_strided_slice %76 {offsets = [1, 0], sizes = [63, 32], strides = [1, 1]} : vector<64x32xf32> to vector<63x32xf32>
    %79 = tpu.concatenate %78, %77 in 0 : vector<63x32xf32>, vector<1x32xf32> -> vector<64x32xf32>
    %c15_i32_21 = arith.constant 15 : i32
    %80 = vector.broadcast %c15_i32_21 : i32 to vector<64x1xi32>
    %81 = arith.cmpi slt, %20, %80 : vector<64x1xi32>
    %cst_22 = arith.constant 0.000000e+00 : f32
    %82 = vector.shape_cast %81 : vector<64x1xi1> to vector<64x1xi1>
    %83 = vector.broadcast %82 : vector<64x1xi1> to vector<64x32xi1>
    %84 = vector.broadcast %cst_22 : f32 to vector<64x32xf32>
    %85 = arith.select %83, %79, %84 : vector<64x32xi1>, vector<64x32xf32>
    %86 = arith.addf %75, %85 : vector<64x32xf32>
    %87 = vector.extract_strided_slice %3 {offsets = [0, 256], sizes = [64, 32], strides = [1, 1]} : vector<64x288xf32> to vector<64x32xf32>
    %cst_23 = arith.constant 0.000000e+00 : f32
    %88 = vector.broadcast %cst_23 : f32 to vector<17x32xf32>
    %89 = vector.extract_strided_slice %87 {offsets = [17, 0], sizes = [47, 32], strides = [1, 1]} : vector<64x32xf32> to vector<47x32xf32>
    %90 = tpu.concatenate %89, %88 in 0 : vector<47x32xf32>, vector<17x32xf32> -> vector<64x32xf32>
    %c15_i32_24 = arith.constant 15 : i32
    %91 = vector.broadcast %c15_i32_24 : i32 to vector<64x1xi32>
    %92 = arith.cmpi slt, %20, %91 : vector<64x1xi32>
    %cst_25 = arith.constant 0.000000e+00 : f32
    %93 = vector.shape_cast %92 : vector<64x1xi1> to vector<64x1xi1>
    %94 = vector.broadcast %93 : vector<64x1xi1> to vector<64x32xi1>
    %95 = vector.broadcast %cst_25 : f32 to vector<64x32xf32>
    %96 = arith.select %94, %90, %95 : vector<64x32xi1>, vector<64x32xf32>
    %97 = arith.addf %86, %96 : vector<64x32xf32>
    %c0_26 = arith.constant 0 : index
    %c0_27 = arith.constant 0 : index
    %98 = vector.load %arg3[%c0_26, %c0_27] : memref<1x32xf32, #tpu.memory_space<vmem>>, vector<1x32xf32>
    %99 = vector.broadcast %98 : vector<1x32xf32> to vector<64x32xf32>
    %100 = arith.addf %97, %99 : vector<64x32xf32>
    %101 = arith.truncf %100 : vector<64x32xf32> to vector<64x32xbf16>
    %c0_28 = arith.constant 0 : index
    %c0_29 = arith.constant 0 : index
    %c0_30 = arith.constant 0 : index
    %102 = vector.load %arg6[%c0_28, %c0_29, %c0_30] : memref<1x64x32xbf16, #tpu.memory_space<vmem>>, vector<1x64x32xbf16>
    %103 = vector.shape_cast %102 : vector<1x64x32xbf16> to vector<64x32xbf16>
    %104 = vector.shape_cast %101 : vector<64x32xbf16> to vector<1x64x32xbf16>
    tpu.vector_store %arg6[%c0_28, %c0_29, %c0_30], %104 {strides = array<i32>} : memref<1x64x32xbf16, #tpu.memory_space<vmem>>, vector<1x64x32xbf16>,
    %cst_31 = arith.constant dense<0.000000e+00> : vector<32xf32>
    %105 = vector.multi_reduction <add>, %100, %cst_31 [0] : vector<64x32xf32> to vector<32xf32>
    %106 = vector.shape_cast %105 : vector<32xf32> to vector<1x32xf32>
    %107 = arith.mulf %100, %100 : vector<64x32xf32>
    %cst_32 = arith.constant dense<0.000000e+00> : vector<32xf32>
    %108 = vector.multi_reduction <add>, %107, %cst_32 [0] : vector<64x32xf32> to vector<32xf32>
    %109 = vector.shape_cast %108 : vector<32xf32> to vector<1x32xf32>
    %110 = tpu.concatenate %106, %109 in 0 : vector<1x32xf32>, vector<1x32xf32> -> vector<2x32xf32>
    %c0_33 = arith.constant 0 : index
    %c0_34 = arith.constant 0 : index
    %c0_35 = arith.constant 0 : index
    %111 = vector.load %arg7[%c0_33, %c0_34, %c0_35] : memref<1x2x32xf32, #tpu.memory_space<vmem>>, vector<1x2x32xf32>
    %112 = vector.shape_cast %111 : vector<1x2x32xf32> to vector<2x32xf32>
    %113 = vector.shape_cast %110 : vector<2x32xf32> to vector<1x2x32xf32>
    tpu.vector_store %arg7[%c0_33, %c0_34, %c0_35], %113 {strides = array<i32>} : memref<1x2x32xf32, #tpu.memory_space<vmem>>, vector<1x2x32xf32>,
    return
  }
  func.func @transform_0(%arg0: i32) -> (i32, i32, i32) {
    %c0_i32 = arith.constant 0 : i32
    %c0_i32_0 = arith.constant 0 : i32
    %c0_i32_1 = arith.constant 0 : i32
    return %arg0, %c0_i32, %c0_i32_0 : i32, i32, i32
  }
  func.func @transform_1(%arg0: i32) -> (i32, i32) {
    %c0_i32 = arith.constant 0 : i32
    %c0_i32_0 = arith.constant 0 : i32
    %c0_i32_1 = arith.constant 0 : i32
    return %c0_i32, %c0_i32_0 : i32, i32
  }
  func.func @transform_2(%arg0: i32) -> (i32, i32) {
    %c0_i32 = arith.constant 0 : i32
    %c0_i32_0 = arith.constant 0 : i32
    %c0_i32_1 = arith.constant 0 : i32
    return %c0_i32, %c0_i32_0 : i32, i32
  }
  func.func @transform_3(%arg0: i32) -> (i32, i32) {
    %c0_i32 = arith.constant 0 : i32
    %c0_i32_0 = arith.constant 0 : i32
    %c0_i32_1 = arith.constant 0 : i32
    return %c0_i32, %c0_i32_0 : i32, i32
  }
  func.func @transform_4(%arg0: i32) -> (i32, i32) {
    %c0_i32 = arith.constant 0 : i32
    %c0_i32_0 = arith.constant 0 : i32
    %c0_i32_1 = arith.constant 0 : i32
    return %c0_i32, %c0_i32_0 : i32, i32
  }
  func.func @transform_5(%arg0: i32) -> (i32, i32, i32) {
    %c0_i32 = arith.constant 0 : i32
    %c0_i32_0 = arith.constant 0 : i32
    %c0_i32_1 = arith.constant 0 : i32
    return %arg0, %c0_i32, %c0_i32_0 : i32, i32, i32
  }
  func.func @transform_6(%arg0: i32) -> (i32, i32, i32) {
    %c0_i32 = arith.constant 0 : i32
    %c0_i32_0 = arith.constant 0 : i32
    %c0_i32_1 = arith.constant 0 : i32
    return %arg0, %c0_i32, %c0_i32_0 : i32, i32, i32
  }
}

module attributes {stable_mosaic.version = 11 : i64} {
  func.func @kernel(%arg0: i32, %arg1: memref<1x64x32xbf16, #tpu.memory_space<vmem>>, %arg2: memref<32x288xbf16, #tpu.memory_space<vmem>>, %arg3: memref<1x32xf32, #tpu.memory_space<vmem>>, %arg4: memref<1x32xf32, #tpu.memory_space<vmem>>, %arg5: memref<1x32xf32, #tpu.memory_space<vmem>>, %arg6: memref<1x64x32xbf16, #tpu.memory_space<vmem>>, %arg7: memref<1x2x32xf32, #tpu.memory_space<vmem>>) attributes {dimension_semantics = [#tpu.dimension_semantics<parallel>], iteration_bounds = array<i64: 2>, scalar_prefetch = 0 : i64, scratch_operands = 0 : i64, tpu.core_type = #tpu.core_type<tc>, window_params = [{transform_indices = @transform_0, window_bounds = array<i64: 1, 64, 32>}, {pipeline_mode = #tpu.pipeline_mode<synchronous>, transform_indices = @transform_1, window_bounds = array<i64: 32, 288>}, {pipeline_mode = #tpu.pipeline_mode<synchronous>, transform_indices = @transform_2, window_bounds = array<i64: 1, 32>}, {pipeline_mode = #tpu.pipeline_mode<synchronous>, transform_indices = @transform_3, window_bounds = array<i64: 1, 32>}, {pipeline_mode = #tpu.pipeline_mode<synchronous>, transform_indices = @transform_4, window_bounds = array<i64: 1, 32>}, {transform_indices = @transform_5, window_bounds = array<i64: 1, 64, 32>}, {transform_indices = @transform_6, window_bounds = array<i64: 1, 2, 32>}]} {
    %c0 = arith.constant 0 : index
    %c0_0 = arith.constant 0 : index
    %c0_1 = arith.constant 0 : index
    %0 = vector.load %arg1[%c0, %c0_0, %c0_1] : memref<1x64x32xbf16, #tpu.memory_space<vmem>>, vector<1x64x32xbf16>
    %1 = vector.shape_cast %0 : vector<1x64x32xbf16> to vector<64x32xbf16>
    %2 = arith.extf %1 : vector<64x32xbf16> to vector<64x32xf32>
    %c0_2 = arith.constant 0 : index
    %c0_3 = arith.constant 0 : index
    %3 = vector.load %arg4[%c0_2, %c0_3] : memref<1x32xf32, #tpu.memory_space<vmem>>, vector<1x32xf32>
    %4 = vector.broadcast %3 : vector<1x32xf32> to vector<64x32xf32>
    %5 = arith.mulf %2, %4 : vector<64x32xf32>
    %c0_4 = arith.constant 0 : index
    %c0_5 = arith.constant 0 : index
    %6 = vector.load %arg5[%c0_4, %c0_5] : memref<1x32xf32, #tpu.memory_space<vmem>>, vector<1x32xf32>
    %7 = vector.broadcast %6 : vector<1x32xf32> to vector<64x32xf32>
    %8 = arith.addf %5, %7 : vector<64x32xf32>
    %cst = arith.constant 0.000000e+00 : f32
    %9 = vector.broadcast %cst : f32 to vector<64x32xf32>
    %10 = arith.maximumf %8, %9 : vector<64x32xf32>
    %11 = arith.truncf %10 : vector<64x32xf32> to vector<64x32xbf16>
    %c0_6 = arith.constant 0 : index
    %c0_7 = arith.constant 0 : index
    %12 = vector.load %arg2[%c0_6, %c0_7] : memref<32x288xbf16, #tpu.memory_space<vmem>>, vector<32x288xbf16>
    %cst_8 = arith.constant dense<0.000000e+00> : vector<64x288xf32>
    %13 = tpu.matmul %11, %12, %cst_8 {dimension_numbers = #tpu.dot_dimension_numbers<[1], [0], [0], [1], [0, 0, 1, 1], [], []>} : vector<64x32xbf16>, vector<32x288xbf16>, vector<64x288xf32> -> vector<64x288xf32>
    %14 = tpu.iota {dimensions = array<i32: 0>} : vector<64x1xi32>
    %c16_i32 = arith.constant 16 : i32
    %c0_i32 = arith.constant 0 : i32
    %15 = arith.cmpi eq, %c16_i32, %c0_i32 : i32
    %c1_i32 = arith.constant 1 : i32
    %16 = arith.select %15, %c1_i32, %c16_i32 : i32
    %17 = vector.broadcast %16 : i32 to vector<64x1xi32>
    %18 = arith.remsi %14, %17 : vector<64x1xi32>
    %c0_i32_9 = arith.constant 0 : i32
    %19 = vector.broadcast %c0_i32_9 : i32 to vector<64x1xi32>
    %20 = arith.cmpi ne, %18, %19 : vector<64x1xi32>
    %c0_i32_10 = arith.constant 0 : i32
    %21 = vector.broadcast %c0_i32_10 : i32 to vector<64x1xi32>
    %22 = arith.cmpi slt, %18, %21 : vector<64x1xi32>
    %c0_i32_11 = arith.constant 0 : i32
    %23 = arith.cmpi slt, %16, %c0_i32_11 : i32
    %24 = vector.broadcast %23 : i1 to vector<64x1xi1>
    %25 = vector.broadcast %24 : vector<64x1xi1> to vector<64x1xi1>
    %26 = arith.xori %22, %25 : vector<64x1xi1>
    %27 = arith.andi %26, %20 : vector<64x1xi1>
    %28 = vector.broadcast %16 : i32 to vector<64x1xi32>
    %29 = arith.addi %18, %28 : vector<64x1xi32>
    %30 = arith.select %27, %29, %18 : vector<64x1xi1>, vector<64x1xi32>
    %31 = vector.extract_strided_slice %13 {offsets = [0, 0], sizes = [64, 32], strides = [1, 1]} : vector<64x288xf32> to vector<64x32xf32>
    %cst_12 = arith.constant 0.000000e+00 : f32
    %32 = vector.broadcast %cst_12 : f32 to vector<34x32xf32>
    %33 = vector.extract_strided_slice %31 {offsets = [0, 0], sizes = [30, 32], strides = [1, 1]} : vector<64x32xf32> to vector<30x32xf32>
    %34 = tpu.concatenate %32, %33 in 0 : vector<34x32xf32>, vector<30x32xf32> -> vector<64x32xf32>
    %c2_i32 = arith.constant 2 : i32
    %35 = vector.broadcast %c2_i32 : i32 to vector<64x1xi32>
    %36 = arith.cmpi sge, %30, %35 : vector<64x1xi32>
    %cst_13 = arith.constant 0.000000e+00 : f32
    %37 = vector.shape_cast %36 : vector<64x1xi1> to vector<64x1xi1>
    %38 = vector.broadcast %37 : vector<64x1xi1> to vector<64x32xi1>
    %39 = vector.broadcast %cst_13 : f32 to vector<64x32xf32>
    %40 = arith.select %38, %34, %39 : vector<64x32xi1>, vector<64x32xf32>
    %41 = vector.extract_strided_slice %13 {offsets = [0, 32], sizes = [64, 32], strides = [1, 1]} : vector<64x288xf32> to vector<64x32xf32>
    %cst_14 = arith.constant 0.000000e+00 : f32
    %42 = vector.broadcast %cst_14 : f32 to vector<2x32xf32>
    %43 = vector.extract_strided_slice %41 {offsets = [0, 0], sizes = [62, 32], strides = [1, 1]} : vector<64x32xf32> to vector<62x32xf32>
    %44 = tpu.concatenate %42, %43 in 0 : vector<2x32xf32>, vector<62x32xf32> -> vector<64x32xf32>
    %c2_i32_15 = arith.constant 2 : i32
    %45 = vector.broadcast %c2_i32_15 : i32 to vector<64x1xi32>
    %46 = arith.cmpi sge, %30, %45 : vector<64x1xi32>
    %cst_16 = arith.constant 0.000000e+00 : f32
    %47 = vector.shape_cast %46 : vector<64x1xi1> to vector<64x1xi1>
    %48 = vector.broadcast %47 : vector<64x1xi1> to vector<64x32xi1>
    %49 = vector.broadcast %cst_16 : f32 to vector<64x32xf32>
    %50 = arith.select %48, %44, %49 : vector<64x32xi1>, vector<64x32xf32>
    %51 = arith.addf %40, %50 : vector<64x32xf32>
    %52 = vector.extract_strided_slice %13 {offsets = [0, 64], sizes = [64, 32], strides = [1, 1]} : vector<64x288xf32> to vector<64x32xf32>
    %cst_17 = arith.constant 0.000000e+00 : f32
    %53 = vector.broadcast %cst_17 : f32 to vector<30x32xf32>
    %54 = vector.extract_strided_slice %52 {offsets = [30, 0], sizes = [34, 32], strides = [1, 1]} : vector<64x32xf32> to vector<34x32xf32>
    %55 = tpu.concatenate %54, %53 in 0 : vector<34x32xf32>, vector<30x32xf32> -> vector<64x32xf32>
    %c2_i32_18 = arith.constant 2 : i32
    %56 = vector.broadcast %c2_i32_18 : i32 to vector<64x1xi32>
    %57 = arith.cmpi sge, %30, %56 : vector<64x1xi32>
    %cst_19 = arith.constant 0.000000e+00 : f32
    %58 = vector.shape_cast %57 : vector<64x1xi1> to vector<64x1xi1>
    %59 = vector.broadcast %58 : vector<64x1xi1> to vector<64x32xi1>
    %60 = vector.broadcast %cst_19 : f32 to vector<64x32xf32>
    %61 = arith.select %59, %55, %60 : vector<64x32xi1>, vector<64x32xf32>
    %62 = arith.addf %51, %61 : vector<64x32xf32>
    %63 = vector.extract_strided_slice %13 {offsets = [0, 96], sizes = [64, 32], strides = [1, 1]} : vector<64x288xf32> to vector<64x32xf32>
    %cst_20 = arith.constant 0.000000e+00 : f32
    %64 = vector.broadcast %cst_20 : f32 to vector<32x32xf32>
    %65 = vector.extract_strided_slice %63 {offsets = [0, 0], sizes = [32, 32], strides = [1, 1]} : vector<64x32xf32> to vector<32x32xf32>
    %66 = tpu.concatenate %64, %65 in 0 : vector<32x32xf32>, vector<32x32xf32> -> vector<64x32xf32>
    %67 = arith.addf %62, %66 : vector<64x32xf32>
    %68 = vector.extract_strided_slice %13 {offsets = [0, 128], sizes = [64, 32], strides = [1, 1]} : vector<64x288xf32> to vector<64x32xf32>
    %69 = arith.addf %67, %68 : vector<64x32xf32>
    %70 = vector.extract_strided_slice %13 {offsets = [0, 160], sizes = [64, 32], strides = [1, 1]} : vector<64x288xf32> to vector<64x32xf32>
    %cst_21 = arith.constant 0.000000e+00 : f32
    %71 = vector.broadcast %cst_21 : f32 to vector<32x32xf32>
    %72 = vector.extract_strided_slice %70 {offsets = [32, 0], sizes = [32, 32], strides = [1, 1]} : vector<64x32xf32> to vector<32x32xf32>
    %73 = tpu.concatenate %72, %71 in 0 : vector<32x32xf32>, vector<32x32xf32> -> vector<64x32xf32>
    %74 = arith.addf %69, %73 : vector<64x32xf32>
    %75 = vector.extract_strided_slice %13 {offsets = [0, 192], sizes = [64, 32], strides = [1, 1]} : vector<64x288xf32> to vector<64x32xf32>
    %cst_22 = arith.constant 0.000000e+00 : f32
    %76 = vector.broadcast %cst_22 : f32 to vector<30x32xf32>
    %77 = vector.extract_strided_slice %75 {offsets = [0, 0], sizes = [34, 32], strides = [1, 1]} : vector<64x32xf32> to vector<34x32xf32>
    %78 = tpu.concatenate %76, %77 in 0 : vector<30x32xf32>, vector<34x32xf32> -> vector<64x32xf32>
    %c14_i32 = arith.constant 14 : i32
    %79 = vector.broadcast %c14_i32 : i32 to vector<64x1xi32>
    %80 = arith.cmpi slt, %30, %79 : vector<64x1xi32>
    %cst_23 = arith.constant 0.000000e+00 : f32
    %81 = vector.shape_cast %80 : vector<64x1xi1> to vector<64x1xi1>
    %82 = vector.broadcast %81 : vector<64x1xi1> to vector<64x32xi1>
    %83 = vector.broadcast %cst_23 : f32 to vector<64x32xf32>
    %84 = arith.select %82, %78, %83 : vector<64x32xi1>, vector<64x32xf32>
    %85 = arith.addf %74, %84 : vector<64x32xf32>
    %86 = vector.extract_strided_slice %13 {offsets = [0, 224], sizes = [64, 32], strides = [1, 1]} : vector<64x288xf32> to vector<64x32xf32>
    %cst_24 = arith.constant 0.000000e+00 : f32
    %87 = vector.broadcast %cst_24 : f32 to vector<2x32xf32>
    %88 = vector.extract_strided_slice %86 {offsets = [2, 0], sizes = [62, 32], strides = [1, 1]} : vector<64x32xf32> to vector<62x32xf32>
    %89 = tpu.concatenate %88, %87 in 0 : vector<62x32xf32>, vector<2x32xf32> -> vector<64x32xf32>
    %c14_i32_25 = arith.constant 14 : i32
    %90 = vector.broadcast %c14_i32_25 : i32 to vector<64x1xi32>
    %91 = arith.cmpi slt, %30, %90 : vector<64x1xi32>
    %cst_26 = arith.constant 0.000000e+00 : f32
    %92 = vector.shape_cast %91 : vector<64x1xi1> to vector<64x1xi1>
    %93 = vector.broadcast %92 : vector<64x1xi1> to vector<64x32xi1>
    %94 = vector.broadcast %cst_26 : f32 to vector<64x32xf32>
    %95 = arith.select %93, %89, %94 : vector<64x32xi1>, vector<64x32xf32>
    %96 = arith.addf %85, %95 : vector<64x32xf32>
    %97 = vector.extract_strided_slice %13 {offsets = [0, 256], sizes = [64, 32], strides = [1, 1]} : vector<64x288xf32> to vector<64x32xf32>
    %cst_27 = arith.constant 0.000000e+00 : f32
    %98 = vector.broadcast %cst_27 : f32 to vector<34x32xf32>
    %99 = vector.extract_strided_slice %97 {offsets = [34, 0], sizes = [30, 32], strides = [1, 1]} : vector<64x32xf32> to vector<30x32xf32>
    %100 = tpu.concatenate %99, %98 in 0 : vector<30x32xf32>, vector<34x32xf32> -> vector<64x32xf32>
    %c14_i32_28 = arith.constant 14 : i32
    %101 = vector.broadcast %c14_i32_28 : i32 to vector<64x1xi32>
    %102 = arith.cmpi slt, %30, %101 : vector<64x1xi32>
    %cst_29 = arith.constant 0.000000e+00 : f32
    %103 = vector.shape_cast %102 : vector<64x1xi1> to vector<64x1xi1>
    %104 = vector.broadcast %103 : vector<64x1xi1> to vector<64x32xi1>
    %105 = vector.broadcast %cst_29 : f32 to vector<64x32xf32>
    %106 = arith.select %104, %100, %105 : vector<64x32xi1>, vector<64x32xf32>
    %107 = arith.addf %96, %106 : vector<64x32xf32>
    %c0_30 = arith.constant 0 : index
    %c0_31 = arith.constant 0 : index
    %108 = vector.load %arg3[%c0_30, %c0_31] : memref<1x32xf32, #tpu.memory_space<vmem>>, vector<1x32xf32>
    %109 = vector.broadcast %108 : vector<1x32xf32> to vector<64x32xf32>
    %110 = arith.addf %107, %109 : vector<64x32xf32>
    %111 = arith.truncf %110 : vector<64x32xf32> to vector<64x32xbf16>
    %c0_32 = arith.constant 0 : index
    %c0_33 = arith.constant 0 : index
    %c0_34 = arith.constant 0 : index
    %112 = vector.load %arg6[%c0_32, %c0_33, %c0_34] : memref<1x64x32xbf16, #tpu.memory_space<vmem>>, vector<1x64x32xbf16>
    %113 = vector.shape_cast %112 : vector<1x64x32xbf16> to vector<64x32xbf16>
    %114 = vector.shape_cast %111 : vector<64x32xbf16> to vector<1x64x32xbf16>
    tpu.vector_store %arg6[%c0_32, %c0_33, %c0_34], %114 {strides = array<i32>} : memref<1x64x32xbf16, #tpu.memory_space<vmem>>, vector<1x64x32xbf16>,
    %cst_35 = arith.constant dense<0.000000e+00> : vector<32xf32>
    %115 = vector.multi_reduction <add>, %110, %cst_35 [0] : vector<64x32xf32> to vector<32xf32>
    %116 = vector.shape_cast %115 : vector<32xf32> to vector<1x32xf32>
    %117 = arith.mulf %110, %110 : vector<64x32xf32>
    %cst_36 = arith.constant dense<0.000000e+00> : vector<32xf32>
    %118 = vector.multi_reduction <add>, %117, %cst_36 [0] : vector<64x32xf32> to vector<32xf32>
    %119 = vector.shape_cast %118 : vector<32xf32> to vector<1x32xf32>
    %120 = tpu.concatenate %116, %119 in 0 : vector<1x32xf32>, vector<1x32xf32> -> vector<2x32xf32>
    %c0_37 = arith.constant 0 : index
    %c0_38 = arith.constant 0 : index
    %c0_39 = arith.constant 0 : index
    %121 = vector.load %arg7[%c0_37, %c0_38, %c0_39] : memref<1x2x32xf32, #tpu.memory_space<vmem>>, vector<1x2x32xf32>
    %122 = vector.shape_cast %121 : vector<1x2x32xf32> to vector<2x32xf32>
    %123 = vector.shape_cast %120 : vector<2x32xf32> to vector<1x2x32xf32>
    tpu.vector_store %arg7[%c0_37, %c0_38, %c0_39], %123 {strides = array<i32>} : memref<1x2x32xf32, #tpu.memory_space<vmem>>, vector<1x2x32xf32>,
    return
  }
  func.func @transform_0(%arg0: i32) -> (i32, i32, i32) {
    %c0_i32 = arith.constant 0 : i32
    %c0_i32_0 = arith.constant 0 : i32
    %c0_i32_1 = arith.constant 0 : i32
    return %arg0, %c0_i32, %c0_i32_0 : i32, i32, i32
  }
  func.func @transform_1(%arg0: i32) -> (i32, i32) {
    %c0_i32 = arith.constant 0 : i32
    %c0_i32_0 = arith.constant 0 : i32
    %c0_i32_1 = arith.constant 0 : i32
    return %c0_i32, %c0_i32_0 : i32, i32
  }
  func.func @transform_2(%arg0: i32) -> (i32, i32) {
    %c0_i32 = arith.constant 0 : i32
    %c0_i32_0 = arith.constant 0 : i32
    %c0_i32_1 = arith.constant 0 : i32
    return %c0_i32, %c0_i32_0 : i32, i32
  }
  func.func @transform_3(%arg0: i32) -> (i32, i32) {
    %c0_i32 = arith.constant 0 : i32
    %c0_i32_0 = arith.constant 0 : i32
    %c0_i32_1 = arith.constant 0 : i32
    return %c0_i32, %c0_i32_0 : i32, i32
  }
  func.func @transform_4(%arg0: i32) -> (i32, i32) {
    %c0_i32 = arith.constant 0 : i32
    %c0_i32_0 = arith.constant 0 : i32
    %c0_i32_1 = arith.constant 0 : i32
    return %c0_i32, %c0_i32_0 : i32, i32
  }
  func.func @transform_5(%arg0: i32) -> (i32, i32, i32) {
    %c0_i32 = arith.constant 0 : i32
    %c0_i32_0 = arith.constant 0 : i32
    %c0_i32_1 = arith.constant 0 : i32
    return %arg0, %c0_i32, %c0_i32_0 : i32, i32, i32
  }
  func.func @transform_6(%arg0: i32) -> (i32, i32, i32) {
    %c0_i32 = arith.constant 0 : i32
    %c0_i32_0 = arith.constant 0 : i32
    %c0_i32_1 = arith.constant 0 : i32
    return %arg0, %c0_i32, %c0_i32_0 : i32, i32, i32
  }
}

module attributes {stable_mosaic.version = 11 : i64} {
  func.func @kernel(%arg0: i32, %arg1: memref<1x64x32xbf16, #tpu.memory_space<vmem>>, %arg2: memref<32x192xbf16, #tpu.memory_space<vmem>>, %arg3: memref<1x64xf32, #tpu.memory_space<vmem>>, %arg4: memref<1x32xf32, #tpu.memory_space<vmem>>, %arg5: memref<1x32xf32, #tpu.memory_space<vmem>>, %arg6: memref<1x64x64xbf16, #tpu.memory_space<vmem>>, %arg7: memref<1x2x64xf32, #tpu.memory_space<vmem>>) attributes {dimension_semantics = [#tpu.dimension_semantics<parallel>], iteration_bounds = array<i64: 2>, scalar_prefetch = 0 : i64, scratch_operands = 0 : i64, tpu.core_type = #tpu.core_type<tc>, window_params = [{transform_indices = @transform_0, window_bounds = array<i64: 1, 64, 32>}, {pipeline_mode = #tpu.pipeline_mode<synchronous>, transform_indices = @transform_1, window_bounds = array<i64: 32, 192>}, {pipeline_mode = #tpu.pipeline_mode<synchronous>, transform_indices = @transform_2, window_bounds = array<i64: 1, 64>}, {pipeline_mode = #tpu.pipeline_mode<synchronous>, transform_indices = @transform_3, window_bounds = array<i64: 1, 32>}, {pipeline_mode = #tpu.pipeline_mode<synchronous>, transform_indices = @transform_4, window_bounds = array<i64: 1, 32>}, {transform_indices = @transform_5, window_bounds = array<i64: 1, 64, 64>}, {transform_indices = @transform_6, window_bounds = array<i64: 1, 2, 64>}]} {
    %c0 = arith.constant 0 : index
    %c0_0 = arith.constant 0 : index
    %c0_1 = arith.constant 0 : index
    %0 = vector.load %arg1[%c0, %c0_0, %c0_1] : memref<1x64x32xbf16, #tpu.memory_space<vmem>>, vector<1x64x32xbf16>
    %1 = vector.shape_cast %0 : vector<1x64x32xbf16> to vector<64x32xbf16>
    %2 = arith.extf %1 : vector<64x32xbf16> to vector<64x32xf32>
    %c0_2 = arith.constant 0 : index
    %c0_3 = arith.constant 0 : index
    %3 = vector.load %arg4[%c0_2, %c0_3] : memref<1x32xf32, #tpu.memory_space<vmem>>, vector<1x32xf32>
    %4 = vector.broadcast %3 : vector<1x32xf32> to vector<64x32xf32>
    %5 = arith.mulf %2, %4 : vector<64x32xf32>
    %c0_4 = arith.constant 0 : index
    %c0_5 = arith.constant 0 : index
    %6 = vector.load %arg5[%c0_4, %c0_5] : memref<1x32xf32, #tpu.memory_space<vmem>>, vector<1x32xf32>
    %7 = vector.broadcast %6 : vector<1x32xf32> to vector<64x32xf32>
    %8 = arith.addf %5, %7 : vector<64x32xf32>
    %cst = arith.constant 0.000000e+00 : f32
    %9 = vector.broadcast %cst : f32 to vector<64x32xf32>
    %10 = arith.maximumf %8, %9 : vector<64x32xf32>
    %11 = arith.truncf %10 : vector<64x32xf32> to vector<64x32xbf16>
    %c0_6 = arith.constant 0 : index
    %c0_7 = arith.constant 0 : index
    %12 = vector.load %arg2[%c0_6, %c0_7] : memref<32x192xbf16, #tpu.memory_space<vmem>>, vector<32x192xbf16>
    %cst_8 = arith.constant dense<0.000000e+00> : vector<64x192xf32>
    %13 = tpu.matmul %11, %12, %cst_8 {dimension_numbers = #tpu.dot_dimension_numbers<[1], [0], [0], [1], [0, 0, 1, 1], [], []>} : vector<64x32xbf16>, vector<32x192xbf16>, vector<64x192xf32> -> vector<64x192xf32>
    %14 = tpu.iota {dimensions = array<i32: 0>} : vector<64x1xi32>
    %c16_i32 = arith.constant 16 : i32
    %c0_i32 = arith.constant 0 : i32
    %15 = arith.cmpi eq, %c16_i32, %c0_i32 : i32
    %c1_i32 = arith.constant 1 : i32
    %16 = arith.select %15, %c1_i32, %c16_i32 : i32
    %17 = vector.broadcast %16 : i32 to vector<64x1xi32>
    %18 = arith.remsi %14, %17 : vector<64x1xi32>
    %c0_i32_9 = arith.constant 0 : i32
    %19 = vector.broadcast %c0_i32_9 : i32 to vector<64x1xi32>
    %20 = arith.cmpi ne, %18, %19 : vector<64x1xi32>
    %c0_i32_10 = arith.constant 0 : i32
    %21 = vector.broadcast %c0_i32_10 : i32 to vector<64x1xi32>
    %22 = arith.cmpi slt, %18, %21 : vector<64x1xi32>
    %c0_i32_11 = arith.constant 0 : i32
    %23 = arith.cmpi slt, %16, %c0_i32_11 : i32
    %24 = vector.broadcast %23 : i1 to vector<64x1xi1>
    %25 = vector.broadcast %24 : vector<64x1xi1> to vector<64x1xi1>
    %26 = arith.xori %22, %25 : vector<64x1xi1>
    %27 = arith.andi %26, %20 : vector<64x1xi1>
    %28 = vector.broadcast %16 : i32 to vector<64x1xi32>
    %29 = arith.addi %18, %28 : vector<64x1xi32>
    %30 = arith.select %27, %29, %18 : vector<64x1xi1>, vector<64x1xi32>
    %31 = vector.extract_strided_slice %13 {offsets = [0, 0], sizes = [64, 64], strides = [1, 1]} : vector<64x192xf32> to vector<64x64xf32>
    %cst_12 = arith.constant 0.000000e+00 : f32
    %32 = vector.broadcast %cst_12 : f32 to vector<5x64xf32>
    %33 = vector.extract_strided_slice %31 {offsets = [0, 0], sizes = [59, 64], strides = [1, 1]} : vector<64x64xf32> to vector<59x64xf32>
    %34 = tpu.concatenate %32, %33 in 0 : vector<5x64xf32>, vector<59x64xf32> -> vector<64x64xf32>
    %c5_i32 = arith.constant 5 : i32
    %35 = vector.broadcast %c5_i32 : i32 to vector<64x1xi32>
    %36 = arith.cmpi sge, %30, %35 : vector<64x1xi32>
    %cst_13 = arith.constant 0.000000e+00 : f32
    %37 = vector.shape_cast %36 : vector<64x1xi1> to vector<64x1xi1>
    %38 = vector.broadcast %37 : vector<64x1xi1> to vector<64x64xi1>
    %39 = vector.broadcast %cst_13 : f32 to vector<64x64xf32>
    %40 = arith.select %38, %34, %39 : vector<64x64xi1>, vector<64x64xf32>
    %41 = vector.extract_strided_slice %13 {offsets = [0, 64], sizes = [64, 64], strides = [1, 1]} : vector<64x192xf32> to vector<64x64xf32>
    %42 = arith.addf %40, %41 : vector<64x64xf32>
    %43 = vector.extract_strided_slice %13 {offsets = [0, 128], sizes = [64, 64], strides = [1, 1]} : vector<64x192xf32> to vector<64x64xf32>
    %cst_14 = arith.constant 0.000000e+00 : f32
    %44 = vector.broadcast %cst_14 : f32 to vector<5x64xf32>
    %45 = vector.extract_strided_slice %43 {offsets = [5, 0], sizes = [59, 64], strides = [1, 1]} : vector<64x64xf32> to vector<59x64xf32>
    %46 = tpu.concatenate %45, %44 in 0 : vector<59x64xf32>, vector<5x64xf32> -> vector<64x64xf32>
    %c11_i32 = arith.constant 11 : i32
    %47 = vector.broadcast %c11_i32 : i32 to vector<64x1xi32>
    %48 = arith.cmpi slt, %30, %47 : vector<64x1xi32>
    %cst_15 = arith.constant 0.000000e+00 : f32
    %49 = vector.shape_cast %48 : vector<64x1xi1> to vector<64x1xi1>
    %50 = vector.broadcast %49 : vector<64x1xi1> to vector<64x64xi1>
    %51 = vector.broadcast %cst_15 : f32 to vector<64x64xf32>
    %52 = arith.select %50, %46, %51 : vector<64x64xi1>, vector<64x64xf32>
    %53 = arith.addf %42, %52 : vector<64x64xf32>
    %c0_16 = arith.constant 0 : index
    %c0_17 = arith.constant 0 : index
    %54 = vector.load %arg3[%c0_16, %c0_17] : memref<1x64xf32, #tpu.memory_space<vmem>>, vector<1x64xf32>
    %55 = vector.broadcast %54 : vector<1x64xf32> to vector<64x64xf32>
    %56 = arith.addf %53, %55 : vector<64x64xf32>
    %57 = arith.truncf %56 : vector<64x64xf32> to vector<64x64xbf16>
    %c0_18 = arith.constant 0 : index
    %c0_19 = arith.constant 0 : index
    %c0_20 = arith.constant 0 : index
    %58 = vector.load %arg6[%c0_18, %c0_19, %c0_20] : memref<1x64x64xbf16, #tpu.memory_space<vmem>>, vector<1x64x64xbf16>
    %59 = vector.shape_cast %58 : vector<1x64x64xbf16> to vector<64x64xbf16>
    %60 = vector.shape_cast %57 : vector<64x64xbf16> to vector<1x64x64xbf16>
    tpu.vector_store %arg6[%c0_18, %c0_19, %c0_20], %60 {strides = array<i32>} : memref<1x64x64xbf16, #tpu.memory_space<vmem>>, vector<1x64x64xbf16>,
    %cst_21 = arith.constant dense<0.000000e+00> : vector<64xf32>
    %61 = vector.multi_reduction <add>, %56, %cst_21 [0] : vector<64x64xf32> to vector<64xf32>
    %62 = vector.shape_cast %61 : vector<64xf32> to vector<1x64xf32>
    %63 = arith.mulf %56, %56 : vector<64x64xf32>
    %cst_22 = arith.constant dense<0.000000e+00> : vector<64xf32>
    %64 = vector.multi_reduction <add>, %63, %cst_22 [0] : vector<64x64xf32> to vector<64xf32>
    %65 = vector.shape_cast %64 : vector<64xf32> to vector<1x64xf32>
    %66 = tpu.concatenate %62, %65 in 0 : vector<1x64xf32>, vector<1x64xf32> -> vector<2x64xf32>
    %c0_23 = arith.constant 0 : index
    %c0_24 = arith.constant 0 : index
    %c0_25 = arith.constant 0 : index
    %67 = vector.load %arg7[%c0_23, %c0_24, %c0_25] : memref<1x2x64xf32, #tpu.memory_space<vmem>>, vector<1x2x64xf32>
    %68 = vector.shape_cast %67 : vector<1x2x64xf32> to vector<2x64xf32>
    %69 = vector.shape_cast %66 : vector<2x64xf32> to vector<1x2x64xf32>
    tpu.vector_store %arg7[%c0_23, %c0_24, %c0_25], %69 {strides = array<i32>} : memref<1x2x64xf32, #tpu.memory_space<vmem>>, vector<1x2x64xf32>,
    return
  }
  func.func @transform_0(%arg0: i32) -> (i32, i32, i32) {
    %c0_i32 = arith.constant 0 : i32
    %c0_i32_0 = arith.constant 0 : i32
    %c0_i32_1 = arith.constant 0 : i32
    return %arg0, %c0_i32, %c0_i32_0 : i32, i32, i32
  }
  func.func @transform_1(%arg0: i32) -> (i32, i32) {
    %c0_i32 = arith.constant 0 : i32
    %c0_i32_0 = arith.constant 0 : i32
    %c0_i32_1 = arith.constant 0 : i32
    return %c0_i32, %c0_i32_0 : i32, i32
  }
  func.func @transform_2(%arg0: i32) -> (i32, i32) {
    %c0_i32 = arith.constant 0 : i32
    %c0_i32_0 = arith.constant 0 : i32
    %c0_i32_1 = arith.constant 0 : i32
    return %c0_i32, %c0_i32_0 : i32, i32
  }
  func.func @transform_3(%arg0: i32) -> (i32, i32) {
    %c0_i32 = arith.constant 0 : i32
    %c0_i32_0 = arith.constant 0 : i32
    %c0_i32_1 = arith.constant 0 : i32
    return %c0_i32, %c0_i32_0 : i32, i32
  }
  func.func @transform_4(%arg0: i32) -> (i32, i32) {
    %c0_i32 = arith.constant 0 : i32
    %c0_i32_0 = arith.constant 0 : i32
    %c0_i32_1 = arith.constant 0 : i32
    return %c0_i32, %c0_i32_0 : i32, i32
  }
  func.func @transform_5(%arg0: i32) -> (i32, i32, i32) {
    %c0_i32 = arith.constant 0 : i32
    %c0_i32_0 = arith.constant 0 : i32
    %c0_i32_1 = arith.constant 0 : i32
    return %arg0, %c0_i32, %c0_i32_0 : i32, i32, i32
  }
  func.func @transform_6(%arg0: i32) -> (i32, i32, i32) {
    %c0_i32 = arith.constant 0 : i32
    %c0_i32_0 = arith.constant 0 : i32
    %c0_i32_1 = arith.constant 0 : i32
    return %arg0, %c0_i32, %c0_i32_0 : i32, i32, i32
  }
}

module attributes {stable_mosaic.version = 11 : i64} {
  func.func @kernel(%arg0: i32, %arg1: memref<1x64x64xbf16, #tpu.memory_space<vmem>>, %arg2: memref<64x576xbf16, #tpu.memory_space<vmem>>, %arg3: memref<1x64xf32, #tpu.memory_space<vmem>>, %arg4: memref<1x64xf32, #tpu.memory_space<vmem>>, %arg5: memref<1x64xf32, #tpu.memory_space<vmem>>, %arg6: memref<1x64x64xbf16, #tpu.memory_space<vmem>>, %arg7: memref<1x2x64xf32, #tpu.memory_space<vmem>>) attributes {dimension_semantics = [#tpu.dimension_semantics<parallel>], iteration_bounds = array<i64: 2>, scalar_prefetch = 0 : i64, scratch_operands = 0 : i64, tpu.core_type = #tpu.core_type<tc>, window_params = [{transform_indices = @transform_0, window_bounds = array<i64: 1, 64, 64>}, {pipeline_mode = #tpu.pipeline_mode<synchronous>, transform_indices = @transform_1, window_bounds = array<i64: 64, 576>}, {pipeline_mode = #tpu.pipeline_mode<synchronous>, transform_indices = @transform_2, window_bounds = array<i64: 1, 64>}, {pipeline_mode = #tpu.pipeline_mode<synchronous>, transform_indices = @transform_3, window_bounds = array<i64: 1, 64>}, {pipeline_mode = #tpu.pipeline_mode<synchronous>, transform_indices = @transform_4, window_bounds = array<i64: 1, 64>}, {transform_indices = @transform_5, window_bounds = array<i64: 1, 64, 64>}, {transform_indices = @transform_6, window_bounds = array<i64: 1, 2, 64>}]} {
    %c0 = arith.constant 0 : index
    %c0_0 = arith.constant 0 : index
    %c0_1 = arith.constant 0 : index
    %0 = vector.load %arg1[%c0, %c0_0, %c0_1] : memref<1x64x64xbf16, #tpu.memory_space<vmem>>, vector<1x64x64xbf16>
    %1 = vector.shape_cast %0 : vector<1x64x64xbf16> to vector<64x64xbf16>
    %2 = arith.extf %1 : vector<64x64xbf16> to vector<64x64xf32>
    %c0_2 = arith.constant 0 : index
    %c0_3 = arith.constant 0 : index
    %3 = vector.load %arg4[%c0_2, %c0_3] : memref<1x64xf32, #tpu.memory_space<vmem>>, vector<1x64xf32>
    %4 = vector.broadcast %3 : vector<1x64xf32> to vector<64x64xf32>
    %5 = arith.mulf %2, %4 : vector<64x64xf32>
    %c0_4 = arith.constant 0 : index
    %c0_5 = arith.constant 0 : index
    %6 = vector.load %arg5[%c0_4, %c0_5] : memref<1x64xf32, #tpu.memory_space<vmem>>, vector<1x64xf32>
    %7 = vector.broadcast %6 : vector<1x64xf32> to vector<64x64xf32>
    %8 = arith.addf %5, %7 : vector<64x64xf32>
    %cst = arith.constant 0.000000e+00 : f32
    %9 = vector.broadcast %cst : f32 to vector<64x64xf32>
    %10 = arith.maximumf %8, %9 : vector<64x64xf32>
    %11 = arith.truncf %10 : vector<64x64xf32> to vector<64x64xbf16>
    %c0_6 = arith.constant 0 : index
    %c0_7 = arith.constant 0 : index
    %12 = vector.load %arg2[%c0_6, %c0_7] : memref<64x576xbf16, #tpu.memory_space<vmem>>, vector<64x576xbf16>
    %cst_8 = arith.constant dense<0.000000e+00> : vector<64x576xf32>
    %13 = tpu.matmul %11, %12, %cst_8 {dimension_numbers = #tpu.dot_dimension_numbers<[1], [0], [0], [1], [0, 0, 1, 1], [], []>} : vector<64x64xbf16>, vector<64x576xbf16>, vector<64x576xf32> -> vector<64x576xf32>
    %14 = tpu.iota {dimensions = array<i32: 0>} : vector<64x1xi32>
    %c16_i32 = arith.constant 16 : i32
    %c0_i32 = arith.constant 0 : i32
    %15 = arith.cmpi eq, %c16_i32, %c0_i32 : i32
    %c1_i32 = arith.constant 1 : i32
    %16 = arith.select %15, %c1_i32, %c16_i32 : i32
    %17 = vector.broadcast %16 : i32 to vector<64x1xi32>
    %18 = arith.remsi %14, %17 : vector<64x1xi32>
    %c0_i32_9 = arith.constant 0 : i32
    %19 = vector.broadcast %c0_i32_9 : i32 to vector<64x1xi32>
    %20 = arith.cmpi ne, %18, %19 : vector<64x1xi32>
    %c0_i32_10 = arith.constant 0 : i32
    %21 = vector.broadcast %c0_i32_10 : i32 to vector<64x1xi32>
    %22 = arith.cmpi slt, %18, %21 : vector<64x1xi32>
    %c0_i32_11 = arith.constant 0 : i32
    %23 = arith.cmpi slt, %16, %c0_i32_11 : i32
    %24 = vector.broadcast %23 : i1 to vector<64x1xi1>
    %25 = vector.broadcast %24 : vector<64x1xi1> to vector<64x1xi1>
    %26 = arith.xori %22, %25 : vector<64x1xi1>
    %27 = arith.andi %26, %20 : vector<64x1xi1>
    %28 = vector.broadcast %16 : i32 to vector<64x1xi32>
    %29 = arith.addi %18, %28 : vector<64x1xi32>
    %30 = arith.select %27, %29, %18 : vector<64x1xi1>, vector<64x1xi32>
    %31 = vector.extract_strided_slice %13 {offsets = [0, 0], sizes = [64, 64], strides = [1, 1]} : vector<64x576xf32> to vector<64x64xf32>
    %cst_12 = arith.constant 0.000000e+00 : f32
    %32 = vector.broadcast %cst_12 : f32 to vector<17x64xf32>
    %33 = vector.extract_strided_slice %31 {offsets = [0, 0], sizes = [47, 64], strides = [1, 1]} : vector<64x64xf32> to vector<47x64xf32>
    %34 = tpu.concatenate %32, %33 in 0 : vector<17x64xf32>, vector<47x64xf32> -> vector<64x64xf32>
    %c1_i32_13 = arith.constant 1 : i32
    %35 = vector.broadcast %c1_i32_13 : i32 to vector<64x1xi32>
    %36 = arith.cmpi sge, %30, %35 : vector<64x1xi32>
    %cst_14 = arith.constant 0.000000e+00 : f32
    %37 = vector.shape_cast %36 : vector<64x1xi1> to vector<64x1xi1>
    %38 = vector.broadcast %37 : vector<64x1xi1> to vector<64x64xi1>
    %39 = vector.broadcast %cst_14 : f32 to vector<64x64xf32>
    %40 = arith.select %38, %34, %39 : vector<64x64xi1>, vector<64x64xf32>
    %41 = vector.extract_strided_slice %13 {offsets = [0, 64], sizes = [64, 64], strides = [1, 1]} : vector<64x576xf32> to vector<64x64xf32>
    %cst_15 = arith.constant 0.000000e+00 : f32
    %42 = vector.broadcast %cst_15 : f32 to vector<1x64xf32>
    %43 = vector.extract_strided_slice %41 {offsets = [0, 0], sizes = [63, 64], strides = [1, 1]} : vector<64x64xf32> to vector<63x64xf32>
    %44 = tpu.concatenate %42, %43 in 0 : vector<1x64xf32>, vector<63x64xf32> -> vector<64x64xf32>
    %c1_i32_16 = arith.constant 1 : i32
    %45 = vector.broadcast %c1_i32_16 : i32 to vector<64x1xi32>
    %46 = arith.cmpi sge, %30, %45 : vector<64x1xi32>
    %cst_17 = arith.constant 0.000000e+00 : f32
    %47 = vector.shape_cast %46 : vector<64x1xi1> to vector<64x1xi1>
    %48 = vector.broadcast %47 : vector<64x1xi1> to vector<64x64xi1>
    %49 = vector.broadcast %cst_17 : f32 to vector<64x64xf32>
    %50 = arith.select %48, %44, %49 : vector<64x64xi1>, vector<64x64xf32>
    %51 = arith.addf %40, %50 : vector<64x64xf32>
    %52 = vector.extract_strided_slice %13 {offsets = [0, 128], sizes = [64, 64], strides = [1, 1]} : vector<64x576xf32> to vector<64x64xf32>
    %cst_18 = arith.constant 0.000000e+00 : f32
    %53 = vector.broadcast %cst_18 : f32 to vector<15x64xf32>
    %54 = vector.extract_strided_slice %52 {offsets = [15, 0], sizes = [49, 64], strides = [1, 1]} : vector<64x64xf32> to vector<49x64xf32>
    %55 = tpu.concatenate %54, %53 in 0 : vector<49x64xf32>, vector<15x64xf32> -> vector<64x64xf32>
    %c1_i32_19 = arith.constant 1 : i32
    %56 = vector.broadcast %c1_i32_19 : i32 to vector<64x1xi32>
    %57 = arith.cmpi sge, %30, %56 : vector<64x1xi32>
    %cst_20 = arith.constant 0.000000e+00 : f32
    %58 = vector.shape_cast %57 : vector<64x1xi1> to vector<64x1xi1>
    %59 = vector.broadcast %58 : vector<64x1xi1> to vector<64x64xi1>
    %60 = vector.broadcast %cst_20 : f32 to vector<64x64xf32>
    %61 = arith.select %59, %55, %60 : vector<64x64xi1>, vector<64x64xf32>
    %62 = arith.addf %51, %61 : vector<64x64xf32>
    %63 = vector.extract_strided_slice %13 {offsets = [0, 192], sizes = [64, 64], strides = [1, 1]} : vector<64x576xf32> to vector<64x64xf32>
    %cst_21 = arith.constant 0.000000e+00 : f32
    %64 = vector.broadcast %cst_21 : f32 to vector<16x64xf32>
    %65 = vector.extract_strided_slice %63 {offsets = [0, 0], sizes = [48, 64], strides = [1, 1]} : vector<64x64xf32> to vector<48x64xf32>
    %66 = tpu.concatenate %64, %65 in 0 : vector<16x64xf32>, vector<48x64xf32> -> vector<64x64xf32>
    %67 = arith.addf %62, %66 : vector<64x64xf32>
    %68 = vector.extract_strided_slice %13 {offsets = [0, 256], sizes = [64, 64], strides = [1, 1]} : vector<64x576xf32> to vector<64x64xf32>
    %69 = arith.addf %67, %68 : vector<64x64xf32>
    %70 = vector.extract_strided_slice %13 {offsets = [0, 320], sizes = [64, 64], strides = [1, 1]} : vector<64x576xf32> to vector<64x64xf32>
    %cst_22 = arith.constant 0.000000e+00 : f32
    %71 = vector.broadcast %cst_22 : f32 to vector<16x64xf32>
    %72 = vector.extract_strided_slice %70 {offsets = [16, 0], sizes = [48, 64], strides = [1, 1]} : vector<64x64xf32> to vector<48x64xf32>
    %73 = tpu.concatenate %72, %71 in 0 : vector<48x64xf32>, vector<16x64xf32> -> vector<64x64xf32>
    %74 = arith.addf %69, %73 : vector<64x64xf32>
    %75 = vector.extract_strided_slice %13 {offsets = [0, 384], sizes = [64, 64], strides = [1, 1]} : vector<64x576xf32> to vector<64x64xf32>
    %cst_23 = arith.constant 0.000000e+00 : f32
    %76 = vector.broadcast %cst_23 : f32 to vector<15x64xf32>
    %77 = vector.extract_strided_slice %75 {offsets = [0, 0], sizes = [49, 64], strides = [1, 1]} : vector<64x64xf32> to vector<49x64xf32>
    %78 = tpu.concatenate %76, %77 in 0 : vector<15x64xf32>, vector<49x64xf32> -> vector<64x64xf32>
    %c15_i32 = arith.constant 15 : i32
    %79 = vector.broadcast %c15_i32 : i32 to vector<64x1xi32>
    %80 = arith.cmpi slt, %30, %79 : vector<64x1xi32>
    %cst_24 = arith.constant 0.000000e+00 : f32
    %81 = vector.shape_cast %80 : vector<64x1xi1> to vector<64x1xi1>
    %82 = vector.broadcast %81 : vector<64x1xi1> to vector<64x64xi1>
    %83 = vector.broadcast %cst_24 : f32 to vector<64x64xf32>
    %84 = arith.select %82, %78, %83 : vector<64x64xi1>, vector<64x64xf32>
    %85 = arith.addf %74, %84 : vector<64x64xf32>
    %86 = vector.extract_strided_slice %13 {offsets = [0, 448], sizes = [64, 64], strides = [1, 1]} : vector<64x576xf32> to vector<64x64xf32>
    %cst_25 = arith.constant 0.000000e+00 : f32
    %87 = vector.broadcast %cst_25 : f32 to vector<1x64xf32>
    %88 = vector.extract_strided_slice %86 {offsets = [1, 0], sizes = [63, 64], strides = [1, 1]} : vector<64x64xf32> to vector<63x64xf32>
    %89 = tpu.concatenate %88, %87 in 0 : vector<63x64xf32>, vector<1x64xf32> -> vector<64x64xf32>
    %c15_i32_26 = arith.constant 15 : i32
    %90 = vector.broadcast %c15_i32_26 : i32 to vector<64x1xi32>
    %91 = arith.cmpi slt, %30, %90 : vector<64x1xi32>
    %cst_27 = arith.constant 0.000000e+00 : f32
    %92 = vector.shape_cast %91 : vector<64x1xi1> to vector<64x1xi1>
    %93 = vector.broadcast %92 : vector<64x1xi1> to vector<64x64xi1>
    %94 = vector.broadcast %cst_27 : f32 to vector<64x64xf32>
    %95 = arith.select %93, %89, %94 : vector<64x64xi1>, vector<64x64xf32>
    %96 = arith.addf %85, %95 : vector<64x64xf32>
    %97 = vector.extract_strided_slice %13 {offsets = [0, 512], sizes = [64, 64], strides = [1, 1]} : vector<64x576xf32> to vector<64x64xf32>
    %cst_28 = arith.constant 0.000000e+00 : f32
    %98 = vector.broadcast %cst_28 : f32 to vector<17x64xf32>
    %99 = vector.extract_strided_slice %97 {offsets = [17, 0], sizes = [47, 64], strides = [1, 1]} : vector<64x64xf32> to vector<47x64xf32>
    %100 = tpu.concatenate %99, %98 in 0 : vector<47x64xf32>, vector<17x64xf32> -> vector<64x64xf32>
    %c15_i32_29 = arith.constant 15 : i32
    %101 = vector.broadcast %c15_i32_29 : i32 to vector<64x1xi32>
    %102 = arith.cmpi slt, %30, %101 : vector<64x1xi32>
    %cst_30 = arith.constant 0.000000e+00 : f32
    %103 = vector.shape_cast %102 : vector<64x1xi1> to vector<64x1xi1>
    %104 = vector.broadcast %103 : vector<64x1xi1> to vector<64x64xi1>
    %105 = vector.broadcast %cst_30 : f32 to vector<64x64xf32>
    %106 = arith.select %104, %100, %105 : vector<64x64xi1>, vector<64x64xf32>
    %107 = arith.addf %96, %106 : vector<64x64xf32>
    %c0_31 = arith.constant 0 : index
    %c0_32 = arith.constant 0 : index
    %108 = vector.load %arg3[%c0_31, %c0_32] : memref<1x64xf32, #tpu.memory_space<vmem>>, vector<1x64xf32>
    %109 = vector.broadcast %108 : vector<1x64xf32> to vector<64x64xf32>
    %110 = arith.addf %107, %109 : vector<64x64xf32>
    %111 = arith.truncf %110 : vector<64x64xf32> to vector<64x64xbf16>
    %c0_33 = arith.constant 0 : index
    %c0_34 = arith.constant 0 : index
    %c0_35 = arith.constant 0 : index
    %112 = vector.load %arg6[%c0_33, %c0_34, %c0_35] : memref<1x64x64xbf16, #tpu.memory_space<vmem>>, vector<1x64x64xbf16>
    %113 = vector.shape_cast %112 : vector<1x64x64xbf16> to vector<64x64xbf16>
    %114 = vector.shape_cast %111 : vector<64x64xbf16> to vector<1x64x64xbf16>
    tpu.vector_store %arg6[%c0_33, %c0_34, %c0_35], %114 {strides = array<i32>} : memref<1x64x64xbf16, #tpu.memory_space<vmem>>, vector<1x64x64xbf16>,
    %cst_36 = arith.constant dense<0.000000e+00> : vector<64xf32>
    %115 = vector.multi_reduction <add>, %110, %cst_36 [0] : vector<64x64xf32> to vector<64xf32>
    %116 = vector.shape_cast %115 : vector<64xf32> to vector<1x64xf32>
    %117 = arith.mulf %110, %110 : vector<64x64xf32>
    %cst_37 = arith.constant dense<0.000000e+00> : vector<64xf32>
    %118 = vector.multi_reduction <add>, %117, %cst_37 [0] : vector<64x64xf32> to vector<64xf32>
    %119 = vector.shape_cast %118 : vector<64xf32> to vector<1x64xf32>
    %120 = tpu.concatenate %116, %119 in 0 : vector<1x64xf32>, vector<1x64xf32> -> vector<2x64xf32>
    %c0_38 = arith.constant 0 : index
    %c0_39 = arith.constant 0 : index
    %c0_40 = arith.constant 0 : index
    %121 = vector.load %arg7[%c0_38, %c0_39, %c0_40] : memref<1x2x64xf32, #tpu.memory_space<vmem>>, vector<1x2x64xf32>
    %122 = vector.shape_cast %121 : vector<1x2x64xf32> to vector<2x64xf32>
    %123 = vector.shape_cast %120 : vector<2x64xf32> to vector<1x2x64xf32>
    tpu.vector_store %arg7[%c0_38, %c0_39, %c0_40], %123 {strides = array<i32>} : memref<1x2x64xf32, #tpu.memory_space<vmem>>, vector<1x2x64xf32>,
    return
  }
  func.func @transform_0(%arg0: i32) -> (i32, i32, i32) {
    %c0_i32 = arith.constant 0 : i32
    %c0_i32_0 = arith.constant 0 : i32
    %c0_i32_1 = arith.constant 0 : i32
    return %arg0, %c0_i32, %c0_i32_0 : i32, i32, i32
  }
  func.func @transform_1(%arg0: i32) -> (i32, i32) {
    %c0_i32 = arith.constant 0 : i32
    %c0_i32_0 = arith.constant 0 : i32
    %c0_i32_1 = arith.constant 0 : i32
    return %c0_i32, %c0_i32_0 : i32, i32
  }
  func.func @transform_2(%arg0: i32) -> (i32, i32) {
    %c0_i32 = arith.constant 0 : i32
    %c0_i32_0 = arith.constant 0 : i32
    %c0_i32_1 = arith.constant 0 : i32
    return %c0_i32, %c0_i32_0 : i32, i32
  }
  func.func @transform_3(%arg0: i32) -> (i32, i32) {
    %c0_i32 = arith.constant 0 : i32
    %c0_i32_0 = arith.constant 0 : i32
    %c0_i32_1 = arith.constant 0 : i32
    return %c0_i32, %c0_i32_0 : i32, i32
  }
  func.func @transform_4(%arg0: i32) -> (i32, i32) {
    %c0_i32 = arith.constant 0 : i32
    %c0_i32_0 = arith.constant 0 : i32
    %c0_i32_1 = arith.constant 0 : i32
    return %c0_i32, %c0_i32_0 : i32, i32
  }
  func.func @transform_5(%arg0: i32) -> (i32, i32, i32) {
    %c0_i32 = arith.constant 0 : i32
    %c0_i32_0 = arith.constant 0 : i32
    %c0_i32_1 = arith.constant 0 : i32
    return %arg0, %c0_i32, %c0_i32_0 : i32, i32, i32
  }
  func.func @transform_6(%arg0: i32) -> (i32, i32, i32) {
    %c0_i32 = arith.constant 0 : i32
    %c0_i32_0 = arith.constant 0 : i32
    %c0_i32_1 = arith.constant 0 : i32
    return %arg0, %c0_i32, %c0_i32_0 : i32, i32, i32
  }
}

module attributes {stable_mosaic.version = 11 : i64} {
  func.func @kernel(%arg0: i32, %arg1: memref<1x64x64xbf16, #tpu.memory_space<vmem>>, %arg2: memref<64x576xbf16, #tpu.memory_space<vmem>>, %arg3: memref<1x64xf32, #tpu.memory_space<vmem>>, %arg4: memref<1x64xf32, #tpu.memory_space<vmem>>, %arg5: memref<1x64xf32, #tpu.memory_space<vmem>>, %arg6: memref<1x64x64xbf16, #tpu.memory_space<vmem>>, %arg7: memref<1x2x64xf32, #tpu.memory_space<vmem>>) attributes {dimension_semantics = [#tpu.dimension_semantics<parallel>], iteration_bounds = array<i64: 2>, scalar_prefetch = 0 : i64, scratch_operands = 0 : i64, tpu.core_type = #tpu.core_type<tc>, window_params = [{transform_indices = @transform_0, window_bounds = array<i64: 1, 64, 64>}, {pipeline_mode = #tpu.pipeline_mode<synchronous>, transform_indices = @transform_1, window_bounds = array<i64: 64, 576>}, {pipeline_mode = #tpu.pipeline_mode<synchronous>, transform_indices = @transform_2, window_bounds = array<i64: 1, 64>}, {pipeline_mode = #tpu.pipeline_mode<synchronous>, transform_indices = @transform_3, window_bounds = array<i64: 1, 64>}, {pipeline_mode = #tpu.pipeline_mode<synchronous>, transform_indices = @transform_4, window_bounds = array<i64: 1, 64>}, {transform_indices = @transform_5, window_bounds = array<i64: 1, 64, 64>}, {transform_indices = @transform_6, window_bounds = array<i64: 1, 2, 64>}]} {
    %c0 = arith.constant 0 : index
    %c0_0 = arith.constant 0 : index
    %c0_1 = arith.constant 0 : index
    %0 = vector.load %arg1[%c0, %c0_0, %c0_1] : memref<1x64x64xbf16, #tpu.memory_space<vmem>>, vector<1x64x64xbf16>
    %1 = vector.shape_cast %0 : vector<1x64x64xbf16> to vector<64x64xbf16>
    %2 = arith.extf %1 : vector<64x64xbf16> to vector<64x64xf32>
    %c0_2 = arith.constant 0 : index
    %c0_3 = arith.constant 0 : index
    %3 = vector.load %arg4[%c0_2, %c0_3] : memref<1x64xf32, #tpu.memory_space<vmem>>, vector<1x64xf32>
    %4 = vector.broadcast %3 : vector<1x64xf32> to vector<64x64xf32>
    %5 = arith.mulf %2, %4 : vector<64x64xf32>
    %c0_4 = arith.constant 0 : index
    %c0_5 = arith.constant 0 : index
    %6 = vector.load %arg5[%c0_4, %c0_5] : memref<1x64xf32, #tpu.memory_space<vmem>>, vector<1x64xf32>
    %7 = vector.broadcast %6 : vector<1x64xf32> to vector<64x64xf32>
    %8 = arith.addf %5, %7 : vector<64x64xf32>
    %cst = arith.constant 0.000000e+00 : f32
    %9 = vector.broadcast %cst : f32 to vector<64x64xf32>
    %10 = arith.maximumf %8, %9 : vector<64x64xf32>
    %11 = arith.truncf %10 : vector<64x64xf32> to vector<64x64xbf16>
    %c0_6 = arith.constant 0 : index
    %c0_7 = arith.constant 0 : index
    %12 = vector.load %arg2[%c0_6, %c0_7] : memref<64x576xbf16, #tpu.memory_space<vmem>>, vector<64x576xbf16>
    %cst_8 = arith.constant dense<0.000000e+00> : vector<64x576xf32>
    %13 = tpu.matmul %11, %12, %cst_8 {dimension_numbers = #tpu.dot_dimension_numbers<[1], [0], [0], [1], [0, 0, 1, 1], [], []>} : vector<64x64xbf16>, vector<64x576xbf16>, vector<64x576xf32> -> vector<64x576xf32>
    %14 = tpu.iota {dimensions = array<i32: 0>} : vector<64x1xi32>
    %c16_i32 = arith.constant 16 : i32
    %c0_i32 = arith.constant 0 : i32
    %15 = arith.cmpi eq, %c16_i32, %c0_i32 : i32
    %c1_i32 = arith.constant 1 : i32
    %16 = arith.select %15, %c1_i32, %c16_i32 : i32
    %17 = vector.broadcast %16 : i32 to vector<64x1xi32>
    %18 = arith.remsi %14, %17 : vector<64x1xi32>
    %c0_i32_9 = arith.constant 0 : i32
    %19 = vector.broadcast %c0_i32_9 : i32 to vector<64x1xi32>
    %20 = arith.cmpi ne, %18, %19 : vector<64x1xi32>
    %c0_i32_10 = arith.constant 0 : i32
    %21 = vector.broadcast %c0_i32_10 : i32 to vector<64x1xi32>
    %22 = arith.cmpi slt, %18, %21 : vector<64x1xi32>
    %c0_i32_11 = arith.constant 0 : i32
    %23 = arith.cmpi slt, %16, %c0_i32_11 : i32
    %24 = vector.broadcast %23 : i1 to vector<64x1xi1>
    %25 = vector.broadcast %24 : vector<64x1xi1> to vector<64x1xi1>
    %26 = arith.xori %22, %25 : vector<64x1xi1>
    %27 = arith.andi %26, %20 : vector<64x1xi1>
    %28 = vector.broadcast %16 : i32 to vector<64x1xi32>
    %29 = arith.addi %18, %28 : vector<64x1xi32>
    %30 = arith.select %27, %29, %18 : vector<64x1xi1>, vector<64x1xi32>
    %31 = vector.extract_strided_slice %13 {offsets = [0, 0], sizes = [64, 64], strides = [1, 1]} : vector<64x576xf32> to vector<64x64xf32>
    %cst_12 = arith.constant 0.000000e+00 : f32
    %32 = vector.broadcast %cst_12 : f32 to vector<34x64xf32>
    %33 = vector.extract_strided_slice %31 {offsets = [0, 0], sizes = [30, 64], strides = [1, 1]} : vector<64x64xf32> to vector<30x64xf32>
    %34 = tpu.concatenate %32, %33 in 0 : vector<34x64xf32>, vector<30x64xf32> -> vector<64x64xf32>
    %c2_i32 = arith.constant 2 : i32
    %35 = vector.broadcast %c2_i32 : i32 to vector<64x1xi32>
    %36 = arith.cmpi sge, %30, %35 : vector<64x1xi32>
    %cst_13 = arith.constant 0.000000e+00 : f32
    %37 = vector.shape_cast %36 : vector<64x1xi1> to vector<64x1xi1>
    %38 = vector.broadcast %37 : vector<64x1xi1> to vector<64x64xi1>
    %39 = vector.broadcast %cst_13 : f32 to vector<64x64xf32>
    %40 = arith.select %38, %34, %39 : vector<64x64xi1>, vector<64x64xf32>
    %41 = vector.extract_strided_slice %13 {offsets = [0, 64], sizes = [64, 64], strides = [1, 1]} : vector<64x576xf32> to vector<64x64xf32>
    %cst_14 = arith.constant 0.000000e+00 : f32
    %42 = vector.broadcast %cst_14 : f32 to vector<2x64xf32>
    %43 = vector.extract_strided_slice %41 {offsets = [0, 0], sizes = [62, 64], strides = [1, 1]} : vector<64x64xf32> to vector<62x64xf32>
    %44 = tpu.concatenate %42, %43 in 0 : vector<2x64xf32>, vector<62x64xf32> -> vector<64x64xf32>
    %c2_i32_15 = arith.constant 2 : i32
    %45 = vector.broadcast %c2_i32_15 : i32 to vector<64x1xi32>
    %46 = arith.cmpi sge, %30, %45 : vector<64x1xi32>
    %cst_16 = arith.constant 0.000000e+00 : f32
    %47 = vector.shape_cast %46 : vector<64x1xi1> to vector<64x1xi1>
    %48 = vector.broadcast %47 : vector<64x1xi1> to vector<64x64xi1>
    %49 = vector.broadcast %cst_16 : f32 to vector<64x64xf32>
    %50 = arith.select %48, %44, %49 : vector<64x64xi1>, vector<64x64xf32>
    %51 = arith.addf %40, %50 : vector<64x64xf32>
    %52 = vector.extract_strided_slice %13 {offsets = [0, 128], sizes = [64, 64], strides = [1, 1]} : vector<64x576xf32> to vector<64x64xf32>
    %cst_17 = arith.constant 0.000000e+00 : f32
    %53 = vector.broadcast %cst_17 : f32 to vector<30x64xf32>
    %54 = vector.extract_strided_slice %52 {offsets = [30, 0], sizes = [34, 64], strides = [1, 1]} : vector<64x64xf32> to vector<34x64xf32>
    %55 = tpu.concatenate %54, %53 in 0 : vector<34x64xf32>, vector<30x64xf32> -> vector<64x64xf32>
    %c2_i32_18 = arith.constant 2 : i32
    %56 = vector.broadcast %c2_i32_18 : i32 to vector<64x1xi32>
    %57 = arith.cmpi sge, %30, %56 : vector<64x1xi32>
    %cst_19 = arith.constant 0.000000e+00 : f32
    %58 = vector.shape_cast %57 : vector<64x1xi1> to vector<64x1xi1>
    %59 = vector.broadcast %58 : vector<64x1xi1> to vector<64x64xi1>
    %60 = vector.broadcast %cst_19 : f32 to vector<64x64xf32>
    %61 = arith.select %59, %55, %60 : vector<64x64xi1>, vector<64x64xf32>
    %62 = arith.addf %51, %61 : vector<64x64xf32>
    %63 = vector.extract_strided_slice %13 {offsets = [0, 192], sizes = [64, 64], strides = [1, 1]} : vector<64x576xf32> to vector<64x64xf32>
    %cst_20 = arith.constant 0.000000e+00 : f32
    %64 = vector.broadcast %cst_20 : f32 to vector<32x64xf32>
    %65 = vector.extract_strided_slice %63 {offsets = [0, 0], sizes = [32, 64], strides = [1, 1]} : vector<64x64xf32> to vector<32x64xf32>
    %66 = tpu.concatenate %64, %65 in 0 : vector<32x64xf32>, vector<32x64xf32> -> vector<64x64xf32>
    %67 = arith.addf %62, %66 : vector<64x64xf32>
    %68 = vector.extract_strided_slice %13 {offsets = [0, 256], sizes = [64, 64], strides = [1, 1]} : vector<64x576xf32> to vector<64x64xf32>
    %69 = arith.addf %67, %68 : vector<64x64xf32>
    %70 = vector.extract_strided_slice %13 {offsets = [0, 320], sizes = [64, 64], strides = [1, 1]} : vector<64x576xf32> to vector<64x64xf32>
    %cst_21 = arith.constant 0.000000e+00 : f32
    %71 = vector.broadcast %cst_21 : f32 to vector<32x64xf32>
    %72 = vector.extract_strided_slice %70 {offsets = [32, 0], sizes = [32, 64], strides = [1, 1]} : vector<64x64xf32> to vector<32x64xf32>
    %73 = tpu.concatenate %72, %71 in 0 : vector<32x64xf32>, vector<32x64xf32> -> vector<64x64xf32>
    %74 = arith.addf %69, %73 : vector<64x64xf32>
    %75 = vector.extract_strided_slice %13 {offsets = [0, 384], sizes = [64, 64], strides = [1, 1]} : vector<64x576xf32> to vector<64x64xf32>
    %cst_22 = arith.constant 0.000000e+00 : f32
    %76 = vector.broadcast %cst_22 : f32 to vector<30x64xf32>
    %77 = vector.extract_strided_slice %75 {offsets = [0, 0], sizes = [34, 64], strides = [1, 1]} : vector<64x64xf32> to vector<34x64xf32>
    %78 = tpu.concatenate %76, %77 in 0 : vector<30x64xf32>, vector<34x64xf32> -> vector<64x64xf32>
    %c14_i32 = arith.constant 14 : i32
    %79 = vector.broadcast %c14_i32 : i32 to vector<64x1xi32>
    %80 = arith.cmpi slt, %30, %79 : vector<64x1xi32>
    %cst_23 = arith.constant 0.000000e+00 : f32
    %81 = vector.shape_cast %80 : vector<64x1xi1> to vector<64x1xi1>
    %82 = vector.broadcast %81 : vector<64x1xi1> to vector<64x64xi1>
    %83 = vector.broadcast %cst_23 : f32 to vector<64x64xf32>
    %84 = arith.select %82, %78, %83 : vector<64x64xi1>, vector<64x64xf32>
    %85 = arith.addf %74, %84 : vector<64x64xf32>
    %86 = vector.extract_strided_slice %13 {offsets = [0, 448], sizes = [64, 64], strides = [1, 1]} : vector<64x576xf32> to vector<64x64xf32>
    %cst_24 = arith.constant 0.000000e+00 : f32
    %87 = vector.broadcast %cst_24 : f32 to vector<2x64xf32>
    %88 = vector.extract_strided_slice %86 {offsets = [2, 0], sizes = [62, 64], strides = [1, 1]} : vector<64x64xf32> to vector<62x64xf32>
    %89 = tpu.concatenate %88, %87 in 0 : vector<62x64xf32>, vector<2x64xf32> -> vector<64x64xf32>
    %c14_i32_25 = arith.constant 14 : i32
    %90 = vector.broadcast %c14_i32_25 : i32 to vector<64x1xi32>
    %91 = arith.cmpi slt, %30, %90 : vector<64x1xi32>
    %cst_26 = arith.constant 0.000000e+00 : f32
    %92 = vector.shape_cast %91 : vector<64x1xi1> to vector<64x1xi1>
    %93 = vector.broadcast %92 : vector<64x1xi1> to vector<64x64xi1>
    %94 = vector.broadcast %cst_26 : f32 to vector<64x64xf32>
    %95 = arith.select %93, %89, %94 : vector<64x64xi1>, vector<64x64xf32>
    %96 = arith.addf %85, %95 : vector<64x64xf32>
    %97 = vector.extract_strided_slice %13 {offsets = [0, 512], sizes = [64, 64], strides = [1, 1]} : vector<64x576xf32> to vector<64x64xf32>
    %cst_27 = arith.constant 0.000000e+00 : f32
    %98 = vector.broadcast %cst_27 : f32 to vector<34x64xf32>
    %99 = vector.extract_strided_slice %97 {offsets = [34, 0], sizes = [30, 64], strides = [1, 1]} : vector<64x64xf32> to vector<30x64xf32>
    %100 = tpu.concatenate %99, %98 in 0 : vector<30x64xf32>, vector<34x64xf32> -> vector<64x64xf32>
    %c14_i32_28 = arith.constant 14 : i32
    %101 = vector.broadcast %c14_i32_28 : i32 to vector<64x1xi32>
    %102 = arith.cmpi slt, %30, %101 : vector<64x1xi32>
    %cst_29 = arith.constant 0.000000e+00 : f32
    %103 = vector.shape_cast %102 : vector<64x1xi1> to vector<64x1xi1>
    %104 = vector.broadcast %103 : vector<64x1xi1> to vector<64x64xi1>
    %105 = vector.broadcast %cst_29 : f32 to vector<64x64xf32>
    %106 = arith.select %104, %100, %105 : vector<64x64xi1>, vector<64x64xf32>
    %107 = arith.addf %96, %106 : vector<64x64xf32>
    %c0_30 = arith.constant 0 : index
    %c0_31 = arith.constant 0 : index
    %108 = vector.load %arg3[%c0_30, %c0_31] : memref<1x64xf32, #tpu.memory_space<vmem>>, vector<1x64xf32>
    %109 = vector.broadcast %108 : vector<1x64xf32> to vector<64x64xf32>
    %110 = arith.addf %107, %109 : vector<64x64xf32>
    %111 = arith.truncf %110 : vector<64x64xf32> to vector<64x64xbf16>
    %c0_32 = arith.constant 0 : index
    %c0_33 = arith.constant 0 : index
    %c0_34 = arith.constant 0 : index
    %112 = vector.load %arg6[%c0_32, %c0_33, %c0_34] : memref<1x64x64xbf16, #tpu.memory_space<vmem>>, vector<1x64x64xbf16>
    %113 = vector.shape_cast %112 : vector<1x64x64xbf16> to vector<64x64xbf16>
    %114 = vector.shape_cast %111 : vector<64x64xbf16> to vector<1x64x64xbf16>
    tpu.vector_store %arg6[%c0_32, %c0_33, %c0_34], %114 {strides = array<i32>} : memref<1x64x64xbf16, #tpu.memory_space<vmem>>, vector<1x64x64xbf16>,
    %cst_35 = arith.constant dense<0.000000e+00> : vector<64xf32>
    %115 = vector.multi_reduction <add>, %110, %cst_35 [0] : vector<64x64xf32> to vector<64xf32>
    %116 = vector.shape_cast %115 : vector<64xf32> to vector<1x64xf32>
    %117 = arith.mulf %110, %110 : vector<64x64xf32>
    %cst_36 = arith.constant dense<0.000000e+00> : vector<64xf32>
    %118 = vector.multi_reduction <add>, %117, %cst_36 [0] : vector<64x64xf32> to vector<64xf32>
    %119 = vector.shape_cast %118 : vector<64xf32> to vector<1x64xf32>
    %120 = tpu.concatenate %116, %119 in 0 : vector<1x64xf32>, vector<1x64xf32> -> vector<2x64xf32>
    %c0_37 = arith.constant 0 : index
    %c0_38 = arith.constant 0 : index
    %c0_39 = arith.constant 0 : index
    %121 = vector.load %arg7[%c0_37, %c0_38, %c0_39] : memref<1x2x64xf32, #tpu.memory_space<vmem>>, vector<1x2x64xf32>
    %122 = vector.shape_cast %121 : vector<1x2x64xf32> to vector<2x64xf32>
    %123 = vector.shape_cast %120 : vector<2x64xf32> to vector<1x2x64xf32>
    tpu.vector_store %arg7[%c0_37, %c0_38, %c0_39], %123 {strides = array<i32>} : memref<1x2x64xf32, #tpu.memory_space<vmem>>, vector<1x2x64xf32>,
    return
  }
  func.func @transform_0(%arg0: i32) -> (i32, i32, i32) {
    %c0_i32 = arith.constant 0 : i32
    %c0_i32_0 = arith.constant 0 : i32
    %c0_i32_1 = arith.constant 0 : i32
    return %arg0, %c0_i32, %c0_i32_0 : i32, i32, i32
  }
  func.func @transform_1(%arg0: i32) -> (i32, i32) {
    %c0_i32 = arith.constant 0 : i32
    %c0_i32_0 = arith.constant 0 : i32
    %c0_i32_1 = arith.constant 0 : i32
    return %c0_i32, %c0_i32_0 : i32, i32
  }
  func.func @transform_2(%arg0: i32) -> (i32, i32) {
    %c0_i32 = arith.constant 0 : i32
    %c0_i32_0 = arith.constant 0 : i32
    %c0_i32_1 = arith.constant 0 : i32
    return %c0_i32, %c0_i32_0 : i32, i32
  }
  func.func @transform_3(%arg0: i32) -> (i32, i32) {
    %c0_i32 = arith.constant 0 : i32
    %c0_i32_0 = arith.constant 0 : i32
    %c0_i32_1 = arith.constant 0 : i32
    return %c0_i32, %c0_i32_0 : i32, i32
  }
  func.func @transform_4(%arg0: i32) -> (i32, i32) {
    %c0_i32 = arith.constant 0 : i32
    %c0_i32_0 = arith.constant 0 : i32
    %c0_i32_1 = arith.constant 0 : i32
    return %c0_i32, %c0_i32_0 : i32, i32
  }
  func.func @transform_5(%arg0: i32) -> (i32, i32, i32) {
    %c0_i32 = arith.constant 0 : i32
    %c0_i32_0 = arith.constant 0 : i32
    %c0_i32_1 = arith.constant 0 : i32
    return %arg0, %c0_i32, %c0_i32_0 : i32, i32, i32
  }
  func.func @transform_6(%arg0: i32) -> (i32, i32, i32) {
    %c0_i32 = arith.constant 0 : i32
    %c0_i32_0 = arith.constant 0 : i32
    %c0_i32_1 = arith.constant 0 : i32
    return %arg0, %c0_i32, %c0_i32_0 : i32, i32, i32
  }
}

module attributes {stable_mosaic.version = 11 : i64} {
  func.func @kernel(%arg0: i32, %arg1: memref<1x64x64xbf16, #tpu.memory_space<vmem>>, %arg2: memref<64x384xbf16, #tpu.memory_space<vmem>>, %arg3: memref<1x128xf32, #tpu.memory_space<vmem>>, %arg4: memref<1x64xf32, #tpu.memory_space<vmem>>, %arg5: memref<1x64xf32, #tpu.memory_space<vmem>>, %arg6: memref<1x64x128xbf16, #tpu.memory_space<vmem>>, %arg7: memref<1x2x128xf32, #tpu.memory_space<vmem>>) attributes {dimension_semantics = [#tpu.dimension_semantics<parallel>], iteration_bounds = array<i64: 2>, scalar_prefetch = 0 : i64, scratch_operands = 0 : i64, tpu.core_type = #tpu.core_type<tc>, window_params = [{transform_indices = @transform_0, window_bounds = array<i64: 1, 64, 64>}, {pipeline_mode = #tpu.pipeline_mode<synchronous>, transform_indices = @transform_1, window_bounds = array<i64: 64, 384>}, {pipeline_mode = #tpu.pipeline_mode<synchronous>, transform_indices = @transform_2, window_bounds = array<i64: 1, 128>}, {pipeline_mode = #tpu.pipeline_mode<synchronous>, transform_indices = @transform_3, window_bounds = array<i64: 1, 64>}, {pipeline_mode = #tpu.pipeline_mode<synchronous>, transform_indices = @transform_4, window_bounds = array<i64: 1, 64>}, {transform_indices = @transform_5, window_bounds = array<i64: 1, 64, 128>}, {transform_indices = @transform_6, window_bounds = array<i64: 1, 2, 128>}]} {
    %c0 = arith.constant 0 : index
    %c0_0 = arith.constant 0 : index
    %c0_1 = arith.constant 0 : index
    %0 = vector.load %arg1[%c0, %c0_0, %c0_1] : memref<1x64x64xbf16, #tpu.memory_space<vmem>>, vector<1x64x64xbf16>
    %1 = vector.shape_cast %0 : vector<1x64x64xbf16> to vector<64x64xbf16>
    %2 = arith.extf %1 : vector<64x64xbf16> to vector<64x64xf32>
    %c0_2 = arith.constant 0 : index
    %c0_3 = arith.constant 0 : index
    %3 = vector.load %arg4[%c0_2, %c0_3] : memref<1x64xf32, #tpu.memory_space<vmem>>, vector<1x64xf32>
    %4 = vector.broadcast %3 : vector<1x64xf32> to vector<64x64xf32>
    %5 = arith.mulf %2, %4 : vector<64x64xf32>
    %c0_4 = arith.constant 0 : index
    %c0_5 = arith.constant 0 : index
    %6 = vector.load %arg5[%c0_4, %c0_5] : memref<1x64xf32, #tpu.memory_space<vmem>>, vector<1x64xf32>
    %7 = vector.broadcast %6 : vector<1x64xf32> to vector<64x64xf32>
    %8 = arith.addf %5, %7 : vector<64x64xf32>
    %cst = arith.constant 0.000000e+00 : f32
    %9 = vector.broadcast %cst : f32 to vector<64x64xf32>
    %10 = arith.maximumf %8, %9 : vector<64x64xf32>
    %11 = arith.truncf %10 : vector<64x64xf32> to vector<64x64xbf16>
    %c0_6 = arith.constant 0 : index
    %c0_7 = arith.constant 0 : index
    %12 = vector.load %arg2[%c0_6, %c0_7] : memref<64x384xbf16, #tpu.memory_space<vmem>>, vector<64x384xbf16>
    %cst_8 = arith.constant dense<0.000000e+00> : vector<64x384xf32>
    %13 = tpu.matmul %11, %12, %cst_8 {dimension_numbers = #tpu.dot_dimension_numbers<[1], [0], [0], [1], [0, 0, 1, 1], [], []>} : vector<64x64xbf16>, vector<64x384xbf16>, vector<64x384xf32> -> vector<64x384xf32>
    %14 = tpu.iota {dimensions = array<i32: 0>} : vector<64x1xi32>
    %c16_i32 = arith.constant 16 : i32
    %c0_i32 = arith.constant 0 : i32
    %15 = arith.cmpi eq, %c16_i32, %c0_i32 : i32
    %c1_i32 = arith.constant 1 : i32
    %16 = arith.select %15, %c1_i32, %c16_i32 : i32
    %17 = vector.broadcast %16 : i32 to vector<64x1xi32>
    %18 = arith.remsi %14, %17 : vector<64x1xi32>
    %c0_i32_9 = arith.constant 0 : i32
    %19 = vector.broadcast %c0_i32_9 : i32 to vector<64x1xi32>
    %20 = arith.cmpi ne, %18, %19 : vector<64x1xi32>
    %c0_i32_10 = arith.constant 0 : i32
    %21 = vector.broadcast %c0_i32_10 : i32 to vector<64x1xi32>
    %22 = arith.cmpi slt, %18, %21 : vector<64x1xi32>
    %c0_i32_11 = arith.constant 0 : i32
    %23 = arith.cmpi slt, %16, %c0_i32_11 : i32
    %24 = vector.broadcast %23 : i1 to vector<64x1xi1>
    %25 = vector.broadcast %24 : vector<64x1xi1> to vector<64x1xi1>
    %26 = arith.xori %22, %25 : vector<64x1xi1>
    %27 = arith.andi %26, %20 : vector<64x1xi1>
    %28 = vector.broadcast %16 : i32 to vector<64x1xi32>
    %29 = arith.addi %18, %28 : vector<64x1xi32>
    %30 = arith.select %27, %29, %18 : vector<64x1xi1>, vector<64x1xi32>
    %31 = vector.extract_strided_slice %13 {offsets = [0, 0], sizes = [64, 128], strides = [1, 1]} : vector<64x384xf32> to vector<64x128xf32>
    %cst_12 = arith.constant 0.000000e+00 : f32
    %32 = vector.broadcast %cst_12 : f32 to vector<5x128xf32>
    %33 = vector.extract_strided_slice %31 {offsets = [0, 0], sizes = [59, 128], strides = [1, 1]} : vector<64x128xf32> to vector<59x128xf32>
    %34 = tpu.concatenate %32, %33 in 0 : vector<5x128xf32>, vector<59x128xf32> -> vector<64x128xf32>
    %c5_i32 = arith.constant 5 : i32
    %35 = vector.broadcast %c5_i32 : i32 to vector<64x1xi32>
    %36 = arith.cmpi sge, %30, %35 : vector<64x1xi32>
    %cst_13 = arith.constant 0.000000e+00 : f32
    %37 = vector.shape_cast %36 : vector<64x1xi1> to vector<64x1xi1>
    %38 = vector.broadcast %37 : vector<64x1xi1> to vector<64x128xi1>
    %39 = vector.broadcast %cst_13 : f32 to vector<64x128xf32>
    %40 = arith.select %38, %34, %39 : vector<64x128xi1>, vector<64x128xf32>
    %41 = vector.extract_strided_slice %13 {offsets = [0, 128], sizes = [64, 128], strides = [1, 1]} : vector<64x384xf32> to vector<64x128xf32>
    %42 = arith.addf %40, %41 : vector<64x128xf32>
    %43 = vector.extract_strided_slice %13 {offsets = [0, 256], sizes = [64, 128], strides = [1, 1]} : vector<64x384xf32> to vector<64x128xf32>
    %cst_14 = arith.constant 0.000000e+00 : f32
    %44 = vector.broadcast %cst_14 : f32 to vector<5x128xf32>
    %45 = vector.extract_strided_slice %43 {offsets = [5, 0], sizes = [59, 128], strides = [1, 1]} : vector<64x128xf32> to vector<59x128xf32>
    %46 = tpu.concatenate %45, %44 in 0 : vector<59x128xf32>, vector<5x128xf32> -> vector<64x128xf32>
    %c11_i32 = arith.constant 11 : i32
    %47 = vector.broadcast %c11_i32 : i32 to vector<64x1xi32>
    %48 = arith.cmpi slt, %30, %47 : vector<64x1xi32>
    %cst_15 = arith.constant 0.000000e+00 : f32
    %49 = vector.shape_cast %48 : vector<64x1xi1> to vector<64x1xi1>
    %50 = vector.broadcast %49 : vector<64x1xi1> to vector<64x128xi1>
    %51 = vector.broadcast %cst_15 : f32 to vector<64x128xf32>
    %52 = arith.select %50, %46, %51 : vector<64x128xi1>, vector<64x128xf32>
    %53 = arith.addf %42, %52 : vector<64x128xf32>
    %c0_16 = arith.constant 0 : index
    %c0_17 = arith.constant 0 : index
    %54 = vector.load %arg3[%c0_16, %c0_17] : memref<1x128xf32, #tpu.memory_space<vmem>>, vector<1x128xf32>
    %55 = vector.broadcast %54 : vector<1x128xf32> to vector<64x128xf32>
    %56 = arith.addf %53, %55 : vector<64x128xf32>
    %57 = arith.truncf %56 : vector<64x128xf32> to vector<64x128xbf16>
    %c0_18 = arith.constant 0 : index
    %c0_19 = arith.constant 0 : index
    %c0_20 = arith.constant 0 : index
    %58 = vector.load %arg6[%c0_18, %c0_19, %c0_20] : memref<1x64x128xbf16, #tpu.memory_space<vmem>>, vector<1x64x128xbf16>
    %59 = vector.shape_cast %58 : vector<1x64x128xbf16> to vector<64x128xbf16>
    %60 = vector.shape_cast %57 : vector<64x128xbf16> to vector<1x64x128xbf16>
    tpu.vector_store %arg6[%c0_18, %c0_19, %c0_20], %60 {strides = array<i32>} : memref<1x64x128xbf16, #tpu.memory_space<vmem>>, vector<1x64x128xbf16>,
    %cst_21 = arith.constant dense<0.000000e+00> : vector<128xf32>
    %61 = vector.multi_reduction <add>, %56, %cst_21 [0] : vector<64x128xf32> to vector<128xf32>
    %62 = vector.shape_cast %61 : vector<128xf32> to vector<1x128xf32>
    %63 = arith.mulf %56, %56 : vector<64x128xf32>
    %cst_22 = arith.constant dense<0.000000e+00> : vector<128xf32>
    %64 = vector.multi_reduction <add>, %63, %cst_22 [0] : vector<64x128xf32> to vector<128xf32>
    %65 = vector.shape_cast %64 : vector<128xf32> to vector<1x128xf32>
    %66 = tpu.concatenate %62, %65 in 0 : vector<1x128xf32>, vector<1x128xf32> -> vector<2x128xf32>
    %c0_23 = arith.constant 0 : index
    %c0_24 = arith.constant 0 : index
    %c0_25 = arith.constant 0 : index
    %67 = vector.load %arg7[%c0_23, %c0_24, %c0_25] : memref<1x2x128xf32, #tpu.memory_space<vmem>>, vector<1x2x128xf32>
    %68 = vector.shape_cast %67 : vector<1x2x128xf32> to vector<2x128xf32>
    %69 = vector.shape_cast %66 : vector<2x128xf32> to vector<1x2x128xf32>
    tpu.vector_store %arg7[%c0_23, %c0_24, %c0_25], %69 {strides = array<i32>} : memref<1x2x128xf32, #tpu.memory_space<vmem>>, vector<1x2x128xf32>,
    return
  }
  func.func @transform_0(%arg0: i32) -> (i32, i32, i32) {
    %c0_i32 = arith.constant 0 : i32
    %c0_i32_0 = arith.constant 0 : i32
    %c0_i32_1 = arith.constant 0 : i32
    return %arg0, %c0_i32, %c0_i32_0 : i32, i32, i32
  }
  func.func @transform_1(%arg0: i32) -> (i32, i32) {
    %c0_i32 = arith.constant 0 : i32
    %c0_i32_0 = arith.constant 0 : i32
    %c0_i32_1 = arith.constant 0 : i32
    return %c0_i32, %c0_i32_0 : i32, i32
  }
  func.func @transform_2(%arg0: i32) -> (i32, i32) {
    %c0_i32 = arith.constant 0 : i32
    %c0_i32_0 = arith.constant 0 : i32
    %c0_i32_1 = arith.constant 0 : i32
    return %c0_i32, %c0_i32_0 : i32, i32
  }
  func.func @transform_3(%arg0: i32) -> (i32, i32) {
    %c0_i32 = arith.constant 0 : i32
    %c0_i32_0 = arith.constant 0 : i32
    %c0_i32_1 = arith.constant 0 : i32
    return %c0_i32, %c0_i32_0 : i32, i32
  }
  func.func @transform_4(%arg0: i32) -> (i32, i32) {
    %c0_i32 = arith.constant 0 : i32
    %c0_i32_0 = arith.constant 0 : i32
    %c0_i32_1 = arith.constant 0 : i32
    return %c0_i32, %c0_i32_0 : i32, i32
  }
  func.func @transform_5(%arg0: i32) -> (i32, i32, i32) {
    %c0_i32 = arith.constant 0 : i32
    %c0_i32_0 = arith.constant 0 : i32
    %c0_i32_1 = arith.constant 0 : i32
    return %arg0, %c0_i32, %c0_i32_0 : i32, i32, i32
  }
  func.func @transform_6(%arg0: i32) -> (i32, i32, i32) {
    %c0_i32 = arith.constant 0 : i32
    %c0_i32_0 = arith.constant 0 : i32
    %c0_i32_1 = arith.constant 0 : i32
    return %arg0, %c0_i32, %c0_i32_0 : i32, i32, i32
  }
}

module attributes {stable_mosaic.version = 11 : i64} {
  func.func @kernel(%arg0: i32, %arg1: memref<1x64x128xbf16, #tpu.memory_space<vmem>>, %arg2: memref<1x128xf32, #tpu.memory_space<vmem>>, %arg3: memref<1x128xf32, #tpu.memory_space<vmem>>, %arg4: memref<1x16x128xf32, #tpu.memory_space<vmem>>) attributes {dimension_semantics = [#tpu.dimension_semantics<parallel>], iteration_bounds = array<i64: 2>, scalar_prefetch = 0 : i64, scratch_operands = 0 : i64, tpu.core_type = #tpu.core_type<tc>, window_params = [{transform_indices = @transform_0, window_bounds = array<i64: 1, 64, 128>}, {pipeline_mode = #tpu.pipeline_mode<synchronous>, transform_indices = @transform_1, window_bounds = array<i64: 1, 128>}, {pipeline_mode = #tpu.pipeline_mode<synchronous>, transform_indices = @transform_2, window_bounds = array<i64: 1, 128>}, {transform_indices = @transform_3, window_bounds = array<i64: 1, 16, 128>}]} {
    %c0 = arith.constant 0 : index
    %c0_0 = arith.constant 0 : index
    %0 = vector.load %arg2[%c0, %c0_0] : memref<1x128xf32, #tpu.memory_space<vmem>>, vector<1x128xf32>
    %c0_1 = arith.constant 0 : index
    %c0_2 = arith.constant 0 : index
    %1 = vector.load %arg3[%c0_1, %c0_2] : memref<1x128xf32, #tpu.memory_space<vmem>>, vector<1x128xf32>
    %c0_3 = arith.constant 0 : index
    %c0_4 = arith.constant 0 : index
    %c0_5 = arith.constant 0 : index
    %2 = vector.load %arg1[%c0_3, %c0_4, %c0_5] : memref<1x64x128xbf16, #tpu.memory_space<vmem>>, vector<1x16x128xbf16>
    %3 = vector.shape_cast %2 : vector<1x16x128xbf16> to vector<16x128xbf16>
    %4 = arith.extf %3 : vector<16x128xbf16> to vector<16x128xf32>
    %5 = vector.broadcast %0 : vector<1x128xf32> to vector<16x128xf32>
    %6 = arith.mulf %4, %5 : vector<16x128xf32>
    %7 = vector.broadcast %1 : vector<1x128xf32> to vector<16x128xf32>
    %8 = arith.addf %6, %7 : vector<16x128xf32>
    %cst = arith.constant 0.000000e+00 : f32
    %9 = vector.broadcast %cst : f32 to vector<16x128xf32>
    %10 = arith.maximumf %8, %9 : vector<16x128xf32>
    %c0_6 = arith.constant 0 : index
    %c16 = arith.constant 16 : index
    %c0_7 = arith.constant 0 : index
    %11 = vector.load %arg1[%c0_6, %c16, %c0_7] : memref<1x64x128xbf16, #tpu.memory_space<vmem>>, vector<1x16x128xbf16>
    %12 = vector.shape_cast %11 : vector<1x16x128xbf16> to vector<16x128xbf16>
    %13 = arith.extf %12 : vector<16x128xbf16> to vector<16x128xf32>
    %14 = vector.broadcast %0 : vector<1x128xf32> to vector<16x128xf32>
    %15 = arith.mulf %13, %14 : vector<16x128xf32>
    %16 = vector.broadcast %1 : vector<1x128xf32> to vector<16x128xf32>
    %17 = arith.addf %15, %16 : vector<16x128xf32>
    %cst_8 = arith.constant 0.000000e+00 : f32
    %18 = vector.broadcast %cst_8 : f32 to vector<16x128xf32>
    %19 = arith.maximumf %17, %18 : vector<16x128xf32>
    %20 = arith.maximumf %10, %19 : vector<16x128xf32>
    %c0_9 = arith.constant 0 : index
    %c32 = arith.constant 32 : index
    %c0_10 = arith.constant 0 : index
    %21 = vector.load %arg1[%c0_9, %c32, %c0_10] : memref<1x64x128xbf16, #tpu.memory_space<vmem>>, vector<1x16x128xbf16>
    %22 = vector.shape_cast %21 : vector<1x16x128xbf16> to vector<16x128xbf16>
    %23 = arith.extf %22 : vector<16x128xbf16> to vector<16x128xf32>
    %24 = vector.broadcast %0 : vector<1x128xf32> to vector<16x128xf32>
    %25 = arith.mulf %23, %24 : vector<16x128xf32>
    %26 = vector.broadcast %1 : vector<1x128xf32> to vector<16x128xf32>
    %27 = arith.addf %25, %26 : vector<16x128xf32>
    %cst_11 = arith.constant 0.000000e+00 : f32
    %28 = vector.broadcast %cst_11 : f32 to vector<16x128xf32>
    %29 = arith.maximumf %27, %28 : vector<16x128xf32>
    %30 = arith.maximumf %20, %29 : vector<16x128xf32>
    %c0_12 = arith.constant 0 : index
    %c48 = arith.constant 48 : index
    %c0_13 = arith.constant 0 : index
    %31 = vector.load %arg1[%c0_12, %c48, %c0_13] : memref<1x64x128xbf16, #tpu.memory_space<vmem>>, vector<1x16x128xbf16>
    %32 = vector.shape_cast %31 : vector<1x16x128xbf16> to vector<16x128xbf16>
    %33 = arith.extf %32 : vector<16x128xbf16> to vector<16x128xf32>
    %34 = vector.broadcast %0 : vector<1x128xf32> to vector<16x128xf32>
    %35 = arith.mulf %33, %34 : vector<16x128xf32>
    %36 = vector.broadcast %1 : vector<1x128xf32> to vector<16x128xf32>
    %37 = arith.addf %35, %36 : vector<16x128xf32>
    %cst_14 = arith.constant 0.000000e+00 : f32
    %38 = vector.broadcast %cst_14 : f32 to vector<16x128xf32>
    %39 = arith.maximumf %37, %38 : vector<16x128xf32>
    %40 = arith.maximumf %30, %39 : vector<16x128xf32>
    %c0_15 = arith.constant 0 : index
    %c0_16 = arith.constant 0 : index
    %c0_17 = arith.constant 0 : index
    %41 = vector.load %arg4[%c0_15, %c0_16, %c0_17] : memref<1x16x128xf32, #tpu.memory_space<vmem>>, vector<1x16x128xf32>
    %42 = vector.shape_cast %41 : vector<1x16x128xf32> to vector<16x128xf32>
    %43 = vector.shape_cast %40 : vector<16x128xf32> to vector<1x16x128xf32>
    tpu.vector_store %arg4[%c0_15, %c0_16, %c0_17], %43 {strides = array<i32>} : memref<1x16x128xf32, #tpu.memory_space<vmem>>, vector<1x16x128xf32>,
    return
  }
  func.func @transform_0(%arg0: i32) -> (i32, i32, i32) {
    %c0_i32 = arith.constant 0 : i32
    %c0_i32_0 = arith.constant 0 : i32
    %c0_i32_1 = arith.constant 0 : i32
    return %arg0, %c0_i32, %c0_i32_0 : i32, i32, i32
  }
  func.func @transform_1(%arg0: i32) -> (i32, i32) {
    %c0_i32 = arith.constant 0 : i32
    %c0_i32_0 = arith.constant 0 : i32
    %c0_i32_1 = arith.constant 0 : i32
    return %c0_i32, %c0_i32_0 : i32, i32
  }
  func.func @transform_2(%arg0: i32) -> (i32, i32) {
    %c0_i32 = arith.constant 0 : i32
    %c0_i32_0 = arith.constant 0 : i32
    %c0_i32_1 = arith.constant 0 : i32
    return %c0_i32, %c0_i32_0 : i32, i32
  }
  func.func @transform_3(%arg0: i32) -> (i32, i32, i32) {
    %c0_i32 = arith.constant 0 : i32
    %c0_i32_0 = arith.constant 0 : i32
    %c0_i32_1 = arith.constant 0 : i32
    return %arg0, %c0_i32, %c0_i32_0 : i32, i32, i32
  }
}

</mosaic_0001>

<bundles_post_ra>
// kernel: edge_conv_forward.9
= control target key start
LH: loop header
LB: loop body
LE: loop exit
PB: predicated region body
PF: predicated region fallthrough
CT: control target
= control target key end

     0   :  { %s473_s9 = smov 0   ;;  %s526_s0 = inlined_call_operand.vmem [shape: bf16[2,16,128], index: 0, kind: input, shape index: {}]   ;;  %s527_s1 = inlined_call_operand.vmem [shape: bf16[2,128,16], index: 1, kind: input, shape index: {}]   ;;  %s528_s2 = inlined_call_operand.vmem [shape: f32[2,16,16], index: 2, kind: output, shape index: {}]  }
   0x1 LB: > { %s373_s10 = sadd.s32 4294967295, %s454_s9   ;;  %p377_p0 = scmp.ge.s32.totalorder %s454_s9, 1  ;;  %s454_s9 = sphi %s473_s9, %s12_s9  }
   0x2   : > { %p122_p1 = scmp.lt.s32.totalorder %s454_s9, 3 }
   0x4   : > { %p123_p2 = pnand %p377_p0, %p122_p1 }
   0x5   : > { %p149_p3 = scmp.lt.s32.totalorder (!%p123_p2), %s373_s10, 1  ;;  %v456_v0 = vmov (!%p123_p2), 0.0   ;;  %vm457_vm0 = vmmov (!%p123_p2), 0   ;;  %vm262_vm1 = vcmask (!%p123_p2), 130048  }
   0x6   : > { %126 = sbr.rel (%p123_p2) target bundleno = 243 (0xf3), region = 28  ;;  %431 = vmatprep.subr.bf16.mxu0 (!%p123_p2), %v456_v0  ;;  %433 = vmatprep.mubr.msk.bf16.mxu0 (!%p123_p2), %vm457_vm0, %v456_v0 }
   0xd   : > { %s530_s10 = smov (!%p149_p3, %s373_s10), 1 }
   0xe   : > { %s387_s11 = sshll.u32 %s530_s10, 3  ;;  %s388_s15 = sshll.u32 %s530_s10, 6 }
   0xf   : > { %s153_s14 = scalar_lea.vmem %s526_s0, %s387_s11  ;;  %s491_s18 = scalar_lea.vmem %s527_s1, %s388_s15 }
  0x10   : > { %v447_v1 = vld [vmem:[%s153_s14] sm:$0xff]   ;;  %v422_v5 = vld [vmem:[%s491_s18 + $0x8] sm:$0xff]   ;;  %v423_v13 = vld [vmem:[%s491_s18 + $0x10] sm:$0xff]   ;;  %s389_s19 = sshll.u32 %s530_s10, 4 }
  0x11   : > { %432 = vmatpush3.bf16.xpose.msra.mxu0 %v447_v1  ;;  %v391_v2 = vld [vmem:[%s491_s18] sm:$0xff]   ;;  %v396_v6 = vunpack.c.l.bf16 %v422_v5  ;;  %v397_v9 = vunpack.c.h.bf16 %v422_v5  ;;  %v400_v15 = vunpack.c.l.bf16 %v423_v13  ;;  %v401_v19 = vunpack.c.h.bf16 %v423_v13  ;;  %v424_v22 = vld [vmem:[%s491_s18 + $0x18] sm:$0xff]   ;;  %v426_v40 = vld [vmem:[%s491_s18 + $0x28] sm:$0xff]   ;;  %s163_s22 = scalar_lea.vmem %s528_s2, %s389_s19 }
  0x12   : > { %v392_v3 = vunpack.c.l.bf16 %v391_v2  ;;  %v393_v4 = vunpack.c.h.bf16 %v391_v2  ;;  %v404_v24 = vunpack.c.l.bf16 %v424_v22  ;;  %v405_v29 = vunpack.c.h.bf16 %v424_v22  ;;  %v425_v31 = vld [vmem:[%s491_s18 + $0x20] sm:$0xff]   ;;  %v427_v49 = vld [vmem:[%s491_s18 + $0x30] sm:$0xff]   ;;  %v428_v58 = vld [vmem:[%s491_s18 + $0x38] sm:$0xff]  }
  0x13   : > { %v248_v10 = vmul.f32 %v396_v6, %v396_v6  ;;  %v249_v16 = vmul.f32 %v397_v9, %v397_v9  ;;  %v250_v20 = vmul.f32 %v400_v15, %v400_v15  ;;  %v251_v25 = vmul.f32 %v401_v19, %v401_v19 }
  0x14   : > { %v246_v7 = vmul.f32 %v392_v3, %v392_v3  ;;  %v247_v8 = vmul.f32 %v393_v4, %v393_v4  ;;  %v252_v28 = vmul.f32 %v404_v24, %v404_v24  ;;  %v408_v33 = vunpack.c.l.bf16 %v425_v31 }
  0x15   : > { %v266_v17 = vsel %vm262_vm1, %v248_v10, 0.0  ;;  %v268_v21 = vsel %vm262_vm1, %v249_v16, 0.0  ;;  %v270_v26 = vsel %vm262_vm1, %v250_v20, 0.0  ;;  %v272_v30 = vsel %vm262_vm1, %v251_v25, 0.0 }
  0x16   : > { %v263_v11 = vsel %vm262_vm1, %v246_v7, 0.0  ;;  %v264_v12 = vsel %vm262_vm1, %v247_v8, 0.0  ;;  %v253_v34 = vmul.f32 %v405_v29, %v405_v29  ;;  %v274_v35 = vsel %vm262_vm1, %v252_v28, 0.0 }
  0x17   : > { %v265_v14 = vadd.f32 %v264_v12, %v263_v11  ;;  %v409_v37 = vunpack.c.h.bf16 %v425_v31  ;;  %v254_v38 = vmul.f32 %v408_v33, %v408_v33  ;;  %v412_v42 = vunpack.c.l.bf16 %v426_v40 }
  0x18   : > { %434 = vmatmul.mubr.bf16.vlgmr.msra.gmra.mrb[0].mxu0 %v447_v1  ;;  %v276_v39 = vsel %vm262_vm1, %v253_v34, 0.0  ;;  %v413_v46 = vunpack.c.h.bf16 %v426_v40  ;;  %v416_v51 = vunpack.c.l.bf16 %v427_v49  ;;  %v417_v55 = vunpack.c.h.bf16 %v427_v49 }
  0x19   : > { %v267_v18 = vadd.f32 %v266_v17, %v265_v14  ;;  %v255_v43 = vmul.f32 %v409_v37, %v409_v37  ;;  %v278_v44 = vsel %vm262_vm1, %v254_v38, 0.0  ;;  %v256_v47 = vmul.f32 %v412_v42, %v412_v42 }
  0x1a   : > { %v257_v52 = vmul.f32 %v413_v46, %v413_v46  ;;  %v258_v56 = vmul.f32 %v416_v51, %v416_v51  ;;  %v420_v60 = vunpack.c.l.bf16 %v428_v58  ;;  %v259_v61 = vmul.f32 %v417_v55, %v417_v55 }
  0x1b   : > { %v269_v23 = vadd.f32 %v268_v21, %v267_v18  ;;  %v280_v48 = vsel %vm262_vm1, %v255_v43, 0.0  ;;  %v282_v53 = vsel %vm262_vm1, %v256_v47, 0.0  ;;  %v421_v0 = vunpack.c.h.bf16 %v428_v58 }
  0x1c   : > { %v284_v57 = vsel %vm262_vm1, %v257_v52, 0.0  ;;  %v286_v62 = vsel %vm262_vm1, %v258_v56, 0.0  ;;  %v260_v1 = vmul.f32 %v420_v60, %v420_v60  ;;  %v288_v2 = vsel %vm262_vm1, %v259_v61, 0.0 }
  0x1d   : > { %v271_v27 = vadd.f32 %v270_v26, %v269_v23  ;;  %v261_v4 = vmul.f32 %v421_v0, %v421_v0 }
  0x1e   : > { %v290_v5 = vsel %vm262_vm1, %v260_v1, 0.0 }
  0x1f   : > { %v273_v32 = vadd.f32 %v272_v30, %v271_v27  ;;  %v292_v7 = vsel %vm262_vm1, %v261_v4, 0.0 }
  0x21   : > { %v275_v36 = vadd.f32 %v274_v35, %v273_v32 }
  0x23   : > { %v277_v41 = vadd.f32 %v276_v39, %v275_v36 }
  0x25   : > { %v279_v45 = vadd.f32 %v278_v44, %v277_v41 }
  0x27   : > { %v281_v50 = vadd.f32 %v280_v48, %v279_v45 }
  0x29   : > { %v283_v54 = vadd.f32 %v282_v53, %v281_v50 }
  0x2b   : > { %v285_v59 = vadd.f32 %v284_v57, %v283_v54 }
  0x2d   : > { %v287_v63 = vadd.f32 %v286_v62, %v285_v59 }
  0x2f   : > { %v289_v3 = vadd.f32 %v288_v2, %v287_v63 }
  0x31   : > { %v291_v6 = vadd.f32 %v290_v5, %v289_v3 }
  0x33   : > { %v293_v8 = vadd.f32 %v292_v7, %v291_v6 }
  0x35   : > { %v294_v9 = vrot.slane %v293_v8, 4 }
  0x37   : > { %v295_v10 = vadd.f32 %v294_v9, %v293_v8 }
  0x39   : > { %v296_v11 = vrot.slane %v295_v10, 2 }
  0x3b   : > { %v297_v12 = vadd.f32 %v296_v11, %v295_v10 }
  0x3d   : > { %v298_v13 = vrot.slane %v297_v12, 1 }
  0x3f   : > { %v299_v14 = vadd.f32 %v298_v13, %v297_v12 }
  0xeb   : > { %v207_v15 = vpop.f32.mrb[0].mxu0 }
  0xec   : > { %v300_v16 = vmul.f32 2.0, %v207_v15  ;;  %v435_v17 = vpop.f32.mrb[1].mxu0 }
  0xed   : > { %v210_v18 = vpop.f32.mrb[2].mxu0 }
  0xee   : > { %v302_v19 = vsub.f32 %v300_v16, %v299_v14  ;;  %v301_v20 = vmul.f32 2.0, %v210_v18  ;;  %v436_v21 = vpop.f32.mrb[3].mxu0 }
  0xf0   : > { %304 = vst.msk [vmem:[%s163_s22] sm:$0xff] %vm262_vm1, %v302_v19  ;;  %v303_v22 = vsub.f32 %v301_v20, %v299_v14 }
  0xf2   : > { %305 = vst.msk [vmem:[%s163_s22 + $0x8] sm:$0xff] %vm262_vm1, %v303_v22 }
  0xf3 PF: > { %s12_s9 = sadd.s32 1, %s454_s9  }
  0xf4   : > { %p9_p4 = scmp.ge.s32.totalorder %s12_s9, 4  }
  0xf6   :  { %11 = sbr.rel (!%p9_p4) target bundleno = 1 (0x1), region = 61 }

// kernel: edge_conv_forward.10
= control target key start
LH: loop header
LB: loop body
LE: loop exit
PB: predicated region body
PF: predicated region fallthrough
CT: control target
= control target key end

     0   :  { %s969_s21 = smov 0   ;;  %s1131_s0 = inlined_call_operand.vmem [shape: bf16[2,4,16,128], index: 0, kind: input, shape index: {}]   ;;  %s1132_s1 = inlined_call_operand.vmem [shape: f32[2,16,128], index: 1, kind: input, shape index: {}]   ;;  %s1133_s2 = inlined_call_operand.vmem [shape: bf16[128,64], index: 2, kind: input, shape index: {}]   ;;  %s1134_s3 = inlined_call_operand.vmem [shape: f32[1,64], index: 3, kind: input, shape index: {}]   ;;  %s1135_s4 = inlined_call_operand.vmem [shape: bf16[64,128], index: 4, kind: input, shape index: {}]   ;;  %s1136_s5 = inlined_call_operand.vmem [shape: f32[1,128], index: 5, kind: input, shape index: {}]   ;;  %s1137_s6 = inlined_call_operand.vmem [shape: bf16[2,64,256], index: 6, kind: output, shape index: {}]  }
   0x1 LB: > { %s753_s22 = sadd.s32 4294967295, %s932_s21   ;;  %p757_p0 = scmp.ge.s32.totalorder %s932_s21, 1  ;;  %s932_s21 = sphi %s969_s21, %s16_s21  }
   0x2   : > { %p222_p1 = scmp.lt.s32.totalorder %s932_s21, 3 }
   0x4   : > { %p223_p2 = pnand %p757_p0, %p222_p1 }
   0x5   : > { %v894_v0 = vld [vmem:[%s1133_s2] sm:$0xff] (!%p223_p2)   ;;  %p257_p3 = scmp.lt.s32.totalorder (!%p223_p2), %s753_s22, 1  ;;  %v895_v1 = vld [vmem:[%s1133_s2 + $0x8] sm:$0xff] (!%p223_p2)   ;;  %v896_v2 = vld [vmem:[%s1133_s2 + $0x10] sm:$0xff] (!%p223_p2)   ;;  %vm490_vm0 = vcmask (!%p223_p2), 523264  }
   0x6   : > { %226 = sbr.rel (%p223_p2) target bundleno = 535 (0x217), region = 44  ;;  %846 = vmatprep.subr.bf16.mxu0 (!%p223_p2), %v894_v0  ;;  %v897_v3 = vld [vmem:[%s1133_s2 + $0x18] sm:$0xff] (!%p223_p2)   ;;  %v898_v11 = vld [vmem:[%s1133_s2 + $0x20] sm:$0xff] (!%p223_p2)   ;;  %v903_v15 = vld [vmem:[%s1135_s4 + $0x8] sm:$0xff] (!%p223_p2)  }
   0x7   : > { %847 = vmatpush3.bf16.msra.mxu0 (!%p223_p2), %v894_v0  ;;  %v902_v12 = vld [vmem:[%s1135_s4] sm:$0xff] (!%p223_p2)   ;;  %v899_v17 = vld [vmem:[%s1133_s2 + $0x28] sm:$0xff] (!%p223_p2)   ;;  %v900_v19 = vld [vmem:[%s1133_s2 + $0x30] sm:$0xff] (!%p223_p2)  }
   0x8   : > { %848 = vmatprep.subr.bf16.mxu0 (!%p223_p2), %v895_v1  ;;  %870 = vmatprep.subr.bf16.mxu1 (!%p223_p2), %v902_v12  ;;  %v901_v25 = vld [vmem:[%s1133_s2 + $0x38] sm:$0xff] (!%p223_p2)   ;;  %v904_v38 = vld [vmem:[%s1135_s4 + $0x10] sm:$0xff] (!%p223_p2)   ;;  %v764_v40 = vld [vmem:[%s1134_s3] ss:$0 sm:$0xff] (!%p223_p2) }
   0x9   : > { %871 = vmatpush3.bf16.msra.mxu1 (!%p223_p2), %v902_v12  ;;  %v905_v39 = vld [vmem:[%s1135_s4 + $0x18] sm:$0xff] (!%p223_p2)  }
   0xa   : > { %872 = vmatprep.subr.bf16.mxu1 (!%p223_p2), %v903_v15 }
   0xb   : > { %849 = vmatpush3.bf16.msra.mxu0 (!%p223_p2), %v895_v1 }
   0xc   : > { %850 = vmatprep.subr.bf16.mxu0 (!%p223_p2), %v896_v2 }
   0xd   : > { %s1139_s22 = smov (!%p257_p3, %s753_s22), 1  ;;  %873 = vmatpush3.bf16.msra.mxu1 %v903_v15 }
   0xe   : > { %s794_s29 = sshll.u32 %s1139_s22, 5  ;;  %s795_s9 = sshll.u32 %s1139_s22, 4  ;;  %874 = vmatprep.subr.bf16.mxu1 %v904_v38 }
   0xf   : > { %s989_s8 = scalar_lea.vmem %s1131_s0, %s794_s29  ;;  %s266_s12 = scalar_lea.vmem %s1132_s1, %s795_s9  ;;  %851 = vmatpush3.bf16.msra.mxu0 %v896_v2 }
  0x10   : > { %s796_s15 = sshll.u32 %s1139_s22, 6  ;;  %v998_v4 = vld [vmem:[%s989_s8] sm:$0xff]   ;;  %v1002_v6 = vld [vmem:[%s266_s12 + $0x8] sm:$0xff]  ;;  %852 = vmatprep.subr.bf16.mxu0 %v897_v3  ;;  %v1048_v20 = vld [vmem:[%s989_s8 + $0x10] sm:$0xff]  }
  0x11   : > { %v1000_v5 = vld [vmem:[%s266_s12] sm:$0xff]  ;;  %v809_v7 = vunpack.c.l.bf16 %v998_v4  ;;  %v810_v8 = vunpack.c.h.bf16 %v998_v4  ;;  %v806_v10 = vpack.c.bf16 %v1002_v6, %v1002_v6  ;;  %s1016_s20 = scalar_lea.vmem %s1137_s6, %s796_s15  ;;  %v1042_v18 = vld [vmem:[%s989_s8 + $0x8] sm:$0xff]   ;;  %v817_v23 = vunpack.c.l.bf16 %v1048_v20  ;;  %v1070_v30 = vld [vmem:[%s989_s8 + $0x18] sm:$0xff]   ;;  %875 = vmatpush3.bf16.msra.mxu1 %v904_v38 }
  0x12   : > { %v805_v9 = vpack.c.bf16 %v1000_v5, %v1000_v5  ;;  %v813_v21 = vunpack.c.l.bf16 %v1042_v18  ;;  %v814_v22 = vunpack.c.h.bf16 %v1042_v18  ;;  %v818_v24 = vunpack.c.h.bf16 %v1048_v20  ;;  %876 = vmatprep.subr.bf16.mxu1 %v905_v39 }
  0x13   : > { %v291_v13 = vsub.f32 %v809_v7, %v1000_v5  ;;  %v292_v14 = vsub.f32 %v810_v8, %v1002_v6  ;;  %679 = vst [vmem:[%s1016_s20 + $0xc] sm:$0xf] %v806_v10  ;;  %681 = vst [vmem:[%s1016_s20 + $0x1c] sm:$0xf] %v806_v10  ;;  %853 = vmatpush3.bf16.msra.mxu0 %v897_v3  ;;  %v295_v28 = vsub.f32 %v817_v23, %v1000_v5 }
  0x14   : > { %678 = vst [vmem:[%s1016_s20 + $0x4] sm:$0xf] %v805_v9  ;;  %680 = vst [vmem:[%s1016_s20 + $0x14] sm:$0xf] %v805_v9  ;;  %854 = vmatprep.subr.bf16.mxu0 %v898_v11  ;;  %v293_v26 = vsub.f32 %v813_v21, %v1000_v5  ;;  %v294_v27 = vsub.f32 %v814_v22, %v1002_v6  ;;  %v296_v29 = vsub.f32 %v818_v24, %v1002_v6 }
  0x15   : > { %682 = vst [vmem:[%s1016_s20 + $0x24] sm:$0xf] %v805_v9  ;;  %683 = vst [vmem:[%s1016_s20 + $0x2c] sm:$0xf] %v806_v10  ;;  %v299_v16 = vpack.c.bf16 %v292_v14, %v291_v13  ;;  %v821_v32 = vunpack.c.l.bf16 %v1070_v30  ;;  %v822_v33 = vunpack.c.h.bf16 %v1070_v30  ;;  %877 = vmatpush3.bf16.msra.mxu1 %v905_v39  ;;  %v773_v14 = vld [vmem:[%s1136_s5] ss:$0 sm:$0xff] }
  0x16   : > { %684 = vst [vmem:[%s1016_s20 + $0x34] sm:$0xf] %v805_v9  ;;  %685 = vst [vmem:[%s1016_s20 + $0x3c] sm:$0xf] %v806_v10  ;;  %v300_v31 = vpack.c.bf16 %v294_v27, %v293_v26  ;;  %v301_v34 = vpack.c.bf16 %v296_v29, %v295_v28 }
  0x17   : > { %862 = vmatprep.mubr.bf16.mxu0 %v299_v16  ;;  %855 = vmatpush3.bf16.msra.mxu0 %v898_v11  ;;  %v297_v35 = vsub.f32 %v821_v32, %v1000_v5  ;;  %v298_v36 = vsub.f32 %v822_v33, %v1002_v6 }
  0x18   : > { %856 = vmatprep.subr.bf16.mxu0 %v899_v17 }
  0x19   : > { %v302_v37 = vpack.c.bf16 %v298_v36, %v297_v35 }
  0x1b   : > { %857 = vmatpush3.bf16.msra.mxu0 %v899_v17 }
  0x1c   : > { %858 = vmatprep.subr.bf16.mxu0 %v900_v19 }
  0x1f   : > { %859 = vmatpush3.bf16.msra.mxu0 %v900_v19 }
  0x20   : > { %860 = vmatprep.subr.bf16.mxu0 %v901_v25 }
  0x23   : > { %861 = vmatpush3.bf16.msra.mxu0 %v901_v25 }
  0x26   : > { %863 = vmatmul.mubr.bf16.vlgmr.msra.gmra.mrb[0].mxu0 %v300_v31 }
  0x27   : > { %866 = vmatprep.mubr.bf16.mxu0 %v301_v34 }
  0x2e   : > { %867 = vmatmul.mubr.bf16.gmra.mrb[4].mxu0 %v302_v37 }
  0xf9   : > { %v864_v41 = vpop.f32.mrb[0].mxu0 }
  0xfa   : > { %v417_v42 = vadd.f32 %v864_v41, %v764_v40  ;;  %v408_v43 = vpop.f32.mrb[1].mxu0 }
  0xfb   : > { %v409_v44 = vadd.f32 %v764_v40, %v408_v43  ;;  %v865_v45 = vpop.f32.mrb[2].mxu0 }
  0xfc   : > { %v420_v46 = vadd.f32 %v865_v45, %v764_v40  ;;  %v411_v47 = vpop.f32.mrb[3].mxu0  ;;  %v441_v49 = vmax.f32 %v417_v42, 0.0 }
  0xfd   : > { %v412_v48 = vadd.f32 %v764_v40, %v411_v47  ;;  %v439_v51 = vmax.f32 %v409_v44, 0.0 }
  0xfe   : > { %v442_v50 = vmax.f32 %v420_v46, 0.0 }
  0xff   : > { %v440_v52 = vmax.f32 %v412_v48, 0.0 }
 0x100   : > { %v448_v53 = vpack.c.bf16 %v442_v50, %v441_v49 }
 0x101   : > { %v868_v54 = vpop.f32.mrb[4].mxu0  ;;  %v447_v55 = vpack.c.bf16 %v440_v52, %v439_v51 }
 0x102   : > { %v433_v56 = vadd.f32 %v868_v54, %v764_v40  ;;  %v424_v57 = vpop.f32.mrb[5].mxu0 }
 0x103   : > { %v425_v58 = vadd.f32 %v764_v40, %v424_v57  ;;  %v869_v59 = vpop.f32.mrb[6].mxu0  ;;  %878 = vmatprep.mubr.msk.bf16.mxu1 %vm490_vm0, %v447_v55 }
 0x104   : > { %v436_v60 = vadd.f32 %v869_v59, %v764_v40  ;;  %v427_v61 = vpop.f32.mrb[7].mxu0  ;;  %879 = vmatmul.mubr.msk.bf16.vlgmr.msra.gmra.mrb[0].mxu1 %vm490_vm0, %v448_v53  ;;  %v445_v63 = vmax.f32 %v433_v56, 0.0 }
 0x105   : > { %v428_v62 = vadd.f32 %v764_v40, %v427_v61  ;;  %v443_v1 = vmax.f32 %v425_v58, 0.0 }
 0x106   : > { %v446_v0 = vmax.f32 %v436_v60, 0.0 }
 0x107   : > { %v444_v2 = vmax.f32 %v428_v62, 0.0 }
 0x108   : > { %v450_v3 = vpack.c.bf16 %v446_v0, %v445_v63 }
 0x109   : > { %v449_v9 = vpack.c.bf16 %v444_v2, %v443_v1 }
 0x10b   : > { %882 = vmatprep.mubr.msk.bf16.mxu1 %vm490_vm0, %v449_v9 }
 0x10c   : > { %883 = vmatmul.mubr.msk.bf16.gmra.mrb[4].mxu1 %vm490_vm0, %v450_v3 }
 0x1d7   : > { %v880_v10 = vpop.f32.mrb[0].mxu1 }
 0x1d8   : > { %v537_v11 = vpop.f32.mrb[1].mxu1  ;;  %v546_v16 = vadd.f32 %v880_v10, %v773_v14 }
 0x1d9   : > { %v881_v12 = vpop.f32.mrb[2].mxu1  ;;  %v538_v25 = vadd.f32 %v773_v14, %v537_v11 }
 0x1da   : > { %v540_v13 = vpop.f32.mrb[3].mxu1  ;;  %v549_v28 = vadd.f32 %v881_v12, %v773_v14 }
 0x1db   : > { %v541_v35 = vadd.f32 %v773_v14, %v540_v13 }
 0x1df   : > { %v884_v15 = vpop.f32.mrb[4].mxu1 }
 0x1e0   : > { %v562_v17 = vadd.f32 %v884_v15, %v773_v14  ;;  %v553_v19 = vpop.f32.mrb[5].mxu1 }
 0x1e1   : > { %v554_v26 = vadd.f32 %v773_v14, %v553_v19  ;;  %v885_v27 = vpop.f32.mrb[6].mxu1 }
 0x1e2   : > { %v569_v29 = vmax.f32 %v546_v16, %v562_v17  ;;  %v565_v31 = vadd.f32 %v885_v27, %v773_v14  ;;  %v556_v34 = vpop.f32.mrb[7].mxu1 }
 0x1e3   : > { %v568_v36 = vmax.f32 %v538_v25, %v554_v26  ;;  %v557_v37 = vadd.f32 %v773_v14, %v556_v34 }
 0x1e4   : > { %v572_v38 = vmax.f32 %v549_v28, %v565_v31 }
 0x1e5   : > { %v570_v39 = vmax.f32 %v568_v36, %v569_v29  ;;  %v571_v40 = vmax.f32 %v541_v35, %v557_v37 }
 0x1e7   : > { %v574_v41 = vsub.f32 %v538_v25, %v570_v39  ;;  %v576_v42 = vsub.f32 %v546_v16, %v570_v39  ;;  %v578_v43 = vsub.f32 %v554_v26, %v570_v39  ;;  %v580_v44 = vsub.f32 %v562_v17, %v570_v39 }
 0x1e8   : > { %v573_v45 = vmax.f32 %v571_v40, %v572_v38 }
 0x1e9   : > { %v582_v46 = vmul.f32 1.442695, %v574_v41  ;;  %v586_v47 = vmul.f32 1.442695, %v576_v42  ;;  %v590_v48 = vmul.f32 1.442695, %v578_v43 }
 0x1ea   : > { %v594_v49 = vmul.f32 1.442695, %v580_v44  ;;  %v575_v50 = vsub.f32 %v541_v35, %v573_v45  ;;  %v577_v51 = vsub.f32 %v549_v28, %v573_v45  ;;  %v579_v52 = vsub.f32 %v557_v37, %v573_v45 }
 0x1eb   : > { %906 = vpow2.f32 %v582_v46  ;;  %v581_v53 = vsub.f32 %v565_v31, %v573_v45 }
 0x1ec   : > { %908 = vpow2.f32 %v586_v47  ;;  %v584_v54 = vmul.f32 1.442695, %v575_v50  ;;  %v588_v55 = vmul.f32 1.442695, %v577_v51  ;;  %v592_v56 = vmul.f32 1.442695, %v579_v52 }
 0x1ed   : > { %910 = vpow2.f32 %v590_v48  ;;  %v596_v57 = vmul.f32 1.442695, %v581_v53 }
 0x1ee   : > { %912 = vpow2.f32 %v594_v49 }
 0x1ef   : > { %914 = vpow2.f32 %v584_v54 }
 0x1f0   : > { %916 = vpow2.f32 %v588_v55 }
 0x1f1   : > { %918 = vpow2.f32 %v592_v56 }
 0x1f2   : > { %920 = vpow2.f32 %v596_v57 }
 0x1f5   : > { %v907_v58 = vpop.eup %906 }
 0x1f6   : > { %v909_v59 = vpop.eup %908 }
 0x1f7   : > { %v911_v60 = vpop.eup %910  ;;  %v598_v61 = vadd.f32 %v909_v59, %v907_v58 }
 0x1f8   : > { %v913_v62 = vpop.eup %912 }
 0x1f9   : > { %v915_v63 = vpop.eup %914  ;;  %v599_v0 = vadd.f32 %v911_v60, %v598_v61 }
 0x1fa   : > { %v917_v1 = vpop.eup %916 }
 0x1fb   : > { %v600_v2 = vadd.f32 %v913_v62, %v599_v0  ;;  %v601_v3 = vadd.f32 %v917_v1, %v915_v63  ;;  %v919_v9 = vpop.eup %918 }
 0x1fc   : > { %v921_v11 = vpop.eup %920 }
 0x1fd   : > { %922 = vrcp.f32 %v600_v2  ;;  %v602_v10 = vadd.f32 %v919_v9, %v601_v3 }
 0x1ff   : > { %v603_v12 = vadd.f32 %v921_v11, %v602_v10 }
 0x201   : > { %924 = vrcp.f32 %v603_v12 }
 0x207   : > { %v923_v13 = vpop.eup %922 }
 0x208   : > { %v606_v14 = vmul.f32 %v923_v13, %v907_v58  ;;  %v608_v15 = vmul.f32 %v923_v13, %v909_v59  ;;  %v610_v16 = vmul.f32 %v923_v13, %v911_v60  ;;  %v612_v17 = vmul.f32 %v923_v13, %v913_v62 }
 0x20a   : > { %v614_v19 = vmul.f32 %v809_v7, %v606_v14  ;;  %v616_v25 = vmul.f32 %v813_v21, %v608_v15  ;;  %v618_v26 = vmul.f32 %v817_v23, %v610_v16  ;;  %v620_v27 = vmul.f32 %v821_v32, %v612_v17 }
 0x20b   : > { %v925_v28 = vpop.eup %924 }
 0x20c   : > { %v622_v29 = vsub.f32 %v614_v19, %v1000_v5  ;;  %v624_v31 = vsub.f32 %v616_v25, %v1000_v5  ;;  %v626_v34 = vsub.f32 %v618_v26, %v1000_v5  ;;  %v628_v7 = vsub.f32 %v620_v27, %v1000_v5 }
 0x20d   : > { %v607_v21 = vmul.f32 %v925_v28, %v915_v63  ;;  %v609_v35 = vmul.f32 %v925_v28, %v917_v1  ;;  %v611_v36 = vmul.f32 %v925_v28, %v919_v9  ;;  %v613_v23 = vmul.f32 %v925_v28, %v921_v11 }
 0x20e   : > { %v797_v37 = vpack.c.bf16 %v622_v29, %v622_v29  ;;  %v799_v38 = vpack.c.bf16 %v624_v31, %v624_v31  ;;  %v801_v32 = vpack.c.bf16 %v626_v34, %v626_v34  ;;  %v803_v39 = vpack.c.bf16 %v628_v7, %v628_v7 }
 0x20f   : > { %v615_v40 = vmul.f32 %v810_v8, %v607_v21  ;;  %v617_v41 = vmul.f32 %v814_v22, %v609_v35  ;;  %v619_v5 = vmul.f32 %v818_v24, %v611_v36  ;;  %v621_v42 = vmul.f32 %v822_v33, %v613_v23 }
 0x210   : > { %662 = vst [vmem:[%s1016_s20] sm:$0xf] %v797_v37  ;;  %664 = vst [vmem:[%s1016_s20 + $0x10] sm:$0xf] %v799_v38 }
 0x211   : > { %666 = vst [vmem:[%s1016_s20 + $0x20] sm:$0xf] %v801_v32  ;;  %668 = vst [vmem:[%s1016_s20 + $0x30] sm:$0xf] %v803_v39  ;;  %v623_v4 = vsub.f32 %v615_v40, %v1002_v6  ;;  %v625_v8 = vsub.f32 %v617_v41, %v1002_v6  ;;  %v627_v18 = vsub.f32 %v619_v5, %v1002_v6 }
 0x212   : > { %v629_v22 = vsub.f32 %v621_v42, %v1002_v6 }
 0x213   : > { %v798_v20 = vpack.c.bf16 %v623_v4, %v623_v4  ;;  %v800_v43 = vpack.c.bf16 %v625_v8, %v625_v8  ;;  %v802_v24 = vpack.c.bf16 %v627_v18, %v627_v18 }
 0x214   : > { %v804_v44 = vpack.c.bf16 %v629_v22, %v629_v22 }
 0x215   : > { %663 = vst [vmem:[%s1016_s20 + $0x8] sm:$0xf] %v798_v20  ;;  %665 = vst [vmem:[%s1016_s20 + $0x18] sm:$0xf] %v800_v43 }
 0x216   : > { %667 = vst [vmem:[%s1016_s20 + $0x28] sm:$0xf] %v802_v24  ;;  %669 = vst [vmem:[%s1016_s20 + $0x38] sm:$0xf] %v804_v44 }
 0x217 PF: > { %s16_s21 = sadd.s32 1, %s932_s21  }
 0x218   : > { %p13_p4 = scmp.ge.s32.totalorder %s16_s21, 4  }
 0x21a   :  { %15 = sbr.rel (!%p13_p4) target bundleno = 1 (0x1), region = 77 }

// kernel: edge_conv_forward.11
= control target key start
LH: loop header
LB: loop body
LE: loop exit
PB: predicated region body
PF: predicated region fallthrough
CT: control target
= control target key end

     0   :  { %s1727_s21 = smov 0   ;;  %s2255_s0 = inlined_call_operand.vmem [shape: bf16[2,64,256], index: 0, kind: input, shape index: {}]   ;;  %s2256_s1 = inlined_call_operand.vmem [shape: bf16[256,288], index: 1, kind: input, shape index: {}]   ;;  %s2257_s2 = inlined_call_operand.vmem [shape: f32[1,32], index: 2, kind: input, shape index: {}]   ;;  %s2258_s3 = inlined_call_operand.vmem [shape: f32[1,256], index: 3, kind: input, shape index: {}]   ;;  %s2259_s4 = inlined_call_operand.vmem [shape: f32[1,256], index: 4, kind: input, shape index: {}]   ;;  %s2260_s5 = inlined_call_operand.vmem [shape: bf16[2,64,32], index: 5, kind: output, shape index: {0}]   ;;  %s2261_s6 = inlined_call_operand.vmem [shape: f32[2,2,32], index: 6, kind: output, shape index: {1}]  }
   0x1 LB: > { %s1465_s3 = sadd.s32 4294967295, %s1686_s21   ;;  %p1469_p0 = scmp.ge.s32.totalorder %s1686_s21, 1  ;;  %s1686_s21 = sphi %s1727_s21, %s17_s21  }
   0x2   : > { %p215_p1 = scmp.lt.s32.totalorder %s1686_s21, 3 }
   0x4   : > { %p216_p2 = pnand %p1469_p0, %p215_p1 }
   0x5   : > { %v1604_v0 = vld [vmem:[%s2256_s1 + $0x4] ss:$12 sps:$4 sm:$0xff] (!%p216_p2)   ;;  %v1606_v1 = vld [vmem:[%s2256_s1] ss:$12 sps:$4 sm:$0xff] (!%p216_p2)   ;;  %v1607_v2 = vld [vmem:[%s2256_s1 + $0x1c] ss:$12 sps:$4 sm:$0xff] (!%p216_p2)  }
   0x6   : > { %219 = sbr.rel (%p216_p2) target bundleno = 506 (0x1fa), region = 40  ;;  %632 = vmatprep.subr.bf16.mxu0 (!%p216_p2), %v1604_v0  ;;  %v1688_v3 = vmov (!%p216_p2), 0.0   ;;  %s1689_s27 = smov (!%p216_p2), 64   ;;  %v1609_v4 = vld [vmem:[%s2256_s1 + $0x18] ss:$12 sps:$4 sm:$0xff] (!%p216_p2)   ;;  %vm1097_vm0 = vcmask (!%p216_p2), 1046528  }
   0x7   : > { %1008 = vrot.lane.b32.xlu0 (!%p216_p2), %v1688_v3, %s1689_s27  ;;  %633 = vmatpush1.bf16.msra.mxu0 (!%p216_p2), %v1606_v1  ;;  %v1610_v5 = vld [vmem:[%s2256_s1 + $0x34] ss:$12 sps:$4 sm:$0xff] (!%p216_p2)   ;;  %v1612_v6 = vld [vmem:[%s2256_s1 + $0x30] ss:$12 sps:$4 sm:$0xff] (!%p216_p2)   ;;  %v1613_v7 = vld [vmem:[%s2256_s1 + $0x4c] ss:$12 sps:$4 sm:$0xff] (!%p216_p2)  }
   0x8   : > { %634 = vmatprep.subr.bf16.mxu0 (!%p216_p2), %v1607_v2  ;;  %p249_p3 = scmp.lt.s32.totalorder (!%p216_p2), %s1465_s3, 1  ;;  %v1615_v8 = vld [vmem:[%s2256_s1 + $0x48] ss:$12 sps:$4 sm:$0xff] (!%p216_p2)   ;;  %v1616_v9 = vld [vmem:[%s2256_s1 + $0x64] ss:$12 sps:$4 sm:$0xff] (!%p216_p2)   ;;  %s1690_s9 = smov (!%p216_p2), 32  }
   0x9   : > { %v1618_v10 = vld [vmem:[%s2256_s1 + $0x60] ss:$12 sps:$4 sm:$0xff] (!%p216_p2)   ;;  %v1619_v11 = vld [vmem:[%s2256_s1 + $0x7c] ss:$12 sps:$4 sm:$0xff] (!%p216_p2)   ;;  %v1621_v12 = vld [vmem:[%s2256_s1 + $0x78] ss:$12 sps:$4 sm:$0xff] (!%p216_p2)  }
   0xa   : > { %v1622_v13 = vld [vmem:[%s2256_s1 + $0x94] ss:$12 sps:$4 sm:$0xff] (!%p216_p2)   ;;  %v1624_v15 = vld [vmem:[%s2256_s1 + $0x90] ss:$12 sps:$4 sm:$0xff] (!%p216_p2)   ;;  %v1625_v16 = vld [vmem:[%s2256_s1 + $0xac] ss:$12 sps:$4 sm:$0xff] (!%p216_p2)  }
   0xb   : > { %635 = vmatpush1.bf16.msra.mxu0 (!%p216_p2), %v1609_v4  ;;  %v1627_v17 = vld [vmem:[%s2256_s1 + $0xa8] ss:$12 sps:$4 sm:$0xff] (!%p216_p2)   ;;  %v1628_v18 = vld [vmem:[%s2256_s1 + $0xc4] ss:$12 sps:$4 sm:$0xff] (!%p216_p2)   ;;  %v1630_v21 = vld [vmem:[%s2256_s1 + $0xc0] ss:$12 sps:$4 sm:$0xff] (!%p216_p2)  }
   0xc   : > { %636 = vmatprep.subr.bf16.mxu0 (!%p216_p2), %v1610_v5  ;;  %v1664_v19 = vld [vmem:[%s2256_s1 + $0xc8] ss:$12 sps:$4 sm:$0xff] (!%p216_p2)   ;;  %v1666_v22 = vld [vmem:[%s2256_s1 + $0xe0] ss:$12 sps:$4 sm:$0xff] (!%p216_p2)   ;;  %v1668_v24 = vld [vmem:[%s2256_s1 + $0xf8] ss:$12 sps:$4 sm:$0xff] (!%p216_p2)  }
   0xd   : > { %s2279_s3 = smov (!%p249_p3, %s1465_s3), 1  ;;  %v1665_v20 = vld [vmem:[%s2256_s1 + $0x8] ss:$12 sps:$4 sm:$0xff]   ;;  %1552 = vmatprep.subr.bf16.mxu1 %v1664_v19  ;;  %v1667_v23 = vld [vmem:[%s2256_s1 + $0x20] ss:$12 sps:$4 sm:$0xff]   ;;  %s1691_s10 = smov 96  }
   0xe   : > { %s1542_s20 = sshll.u32 %s2279_s3, 6  ;;  %1553 = vmatpush3.bf16.msra.mxu1 %v1665_v20  ;;  %v1631_v25 = vld [vmem:[%s2256_s1 + $0xdc] ss:$12 sps:$4 sm:$0xff]   ;;  %v1633_v26 = vld [vmem:[%s2256_s1 + $0xd8] ss:$12 sps:$4 sm:$0xff]   ;;  %vm879_vm1 = vcmask 1040384  }
   0xf   : > { %637 = vmatpush1.bf16.msra.mxu0 %v1612_v6  ;;  %s1779_s25 = scalar_lea.vmem %s2255_s0, %s1542_s20  ;;  %1554 = vmatprep.subr.bf16.mxu1 %v1666_v22  ;;  %v1669_v27 = vld [vmem:[%s2256_s1 + $0x38] ss:$12 sps:$4 sm:$0xff]   ;;  %v1670_v28 = vld [vmem:[%s2256_s1 + $0x110] ss:$12 sps:$4 sm:$0xff]   ;;  %v1634_v29 = vld [vmem:[%s2256_s1 + $0xf4] ss:$12 sps:$4 sm:$0xff]  }
  0x10   : > { %638 = vmatprep.subr.bf16.mxu0 %v1613_v7  ;;  %v1654_v14 = vld [vmem:[%s1779_s25 + $0x4] ss:$8 sps:$4 sm:$0xff]   ;;  %v1636_v30 = vld [vmem:[%s2256_s1 + $0xf0] ss:$12 sps:$4 sm:$0xff]   ;;  %v1672_v32 = vld [vmem:[%s2256_s1 + $0x128] ss:$12 sps:$4 sm:$0xff]  }
  0x11   : > { %664 = vmatprep.mubr.bf16.mxu0 %v1654_v14  ;;  %737 = vmatprep.mubr.bf16.mxu1 %v1654_v14  ;;  %v1671_v31 = vld [vmem:[%s2256_s1 + $0x50] ss:$12 sps:$4 sm:$0xff]   ;;  %v1637_v33 = vld [vmem:[%s2256_s1 + $0x10c] ss:$12 sps:$4 sm:$0xff]   ;;  %v1673_v34 = vld [vmem:[%s2256_s1 + $0x68] ss:$12 sps:$4 sm:$0xff]  }
  0x12   : > { %1555 = vmatpush3.bf16.msra.mxu1 %v1667_v23  ;;  %v1639_v35 = vld [vmem:[%s2256_s1 + $0x108] ss:$12 sps:$4 sm:$0xff]   ;;  %v1674_v36 = vld [vmem:[%s2256_s1 + $0x140] ss:$12 sps:$4 sm:$0xff]   ;;  %v1640_v37 = vld [vmem:[%s2256_s1 + $0x124] ss:$12 sps:$4 sm:$0xff]  }
  0x13   : > { %639 = vmatpush1.bf16.msra.mxu0 %v1615_v8  ;;  %1556 = vmatprep.subr.bf16.mxu1 %v1668_v24  ;;  %v1675_v38 = vld [vmem:[%s2256_s1 + $0x80] ss:$12 sps:$4 sm:$0xff]   ;;  %v1676_v40 = vld [vmem:[%s2256_s1 + $0x158] ss:$12 sps:$4 sm:$0xff]   ;;  %v1643_v41 = vld [vmem:[%s2256_s1 + $0x13c] ss:$12 sps:$4 sm:$0xff]  }
  0x14   : > { %640 = vmatprep.subr.bf16.mxu0 %v1616_v9  ;;  %v1642_v39 = vld [vmem:[%s2256_s1 + $0x120] ss:$12 sps:$4 sm:$0xff]   ;;  %v1677_v42 = vld [vmem:[%s2256_s1 + $0x98] ss:$12 sps:$4 sm:$0xff]   ;;  %v1678_v44 = vld [vmem:[%s2256_s1 + $0x170] ss:$12 sps:$4 sm:$0xff]  }
  0x15   : > { %v1645_v43 = vld [vmem:[%s2256_s1 + $0x138] ss:$12 sps:$4 sm:$0xff]   ;;  %v1646_v45 = vld [vmem:[%s2256_s1 + $0x154] ss:$12 sps:$4 sm:$0xff]   ;;  %v1679_v46 = vld [vmem:[%s2256_s1 + $0xb0] ss:$12 sps:$4 sm:$0xff]  }
  0x16   : > { %1557 = vmatpush3.bf16.msra.mxu1 %v1669_v27  ;;  %v1648_v47 = vld [vmem:[%s2256_s1 + $0x150] ss:$12 sps:$4 sm:$0xff]   ;;  %v1649_v48 = vld [vmem:[%s2256_s1 + $0x16c] ss:$12 sps:$4 sm:$0xff]   ;;  %v1651_v49 = vld [vmem:[%s2256_s1 + $0x168] ss:$12 sps:$4 sm:$0xff]  }
  0x17   : > { %641 = vmatpush1.bf16.msra.mxu0 %v1618_v10  ;;  %1558 = vmatprep.subr.bf16.mxu1 %v1670_v28  ;;  %v1652_v50 = vld [vmem:[%s1779_s25] ss:$8 sps:$4 sm:$0xff]   ;;  %v1655_v51 = vld [vmem:[%s1779_s25 + $0x14] ss:$8 sps:$4 sm:$0xff]   ;;  %v1657_v52 = vld [vmem:[%s1779_s25 + $0x10] ss:$8 sps:$4 sm:$0xff]   ;;  %v768_v10 = vlaneseq }
  0x18   : > { %642 = vmatprep.subr.bf16.mxu0 %v1619_v11  ;;  %v1658_v53 = vld [vmem:[%s1779_s25 + $0x24] ss:$8 sps:$4 sm:$0xff]   ;;  %v1660_v54 = vld [vmem:[%s1779_s25 + $0x20] ss:$8 sps:$4 sm:$0xff]   ;;  %v1661_v55 = vld [vmem:[%s1779_s25 + $0x34] ss:$8 sps:$4 sm:$0xff]  }
  0x19   : > { %v1663_v56 = vld [vmem:[%s1779_s25 + $0x30] ss:$8 sps:$4 sm:$0xff]   ;;  %v1927_v22 = vshrl.u32 %v768_v10, 7  ;;  %s1543_s11 = sshll.u32 %s2279_s3, 5  ;;  %vm1316_vm10 = vcmask 257024   ;;  %vm1325_vm11 = vcmask 261120  }
  0x1a   : > { %1559 = vmatpush3.bf16.msra.mxu1 %v1671_v31  ;;  %s2139_s14 = scalar_lea.vmem %s2260_s5, %s1543_s11  ;;  %s1474_s15 = sshll.u32 %s2279_s3, 1  ;;  %vm1377_vm12 = vcmask 254976  }
  0x1b   : > { %643 = vmatpush1.bf16.msra.mxu0 %v1621_v12  ;;  %1560 = vmatprep.subr.bf16.mxu1 %v1672_v32  ;;  %v781_v27 = vand.u32 15, %v1927_v22  ;;  %s262_s18 = scalar_lea.vmem %s2261_s6, %s1474_s15 }
  0x1c   : > { %644 = vmatprep.subr.bf16.mxu0 %v1622_v13 }
  0x1d   : > { %vm1946_vm2 = vcmp.ge.s32.totalorder %v781_v27, 1 }
  0x1e   : > { %1561 = vmatpush3.bf16.msra.mxu1 %v1673_v34 }
  0x1f   : > { %645 = vmatpush1.bf16.msra.mxu0 %v1624_v15  ;;  %1562 = vmatprep.subr.bf16.mxu1 %v1674_v36 }
  0x20   : > { %646 = vmatprep.subr.bf16.mxu0 %v1625_v16 }
  0x22   : > { %1563 = vmatpush3.bf16.msra.mxu1 %v1675_v38 }
  0x23   : > { %647 = vmatpush1.bf16.msra.mxu0 %v1627_v17  ;;  %1564 = vmatprep.subr.bf16.mxu1 %v1676_v40 }
  0x24   : > { %648 = vmatprep.subr.bf16.mxu0 %v1628_v18 }
  0x26   : > { %1565 = vmatpush3.bf16.msra.mxu1 %v1677_v42 }
  0x27   : > { %649 = vmatpush1.bf16.msra.mxu0 %v1630_v21  ;;  %1566 = vmatprep.subr.bf16.mxu1 %v1678_v44 }
  0x28   : > { %650 = vmatprep.subr.bf16.mxu0 %v1631_v25 }
  0x2a   : > { %1567 = vmatpush3.bf16.msra.mxu1 %v1679_v46 }
  0x2b   : > { %651 = vmatpush1.bf16.msra.mxu0 %v1633_v26 }
  0x2c   : > { %652 = vmatprep.subr.bf16.mxu0 %v1634_v29 }
  0x2d   : > { %738 = vmatmul.mubr.bf16.vlgmr.msra.gmra.mrb[0].mxu1 %v1652_v50 }
  0x2e   : > { %743 = vmatprep.mubr.bf16.mxu1 %v1655_v51 }
  0x2f   : > { %653 = vmatpush1.bf16.msra.mxu0 %v1636_v30 }
  0x30   : > { %654 = vmatprep.subr.bf16.mxu0 %v1637_v33 }
  0x33   : > { %655 = vmatpush1.bf16.msra.mxu0 %v1639_v35 }
  0x34   : > { %656 = vmatprep.subr.bf16.mxu0 %v1640_v37 }
  0x35   : > { %744 = vmatmul.mubr.bf16.gmra.mrb[4].mxu1 %v1657_v52 }
  0x36   : > { %751 = vmatprep.mubr.bf16.mxu1 %v1658_v53 }
  0x37   : > { %657 = vmatpush1.bf16.msra.mxu0 %v1642_v39 }
  0x38   : > { %658 = vmatprep.subr.bf16.mxu0 %v1643_v41 }
  0x3b   : > { %659 = vmatpush1.bf16.msra.mxu0 %v1645_v43 }
  0x3c   : > { %660 = vmatprep.subr.bf16.mxu0 %v1646_v45 }
  0x3d   : > { %752 = vmatmul.mubr.bf16.gmra.mrb[8].mxu1 %v1660_v54 }
  0x3e   : > { %759 = vmatprep.mubr.bf16.mxu1 %v1661_v55 }
  0x3f   : > { %661 = vmatpush1.bf16.msra.mxu0 %v1648_v47 }
  0x40   : > { %662 = vmatprep.subr.bf16.mxu0 %v1649_v48 }
  0x43   : > { %663 = vmatpush1.bf16.msra.mxu0 %v1651_v49  ;;  %v770_v49 = vadd.s32 8, %v1927_v22 }
  0x45   : > { %760 = vmatmul.mubr.bf16.gmra.mrb[12].mxu1 %v1663_v56 }
  0x46   : > { %665 = vmatmul.mubr.bf16.vlgmr.msra.gmra.mrb[0].mxu0 %v1652_v50 }
  0x47   : > { %674 = vmatprep.mubr.bf16.mxu0 %v1655_v51 }
  0x4e   : > { %675 = vmatmul.mubr.bf16.gmra.mrb[4].mxu0 %v1657_v52 }
  0x4f   : > { %684 = vmatprep.mubr.bf16.mxu0 %v1658_v53 }
  0x56   : > { %685 = vmatmul.mubr.bf16.gmra.mrb[8].mxu0 %v1660_v54 }
  0x57   : > { %694 = vmatprep.mubr.bf16.mxu0 %v1661_v55 }
  0x5e   : > { %695 = vmatmul.mubr.bf16.gmra.mrb[12].mxu0 %v1663_v56 }
 0x100   : > { %v1568_v57 = vpop.f32.mrb[0].mxu1 }
 0x101   : > { %v1569_v58 = vpop.f32.mrb[1].mxu1  ;;  %v788_v57 = vand.u32 15, %v770_v49 }
 0x102   : > { %v1571_v59 = vpop.f32.mrb[2].mxu1 }
 0x103   : > { %v1572_v60 = vpop.f32.mrb[3].mxu1  ;;  %vm2001_vm3 = vcmp.lt.s32.totalorder %v788_v57, 15  ;;  %v776_v57 = vadd.s32 56, %v1927_v22 }
 0x108   : > { %v1574_v7 = vpop.f32.mrb[4].mxu1 }
 0x109   : > { %v1575_v13 = vpop.f32.mrb[5].mxu1 }
 0x10a   : > { %v1577_v16 = vpop.f32.mrb[6].mxu1  ;;  %v1576_v24 = vadd.f32 %v1575_v13, %v1574_v7 }
 0x10b   : > { %v1578_v20 = vpop.f32.mrb[7].mxu1 }
 0x10c   : > { %v1579_v26 = vadd.f32 %v1578_v20, %v1577_v16  ;;  %v1237_v29 = vrot.slane %v1576_v24, 1 }
 0x10e   : > { %v1238_v30 = vrot.slane %v1579_v26, 1 }
 0x110   : > { %v1941_v34 = vsel %vm1097_vm0, %v1237_v29, %v1238_v30  ;;  %v1580_v43 = vpop.f32.mrb[8].mxu1 }
 0x111   : > { %v1581_v46 = vpop.f32.mrb[9].mxu1 }
 0x112   : > { %v1582_v48 = vadd.f32 %v1581_v46, %v1580_v43 }
 0x114   : > { %v1240_v51 = vrot.slane %v1582_v48, 1  ;;  %v774_v48 = vadd.s32 40, %v1927_v22 }
 0x116   : > { %v1979_v56 = vsel %vm1097_vm0, %v1238_v30, %v1240_v51  ;;  %v773_v30 = vadd.s32 32, %v1927_v22 }
 0x119   : > { %v666_v61 = vpop.f32.mrb[0].mxu0 }
 0x11a   : > { %v1897_v62 = vrot.slane %v666_v61, 7  ;;  %1026 = vrot.lane.b32.xlu1 %v666_v61, %s1690_s9  ;;  %v1900_v63 = vpop.f32.mrb[1].mxu0 }
 0x11b   : > { %v670_v0 = vpop.f32.mrb[2].mxu0  ;;  %v1098_v4 = vrot.slane %v1900_v63, 1 }
 0x11c   : > { %v881_v1 = vrot.slane %v670_v0, 7  ;;  %934 = vrot.lane.b32.xlu0 %v1897_v62, %s1691_s10  ;;  %v1904_v2 = vpop.f32.mrb[3].mxu0 }
 0x11d   : > { %v1099_v5 = vrot.slane %v1904_v2, 1 }
 0x11e   : > { %v1910_v6 = vsel %vm879_vm1, %v1897_v62, %v881_v1 }
 0x11f   : > { %936 = vrot.lane.b32.xlu1 %v1910_v6, %s1691_s10  ;;  %v1100_v8 = vsel %vm1097_vm0, %v1098_v4, %v1099_v5 }
 0x120   : > { %1028 = vrot.lane.b32.xlu0 %v670_v0, %s1690_s9 }
 0x121   : > { %v676_v9 = vpop.f32.mrb[4].mxu0 }
 0x122   : > { %v883_v11 = vrot.slane %v676_v9, 7  ;;  %v1916_v12 = vpop.f32.mrb[5].mxu0 }
 0x123   : > { %v1101_v14 = vrot.slane %v1916_v12, 1  ;;  %1199 = vrot.lane.b32.xlu1 %v1100_v8, %s1690_s9  ;;  %v680_v15 = vpop.f32.mrb[6].mxu0 }
 0x124   : > { %1111 = vrot.lane.b32.xlu0 %v1098_v4, %s1689_s27  ;;  %v885_v17 = vrot.slane %v680_v15, 7  ;;  %v1921_v18 = vpop.f32.mrb[7].mxu0  ;;  %v1924_v19 = vsel %vm879_vm1, %v881_v1, %v883_v11 }
 0x125   : > { %v1103_v21 = vrot.slane %v1921_v18, 1  ;;  %v1102_v23 = vsel %vm1097_vm0, %v1099_v5, %v1101_v14  ;;  %v979_v44 = vsel %vm1946_vm2, %v1924_v19, 0.0 }
 0x126   : > { %v1931_v25 = vsel %vm879_vm1, %v883_v11, %v885_v17  ;;  %v1184_v7 = vsel %vm2001_vm3, %v1102_v23, 0.0 }
 0x127   : > { %1066 = vrot.lane.b32.xlu1 %v1916_v12, %s1691_s10  ;;  %v1104_v28 = vsel %vm1097_vm0, %v1101_v14, %v1103_v21 }
 0x128   : > { %1113 = vrot.lane.b32.xlu0 %v1100_v8, %s1689_s27  ;;  %v771_v8 = vadd.s32 16, %v1927_v22 }
 0x129   : > { %v686_v31 = vpop.f32.mrb[8].mxu0 }
 0x12a   : > { %v887_v32 = vrot.slane %v686_v31, 7  ;;  %v1938_v33 = vpop.f32.mrb[9].mxu0  ;;  %v795_v13 = vand.u32 15, %v771_v8 }
 0x12b   : > { %v1105_v35 = vrot.slane %v1938_v33, 1  ;;  %1068 = vrot.lane.b32.xlu1 %v1921_v18, %s1691_s10  ;;  %v690_v37 = vpop.f32.mrb[10].mxu0 }
 0x12c   : > { %1030 = vrot.lane.b32.xlu0 %v676_v9, %s1690_s9  ;;  %v889_v38 = vrot.slane %v690_v37, 7  ;;  %v1951_v39 = vpop.f32.mrb[11].mxu0  ;;  %v1954_v40 = vsel %vm879_vm1, %v885_v17, %v887_v32  ;;  %v1583_v9 = vpop.f32.mrb[10].mxu1  ;;  %v772_v17 = vadd.s32 24, %v1927_v22  ;;  %vm2020_vm4 = vcmp.ge.s32.totalorder %v795_v13, 1 }
 0x12d   : > { %v1107_v41 = vrot.slane %v1951_v39, 1  ;;  %v1958_v42 = vsel %vm1097_vm0, %v1103_v21, %v1105_v35  ;;  %v1584_v10 = vpop.f32.mrb[11].mxu1  ;;  %v981_v24 = vsel %vm2020_vm4, %v1954_v40, 0.0 }
 0x12e   : > { %v1964_v45 = vsel %vm879_vm1, %v887_v32, %v889_v38  ;;  %v1586_v11 = vpop.f32.mrb[12].mxu1 }
 0x12f   : > { %994 = vrot.lane.b32.xlu1 %v979_v44, %s1689_s27  ;;  %v1968_v47 = vsel %vm1097_vm0, %v1105_v35, %v1107_v41  ;;  %v1587_v14 = vpop.f32.mrb[13].mxu1  ;;  %v775_v44 = vadd.s32 48, %v1927_v22 }
 0x130   : > { %1032 = vrot.lane.b32.xlu0 %v680_v15, %s1690_s9  ;;  %v1585_v15 = vadd.f32 %v1584_v10, %v1583_v9  ;;  %v1588_v16 = vadd.f32 %v1587_v14, %v1586_v11 }
 0x131   : > { %v696_v50 = vpop.f32.mrb[12].mxu0  ;;  %v823_v49 = vand.u32 15, %v775_v44 }
 0x132   : > { %v930_v52 = vrot.slane %v696_v50, 7  ;;  %v1972_v53 = vpop.f32.mrb[13].mxu0  ;;  %v1242_v20 = vrot.slane %v1585_v15, 1  ;;  %v1244_v21 = vrot.slane %v1588_v16, 1 }
 0x133   : > { %1115 = vrot.lane.b32.xlu1 %v1102_v23, %s1689_s27  ;;  %v1109_v54 = vrot.slane %v1972_v53, 1  ;;  %v1976_v55 = vpop.f32.mrb[14].mxu0  ;;  %vm2076_vm7 = vcmp.ge.s32.totalorder %v823_v49, 1 }
 0x134   : > { %938 = vrot.lane.b32.xlu0 %v1924_v19, %s1691_s10  ;;  %v932_v58 = vrot.slane %v1976_v55, 7  ;;  %v1984_v59 = vpop.f32.mrb[15].mxu0  ;;  %v931_v60 = vsel %vm879_vm1, %v889_v38, %v930_v52  ;;  %v2028_v26 = vsel %vm1097_vm0, %v1240_v51, %v1242_v20  ;;  %v2031_v27 = vsel %vm1097_vm0, %v1242_v20, %v1244_v21 }
 0x135   : > { %v1172_v61 = vrot.slane %v1984_v59, 1  ;;  %v1989_v0 = vsel %vm1097_vm0, %v1107_v41, %v1109_v54  ;;  %v809_v38 = vand.u32 15, %v773_v30  ;;  %v816_v51 = vand.u32 15, %v774_v48 }
 0x136   : > { %v933_v1 = vsel %vm879_vm1, %v930_v52, %v932_v58  ;;  %v978_v50 = vsel %vm879_vm1, %v932_v58, 0.0 }
 0x137   : > { %940 = vrot.lane.b32.xlu1 %v1931_v25, %s1691_s10  ;;  %v1997_v4 = vsel %vm1097_vm0, %v1109_v54, %v1172_v61  ;;  %vm2062_vm6 = vcmp.ge.s32.totalorder %v809_v38, 1  ;;  %v985_v54 = vsel %vm2076_vm7, %v978_v50, 0.0  ;;  %vm2083_vm8 = vcmp.lt.s32.totalorder %v816_v51, 15 }
 0x138   : > { %996 = vrot.lane.b32.xlu0 %v1931_v25, %s1689_s27  ;;  %v983_v46 = vsel %vm2062_vm6, %v931_v60, 0.0  ;;  %v1188_v58 = vsel %vm2083_vm8, %v1989_v0, 0.0 }
 0x13b   : > { %1203 = vrot.lane.b32.xlu1 %v1104_v28, %s1690_s9 }
 0x13c   : > { %1201 = vrot.lane.b32.xlu0 %v1184_v7, %s1690_s9 }
 0x13f   : > { %1117 = vrot.lane.b32.xlu1 %v1104_v28, %s1689_s27  ;;  %v802_v28 = vand.u32 15, %v772_v17 }
 0x140   : > { %1070 = vrot.lane.b32.xlu0 %v1938_v33, %s1691_s10 }
 0x141   : > { %vm2040_vm5 = vcmp.lt.s32.totalorder %v802_v28, 15 }
 0x142   : > { %v1186_v32 = vsel %vm2040_vm5, %v1958_v42, 0.0 }
 0x143   : > { %1034 = vrot.lane.b32.xlu1 %v686_v31, %s1690_s9  ;;  %v1589_v31 = vpop.f32.mrb[14].mxu1 }
 0x144   : > { %1036 = vrot.lane.b32.xlu0 %v690_v37, %s1690_s9  ;;  %v1590_v35 = vpop.f32.mrb[15].mxu1 }
 0x145   : > { %v2051_v37 = vadd.f32 %v1590_v35, %v1589_v31  ;;  %v2131_v35 = vld [vmem:[%s2257_s2] ss:$0 sm:$0xff] }
 0x147   : > { %1072 = vrot.lane.b32.xlu1 %v1951_v39, %s1691_s10  ;;  %v1246_v41 = vrot.slane %v2051_v37, 1 }
 0x148   : > { %942 = vrot.lane.b32.xlu0 %v1954_v40, %s1691_s10 }
 0x149   : > { %v2060_v43 = vsel %vm1097_vm0, %v1244_v21, %v1246_v41 }
 0x14b   : > { %998 = vrot.lane.b32.xlu1 %v981_v24, %s1689_s27 }
 0x14c   : > { %1000 = vrot.lane.b32.xlu0 %v1964_v45, %s1689_s27 }
 0x14f   : > { %1119 = vrot.lane.b32.xlu1 %v1958_v42, %s1689_s27 }
 0x150   : > { %944 = vrot.lane.b32.xlu0 %v1964_v45, %s1691_s10 }
 0x153   : > { %1207 = vrot.lane.b32.xlu1 %v1968_v47, %s1690_s9 }
 0x154   : > { %1205 = vrot.lane.b32.xlu0 %v1186_v32, %s1690_s9 }
 0x157   : > { %946 = vrot.lane.b32.xlu1 %v931_v60, %s1691_s10  ;;  %v830_v60 = vand.u32 15, %v776_v57 }
 0x158   : > { %1074 = vrot.lane.b32.xlu0 %v1972_v53, %s1691_s10 }
 0x159   : > { %vm2098_vm9 = vcmp.lt.s32.totalorder %v830_v60, 15 }
 0x15b   : > { %1002 = vrot.lane.b32.xlu1 %v983_v46, %s1689_s27 }
 0x15c   : > { %1076 = vrot.lane.b32.xlu0 %v1984_v59, %s1691_s10 }
 0x15f   : > { %1004 = vrot.lane.b32.xlu1 %v933_v1, %s1689_s27 }
 0x160   : > { %948 = vrot.lane.b32.xlu0 %v933_v1, %s1691_s10 }
 0x163   : > { %1006 = vrot.lane.b32.xlu1 %v985_v54, %s1689_s27 }
 0x164   : > { %1078 = vrot.lane.b32.xlu0 %v1688_v3, %s1691_s10  ;;  %v1182_v3 = vsel %vm1097_vm0, %v1172_v61, 0.0 }
 0x165   : > { %v1190_v22 = vsel %vm2098_vm9, %v1182_v3, 0.0  ;;  %v1256_v3 = vsel %vm2001_vm3, %v1979_v56, 0.0 }
 0x167   : > { %1209 = vrot.lane.b32.xlu1 %v1188_v58, %s1690_s9 }
 0x168   : > { %1121 = vrot.lane.b32.xlu0 %v1968_v47, %s1689_s27  ;;  %v2110_v47 = vpop.permute.xlu0 %1008 }
 0x16b   : > { %1123 = vrot.lane.b32.xlu1 %v1989_v0, %s1689_s27 }
 0x16c   : > { %1211 = vrot.lane.b32.xlu0 %v1997_v4, %s1690_s9 }
 0x16f   : > { %1213 = vrot.lane.b32.xlu1 %v1190_v22, %s1690_s9 }
 0x18c   : > { %v2112_v7 = vpop.permute.xlu1 %1026 }
 0x18e   : > { %v935_v0 = vpop.permute.xlu0 %934 }
 0x18f   : > { %v958_v14 = vsel %vm879_vm1, 0.0, %v935_v0 }
 0x190   : > { %v959_v16 = vsel %vm1946_vm2, %v958_v14, 0.0 }
 0x191   : > { %v937_v8 = vpop.permute.xlu1 %936 }
 0x192   : > { %v2114_v9 = vpop.permute.xlu0 %1028 }
 0x195   : > { %v1200_v10 = vpop.permute.xlu1 %1199 }
 0x196   : > { %v1112_v11 = vpop.permute.xlu0 %1111 }
 0x199   : > { %v1067_v13 = vpop.permute.xlu1 %1066 }
 0x19a   : > { %v2116_v61 = vpop.permute.xlu0 %1113 }
 0x19d   : > { %v1069_v4 = vpop.permute.xlu1 %1068 }
 0x19e   : > { %v2119_v15 = vpop.permute.xlu0 %1030 }
 0x1a1   : > { %v995_v17 = vpop.permute.xlu1 %994 }
 0x1a2   : > { %v1018_v20 = vadd.f32 %v995_v17, %v959_v16  ;;  %v2123_v21 = vpop.permute.xlu0 %1032 }
 0x1a4   : > { %v1052_v24 = vadd.f32 %v1018_v20, %v1900_v63  ;;  %v1132_v63 = vsel %vm1097_vm0, 0.0, %v1112_v11 }
 0x1a5   : > { %v2126_v28 = vpop.permute.xlu1 %1115 }
 0x1a6   : > { %v1087_v30 = vadd.f32 %v1067_v13, %v1052_v24  ;;  %v939_v31 = vpop.permute.xlu0 %938 }
 0x1a7   : > { %v961_v14 = vsel %vm2020_vm4, %v939_v31, 0.0 }
 0x1a8   : > { %v1223_v32 = vadd.f32 %v1200_v10, %v1087_v30 }
 0x1a9   : > { %v941_v38 = vpop.permute.xlu1 %940 }
 0x1aa   : > { %v1261_v36 = vadd.f32 %v1941_v34, %v1223_v32  ;;  %v997_v44 = vpop.permute.xlu0 %996  ;;  %v1157_v34 = vsel %vm2001_vm3, %v1132_v63, 0.0 }
 0x1ab   : > { %v1019_v46 = vadd.f32 %v997_v44, %v937_v8 }
 0x1ac   : > { %v1276_v48 = vadd.f32 %v2131_v35, %v1261_v36 }
 0x1ad   : > { %v1053_v49 = vadd.f32 %v1019_v46, %v1904_v2  ;;  %v1204_v50 = vpop.permute.xlu1 %1203  ;;  %v970_v46 = vadd.f32 %v941_v38, %v1910_v6  ;;  %v1159_v6 = vsel %vm2040_vm5, %v2126_v28, 0.0 }
 0x1ae   : > { %v1544_v51 = vpack.c.bf16 %v1276_v48, %v1276_v48  ;;  %v1202_v54 = vpop.permute.xlu0 %1201  ;;  %v1347_v11 = vmul.f32 %v1276_v48, %v1276_v48  ;;  %v1326_v56 = vsel %vm1325_vm11, %v1276_v48, 0.0 }
 0x1af   : > { %v1088_v57 = vadd.f32 %v1069_v4, %v1053_v49  ;;  %v897_v4 = vsel %vm879_vm1, 0.0, %v1897_v62 }
 0x1b0   : > { %1317 = vst.msk [vmem:[%s2139_s14] sm:$0xf] %vm1316_vm10, %v1544_v51  ;;  %v922_v32 = vsel %vm2020_vm4, %v897_v4, 0.0  ;;  %v1355_v36 = vsel %vm1325_vm11, %v1347_v11, 0.0 }
 0x1b1   : > { %v1165_v58 = vadd.f32 %v1157_v34, %v1088_v57  ;;  %v2147_v60 = vpop.permute.xlu1 %1117  ;;  %v969_v44 = vadd.f32 %v961_v14, %v922_v32 }
 0x1b2   : > { %v1071_v22 = vpop.permute.xlu0 %1070 }
 0x1b3   : > { %v1224_v0 = vadd.f32 %v1202_v54, %v1165_v58 }
 0x1b5   : > { %v1262_v8 = vadd.f32 %v1256_v3, %v1224_v0  ;;  %v2152_v2 = vpop.permute.xlu1 %1034 }
 0x1b6   : > { %v2154_v10 = vpop.permute.xlu0 %1036 }
 0x1b7   : > { %v1277_v13 = vadd.f32 %v2131_v35, %v1262_v8 }
 0x1b9   : > { %v1545_v5 = vpack.c.bf16 %v1277_v13, %v1277_v13  ;;  %v1327_v16 = vsel %vm1325_vm11, %v1277_v13, 0.0  ;;  %v1348_v17 = vmul.f32 %v1277_v13, %v1277_v13  ;;  %v1073_v20 = vpop.permute.xlu1 %1072 }
 0x1ba   : > { %v1328_v24 = vadd.f32 %v1327_v16, %v1326_v56  ;;  %v943_v30 = vpop.permute.xlu0 %942 }
 0x1bb   : > { %1318 = vst.msk [vmem:[%s2139_s14 + $0x4] sm:$0xf] %vm1316_vm10, %v1545_v5  ;;  %v1356_v62 = vsel %vm1325_vm11, %v1348_v17, 0.0 }
 0x1bc   : > { %v1357_v31 = vadd.f32 %v1356_v62, %v1355_v36 }
 0x1bd   : > { %v999_v48 = vpop.permute.xlu1 %998 }
 0x1be   : > { %v1020_v63 = vadd.f32 %v999_v48, %v969_v44  ;;  %v1001_v49 = vpop.permute.xlu0 %1000 }
 0x1bf   : > { %v1021_v51 = vadd.f32 %v1001_v49, %v970_v46 }
 0x1c0   : > { %v1046_v54 = vadd.f32 %v2112_v7, %v1020_v63 }
 0x1c1   : > { %v1047_v57 = vadd.f32 %v2114_v9, %v1021_v51  ;;  %v2172_v23 = vpop.permute.xlu1 %1119  ;;  %v1258_v9 = vsel %vm2040_vm5, %v2031_v27, 0.0 }
 0x1c2   : > { %v1054_v34 = vadd.f32 %v1046_v54, %v1916_v12  ;;  %v945_v58 = vpop.permute.xlu0 %944  ;;  %v963_v12 = vsel %vm2062_vm6, %v943_v30, 0.0 }
 0x1c3   : > { %v1055_v3 = vadd.f32 %v1047_v57, %v1921_v18 }
 0x1c4   : > { %v1089_v0 = vadd.f32 %v1071_v22, %v1054_v34 }
 0x1c5   : > { %v1208_v8 = vpop.permute.xlu1 %1207  ;;  %v1090_v11 = vadd.f32 %v1073_v20, %v1055_v3 }
 0x1c6   : > { %v1166_v38 = vadd.f32 %v2116_v61, %v1089_v0  ;;  %v1206_v13 = vpop.permute.xlu0 %1205  ;;  %v924_v61 = vsel %vm2062_vm6, %v1924_v19, 0.0  ;;  %v972_v19 = vadd.f32 %v945_v58, %v1931_v25  ;;  %v926_v25 = vsel %vm2076_vm7, %v1954_v40, 0.0 }
 0x1c7   : > { %v1167_v7 = vadd.f32 %v1159_v6, %v1090_v11  ;;  %v971_v56 = vadd.f32 %v963_v12, %v924_v61 }
 0x1c8   : > { %v1225_v4 = vadd.f32 %v1204_v50, %v1166_v38 }
 0x1c9   : > { %v1226_v18 = vadd.f32 %v1206_v13, %v1167_v7  ;;  %v947_v22 = vpop.permute.xlu1 %946 }
 0x1ca   : > { %v1263_v14 = vadd.f32 %v2028_v26, %v1225_v4  ;;  %v1075_v5 = vpop.permute.xlu0 %1074 }
 0x1cb   : > { %v1264_v28 = vadd.f32 %v1258_v9, %v1226_v18 }
 0x1cc   : > { %v1278_v50 = vadd.f32 %v2131_v35, %v1263_v14 }
 0x1cd   : > { %v1279_v27 = vadd.f32 %v2131_v35, %v1264_v28  ;;  %v1003_v29 = vpop.permute.xlu1 %1002 }
 0x1ce   : > { %v1546_v16 = vpack.c.bf16 %v1278_v50, %v1278_v50  ;;  %v1349_v17 = vmul.f32 %v1278_v50, %v1278_v50  ;;  %v1329_v20 = vsel %vm1325_vm11, %v1278_v50, 0.0  ;;  %v1022_v30 = vadd.f32 %v1003_v29, %v971_v56  ;;  %v1077_v26 = vpop.permute.xlu0 %1076 }
 0x1cf   : > { %v1547_v32 = vpack.c.bf16 %v1279_v27, %v1279_v27  ;;  %v1330_v36 = vadd.f32 %v1329_v20, %v1328_v24  ;;  %v1331_v42 = vsel %vm1325_vm11, %v1279_v27, 0.0  ;;  %v1350_v62 = vmul.f32 %v1279_v27, %v1279_v27 }
 0x1d0   : > { %1319 = vst.msk [vmem:[%s2139_s14 + $0x8] sm:$0xf] %vm1316_vm10, %v1546_v16  ;;  %v1358_v44 = vsel %vm1325_vm11, %v1349_v17, 0.0  ;;  %v1048_v46 = vadd.f32 %v2119_v15, %v1022_v30  ;;  %v965_v24 = vsel %vm2076_vm7, %v947_v22, 0.0 }
 0x1d1   : > { %1320 = vst.msk [vmem:[%s2139_s14 + $0xc] sm:$0xf] %vm1316_vm10, %v1547_v32  ;;  %v1332_v48 = vadd.f32 %v1331_v42, %v1330_v36  ;;  %v1359_v63 = vadd.f32 %v1358_v44, %v1357_v31  ;;  %v1360_v49 = vsel %vm1325_vm11, %v1350_v62, 0.0  ;;  %v1005_v51 = vpop.permute.xlu1 %1004  ;;  %v973_v58 = vadd.f32 %v965_v24, %v926_v25 }
 0x1d2   : > { %v1056_v54 = vadd.f32 %v1048_v46, %v1938_v33  ;;  %v1023_v57 = vadd.f32 %v1005_v51, %v972_v19  ;;  %v949_v34 = vpop.permute.xlu0 %948 }
 0x1d3   : > { %v1361_v3 = vadd.f32 %v1360_v49, %v1359_v63  ;;  %v974_v15 = vadd.f32 %v949_v34, %v1964_v45  ;;  %v1161_v45 = vsel %vm2083_vm8, %v2172_v23, 0.0 }
 0x1d4   : > { %v1091_v0 = vadd.f32 %v1075_v5, %v1056_v54  ;;  %v1049_v31 = vadd.f32 %v2123_v21, %v1023_v57 }
 0x1d5   : > { %v1025_v11 = vadd.f32 %v2110_v47, %v974_v15  ;;  %v1007_v6 = vpop.permute.xlu1 %1006 }
 0x1d6   : > { %v1168_v38 = vadd.f32 %v2147_v60, %v1091_v0  ;;  %v1057_v33 = vadd.f32 %v1049_v31, %v1951_v39  ;;  %v1024_v13 = vadd.f32 %v1007_v6, %v973_v58  ;;  %v1079_v7 = vpop.permute.xlu0 %1078  ;;  %v1254_v60 = vsel %vm1097_vm0, %v1246_v41, 0.0 }
 0x1d7   : > { %v1051_v4 = vadd.f32 %v2154_v10, %v1025_v11 }
 0x1d8   : > { %v1227_v9 = vadd.f32 %v1208_v8, %v1168_v38  ;;  %v1050_v40 = vadd.f32 %v2152_v2, %v1024_v13  ;;  %v1092_v52 = vadd.f32 %v1077_v26, %v1057_v33 }
 0x1d9   : > { %v1059_v21 = vadd.f32 %v1051_v4, %v1984_v59  ;;  %v1210_v47 = vpop.permute.xlu1 %1209  ;;  %v1260_v59 = vsel %vm2083_vm8, %v1254_v60, 0.0 }
 0x1da   : > { %v1265_v39 = vadd.f32 %v2060_v43, %v1227_v9  ;;  %v1058_v12 = vadd.f32 %v1050_v40, %v1972_v53  ;;  %v1169_v10 = vadd.f32 %v1161_v45, %v1092_v52  ;;  %v1122_v8 = vpop.permute.xlu0 %1121 }
 0x1db   : > { %v1094_v14 = vadd.f32 %v1079_v7, %v1059_v21 }
 0x1dc   : > { %v1280_v2 = vadd.f32 %v2131_v35, %v1265_v39  ;;  %v1093_v18 = vadd.f32 %v1079_v7, %v1058_v12  ;;  %v1228_v22 = vadd.f32 %v1210_v47, %v1169_v10 }
 0x1dd   : > { %v1124_v23 = vpop.permute.xlu1 %1123 }
 0x1de   : > { %v1548_v5 = vpack.c.bf16 %v1280_v2, %v1280_v2  ;;  %v1351_v37 = vmul.f32 %v1280_v2, %v1280_v2  ;;  %v1266_v61 = vadd.f32 %v1260_v59, %v1228_v22  ;;  %v1170_v41 = vadd.f32 %v1122_v8, %v1093_v18  ;;  %v1212_v28 = vpop.permute.xlu0 %1211 }
 0x1df   : > { %v1163_v53 = vsel %vm2098_vm9, %v1124_v23, 0.0  ;;  %v1333_v43 = vsel %vm1325_vm11, %v1280_v2, 0.0 }
 0x1e0   : > { %1321 = vst.msk [vmem:[%s2139_s14 + $0x10] sm:$0xf] %vm1316_vm10, %v1548_v5  ;;  %v1281_v56 = vadd.f32 %v2131_v35, %v1266_v61  ;;  %v1171_v50 = vadd.f32 %v1163_v53, %v1094_v14  ;;  %v1334_v27 = vadd.f32 %v1333_v43, %v1332_v48  ;;  %v1362_v55 = vsel %vm1325_vm11, %v1351_v37, 0.0 }
 0x1e1   : > { %v1363_v29 = vadd.f32 %v1362_v55, %v1361_v3  ;;  %v1229_v16 = vadd.f32 %v1212_v28, %v1170_v41  ;;  %v1214_v17 = vpop.permute.xlu1 %1213 }
 0x1e2   : > { %v1549_v20 = vpack.c.bf16 %v1281_v56, %v1281_v56  ;;  %v1335_v30 = vsel %vm1325_vm11, %v1281_v56, 0.0  ;;  %v1352_v1 = vmul.f32 %v1281_v56, %v1281_v56  ;;  %v1230_v26 = vadd.f32 %v1214_v17, %v1171_v50 }
 0x1e3   : > { %v1336_v32 = vadd.f32 %v1335_v30, %v1334_v27  ;;  %v1282_v36 = vadd.f32 %v2131_v35, %v1229_v16 }
 0x1e4   : > { %1322 = vst.msk [vmem:[%s2139_s14 + $0x14] sm:$0xf] %vm1316_vm10, %v1549_v20  ;;  %v1364_v42 = vsel %vm1325_vm11, %v1352_v1, 0.0  ;;  %v1283_v62 = vadd.f32 %v2131_v35, %v1230_v26 }
 0x1e5   : > { %v1365_v19 = vadd.f32 %v1364_v42, %v1363_v29  ;;  %v1550_v44 = vpack.c.bf16 %v1282_v36, %v1282_v36  ;;  %v1337_v46 = vsel %vm1325_vm11, %v1282_v36, 0.0  ;;  %v1353_v48 = vmul.f32 %v1282_v36, %v1282_v36 }
 0x1e6   : > { %v1338_v63 = vadd.f32 %v1337_v46, %v1336_v32  ;;  %v1551_v49 = vpack.c.bf16 %v1283_v62, %v1283_v62  ;;  %v1339_v24 = vsel %vm1325_vm11, %v1283_v62, 0.0  ;;  %v1354_v51 = vmul.f32 %v1283_v62, %v1283_v62 }
 0x1e7   : > { %1323 = vst.msk [vmem:[%s2139_s14 + $0x18] sm:$0xf] %vm1316_vm10, %v1550_v44  ;;  %v1366_v54 = vsel %vm1325_vm11, %v1353_v48, 0.0 }
 0x1e8   : > { %v1367_v57 = vadd.f32 %v1366_v54, %v1365_v19  ;;  %1324 = vst.msk [vmem:[%s2139_s14 + $0x1c] sm:$0xf] %vm1316_vm10, %v1551_v49  ;;  %v1340_v34 = vadd.f32 %v1339_v24, %v1338_v63  ;;  %v1368_v35 = vsel %vm1325_vm11, %v1354_v51, 0.0 }
 0x1ea   : > { %v1341_v3 = vrot.slane %v1340_v34, 4  ;;  %v1369_v25 = vadd.f32 %v1368_v35, %v1367_v57 }
 0x1ec   : > { %v1342_v15 = vadd.f32 %v1341_v3, %v1340_v34  ;;  %v1370_v58 = vrot.slane %v1369_v25, 4 }
 0x1ee   : > { %v1343_v0 = vrot.slane %v1342_v15, 2  ;;  %v1371_v31 = vadd.f32 %v1370_v58, %v1369_v25 }
 0x1f0   : > { %v1344_v11 = vadd.f32 %v1343_v0, %v1342_v15  ;;  %v1372_v6 = vrot.slane %v1371_v31, 2 }
 0x1f2   : > { %v1345_v38 = vrot.slane %v1344_v11, 1  ;;  %v1373_v33 = vadd.f32 %v1372_v6, %v1371_v31 }
 0x1f4   : > { %v1374_v13 = vrot.slane %v1373_v33, 1  ;;  %v1346_v7 = vadd.f32 %v1345_v38, %v1344_v11 }
 0x1f6   : > { %v1375_v4 = vadd.f32 %v1374_v13, %v1373_v33 }
 0x1f8   : > { %v1376_v9 = vsel %vm879_vm1, %v1346_v7, %v1375_v4 }
 0x1f9   : > { %1378 = vst.msk [vmem:[%s262_s18] sm:$0x3] %vm1377_vm12, %v1376_v9 }
 0x1fa PF: > { %s17_s21 = sadd.s32 1, %s1686_s21  }
 0x1fb   : > { %p14_p4 = scmp.ge.s32.totalorder %s17_s21, 4  }
 0x1fd   :  { %16 = sbr.rel (!%p14_p4) target bundleno = 1 (0x1), region = 82 }

// kernel: edge_conv_forward.13
= control target key start
LH: loop header
LB: loop body
LE: loop exit
PB: predicated region body
PF: predicated region fallthrough
CT: control target
= control target key end

     0   :  { %s1029_s21 = smov 0   ;;  %s1217_s0 = inlined_call_operand.vmem [shape: bf16[2,64,32], index: 0, kind: input, shape index: {}]   ;;  %s1218_s1 = inlined_call_operand.vmem [shape: bf16[32,192], index: 1, kind: input, shape index: {}]   ;;  %s1219_s2 = inlined_call_operand.vmem [shape: f32[1,64], index: 2, kind: input, shape index: {}]   ;;  %s1220_s3 = inlined_call_operand.vmem [shape: f32[1,32], index: 3, kind: input, shape index: {}]   ;;  %s1221_s4 = inlined_call_operand.vmem [shape: f32[1,32], index: 4, kind: input, shape index: {}]   ;;  %s1222_s5 = inlined_call_operand.vmem [shape: bf16[2,64,64], index: 5, kind: output, shape index: {0}]   ;;  %s1223_s6 = inlined_call_operand.vmem [shape: f32[2,2,64], index: 6, kind: output, shape index: {1}]  }
   0x1 LB: > { %s904_s22 = sadd.s32 4294967295, %s990_s21   ;;  %p908_p0 = scmp.ge.s32.totalorder %s990_s21, 1  ;;  %s990_s21 = sphi %s1029_s21, %s17_s21  }
   0x2   : > { %p215_p1 = scmp.lt.s32.totalorder %s990_s21, 3 }
   0x4   : > { %p216_p2 = pnand %p908_p0, %p215_p1 }
   0x5   : > { %v978_v0 = vld [vmem:[%s1218_s1 + $0x4] ss:$8 sps:$4 sm:$0xff] (!%p216_p2)   ;;  %p249_p3 = scmp.lt.s32.totalorder (!%p216_p2), %s904_s22, 1  ;;  %v980_v1 = vld [vmem:[%s1218_s1] ss:$8 sps:$4 sm:$0xff] (!%p216_p2)   ;;  %v992_v2 = vmov (!%p216_p2), 0  }
   0x6   : > { %219 = sbr.rel (%p216_p2) target bundleno = 400 (0x190), region = 40  ;;  %391 = vmatprep.mubr.bf16.mxu0 (!%p216_p2), %v992_v2  ;;  %411 = vmatprep.mubr.bf16.mxu1 (!%p216_p2), %v992_v2  ;;  %v981_v3 = vld [vmem:[%s1218_s1 + $0x14] ss:$8 sps:$4 sm:$0xff] (!%p216_p2)   ;;  %v983_v4 = vld [vmem:[%s1218_s1 + $0x10] ss:$8 sps:$4 sm:$0xff] (!%p216_p2)   ;;  %vm346_vm0 = vcmask (!%p216_p2), 261120  }
   0x7   : > { %359 = vmatprep.subr.bf16.mxu0 (!%p216_p2), %v978_v0  ;;  %964 = vmatprep.subr.bf16.mxu1 (!%p216_p2), %v978_v0  ;;  %v914_v5 = vld [vmem:[%s1220_s3] ss:$0 sm:$0xff] (!%p216_p2)  ;;  %s993_s15 = smov (!%p216_p2), 64   ;;  %vm642_vm1 = vcmask (!%p216_p2), 1042432   ;;  %vm545_vm2 = vcmask (!%p216_p2), 1044480   ;;  %vm754_vm7 = vcmask (!%p216_p2), 519168  }
   0x8   : > { %360 = vmatpush1.bf16.msra.mxu0 (!%p216_p2), %v980_v1  ;;  %966 = vmatpush1.bf16.msra.mxu1 (!%p216_p2), %v980_v1  ;;  %v915_v14 = vld [vmem:[%s1221_s4] ss:$0 sm:$0xff] (!%p216_p2)  ;;  %vm763_vm8 = vcmask (!%p216_p2), 523264   ;;  %vm814_vm13 = vcmask (!%p216_p2), 1040384   ;;  %vm816_vm14 = vcmask (!%p216_p2), 517120  }
   0x9   : > { %361 = vmatprep.subr.bf16.mxu0 (!%p216_p2), %v981_v3  ;;  %965 = vmatprep.subr.bf16.mxu1 (!%p216_p2), %v981_v3 }
   0xc   : > { %362 = vmatpush1.bf16.msra.mxu0 (!%p216_p2), %v983_v4  ;;  %967 = vmatpush1.bf16.msra.mxu1 (!%p216_p2), %v983_v4 }
   0xd   : > { %s1237_s22 = smov (!%p249_p3, %s904_s22), 1 }
   0xe   : > { %s935_s7 = sshll.u32 %s1237_s22, 5  ;;  %s913_s23 = sshll.u32 %s1237_s22, 1 }
   0xf   : > { %s253_s10 = scalar_lea.vmem %s1217_s0, %s935_s7  ;;  %s1130_s20 = scalar_lea.vmem %s1222_s5, %s935_s7 }
  0x10   : > { %v946_v6 = vld [vmem:[%s253_s10] sm:$0xff]   ;;  %v962_v7 = vld [vmem:[%s253_s10 + $0x10] sm:$0xff]   ;;  %v961_v8 = vld [vmem:[%s253_s10 + $0x8] sm:$0xff]   ;;  %s262_s26 = scalar_lea.vmem %s1223_s6, %s913_s23 }
  0x11   : > { %v947_v9 = vunpack.c.l.bf16 %v946_v6  ;;  %v948_v10 = vunpack.c.h.bf16 %v946_v6  ;;  %v955_v11 = vunpack.c.l.bf16 %v962_v7  ;;  %v956_v12 = vunpack.c.h.bf16 %v962_v7  ;;  %v963_v13 = vld [vmem:[%s253_s10 + $0x18] sm:$0xff]  }
  0x12   : > { %v951_v15 = vunpack.c.l.bf16 %v961_v8  ;;  %v952_v16 = vunpack.c.h.bf16 %v961_v8  ;;  %v959_v17 = vunpack.c.l.bf16 %v963_v13  ;;  %v960_v18 = vunpack.c.h.bf16 %v963_v13 }
  0x13   : > { %v287_v19 = vmul.f32 %v947_v9, %v914_v5  ;;  %v288_v20 = vmul.f32 %v948_v10, %v914_v5  ;;  %v291_v21 = vmul.f32 %v955_v11, %v914_v5  ;;  %v292_v22 = vmul.f32 %v956_v12, %v914_v5 }
  0x14   : > { %v289_v23 = vmul.f32 %v951_v15, %v914_v5  ;;  %v290_v24 = vmul.f32 %v952_v16, %v914_v5  ;;  %v293_v25 = vmul.f32 %v959_v17, %v914_v5  ;;  %v294_v26 = vmul.f32 %v960_v18, %v914_v5 }
  0x15   : > { %v302_v27 = vadd.f32 %v915_v14, %v287_v19  ;;  %v303_v28 = vadd.f32 %v915_v14, %v288_v20  ;;  %v306_v29 = vadd.f32 %v915_v14, %v291_v21  ;;  %v307_v30 = vadd.f32 %v915_v14, %v292_v22 }
  0x16   : > { %v304_v31 = vadd.f32 %v915_v14, %v289_v23  ;;  %v305_v32 = vadd.f32 %v915_v14, %v290_v24  ;;  %v308_v33 = vadd.f32 %v915_v14, %v293_v25  ;;  %v309_v34 = vadd.f32 %v915_v14, %v294_v26 }
  0x17   : > { %v310_v35 = vmax.f32 %v302_v27, 0.0  ;;  %v311_v36 = vmax.f32 %v303_v28, 0.0  ;;  %v314_v37 = vmax.f32 %v306_v29, 0.0  ;;  %v315_v38 = vmax.f32 %v307_v30, 0.0 }
  0x18   : > { %v312_v41 = vmax.f32 %v304_v31, 0.0  ;;  %v313_v42 = vmax.f32 %v305_v32, 0.0  ;;  %v316_v43 = vmax.f32 %v308_v33, 0.0  ;;  %v317_v44 = vmax.f32 %v309_v34, 0.0 }
  0x19   : > { %v318_v39 = vpack.c.bf16 %v311_v36, %v310_v35  ;;  %v320_v40 = vpack.c.bf16 %v315_v38, %v314_v37  ;;  %v432_v29 = vlaneseq }
  0x1a   : > { %v319_v45 = vpack.c.bf16 %v313_v42, %v312_v41  ;;  %v321_v46 = vpack.c.bf16 %v317_v44, %v316_v43  ;;  %v1114_v43 = vld [vmem:[%s1219_s2] ss:$0 sm:$0xff] }
  0x1b   : > { %920 = vmatmul.mubr.msk.bf16.vlgmr.msra.gmra.mrb[0].mxu0 %vm346_vm0, %v318_v39  ;;  %922 = vmatmul.mubr.msk.bf16.vlgmr.msra.gmra.mrb[0].mxu1 %vm346_vm0, %v320_v40  ;;  %v433_v30 = vshrl.u32 %v432_v29, 7 }
  0x1c   : > { %401 = vmatprep.mubr.bf16.mxu0 %v992_v2  ;;  %421 = vmatprep.mubr.bf16.mxu1 %v992_v2 }
  0x1d   : > { %v445_v31 = vand.u32 15, %v433_v30  ;;  %v434_v32 = vadd.s32 8, %v433_v30  ;;  %v435_v33 = vadd.s32 16, %v433_v30  ;;  %v437_v35 = vadd.s32 32, %v433_v30 }
  0x1e   : > { %v439_v42 = vadd.s32 48, %v433_v30  ;;  %v436_v44 = vadd.s32 24, %v433_v30 }
  0x1f   : > { %vm570_vm3 = vcmp.ge.s32.totalorder %v445_v31, 5  ;;  %v452_v36 = vand.u32 15, %v434_v32  ;;  %v459_v39 = vand.u32 15, %v435_v33  ;;  %v473_v41 = vand.u32 15, %v437_v35 }
  0x21   : > { %vm668_vm4 = vcmp.lt.s32.totalorder %v452_v36, 11  ;;  %vm1116_vm5 = vcmp.ge.s32.totalorder %v459_v39, 5  ;;  %vm1121_vm6 = vcmp.ge.s32.totalorder %v473_v41, 5 }
  0x23   : > { %921 = vmatmul.mubr.msk.bf16.gmra.mrb[4].mxu0 %vm346_vm0, %v319_v45  ;;  %923 = vmatmul.mubr.msk.bf16.gmra.mrb[4].mxu1 %vm346_vm0, %v321_v46 }
  0xee   : > { %v1063_v47 = vpop.f32.mrb[0].mxu0  ;;  %v413_v48 = vpop.f32.mrb[0].mxu1 }
  0xef   : > { %602 = vrot.lane.b32.xlu0 %v1063_v47, %s993_s15  ;;  %v395_v49 = vpop.f32.mrb[1].mxu0  ;;  %v553_v50 = vrot.slane %v413_v48, 3  ;;  %v415_v51 = vpop.f32.mrb[1].mxu1  ;;  %v546_v55 = vrot.slane %v1063_v47, 3 }
  0xf0   : > { %v397_v52 = vpop.f32.mrb[2].mxu0  ;;  %v650_v53 = vrot.slane %v415_v51, 5  ;;  %v417_v54 = vpop.f32.mrb[2].mxu1  ;;  %v643_v60 = vrot.slane %v395_v49, 5  ;;  %v487_v51 = vand.u32 15, %v439_v42 }
  0xf1   : > { %v547_v56 = vrot.slane %v397_v52, 3  ;;  %v399_v57 = vpop.f32.mrb[3].mxu0  ;;  %v555_v58 = vrot.slane %v417_v54, 3  ;;  %v419_v59 = vpop.f32.mrb[3].mxu1  ;;  %v569_v34 = vsel %vm545_vm2, 0.0, %v546_v55 }
  0xf2   : > { %v644_v61 = vrot.slane %v399_v57, 5  ;;  %v652_v62 = vrot.slane %v419_v59, 5  ;;  %v594_v38 = vsel %vm570_vm3, %v569_v34, 0.0  ;;  %vm1139_vm9 = vcmp.ge.s32.totalorder %v487_v51, 5 }
  0xf3   : > { %604 = vrot.lane.b32.xlu0 %v397_v52, %s993_s15  ;;  %v548_v63 = vsel %vm545_vm2, %v546_v55, %v547_v56  ;;  %v1071_v0 = vsel %vm545_vm2, %v553_v50, %v555_v58 }
  0xf4   : > { %v645_v1 = vsel %vm642_vm1, %v643_v60, %v644_v61  ;;  %v1075_v2 = vsel %vm642_vm1, %v650_v53, %v652_v62 }
  0xf6   : > { %v403_v3 = vpop.f32.mrb[4].mxu0  ;;  %v423_v4 = vpop.f32.mrb[4].mxu1 }
  0xf7   : > { %v549_v5 = vrot.slane %v403_v3, 3  ;;  %v557_v6 = vrot.slane %v423_v4, 3  ;;  %610 = vrot.lane.b32.xlu0 %v413_v48, %s993_s15  ;;  %606 = vrot.lane.b32.xlu1 %v403_v3, %s993_s15  ;;  %v405_v7 = vpop.f32.mrb[5].mxu0  ;;  %v425_v8 = vpop.f32.mrb[5].mxu1 }
  0xf8   : > { %v646_v9 = vrot.slane %v405_v7, 5  ;;  %v407_v10 = vpop.f32.mrb[6].mxu0  ;;  %v427_v11 = vpop.f32.mrb[6].mxu1  ;;  %v654_v13 = vrot.slane %v425_v8, 5 }
  0xf9   : > { %v551_v12 = vrot.slane %v407_v10, 3  ;;  %v409_v14 = vpop.f32.mrb[7].mxu0  ;;  %v1079_v15 = vpop.f32.mrb[7].mxu1  ;;  %v550_v16 = vsel %vm545_vm2, %v547_v56, %v549_v5  ;;  %v1083_v17 = vsel %vm545_vm2, %v555_v58, %v557_v6  ;;  %v559_v19 = vrot.slane %v427_v11, 3 }
  0xfa   : > { %v648_v18 = vrot.slane %v409_v14, 5  ;;  %v656_v20 = vrot.slane %v1079_v15, 5  ;;  %v647_v21 = vsel %vm642_vm1, %v644_v61, %v646_v9  ;;  %v1103_v27 = vsel %vm642_vm1, %v652_v62, %v654_v13 }
  0xfb   : > { %614 = vrot.lane.b32.xlu0 %v423_v4, %s993_s15  ;;  %608 = vrot.lane.b32.xlu1 %v407_v10, %s993_s15  ;;  %v554_v22 = vsel %vm545_vm2, %v551_v12, %v553_v50  ;;  %v1091_v23 = vsel %vm545_vm2, %v549_v5, %v551_v12  ;;  %v1106_v28 = vsel %vm545_vm2, %v557_v6, %v559_v19  ;;  %v692_v52 = vsel %vm668_vm4, %v647_v21, 0.0 }
  0xfc   : > { %v1094_v24 = vsel %vm642_vm1, %v648_v18, %v650_v53  ;;  %v649_v25 = vsel %vm642_vm1, %v646_v9, %v648_v18  ;;  %v1100_v26 = vsel %vm642_vm1, %v654_v13, %v656_v20  ;;  %v466_v53 = vand.u32 15, %v436_v44 }
  0xfd   : > { %v598_v59 = vsel %vm1121_vm6, %v554_v22, 0.0  ;;  %v596_v61 = vsel %vm1116_vm5, %v550_v16, 0.0  ;;  %v440_v4 = vadd.s32 56, %v433_v30  ;;  %v600_v16 = vsel %vm1139_vm9, %v1083_v17, 0.0 }
  0xfe   : > { %vm1144_vm10 = vcmp.lt.s32.totalorder %v466_v53, 11 }
  0xff   : > { %612 = vrot.lane.b32.xlu1 %v417_v54, %s993_s15  ;;  %v438_v54 = vadd.s32 40, %v433_v30  ;;  %v494_v30 = vand.u32 15, %v440_v4  ;;  %v694_v33 = vsel %vm1144_vm10, %v1094_v24, 0.0  ;;  %v666_v24 = vsel %vm642_vm1, %v656_v20, 0.0 }
 0x101   : > { %v480_v7 = vand.u32 15, %v438_v54  ;;  %vm1176_vm12 = vcmp.lt.s32.totalorder %v494_v30, 11 }
 0x102   : > { %v698_v53 = vsel %vm1176_vm12, %v666_v24, 0.0 }
 0x103   : > { %616 = vrot.lane.b32.xlu1 %v427_v11, %s993_s15  ;;  %vm1164_vm11 = vcmp.lt.s32.totalorder %v480_v7, 11 }
 0x161   : > { %v603_v37 = vpop.permute.xlu0 %602 }
 0x162   : > { %v626_v40 = vadd.f32 %v603_v37, %v594_v38 }
 0x164   : > { %v699_v45 = vadd.f32 %v645_v1, %v626_v40 }
 0x165   : > { %v605_v46 = vpop.permute.xlu0 %604 }
 0x166   : > { %v714_v48 = vadd.f32 %v1114_v43, %v699_v45  ;;  %v627_v49 = vadd.f32 %v605_v46, %v548_v63 }
 0x168   : > { %v937_v55 = vpack.c.bf16 %v714_v48, %v714_v48  ;;  %v700_v56 = vadd.f32 %v692_v52, %v627_v49  ;;  %v785_v57 = vmul.f32 %v714_v48, %v714_v48  ;;  %v764_v5 = vsel %vm763_vm8, %v714_v48, 0.0 }
 0x169   : > { %v611_v58 = vpop.permute.xlu0 %610  ;;  %v607_v60 = vpop.permute.xlu1 %606 }
 0x16a   : > { %755 = vst.msk [vmem:[%s1130_s20] sm:$0xf] %vm754_vm7, %v937_v55  ;;  %v715_v62 = vadd.f32 %v1114_v43, %v700_v56  ;;  %v630_v63 = vadd.f32 %v611_v58, %v598_v59  ;;  %v628_v1 = vadd.f32 %v607_v60, %v596_v61  ;;  %v793_v12 = vsel %vm763_vm8, %v785_v57, 0.0 }
 0x16c   : > { %v938_v8 = vpack.c.bf16 %v715_v62, %v715_v62  ;;  %v765_v9 = vsel %vm763_vm8, %v715_v62, 0.0  ;;  %v786_v10 = vmul.f32 %v715_v62, %v715_v62  ;;  %v703_v11 = vadd.f32 %v1075_v2, %v630_v63 }
 0x16d   : > { %v766_v13 = vadd.f32 %v765_v9, %v764_v5  ;;  %v701_v14 = vadd.f32 %v649_v25, %v628_v1  ;;  %v615_v18 = vpop.permute.xlu0 %614  ;;  %v609_v19 = vpop.permute.xlu1 %608 }
 0x16e   : > { %756 = vst.msk [vmem:[%s1130_s20 + $0x4] sm:$0xf] %vm754_vm7, %v938_v8  ;;  %v794_v21 = vsel %vm763_vm8, %v786_v10, 0.0  ;;  %v718_v22 = vadd.f32 %v1114_v43, %v703_v11  ;;  %v632_v29 = vadd.f32 %v615_v18, %v600_v16  ;;  %v629_v2 = vadd.f32 %v609_v19, %v1091_v23 }
 0x16f   : > { %v795_v31 = vadd.f32 %v794_v21, %v793_v12  ;;  %v716_v25 = vadd.f32 %v1114_v43, %v701_v14 }
 0x170   : > { %v941_v32 = vpack.c.bf16 %v718_v22, %v718_v22  ;;  %v705_v17 = vadd.f32 %v1100_v26, %v632_v29  ;;  %v702_v37 = vadd.f32 %v694_v33, %v629_v2  ;;  %v789_v45 = vmul.f32 %v718_v22, %v718_v22 }
 0x171   : > { %v939_v35 = vpack.c.bf16 %v716_v25, %v716_v25  ;;  %v767_v36 = vsel %vm763_vm8, %v716_v25, 0.0  ;;  %v787_v23 = vmul.f32 %v716_v25, %v716_v25  ;;  %v613_v38 = vpop.permute.xlu1 %612  ;;  %v771_v54 = vsel %vm763_vm8, %v718_v22, 0.0 }
 0x172   : > { %759 = vst.msk [vmem:[%s1130_s20 + $0x10] sm:$0xf] %vm754_vm7, %v941_v32  ;;  %v768_v39 = vadd.f32 %v767_v36, %v766_v13  ;;  %v720_v40 = vadd.f32 %v1114_v43, %v705_v17  ;;  %v631_v26 = vadd.f32 %v613_v38, %v1071_v0  ;;  %v717_v44 = vadd.f32 %v1114_v43, %v702_v37 }
 0x173   : > { %757 = vst.msk [vmem:[%s1130_s20 + $0x8] sm:$0xf] %vm754_vm7, %v939_v35  ;;  %v796_v42 = vsel %vm763_vm8, %v787_v23, 0.0  ;;  %v696_v0 = vsel %vm1164_vm11, %v1103_v27, 0.0  ;;  %v800_v56 = vsel %vm763_vm8, %v789_v45, 0.0 }
 0x174   : > { %v797_v46 = vadd.f32 %v796_v42, %v795_v31  ;;  %v943_v47 = vpack.c.bf16 %v720_v40, %v720_v40  ;;  %v940_v15 = vpack.c.bf16 %v717_v44, %v717_v44  ;;  %v769_v20 = vsel %vm763_vm8, %v717_v44, 0.0 }
 0x175   : > { %v788_v48 = vmul.f32 %v717_v44, %v717_v44  ;;  %v704_v49 = vadd.f32 %v696_v0, %v631_v26  ;;  %v617_v50 = vpop.permute.xlu1 %616  ;;  %v770_v51 = vadd.f32 %v769_v20, %v768_v39  ;;  %v791_v60 = vmul.f32 %v720_v40, %v720_v40 }
 0x176   : > { %761 = vst.msk [vmem:[%s1130_s20 + $0x18] sm:$0xf] %vm754_vm7, %v943_v47  ;;  %v633_v52 = vadd.f32 %v617_v50, %v1106_v28  ;;  %758 = vst.msk [vmem:[%s1130_s20 + $0xc] sm:$0xf] %vm754_vm7, %v940_v15  ;;  %v775_v4 = vsel %vm763_vm8, %v720_v40, 0.0 }
 0x177   : > { %v798_v27 = vsel %vm763_vm8, %v788_v48, 0.0  ;;  %v719_v55 = vadd.f32 %v1114_v43, %v704_v49  ;;  %v772_v58 = vadd.f32 %v771_v54, %v770_v51  ;;  %v804_v10 = vsel %vm763_vm8, %v791_v60, 0.0 }
 0x178   : > { %v799_v57 = vadd.f32 %v798_v27, %v797_v46  ;;  %v706_v59 = vadd.f32 %v698_v53, %v633_v52 }
 0x179   : > { %v942_v28 = vpack.c.bf16 %v719_v55, %v719_v55  ;;  %v773_v61 = vsel %vm763_vm8, %v719_v55, 0.0  ;;  %v790_v62 = vmul.f32 %v719_v55, %v719_v55 }
 0x17a   : > { %v774_v63 = vadd.f32 %v773_v61, %v772_v58  ;;  %v801_v1 = vadd.f32 %v800_v56, %v799_v57  ;;  %v721_v3 = vadd.f32 %v1114_v43, %v706_v59 }
 0x17b   : > { %760 = vst.msk [vmem:[%s1130_s20 + $0x14] sm:$0xf] %vm754_vm7, %v942_v28  ;;  %v802_v5 = vsel %vm763_vm8, %v790_v62, 0.0 }
 0x17c   : > { %v803_v6 = vadd.f32 %v802_v5, %v801_v1  ;;  %v944_v7 = vpack.c.bf16 %v721_v3, %v721_v3  ;;  %v776_v8 = vadd.f32 %v775_v4, %v774_v63  ;;  %v777_v9 = vsel %vm763_vm8, %v721_v3, 0.0 }
 0x17d   : > { %v792_v11 = vmul.f32 %v721_v3, %v721_v3 }
 0x17e   : > { %762 = vst.msk [vmem:[%s1130_s20 + $0x1c] sm:$0xf] %vm754_vm7, %v944_v7  ;;  %v778_v12 = vadd.f32 %v777_v9, %v776_v8  ;;  %v805_v13 = vadd.f32 %v804_v10, %v803_v6 }
 0x17f   : > { %v806_v43 = vsel %vm763_vm8, %v792_v11, 0.0 }
 0x180   : > { %v779_v14 = vrot.slane %v778_v12, 4  ;;  %v807_v16 = vadd.f32 %v806_v43, %v805_v13 }
 0x182   : > { %v780_v18 = vadd.f32 %v779_v14, %v778_v12  ;;  %v808_v19 = vrot.slane %v807_v16, 4 }
 0x184   : > { %v781_v21 = vrot.slane %v780_v18, 2  ;;  %v809_v22 = vadd.f32 %v808_v19, %v807_v16 }
 0x186   : > { %v782_v29 = vadd.f32 %v781_v21, %v780_v18  ;;  %v810_v2 = vrot.slane %v809_v22, 2 }
 0x188   : > { %v783_v30 = vrot.slane %v782_v29, 1  ;;  %v811_v31 = vadd.f32 %v810_v2, %v809_v22 }
 0x18a   : > { %v812_v25 = vrot.slane %v811_v31, 1  ;;  %v784_v32 = vadd.f32 %v783_v30, %v782_v29 }
 0x18c   : > { %v813_v17 = vadd.f32 %v812_v25, %v811_v31 }
 0x18e   : > { %v815_v33 = vsel %vm814_vm13, %v784_v32, %v813_v17 }
 0x18f   : > { %817 = vst.msk [vmem:[%s262_s26] sm:$0x3] %vm816_vm14, %v815_v33 }
 0x190 PF: > { %s17_s21 = sadd.s32 1, %s990_s21  }
 0x191   : > { %p14_p4 = scmp.ge.s32.totalorder %s17_s21, 4  }
 0x193   :  { %16 = sbr.rel (!%p14_p4) target bundleno = 1 (0x1), region = 82 }

// kernel: edge_conv_forward.12
= control target key start
LH: loop header
LB: loop body
LE: loop exit
PB: predicated region body
PF: predicated region fallthrough
CT: control target
= control target key end

     0   :  { %s1321_s21 = smov 0   ;;  %s1698_s0 = inlined_call_operand.vmem [shape: bf16[2,64,32], index: 0, kind: input, shape index: {}]   ;;  %s1699_s1 = inlined_call_operand.vmem [shape: bf16[32,288], index: 1, kind: input, shape index: {}]   ;;  %s1700_s2 = inlined_call_operand.vmem [shape: f32[1,32], index: 2, kind: input, shape index: {}]   ;;  %s1701_s3 = inlined_call_operand.vmem [shape: f32[1,32], index: 3, kind: input, shape index: {}]   ;;  %s1702_s4 = inlined_call_operand.vmem [shape: f32[1,32], index: 4, kind: input, shape index: {}]   ;;  %s1703_s5 = inlined_call_operand.vmem [shape: bf16[2,64,32], index: 5, kind: output, shape index: {0}]   ;;  %s1704_s6 = inlined_call_operand.vmem [shape: f32[2,2,32], index: 6, kind: output, shape index: {1}]  }
   0x1 LB: > { %s1164_s22 = sadd.s32 4294967295, %s1279_s21   ;;  %p1168_p0 = scmp.ge.s32.totalorder %s1279_s21, 1  ;;  %s1279_s21 = sphi %s1321_s21, %s17_s21  }
   0x2   : > { %p215_p1 = scmp.lt.s32.totalorder %s1279_s21, 3 }
   0x4   : > { %p216_p2 = pnand %p1168_p0, %p215_p1 }
   0x5   : > { %v1265_v0 = vld [vmem:[%s1699_s1 + $0x4] ss:$12 sps:$4 sm:$0xff] (!%p216_p2)   ;;  %p249_p3 = scmp.lt.s32.totalorder (!%p216_p2), %s1164_s22, 1  ;;  %v1267_v1 = vld [vmem:[%s1699_s1] ss:$12 sps:$4 sm:$0xff] (!%p216_p2)   ;;  %v1281_v2 = vmov (!%p216_p2), 0   ;;  %v509_v50 = vlaneseq (!%p216_p2) }
   0x6   : > { %219 = sbr.rel (%p216_p2) target bundleno = 444 (0x1bc), region = 40  ;;  %407 = vmatprep.mubr.bf16.mxu0 (!%p216_p2), %v1281_v2  ;;  %437 = vmatprep.mubr.bf16.mxu1 (!%p216_p2), %v1281_v2  ;;  %v1268_v3 = vld [vmem:[%s1699_s1 + $0x1c] ss:$12 sps:$4 sm:$0xff] (!%p216_p2)   ;;  %v1270_v4 = vld [vmem:[%s1699_s1 + $0x18] ss:$12 sps:$4 sm:$0xff] (!%p216_p2)   ;;  %v1282_v7 = vmov (!%p216_p2), 0.0  }
   0x7   : > { %375 = vmatprep.subr.bf16.mxu0 (!%p216_p2), %v1265_v0  ;;  %1248 = vmatprep.subr.bf16.mxu1 (!%p216_p2), %v1265_v0  ;;  %v1271_v5 = vld [vmem:[%s1699_s1 + $0x8] ss:$12 sps:$4 sm:$0xff] (!%p216_p2)   ;;  %v1174_v6 = vld [vmem:[%s1701_s3] ss:$0 sm:$0xff] (!%p216_p2)  ;;  %s1283_s15 = smov (!%p216_p2), 96   ;;  %s1284_s18 = smov (!%p216_p2), 64  }
   0x8   : > { %376 = vmatpush1.bf16.msra.mxu0 (!%p216_p2), %v1267_v1  ;;  %1250 = vmatpush1.bf16.msra.mxu1 (!%p216_p2), %v1267_v1  ;;  %v1175_v16 = vld [vmem:[%s1702_s4] ss:$0 sm:$0xff] (!%p216_p2)  ;;  %vm362_vm0 = vcmask (!%p216_p2), 261120   ;;  %v1375_v51 = vshrl.u32 (!%p216_p2), %v509_v50, 7  ;;  %s1285_s23 = smov (!%p216_p2), 32   ;;  %vm618_vm1 = vcmask (!%p216_p2), 1041408  }
   0x9   : > { %377 = vmatprep.subr.bf16.mxu0 (!%p216_p2), %v1268_v3  ;;  %1249 = vmatprep.subr.bf16.mxu1 (!%p216_p2), %v1268_v3  ;;  %v1272_v41 = vld [vmem:[%s1699_s1 + $0x20] ss:$12 sps:$4 sm:$0xff] (!%p216_p2)   ;;  %vm814_vm2 = vcmask (!%p216_p2), 1045504   ;;  %vm1015_vm11 = vcmask (!%p216_p2), 257024   ;;  %vm1074_vm12 = vcmask (!%p216_p2), 1040384   ;;  %vm1076_vm13 = vcmask (!%p216_p2), 254976  }
   0xa   : > { %795 = vrot.lane.b32.xlu1 (!%p216_p2), %v1282_v7, %s1283_s15  ;;  %739 = vrot.lane.b32.xlu0 (!%p216_p2), %v1282_v7, %s1284_s18  ;;  %v516_v57 = vadd.s32 (!%p216_p2), 48, %v1375_v51 }
   0xc   : > { %378 = vmatpush1.bf16.msra.mxu0 (!%p216_p2), %v1270_v4  ;;  %1251 = vmatpush1.bf16.msra.mxu1 (!%p216_p2), %v1270_v4  ;;  %v564_v7 = vand.u32 (!%p216_p2), 15, %v516_v57 }
   0xd   : > { %s1722_s22 = smov (!%p249_p3, %s1164_s22), 1  ;;  %1236 = vmatprep.subr.bf16.mxu1 %v1271_v5 }
   0xe   : > { %s1201_s7 = sshll.u32 %s1722_s22, 5  ;;  %vm1426_vm3 = vcmp.ge.s32.totalorder %v564_v7, 2  ;;  %s1173_s29 = sshll.u32 %s1722_s22, 1 }
   0xf   : > { %s253_s12 = scalar_lea.vmem %s1698_s0, %s1201_s7  ;;  %s1610_s28 = scalar_lea.vmem %s1703_s5, %s1201_s7 }
  0x10   : > { %v1212_v8 = vld [vmem:[%s253_s12] sm:$0xff]   ;;  %v1229_v9 = vld [vmem:[%s253_s12 + $0x18] sm:$0xff]   ;;  %v1227_v10 = vld [vmem:[%s253_s12 + $0x8] sm:$0xff]   ;;  %s262_s8 = scalar_lea.vmem %s1704_s6, %s1173_s29 }
  0x11   : > { %v1213_v11 = vunpack.c.l.bf16 %v1212_v8  ;;  %v1214_v12 = vunpack.c.h.bf16 %v1212_v8  ;;  %v1225_v13 = vunpack.c.l.bf16 %v1229_v9  ;;  %v1226_v14 = vunpack.c.h.bf16 %v1229_v9  ;;  %v1228_v15 = vld [vmem:[%s253_s12 + $0x10] sm:$0xff]  }
  0x12   : > { %v1217_v17 = vunpack.c.l.bf16 %v1227_v10  ;;  %v1218_v18 = vunpack.c.h.bf16 %v1227_v10  ;;  %v1221_v19 = vunpack.c.l.bf16 %v1228_v15  ;;  %v1222_v20 = vunpack.c.h.bf16 %v1228_v15 }
  0x13   : > { %v287_v21 = vmul.f32 %v1213_v11, %v1174_v6  ;;  %v288_v22 = vmul.f32 %v1214_v12, %v1174_v6  ;;  %v293_v23 = vmul.f32 %v1225_v13, %v1174_v6  ;;  %v294_v24 = vmul.f32 %v1226_v14, %v1174_v6 }
  0x14   : > { %v289_v25 = vmul.f32 %v1217_v17, %v1174_v6  ;;  %v290_v26 = vmul.f32 %v1218_v18, %v1174_v6  ;;  %v291_v33 = vmul.f32 %v1221_v19, %v1174_v6  ;;  %v292_v34 = vmul.f32 %v1222_v20, %v1174_v6 }
  0x15   : > { %v302_v27 = vadd.f32 %v1175_v16, %v287_v21  ;;  %v303_v28 = vadd.f32 %v1175_v16, %v288_v22  ;;  %v308_v29 = vadd.f32 %v1175_v16, %v293_v23  ;;  %v309_v30 = vadd.f32 %v1175_v16, %v294_v24 }
  0x16   : > { %v304_v31 = vadd.f32 %v1175_v16, %v289_v25  ;;  %v305_v32 = vadd.f32 %v1175_v16, %v290_v26  ;;  %v306_v42 = vadd.f32 %v1175_v16, %v291_v33  ;;  %v307_v43 = vadd.f32 %v1175_v16, %v292_v34 }
  0x17   : > { %v310_v35 = vmax.f32 %v302_v27, 0.0  ;;  %v311_v36 = vmax.f32 %v303_v28, 0.0  ;;  %v316_v37 = vmax.f32 %v308_v29, 0.0  ;;  %v317_v38 = vmax.f32 %v309_v30, 0.0 }
  0x18   : > { %v312_v44 = vmax.f32 %v304_v31, 0.0  ;;  %v313_v45 = vmax.f32 %v305_v32, 0.0  ;;  %v314_v46 = vmax.f32 %v306_v42, 0.0  ;;  %v315_v47 = vmax.f32 %v307_v43, 0.0 }
  0x19   : > { %v318_v39 = vpack.c.bf16 %v311_v36, %v310_v35  ;;  %v321_v40 = vpack.c.bf16 %v317_v38, %v316_v37  ;;  %v514_v26 = vadd.s32 32, %v1375_v51  ;;  %v511_v30 = vadd.s32 8, %v1375_v51 }
  0x1a   : > { %v319_v48 = vpack.c.bf16 %v313_v45, %v312_v44  ;;  %v320_v49 = vpack.c.bf16 %v315_v47, %v314_v46  ;;  %v522_v43 = vand.u32 15, %v1375_v51 }
  0x1b   : > { %1182 = vmatmul.mubr.msk.bf16.vlgmr.msra.gmra.mrb[0].mxu0 %vm362_vm0, %v318_v39  ;;  %1185 = vmatmul.mubr.msk.bf16.vlgmr.msra.gmra.mrb[0].mxu1 %vm362_vm0, %v321_v40  ;;  %v550_v33 = vand.u32 15, %v514_v26  ;;  %v529_v44 = vand.u32 15, %v511_v30  ;;  %v517_v30 = vadd.s32 56, %v1375_v51 }
  0x1c   : > { %417 = vmatprep.mubr.bf16.mxu0 %v1281_v2  ;;  %1237 = vmatpush3.bf16.msra.mxu1 %v1271_v5  ;;  %vm1488_vm5 = vcmp.ge.s32.totalorder %v522_v43, 2 }
  0x1d   : > { %1238 = vmatprep.subr.bf16.mxu1 %v1272_v41  ;;  %1240 = vmatprep.mubr.msk.bf16.mxu1 %vm362_vm0, %v318_v39  ;;  %vm1475_vm4 = vcmp.ge.s32.totalorder %v550_v33, 2  ;;  %vm1492_vm6 = vcmp.lt.s32.totalorder %v529_v44, 14 }
  0x20   : > { %1239 = vmatpush3.bf16.msra.mxu1 %v1272_v41 }
  0x23   : > { %1183 = vmatmul.mubr.msk.bf16.gmra.mrb[4].mxu0 %vm362_vm0, %v319_v48  ;;  %1241 = vmatmul.mubr.msk.bf16.vlgmr.msra.gmra.mrb[4].mxu1 %vm362_vm0, %v319_v48 }
  0x24   : > { %427 = vmatprep.mubr.bf16.mxu0 %v1281_v2  ;;  %1244 = vmatprep.mubr.msk.bf16.mxu1 %vm362_vm0, %v320_v49 }
  0x2b   : > { %1184 = vmatmul.mubr.msk.bf16.gmra.mrb[8].mxu0 %vm362_vm0, %v320_v49  ;;  %1245 = vmatmul.mubr.msk.bf16.gmra.mrb[8].mxu1 %vm362_vm0, %v321_v40 }
  0xee   : > { %v409_v52 = vpop.f32.mrb[0].mxu0  ;;  %v1377_v53 = vpop.f32.mrb[0].mxu1 }
  0xef   : > { %v1379_v54 = vrot.slane %v409_v52, 6  ;;  %v1381_v55 = vpop.f32.mrb[1].mxu1  ;;  %755 = vrot.lane.b32.xlu1 %v409_v52, %s1285_s23  ;;  %v1384_v56 = vpop.f32.mrb[1].mxu0  ;;  %v667_v61 = vrot.slane %v1377_v53, 6 }
  0xf0   : > { %v815_v58 = vrot.slane %v1384_v56, 2  ;;  %791 = vrot.lane.b32.xlu0 %v1381_v55, %s1283_s15  ;;  %v413_v59 = vpop.f32.mrb[2].mxu0  ;;  %v1390_v60 = vpop.f32.mrb[2].mxu1  ;;  %v879_v2 = vrot.slane %v1381_v55, 2 }
  0xf1   : > { %v620_v62 = vrot.slane %v413_v59, 6  ;;  %v669_v63 = vrot.slane %v1390_v60, 6  ;;  %v1394_v0 = vpop.f32.mrb[3].mxu0  ;;  %v1396_v1 = vpop.f32.mrb[3].mxu1 }
  0xf2   : > { %v816_v3 = vrot.slane %v1394_v0, 2  ;;  %v881_v4 = vrot.slane %v1396_v1, 2 }
  0xf3   : > { %793 = vrot.lane.b32.xlu1 %v1396_v1, %s1283_s15  ;;  %v670_v5 = vsel %vm618_vm1, %v667_v61, %v669_v63  ;;  %v1408_v6 = vsel %vm618_vm1, %v1379_v54, %v620_v62  ;;  %v717_v52 = vsel %vm618_vm1, %v669_v63, 0.0 }
  0xf4   : > { %671 = vrot.lane.b32.xlu0 %v1379_v54, %s1283_s15  ;;  %v1413_v8 = vsel %vm814_vm2, %v815_v58, %v816_v3  ;;  %v1418_v9 = vsel %vm814_vm2, %v879_v2, %v881_v4 }
  0xf6   : > { %v1420_v10 = vpop.f32.mrb[4].mxu0  ;;  %v1242_v11 = vpop.f32.mrb[4].mxu1 }
  0xf7   : > { %v622_v12 = vrot.slane %v1420_v10, 6  ;;  %685 = vrot.lane.b32.xlu1 %v670_v5, %s1283_s15  ;;  %v1424_v13 = vpop.f32.mrb[5].mxu0  ;;  %v482_v14 = vpop.f32.mrb[5].mxu1 }
  0xf8   : > { %v818_v16 = vrot.slane %v1424_v13, 2  ;;  %757 = vrot.lane.b32.xlu0 %v413_v59, %s1285_s23  ;;  %v1432_v17 = vpop.f32.mrb[6].mxu0  ;;  %v1243_v18 = vpop.f32.mrb[6].mxu1 }
  0xf9   : > { %v624_v19 = vrot.slane %v1432_v17, 6  ;;  %v1435_v20 = vpop.f32.mrb[7].mxu0  ;;  %v1438_v21 = vsel %vm618_vm1, %v620_v62, %v622_v12  ;;  %v484_v22 = vpop.f32.mrb[7].mxu1 }
  0xfa   : > { %v820_v23 = vrot.slane %v1435_v20, 2  ;;  %v1442_v24 = vsel %vm814_vm2, %v816_v3, %v818_v16  ;;  %v657_v25 = vsel %vm1426_vm3, %v1438_v21, 0.0 }
  0xfb   : > { %908 = vrot.lane.b32.xlu1 %v1413_v8, %s1285_s23  ;;  %v1451_v27 = vsel %vm618_vm1, %v622_v12, %v624_v19  ;;  %v512_v12 = vadd.s32 16, %v1375_v51 }
  0xfc   : > { %824 = vrot.lane.b32.xlu0 %v815_v58, %s1284_s18  ;;  %v1455_v28 = vsel %vm814_vm2, %v818_v16, %v820_v23  ;;  %v513_v16 = vadd.s32 24, %v1375_v51 }
  0xfd   : > { %v536_v14 = vand.u32 15, %v512_v12 }
  0xfe   : > { %v429_v29 = vpop.f32.mrb[8].mxu0  ;;  %v1246_v34 = vpop.f32.mrb[8].mxu1 }
  0xff   : > { %v663_v31 = vrot.slane %v429_v29, 6  ;;  %912 = vrot.lane.b32.xlu1 %v1455_v28, %s1285_s23  ;;  %v1460_v32 = vpop.f32.mrb[9].mxu0  ;;  %v494_v37 = vpop.f32.mrb[9].mxu1  ;;  %v947_v59 = vrot.slane %v1246_v34, 2  ;;  %vm1531_vm7 = vcmp.ge.s32.totalorder %v536_v14, 2  ;;  %v515_v29 = vadd.s32 40, %v1375_v51 }
 0x100   : > { %v822_v35 = vrot.slane %v1460_v32, 2  ;;  %673 = vrot.lane.b32.xlu0 %v1408_v6, %s1283_s15  ;;  %v433_v36 = vpop.f32.mrb[10].mxu0  ;;  %v1468_v41 = vpop.f32.mrb[10].mxu1  ;;  %v944_v50 = vrot.slane %v494_v37, 2 }
 0x101   : > { %v665_v38 = vrot.slane %v433_v36, 6  ;;  %v1465_v39 = vpop.f32.mrb[11].mxu0  ;;  %v664_v40 = vsel %vm618_vm1, %v624_v19, %v663_v31  ;;  %v497_v46 = vpop.f32.mrb[11].mxu1  ;;  %v949_v60 = vrot.slane %v1468_v41, 2  ;;  %v543_v19 = vand.u32 15, %v513_v16 }
 0x102   : > { %v877_v42 = vrot.slane %v1465_v39, 2  ;;  %v823_v45 = vsel %vm814_vm2, %v820_v23, %v822_v35  ;;  %v945_v62 = vrot.slane %v497_v46, 2  ;;  %v718_v11 = vsel %vm1488_vm5, %v664_v40, 0.0  ;;  %v1579_v34 = vpop.permute.xlu1 %795 }
 0x103   : > { %787 = vrot.lane.b32.xlu1 %v1460_v32, %s1283_s15  ;;  %v666_v48 = vsel %vm618_vm1, %v663_v31, %v665_v38  ;;  %v668_v49 = vsel %vm618_vm1, %v665_v38, %v667_v61  ;;  %v722_v61 = vsel %vm1475_vm4, %v717_v52, 0.0  ;;  %v1502_v63 = vsel %vm814_vm2, %v947_v59, %v949_v60 }
 0x104   : > { %735 = vrot.lane.b32.xlu0 %v670_v5, %s1284_s18  ;;  %v878_v57 = vsel %vm814_vm2, %v822_v35, %v877_v42  ;;  %v880_v58 = vsel %vm814_vm2, %v877_v42, %v879_v2  ;;  %v1505_v2 = vsel %vm814_vm2, %v944_v50, %v945_v62  ;;  %v1508_v5 = vsel %vm814_vm2, %v945_v62, %v947_v59  ;;  %v740_v35 = vpop.permute.xlu0 %739 }
 0x105   : > { %v957_v7 = vsel %vm1492_vm6, %v1508_v5, 0.0  ;;  %v720_v22 = vsel %vm1531_vm7, %v668_v49, 0.0  ;;  %vm1541_vm8 = vcmp.lt.s32.totalorder %v543_v19, 14  ;;  %v557_v31 = vand.u32 15, %v515_v29 }
 0x106   : > { %v895_v26 = vsel %vm1541_vm8, %v823_v45, 0.0 }
 0x107   : > { %679 = vrot.lane.b32.xlu1 %v664_v40, %s1283_s15  ;;  %vm1559_vm9 = vcmp.lt.s32.totalorder %v557_v31, 14 }
 0x108   : > { %737 = vrot.lane.b32.xlu0 %v722_v61, %s1284_s18 }
 0x10b   : > { %729 = vrot.lane.b32.xlu1 %v718_v11, %s1284_s18 }
 0x10c   : > { %759 = vrot.lane.b32.xlu0 %v1420_v10, %s1285_s23  ;;  %v893_v10 = vsel %vm1492_vm6, %v1442_v24, 0.0 }
 0x10f   : > { %731 = vrot.lane.b32.xlu1 %v666_v48, %s1284_s18 }
 0x110   : > { %675 = vrot.lane.b32.xlu0 %v1438_v21, %s1283_s15 }
 0x113   : > { %681 = vrot.lane.b32.xlu1 %v666_v48, %s1283_s15 }
 0x114   : > { %677 = vrot.lane.b32.xlu0 %v1451_v27, %s1283_s15 }
 0x117   : > { %683 = vrot.lane.b32.xlu1 %v668_v49, %s1283_s15 }
 0x118   : > { %910 = vrot.lane.b32.xlu0 %v893_v10, %s1285_s23 }
 0x11b   : > { %733 = vrot.lane.b32.xlu1 %v720_v22, %s1284_s18 }
 0x11c   : > { %789 = vrot.lane.b32.xlu0 %v1465_v39, %s1283_s15 }
 0x11f   : > { %761 = vrot.lane.b32.xlu1 %v1432_v17, %s1285_s23  ;;  %v571_v17 = vand.u32 15, %v517_v30  ;;  %v1601_v30 = vld [vmem:[%s1700_s2] ss:$0 sm:$0xff] }
 0x120   : > { %914 = vrot.lane.b32.xlu0 %v895_v26, %s1285_s23 }
 0x121   : > { %vm1566_vm10 = vcmp.lt.s32.totalorder %v571_v17, 14 }
 0x123   : > { %828 = vrot.lane.b32.xlu1 %v1442_v24, %s1284_s18  ;;  %v897_v24 = vsel %vm1559_vm9, %v880_v58, 0.0 }
 0x124   : > { %826 = vrot.lane.b32.xlu0 %v1413_v8, %s1284_s18  ;;  %v891_v8 = vsel %vm814_vm2, %v881_v4, 0.0 }
 0x127   : > { %830 = vrot.lane.b32.xlu1 %v1455_v28, %s1284_s18  ;;  %v899_v28 = vsel %vm1566_vm10, %v891_v8, 0.0 }
 0x128   : > { %916 = vrot.lane.b32.xlu0 %v878_v57, %s1285_s23 }
 0x12b   : > { %832 = vrot.lane.b32.xlu1 %v823_v45, %s1284_s18 }
 0x12c   : > { %918 = vrot.lane.b32.xlu0 %v897_v24, %s1285_s23 }
 0x12f   : > { %922 = vrot.lane.b32.xlu1 %v899_v28, %s1285_s23 }
 0x130   : > { %920 = vrot.lane.b32.xlu0 %v1418_v9, %s1285_s23  ;;  %v630_v9 = vsel %vm618_vm1, 0.0, %v1379_v54 }
 0x131   : > { %v655_v57 = vsel %vm1475_vm4, %v630_v9, 0.0 }
 0x161   : > { %v756_v36 = vpop.permute.xlu1 %755 }
 0x162   : > { %v1581_v37 = vpop.permute.xlu0 %791 }
 0x165   : > { %v794_v38 = vpop.permute.xlu1 %793 }
 0x166   : > { %v672_v40 = vpop.permute.xlu0 %671 }
 0x167   : > { %v695_v52 = vsel %vm618_vm1, 0.0, %v672_v40 }
 0x168   : > { %v696_v11 = vsel %vm1488_vm5, %v695_v52, 0.0 }
 0x169   : > { %v686_v42 = vpop.permute.xlu1 %685 }
 0x16a   : > { %v1583_v4 = vpop.permute.xlu0 %757 }
 0x16d   : > { %v909_v43 = vpop.permute.xlu1 %908 }
 0x16e   : > { %v825_v44 = vpop.permute.xlu0 %824 }
 0x171   : > { %v1585_v45 = vpop.permute.xlu1 %912 }
 0x172   : > { %v674_v46 = vpop.permute.xlu0 %673 }
 0x175   : > { %v788_v48 = vpop.permute.xlu1 %787 }
 0x176   : > { %v736_v49 = vpop.permute.xlu0 %735 }
 0x179   : > { %v680_v50 = vpop.permute.xlu1 %679 }
 0x17a   : > { %v700_v58 = vsel %vm1475_vm4, %v680_v50, 0.0  ;;  %v738_v59 = vpop.permute.xlu0 %737 }
 0x17b   : > { %v708_v62 = vadd.f32 %v700_v58, %v655_v57 }
 0x17d   : > { %v751_v61 = vadd.f32 %v738_v59, %v708_v62  ;;  %v730_v12 = vpop.permute.xlu1 %729 }
 0x17e   : > { %v747_v14 = vadd.f32 %v730_v12, %v696_v11  ;;  %v760_v16 = vpop.permute.xlu0 %759 }
 0x17f   : > { %v771_v54 = vadd.f32 %v756_v36, %v751_v61 }
 0x180   : > { %v775_v10 = vadd.f32 %v747_v14, %v1384_v56 }
 0x181   : > { %v732_v19 = vpop.permute.xlu1 %731  ;;  %v779_v22 = vadd.f32 %v771_v54, %v1460_v32 }
 0x182   : > { %v802_v26 = vadd.f32 %v788_v48, %v775_v10  ;;  %v676_v29 = vpop.permute.xlu0 %675  ;;  %v748_v56 = vadd.f32 %v732_v19, %v674_v46 }
 0x184   : > { %v932_v47 = vadd.f32 %v909_v43, %v802_v26 }
 0x185   : > { %v682_v3 = vpop.permute.xlu1 %681 }
 0x186   : > { %v960_v31 = vadd.f32 %v1505_v2, %v932_v47  ;;  %v678_v17 = vpop.permute.xlu0 %677  ;;  %v711_v2 = vadd.f32 %v686_v42, %v1451_v27  ;;  %v709_v48 = vadd.f32 %v682_v3, %v1408_v6  ;;  %v776_v27 = vadd.f32 %v748_v56, %v1394_v0 }
 0x187   : > { %v750_v24 = vadd.f32 %v736_v49, %v678_v17  ;;  %v839_v49 = vsel %vm814_vm2, 0.0, %v825_v44  ;;  %v955_v6 = vsel %vm814_vm2, %v949_v60, 0.0 }
 0x188   : > { %v975_v8 = vadd.f32 %v1601_v30, %v960_v31  ;;  %v754_v58 = vadd.f32 %v740_v35, %v711_v2  ;;  %v864_v21 = vsel %vm1541_vm8, %v839_v49, 0.0  ;;  %v959_v41 = vsel %vm1541_vm8, %v955_v6, 0.0 }
 0x189   : > { %v778_v32 = vadd.f32 %v750_v24, %v1435_v20  ;;  %v684_v28 = vpop.permute.xlu1 %683  ;;  %v698_v20 = vsel %vm1531_vm7, %v676_v29, 0.0 }
 0x18a   : > { %v1203_v36 = vpack.c.bf16 %v975_v8, %v975_v8  ;;  %v911_v40 = vpop.permute.xlu0 %910  ;;  %v702_v43 = vsel %vm1426_vm3, %v684_v28, 0.0  ;;  %v1045_v54 = vmul.f32 %v975_v8, %v975_v8  ;;  %v1024_v53 = vsel %vm362_vm0, %v975_v8, 0.0 }
 0x18b   : > { %v710_v46 = vadd.f32 %v702_v43, %v657_v25  ;;  %v805_v42 = vadd.f32 %v794_v38, %v778_v32  ;;  %v752_v25 = vadd.f32 %v740_v35, %v709_v48 }
 0x18c   : > { %1016 = vst.msk [vmem:[%s1610_s28] sm:$0xf] %vm1015_vm11, %v1203_v36 }
 0x18d   : > { %v734_v9 = vpop.permute.xlu1 %733  ;;  %v753_v50 = vadd.f32 %v740_v35, %v710_v46  ;;  %v872_v0 = vadd.f32 %v864_v21, %v805_v42 }
 0x18e   : > { %v749_v52 = vadd.f32 %v734_v9, %v698_v20  ;;  %v790_v57 = vpop.permute.xlu0 %789 }
 0x18f   : > { %v803_v15 = vadd.f32 %v790_v57, %v776_v27  ;;  %v773_v44 = vadd.f32 %v760_v16, %v753_v50 }
 0x190   : > { %v777_v18 = vadd.f32 %v749_v52, %v1424_v13  ;;  %v772_v13 = vadd.f32 %v1583_v4, %v752_v25 }
 0x191   : > { %v933_v59 = vadd.f32 %v911_v40, %v803_v15  ;;  %v762_v62 = vpop.permute.xlu1 %761  ;;  %v781_v60 = vadd.f32 %v773_v44, %v1381_v55 }
 0x192   : > { %v804_v38 = vadd.f32 %v1581_v37, %v777_v18  ;;  %v774_v61 = vadd.f32 %v762_v62, %v754_v58  ;;  %v915_v11 = vpop.permute.xlu0 %914  ;;  %v780_v31 = vadd.f32 %v772_v13, %v1465_v39 }
 0x193   : > { %v961_v35 = vadd.f32 %v957_v7, %v933_v59  ;;  %v935_v12 = vadd.f32 %v915_v11, %v872_v0  ;;  %v808_v37 = vadd.f32 %v1579_v34, %v781_v60  ;;  %v806_v7 = vadd.f32 %v1579_v34, %v779_v22 }
 0x194   : > { %v934_v14 = vadd.f32 %v1585_v45, %v804_v38  ;;  %v782_v16 = vadd.f32 %v774_v61, %v1396_v1  ;;  %v807_v48 = vadd.f32 %v1579_v34, %v780_v31 }
 0x195   : > { %v976_v23 = vadd.f32 %v1601_v30, %v961_v35  ;;  %v963_v10 = vadd.f32 %v959_v41, %v935_v12  ;;  %v829_v55 = vpop.permute.xlu1 %828 }
 0x196   : > { %v962_v5 = vadd.f32 %v1502_v63, %v934_v14  ;;  %v827_v19 = vpop.permute.xlu0 %826  ;;  %v809_v4 = vadd.f32 %v1579_v34, %v782_v16  ;;  %v1053_v63 = vsel %vm362_vm0, %v1045_v54, 0.0  ;;  %v866_v39 = vsel %vm1559_vm9, %v829_v55, 0.0 }
 0x197   : > { %v1204_v45 = vpack.c.bf16 %v976_v23, %v976_v23  ;;  %v1025_v1 = vsel %vm362_vm0, %v976_v23, 0.0  ;;  %v1046_v26 = vmul.f32 %v976_v23, %v976_v23  ;;  %v978_v29 = vadd.f32 %v1601_v30, %v963_v10 }
 0x198   : > { %v977_v47 = vadd.f32 %v1601_v30, %v962_v5  ;;  %v1026_v3 = vadd.f32 %v1025_v1, %v1024_v53  ;;  %v873_v24 = vadd.f32 %v827_v19, %v806_v7  ;;  %v874_v50 = vadd.f32 %v866_v39, %v807_v48 }
 0x199   : > { %1017 = vst.msk [vmem:[%s1610_s28 + $0x4] sm:$0xf] %vm1015_vm11, %v1204_v45  ;;  %v1054_v22 = vsel %vm362_vm0, %v1046_v26, 0.0  ;;  %v1206_v17 = vpack.c.bf16 %v978_v29, %v978_v29  ;;  %v831_v8 = vpop.permute.xlu1 %830  ;;  %v1048_v36 = vmul.f32 %v978_v29, %v978_v29  ;;  %v1029_v20 = vsel %vm362_vm0, %v978_v29, 0.0 }
 0x19a   : > { %v1205_v56 = vpack.c.bf16 %v977_v47, %v977_v47  ;;  %v1047_v32 = vmul.f32 %v977_v47, %v977_v47  ;;  %v1055_v28 = vadd.f32 %v1054_v22, %v1053_v63  ;;  %v917_v40 = vpop.permute.xlu0 %916  ;;  %v1027_v2 = vsel %vm362_vm0, %v977_v47, 0.0 }
 0x19b   : > { %1019 = vst.msk [vmem:[%s1610_s28 + $0xc] sm:$0xf] %vm1015_vm11, %v1206_v17  ;;  %v936_v43 = vadd.f32 %v917_v40, %v873_v24  ;;  %v1028_v46 = vadd.f32 %v1027_v2, %v1026_v3  ;;  %v1058_v33 = vsel %vm362_vm0, %v1048_v36, 0.0  ;;  %v875_v59 = vadd.f32 %v831_v8, %v808_v37 }
 0x19c   : > { %1018 = vst.msk [vmem:[%s1610_s28 + $0x8] sm:$0xf] %vm1015_vm11, %v1205_v56  ;;  %v1056_v49 = vsel %vm362_vm0, %v1047_v32, 0.0 }
 0x19d   : > { %v1057_v9 = vadd.f32 %v1056_v49, %v1055_v28  ;;  %v979_v27 = vadd.f32 %v1601_v30, %v936_v43  ;;  %v833_v42 = vpop.permute.xlu1 %832  ;;  %v1030_v52 = vadd.f32 %v1029_v20, %v1028_v46 }
 0x19e   : > { %v868_v57 = vsel %vm1566_vm10, %v833_v42, 0.0  ;;  %v919_v6 = vpop.permute.xlu0 %918 }
 0x19f   : > { %v1059_v15 = vadd.f32 %v1058_v33, %v1057_v9  ;;  %v1207_v34 = vpack.c.bf16 %v979_v27, %v979_v27  ;;  %v1031_v58 = vsel %vm362_vm0, %v979_v27, 0.0  ;;  %v1049_v21 = vmul.f32 %v979_v27, %v979_v27 }
 0x1a0   : > { %v1032_v25 = vadd.f32 %v1031_v58, %v1030_v52  ;;  %v876_v44 = vadd.f32 %v868_v57, %v809_v4  ;;  %v937_v18 = vadd.f32 %v919_v6, %v874_v50 }
 0x1a1   : > { %1020 = vst.msk [vmem:[%s1610_s28 + $0x10] sm:$0xf] %vm1015_vm11, %v1207_v34  ;;  %v1060_v62 = vsel %vm362_vm0, %v1049_v21, 0.0  ;;  %v923_v0 = vpop.permute.xlu1 %922 }
 0x1a2   : > { %v1061_v38 = vadd.f32 %v1060_v62, %v1059_v15  ;;  %v980_v51 = vadd.f32 %v1601_v30, %v937_v18  ;;  %v939_v61 = vadd.f32 %v923_v0, %v876_v44  ;;  %v921_v41 = vpop.permute.xlu0 %920 }
 0x1a3   : > { %v938_v11 = vadd.f32 %v921_v41, %v875_v59 }
 0x1a4   : > { %v1208_v60 = vpack.c.bf16 %v980_v51, %v980_v51  ;;  %v1033_v35 = vsel %vm362_vm0, %v980_v51, 0.0  ;;  %v1050_v12 = vmul.f32 %v980_v51, %v980_v51  ;;  %v982_v13 = vadd.f32 %v1601_v30, %v939_v61 }
 0x1a5   : > { %v1034_v14 = vadd.f32 %v1033_v35, %v1032_v25  ;;  %v981_v16 = vadd.f32 %v1601_v30, %v938_v11 }
 0x1a6   : > { %1021 = vst.msk [vmem:[%s1610_s28 + $0x14] sm:$0xf] %vm1015_vm11, %v1208_v60  ;;  %v1062_v37 = vsel %vm362_vm0, %v1050_v12, 0.0  ;;  %v1210_v54 = vpack.c.bf16 %v982_v13, %v982_v13  ;;  %v1052_v23 = vmul.f32 %v982_v13, %v982_v13  ;;  %v1037_v19 = vsel %vm362_vm0, %v982_v13, 0.0 }
 0x1a7   : > { %v1063_v10 = vadd.f32 %v1062_v37, %v1061_v38  ;;  %v1209_v55 = vpack.c.bf16 %v981_v16, %v981_v16  ;;  %v1035_v53 = vsel %vm362_vm0, %v981_v16, 0.0  ;;  %v1051_v5 = vmul.f32 %v981_v16, %v981_v16 }
 0x1a8   : > { %1023 = vst.msk [vmem:[%s1610_s28 + $0x1c] sm:$0xf] %vm1015_vm11, %v1210_v54  ;;  %v1036_v7 = vadd.f32 %v1035_v53, %v1034_v14  ;;  %v1066_v1 = vsel %vm362_vm0, %v1052_v23, 0.0 }
 0x1a9   : > { %1022 = vst.msk [vmem:[%s1610_s28 + $0x18] sm:$0xf] %vm1015_vm11, %v1209_v55  ;;  %v1064_v30 = vsel %vm362_vm0, %v1051_v5, 0.0 }
 0x1aa   : > { %v1038_v4 = vadd.f32 %v1037_v19, %v1036_v7  ;;  %v1065_v45 = vadd.f32 %v1064_v30, %v1063_v10 }
 0x1ac   : > { %v1039_v26 = vrot.slane %v1038_v4, 4  ;;  %v1067_v29 = vadd.f32 %v1066_v1, %v1065_v45 }
 0x1ae   : > { %v1040_v47 = vadd.f32 %v1039_v26, %v1038_v4  ;;  %v1068_v3 = vrot.slane %v1067_v29, 4 }
 0x1b0   : > { %v1041_v31 = vrot.slane %v1040_v47, 2  ;;  %v1069_v63 = vadd.f32 %v1068_v3, %v1067_v29 }
 0x1b2   : > { %v1042_v22 = vadd.f32 %v1041_v31, %v1040_v47  ;;  %v1070_v17 = vrot.slane %v1069_v63, 2 }
 0x1b4   : > { %v1043_v24 = vrot.slane %v1042_v22, 1  ;;  %v1071_v8 = vadd.f32 %v1070_v17, %v1069_v63 }
 0x1b6   : > { %v1072_v56 = vrot.slane %v1071_v8, 1  ;;  %v1044_v32 = vadd.f32 %v1043_v24, %v1042_v22 }
 0x1b8   : > { %v1073_v28 = vadd.f32 %v1072_v56, %v1071_v8 }
 0x1ba   : > { %v1075_v36 = vsel %vm1074_vm12, %v1044_v32, %v1073_v28 }
 0x1bb   : > { %1077 = vst.msk [vmem:[%s262_s8] sm:$0x3] %vm1076_vm13, %v1075_v36 }
 0x1bc PF: > { %s17_s21 = sadd.s32 1, %s1279_s21  }
 0x1bd   : > { %p14_p4 = scmp.ge.s32.totalorder %s17_s21, 4  }
 0x1bf   :  { %16 = sbr.rel (!%p14_p4) target bundleno = 1 (0x1), region = 82 }

// kernel: edge_conv_forward.17
= control target key start
LH: loop header
LB: loop body
LE: loop exit
PB: predicated region body
PF: predicated region fallthrough
CT: control target
= control target key end

     0   :  { %8 = vsyncpa [#allocation3], 0  ;;  %s583_s0 = inlined_call_operand.vmem [shape: bf16[2,64,128], index: 0, kind: input, shape index: {}]   ;;  %s584_s1 = inlined_call_operand.vmem [shape: f32[1,128], index: 1, kind: input, shape index: {}]   ;;  %s585_s2 = inlined_call_operand.vmem [shape: f32[1,128], index: 2, kind: input, shape index: {}]   ;;  %s586_s3 = inlined_call_operand.hbm [shape: f32[2,16,128], index: 3, kind: output, shape index: {}]  }
   0x1   :  { %10 = vsyncpa [#allocation3 + $0x1], 0  ;;  %s470_s12 = smov 0   ;;  %s472_s13 = smov 0  }
   0x2   :  { %s474_s14 = smov 0   ;;  %s476_s15 = smov 0  }
   0x3 LB: > { %s491_s16 = sadd.s32 4294967295, %s445_s15   ;;  %s307_s17 = sadd.s32 4294967294, %s445_s15   ;;  %s445_s15 = sphi %s476_s15, %s592_s15   ;;  %s441_s14 = sphi %s474_s14, %s591_s14   ;;  %s437_s13 = sphi %s472_s13, %s590_s13   ;;  %s433_s12 = sphi %s470_s12, %s589_s12  }
   0x4   : > { %s495_s18 = sadd.s32 1, %s445_s15   ;;  %s91_s19 = sadd.s32 1, %s441_s14 }
   0x5   : > { %s88_s20 = ssub.s32 %s445_s15, %s495_s18  ;;  %p101_p0 = scmp.ne.s32.totalorder %s441_s14, %s437_s13 }
   0x6   : > { %p89_p1 = scmp.eq.s32.totalorder %s88_s20, 0  ;;  %p102_p2 = scmp.eq.s32.totalorder %s491_s16, 1 }
   0x7   : > { %p107_p3 = scmp.ne.s32.totalorder %s437_s13, %s433_s12  ;;  %p108_p4 = scmp.eq.s32.totalorder %s307_s17, 1 }
   0x8   : > { %s506_s21 = scalar_select %p89_p1, %s441_s14, %s91_s19  }
   0x9   : > { %p508_p5 = por %p102_p2, %p101_p0  ;;  %p512_p6 = por %p108_p4, %p107_p3 }
   0xa   : > { %p310_p7 = scmp.ge.s32.totalorder %s445_s15, 1  ;;  %p140_p8 = scmp.lt.s32.totalorder %s445_s15, 3 }
   0xc   : > { %p141_p9 = pnand %p310_p7, %p140_p8 }
   0xd   : > { %p164_p10 = scmp.lt.s32.totalorder (!%p141_p9), %s491_s16, 1  ;;  %v314_v0 = vld [vmem:[%s584_s1] ss:$0 sm:$0xff] (!%p141_p9)  ;;  %s161_s4 = sand.u32 (!%p141_p9), 1, %s437_s13  }
   0xe   : > { %144 = sbr.rel (%p141_p9) target bundleno = 56 (0x38), region = 32  ;;  %v315_v9 = vld [vmem:[%s585_s2] ss:$0 sm:$0xff] (!%p141_p9)  ;;  %s311_s7 = sshll.u32 (!%p141_p9), %s161_s4, 4 }
   0xf   : > { %s163_s8 = scalar_lea.vmem (!%p141_p9), [#allocation2], %s311_s7  ;;  %s322_s10 = sshll.u32 (!%p141_p9), %s491_s16, 8 }
  0x10   : > { %s245_s9 = sshll.u32 (!%p141_p9), %s163_s8, 4  ;;  %s538_s19 = scalar_lea.hbm (!%p141_p9), %s586_s3, %s322_s10  ;;  %s533_s9 = int_to_ptr.vmem [resolvable:$true] %s245_s9 }
  0x11   : > { %s542_s20 = scalar_lea.sflag (!%p141_p9), [#allocation3], %s161_s4 }
  0x15   : > { %s165_s24 = scalar_select %p164_p10, %s491_s16, 1 }
  0x16   : > { %s383_s16 = scalar_lea.vmem %s533_s9, 256 }
  0x17   : > { %s321_s25 = sshll.u32 %s165_s24, 5  ;;  %p384_p11 = scmp.ne.s32.totalorder %s533_s9, %s383_s16 }
  0x18   : > { %s168_s28 = scalar_lea.vmem %s583_s0, %s321_s25  ;;  %s447_s24 = smov [#allocation2]  }
  0x19   : > { %v324_v1 = vld [vmem:[%s168_s28] sm:$0xff]   ;;  %v339_v2 = vld [vmem:[%s168_s28 + $0x8] sm:$0xff]   ;;  %v340_v3 = vld [vmem:[%s168_s28 + $0x10] sm:$0xff]   ;;  %p385_p12 = pnand %p384_p11, %p508_p5  ;;  %s387_s25 = sshll.u32 %s447_s24, 4  ;;  %s388_s25 = int_to_ptr.vmem [resolvable:$false] %s387_s25 }
  0x1a   : > { %v325_v4 = vunpack.c.l.bf16 %v324_v1  ;;  %v329_v5 = vunpack.c.l.bf16 %v339_v2  ;;  %v333_v6 = vunpack.c.l.bf16 %v340_v3  ;;  %v341_v7 = vld [vmem:[%s168_s28 + $0x18] sm:$0xff]   ;;  %v326_v8 = vunpack.c.h.bf16 %v324_v1  ;;  %s389_s26 = scalar_lea.vmem %s388_s25, 512  ;;  %p390_p0 = scmp.lt.s32.totalorder %s533_s9, %s388_s25 }
  0x1b   : > { %v337_v10 = vunpack.c.l.bf16 %v341_v7  ;;  %v330_v11 = vunpack.c.h.bf16 %v339_v2  ;;  %v334_v12 = vunpack.c.h.bf16 %v340_v3  ;;  %v338_v13 = vunpack.c.h.bf16 %v341_v7  ;;  %p386_p13 = pneg %p385_p12  ;;  %p391_p1 = scmp.lt.s32.totalorder %s389_s26, %s383_s16 }
  0x1c   : > { %v181_v14 = vmul.f32 %v325_v4, %v314_v0  ;;  %v197_v15 = vmul.f32 %v329_v5, %v314_v0  ;;  %v209_v16 = vmul.f32 %v333_v6, %v314_v0  ;;  %v182_v17 = vmul.f32 %v326_v8, %v314_v0 }
  0x1d   : > { %v221_v18 = vmul.f32 %v337_v10, %v314_v0  ;;  %v198_v19 = vmul.f32 %v330_v11, %v314_v0  ;;  %v210_v20 = vmul.f32 %v334_v12, %v314_v0  ;;  %v222_v21 = vmul.f32 %v338_v13, %v314_v0  ;;  %p392_p2 = por %p391_p1, %p390_p0 }
  0x1e   : > { %v189_v22 = vadd.f32 %v315_v9, %v181_v14  ;;  %v199_v23 = vadd.f32 %v315_v9, %v197_v15  ;;  %v211_v24 = vadd.f32 %v315_v9, %v209_v16  ;;  %v190_v25 = vadd.f32 %v315_v9, %v182_v17 }
  0x1f   : > { %v223_v26 = vadd.f32 %v315_v9, %v221_v18  ;;  %v200_v27 = vadd.f32 %v315_v9, %v198_v19  ;;  %v212_v28 = vadd.f32 %v315_v9, %v210_v20  ;;  %v224_v29 = vadd.f32 %v315_v9, %v222_v21  ;;  %p393_p3 = pnand %p392_p2, %p386_p13 }
  0x20   : > { %v191_v30 = vmax.f32 %v189_v22, 0.0  ;;  %v201_v31 = vmax.f32 %v199_v23, 0.0  ;;  %v213_v32 = vmax.f32 %v211_v24, 0.0  ;;  %v192_v33 = vmax.f32 %v190_v25, 0.0 }
  0x21   : > { %v202_v34 = vmax.f32 %v200_v27, 0.0  ;;  %v214_v35 = vmax.f32 %v212_v28, 0.0  ;;  %v225_v37 = vmax.f32 %v223_v26, 0.0  ;;  %v226_v39 = vmax.f32 %v224_v29, 0.0 }
  0x22   : > { %v203_v36 = vmax.f32 %v191_v30, %v201_v31 }
  0x23   : > { %v204_v38 = vmax.f32 %v192_v33, %v202_v34 }
  0x24   : > { %v215_v40 = vmax.f32 %v203_v36, %v213_v32 }
  0x25   : > { %v216_v41 = vmax.f32 %v204_v38, %v214_v35 }
  0x26   : > { %v227_v42 = vmax.f32 %v215_v40, %v225_v37 }
  0x27   : > { %v228_v43 = vmax.f32 %v216_v41, %v226_v39 }
  0x28   : > { %229 = vst [vmem:[%s163_s8] sm:$0xff] %v227_v42 }
  0x29   : > { %230 = vst [vmem:[%s163_s8 + $0x8] sm:$0xff] %v228_v43 }
  0x2a   : > { %396 = shalt.err (!%p393_p3)
}
  0x2b   : > { %s397_s27 = scalar_lea.hbm %s538_s19, 256  ;;  %s401_s30 = scalar_lea.hbm %s586_s3, 512 }
  0x2c   : > { %p398_p4 = scmp.ne.s32.totalorder %s538_s19, %s397_s27  ;;  %p402_p9 = scmp.lt.u32.totalorder %s538_s19, %s586_s3 }
  0x2d   : > { %p403_p10 = scmp.lt.u32.totalorder %s401_s30, %s397_s27  ;;  %p405_p12 = scmp.lt.u32.totalorder %s397_s27, %s538_s19 }
  0x2e   : > { %p399_p7 = pnand %p398_p4, %p508_p5 }
  0x2f   : > { %p404_p11 = por %p403_p10, %p402_p9 }
  0x30   : > { %p400_p8 = pneg %p399_p7 }
  0x31   : > { %p406_p13 = por %p405_p12, %p404_p11 }
  0x33   : > { %p407_p0 = pnand %p406_p13, %p400_p8 }
  0x35   : > { %410 = shalt.err (!%p407_p0)
}
  0x36   : > { %s448_s6 = smov 128   ;;  %s449_s7 = smov 8  }
  0x37   : > { %342 = dma.vmem_to_hbm [thread:$0]  (%p508_p5), %s533_s9, 256, %s538_s19, %s542_s20, %s448_s6, %s448_s6, %s449_s7  }
  0x38 PF: > { %p348_p1 = scmp.ge.s32.totalorder %s445_s15, 2  ;;  %s260_s8 = sand.u32 1, %s433_s12  }
  0x39   : > { %s261_s10 = scalar_lea.sflag [#allocation3], %s260_s8 }
  0x3a   : > { %p345_p2 = pnand %p348_p1, %p512_p6 }
  0x3c   : > { %428 = dma.done.wait (!%p345_p2), %s261_s10, 256  }
  0x3d   : > { %430 = vsyncadd (!%p345_p2), %s261_s10, 4294967040  ;;  %p13_p3 = scmp.ge.s32.totalorder %s495_s18, 4   ;;  %s589_s12 = smov %s437_s13 }
  0x3e   : > { %s590_s13 = smov %s441_s14  ;;  %s591_s14 = smov %s506_s21 }
  0x3f   : > { %s592_s15 = smov %s495_s18  ;;  %15 = sbr.rel (!%p13_p3) target bundleno = 3 (0x3), region = 67 }
  0x46   :  { %266 = vsyncpa [#allocation3], 1 }
  0x47   :  { %268 = vsyncpa [#allocation3 + $0x1], 1 }

// kernel: edge_conv_forward.14
= control target key start
LH: loop header
LB: loop body
LE: loop exit
PB: predicated region body
PF: predicated region fallthrough
CT: control target
= control target key end

     0   :  { %s1549_s21 = smov 0   ;;  %s2042_s0 = inlined_call_operand.vmem [shape: bf16[2,64,64], index: 0, kind: input, shape index: {}]   ;;  %s2043_s1 = inlined_call_operand.vmem [shape: bf16[64,576], index: 1, kind: input, shape index: {}]   ;;  %s2044_s2 = inlined_call_operand.vmem [shape: f32[1,64], index: 2, kind: input, shape index: {}]   ;;  %s2045_s3 = inlined_call_operand.vmem [shape: f32[1,64], index: 3, kind: input, shape index: {}]   ;;  %s2046_s4 = inlined_call_operand.vmem [shape: f32[1,64], index: 4, kind: input, shape index: {}]   ;;  %s2047_s5 = inlined_call_operand.vmem [shape: bf16[2,64,64], index: 5, kind: output, shape index: {0}]   ;;  %s2048_s6 = inlined_call_operand.vmem [shape: f32[2,2,64], index: 6, kind: output, shape index: {1}]  }
   0x1 LB: > { %s1348_s22 = sadd.s32 4294967295, %s1509_s21   ;;  %p1352_p0 = scmp.ge.s32.totalorder %s1509_s21, 1  ;;  %s1509_s21 = sphi %s1549_s21, %s17_s21  }
   0x2   : > { %p215_p1 = scmp.lt.s32.totalorder %s1509_s21, 3 }
   0x4   : > { %p216_p2 = pnand %p1352_p0, %p215_p1 }
   0x5   : > { %v1475_v0 = vld [vmem:[%s2043_s1 + $0x4] ss:$20 sps:$4 sm:$0xff] (!%p216_p2)   ;;  %p249_p3 = scmp.lt.s32.totalorder (!%p216_p2), %s1348_s22, 1  ;;  %v1477_v1 = vld [vmem:[%s2043_s1 + $0xc] ss:$20 sps:$4 sm:$0xff] (!%p216_p2)   ;;  %v1511_v2 = vmov (!%p216_p2), 0   ;;  %v672_v63 = vlaneseq (!%p216_p2) }
   0x6   : > { %219 = sbr.rel (%p216_p2) target bundleno = 439 (0x1b7), region = 40  ;;  %495 = vmatprep.mubr.bf16.mxu0 (!%p216_p2), %v1511_v2  ;;  %568 = vmatprep.mubr.bf16.mxu1 (!%p216_p2), %v1511_v2  ;;  %v1479_v3 = vld [vmem:[%s2043_s1] ss:$20 sps:$4 sm:$0xff] (!%p216_p2)   ;;  %v1480_v4 = vld [vmem:[%s2043_s1 + $0x8] ss:$20 sps:$4 sm:$0xff] (!%p216_p2)   ;;  %vm450_vm0 = vcmask (!%p216_p2), 523264  }
   0x7   : > { %463 = vmatprep.subr.bf16.mxu0 (!%p216_p2), %v1475_v0  ;;  %536 = vmatprep.subr.bf16.mxu1 (!%p216_p2), %v1477_v1  ;;  %v1481_v5 = vld [vmem:[%s2043_s1 + $0x2c] ss:$20 sps:$4 sm:$0xff] (!%p216_p2)   ;;  %v1483_v6 = vld [vmem:[%s2043_s1 + $0x34] ss:$20 sps:$4 sm:$0xff] (!%p216_p2)   ;;  %v1486_v8 = vld [vmem:[%s2043_s1 + $0x30] ss:$20 sps:$4 sm:$0xff] (!%p216_p2)  }
   0x8   : > { %464 = vmatpush1.bf16.msra.mxu0 (!%p216_p2), %v1479_v3  ;;  %537 = vmatpush1.bf16.msra.mxu1 (!%p216_p2), %v1480_v4  ;;  %v1485_v7 = vld [vmem:[%s2043_s1 + $0x28] ss:$20 sps:$4 sm:$0xff] (!%p216_p2)   ;;  %v1491_v11 = vld [vmem:[%s2043_s1 + $0x50] ss:$20 sps:$4 sm:$0xff] (!%p216_p2)   ;;  %v1492_v12 = vld [vmem:[%s2043_s1 + $0x58] ss:$20 sps:$4 sm:$0xff] (!%p216_p2)  }
   0x9   : > { %465 = vmatprep.subr.bf16.mxu0 (!%p216_p2), %v1481_v5  ;;  %538 = vmatprep.subr.bf16.mxu1 (!%p216_p2), %v1483_v6  ;;  %v1487_v9 = vld [vmem:[%s2043_s1 + $0x54] ss:$20 sps:$4 sm:$0xff] (!%p216_p2)   ;;  %v1489_v10 = vld [vmem:[%s2043_s1 + $0x5c] ss:$20 sps:$4 sm:$0xff] (!%p216_p2)   ;;  %v1495_v14 = vld [vmem:[%s2043_s1 + $0x84] ss:$20 sps:$4 sm:$0xff] (!%p216_p2)  }
   0xa   : > { %v1493_v13 = vld [vmem:[%s2043_s1 + $0x7c] ss:$20 sps:$4 sm:$0xff] (!%p216_p2)   ;;  %v1497_v15 = vld [vmem:[%s2043_s1 + $0x78] ss:$20 sps:$4 sm:$0xff] (!%p216_p2)   ;;  %v1498_v17 = vld [vmem:[%s2043_s1 + $0x80] ss:$20 sps:$4 sm:$0xff] (!%p216_p2)  }
   0xb   : > { %v1358_v20 = vld [vmem:[%s2045_s3] ss:$0 sm:$0xff] (!%p216_p2)  ;;  %v1499_v28 = vld [vmem:[%s2043_s1 + $0x10] ss:$20 sps:$4 sm:$0xff] (!%p216_p2)   ;;  %v1500_v40 = vld [vmem:[%s2043_s1 + $0x38] ss:$20 sps:$4 sm:$0xff] (!%p216_p2)  }
   0xc   : > { %466 = vmatpush1.bf16.msra.mxu0 (!%p216_p2), %v1485_v7  ;;  %539 = vmatpush1.bf16.msra.mxu1 (!%p216_p2), %v1486_v8  ;;  %v1625_v22 = vld [vmem:[%s2046_s4] ss:$0 sm:$0xff] (!%p216_p2)  ;;  %v1502_v52 = vld [vmem:[%s2043_s1 + $0x88] ss:$20 sps:$4 sm:$0xff] (!%p216_p2)   ;;  %v1667_v0 = vshrl.u32 (!%p216_p2), %v672_v63, 7  ;;  %vm783_vm1 = vcmask (!%p216_p2), 1040384  }
   0xd   : > { %s2071_s22 = smov (!%p249_p3, %s1348_s22), 1  ;;  %467 = vmatprep.subr.bf16.mxu0 %v1487_v9  ;;  %540 = vmatprep.subr.bf16.mxu1 %v1489_v10  ;;  %v1501_v47 = vld [vmem:[%s2043_s1 + $0x60] ss:$20 sps:$4 sm:$0xff]   ;;  %vm1000_vm2 = vcmask 1046528   ;;  %vm1200_vm11 = vcmask 519168   ;;  %vm1260_vm12 = vcmask 517120  }
   0xe   : > { %s1403_s13 = sshll.u32 %s2071_s22, 5  ;;  %v675_v1 = vadd.s32 16, %v1667_v0 }
   0xf   : > { %s1603_s28 = scalar_lea.vmem %s2042_s0, %s1403_s13  ;;  %s1933_s9 = scalar_lea.vmem %s2047_s5, %s1403_s13 }
  0x10   : > { %v1414_v16 = vld [vmem:[%s1603_s28] sm:$0xff]   ;;  %v1429_v21 = vld [vmem:[%s1603_s28 + $0x8] sm:$0xff]   ;;  %468 = vmatpush1.bf16.msra.mxu0 %v1491_v11  ;;  %541 = vmatpush1.bf16.msra.mxu1 %v1492_v12  ;;  %v1430_v25 = vld [vmem:[%s1603_s28 + $0x10] sm:$0xff]   ;;  %v699_v3 = vand.u32 15, %v675_v1  ;;  %v677_v11 = vadd.s32 32, %v1667_v0  ;;  %s1357_s13 = sshll.u32 %s2071_s22, 1 }
  0x11   : > { %v1415_v18 = vunpack.c.l.bf16 %v1414_v16  ;;  %v1416_v19 = vunpack.c.h.bf16 %v1414_v16  ;;  %v1419_v23 = vunpack.c.l.bf16 %v1429_v21  ;;  %v1420_v24 = vunpack.c.h.bf16 %v1429_v21  ;;  %469 = vmatprep.subr.bf16.mxu0 %v1493_v13  ;;  %542 = vmatprep.subr.bf16.mxu1 %v1495_v14  ;;  %v1431_v45 = vld [vmem:[%s1603_s28 + $0x18] sm:$0xff]   ;;  %s1512_s28 = smov 64   ;;  %s262_s12 = scalar_lea.vmem %s2048_s6, %s1357_s13 }
  0x12   : > { %v1423_v33 = vunpack.c.l.bf16 %v1430_v25  ;;  %v1424_v34 = vunpack.c.h.bf16 %v1430_v25  ;;  %v1427_v46 = vunpack.c.l.bf16 %v1431_v45  ;;  %v1428_v51 = vunpack.c.h.bf16 %v1431_v45 }
  0x13   : > { %v287_v26 = vmul.f32 %v1415_v18, %v1358_v20  ;;  %v288_v27 = vmul.f32 %v1416_v19, %v1358_v20  ;;  %v289_v29 = vmul.f32 %v1419_v23, %v1358_v20  ;;  %v290_v30 = vmul.f32 %v1420_v24, %v1358_v20 }
  0x14   : > { %470 = vmatpush1.bf16.msra.mxu0 %v1497_v15  ;;  %543 = vmatpush1.bf16.msra.mxu1 %v1498_v17  ;;  %v291_v43 = vmul.f32 %v1423_v33, %v1358_v20  ;;  %v292_v44 = vmul.f32 %v1424_v34, %v1358_v20  ;;  %v293_v55 = vmul.f32 %v1427_v46, %v1358_v20  ;;  %vm1673_vm3 = vcmp.ge.s32.totalorder %v699_v3, 1 }
  0x15   : > { %v302_v31 = vadd.f32 %v1625_v22, %v287_v26  ;;  %v303_v32 = vadd.f32 %v1625_v22, %v288_v27  ;;  %v304_v37 = vadd.f32 %v1625_v22, %v289_v29  ;;  %v305_v38 = vadd.f32 %v1625_v22, %v290_v30  ;;  %1440 = vmatprep.subr.bf16.mxu0 %v1499_v28 }
  0x16   : > { %1456 = vmatprep.subr.bf16.mxu1 %v1499_v28  ;;  %v306_v49 = vadd.f32 %v1625_v22, %v291_v43  ;;  %v307_v50 = vadd.f32 %v1625_v22, %v292_v44  ;;  %v294_v56 = vmul.f32 %v1428_v51, %v1358_v20  ;;  %v308_v58 = vadd.f32 %v1625_v22, %v293_v55 }
  0x17   : > { %v310_v35 = vmax.f32 %v302_v31, 0.0  ;;  %v311_v36 = vmax.f32 %v303_v32, 0.0  ;;  %v312_v41 = vmax.f32 %v304_v37, 0.0  ;;  %v313_v42 = vmax.f32 %v305_v38, 0.0 }
  0x18   : > { %v314_v53 = vmax.f32 %v306_v49, 0.0  ;;  %v315_v54 = vmax.f32 %v307_v50, 0.0  ;;  %v309_v59 = vadd.f32 %v1625_v22, %v294_v56  ;;  %v316_v60 = vmax.f32 %v308_v58, 0.0 }
  0x19   : > { %v318_v39 = vpack.c.bf16 %v311_v36, %v310_v35  ;;  %v319_v48 = vpack.c.bf16 %v313_v42, %v312_v41  ;;  %v676_v19 = vadd.s32 24, %v1667_v0  ;;  %v685_v25 = vand.u32 15, %v1667_v0  ;;  %v1915_v35 = vld [vmem:[%s2044_s2] ss:$0 sm:$0xff] }
  0x1a   : > { %v320_v57 = vpack.c.bf16 %v315_v54, %v314_v53  ;;  %v317_v61 = vmax.f32 %v309_v59, 0.0  ;;  %v713_v27 = vand.u32 15, %v677_v11  ;;  %v679_v42 = vadd.s32 48, %v1667_v0 }
  0x1b   : > { %1380 = vmatmul.mubr.msk.bf16.vlgmr.msra.gmra.mrb[0].mxu0 %vm450_vm0, %v318_v39  ;;  %1384 = vmatmul.mubr.msk.bf16.vlgmr.msra.gmra.mrb[0].mxu1 %vm450_vm0, %v318_v39  ;;  %v706_v29 = vand.u32 15, %v676_v19  ;;  %vm1711_vm5 = vcmp.ge.s32.totalorder %v685_v25, 1 }
  0x1c   : > { %505 = vmatprep.mubr.bf16.mxu0 %v1511_v2  ;;  %578 = vmatprep.mubr.bf16.mxu1 %v1511_v2  ;;  %v321_v62 = vpack.c.bf16 %v317_v61, %v316_v60  ;;  %vm1715_vm6 = vcmp.ge.s32.totalorder %v713_v27, 1  ;;  %v727_v58 = vand.u32 15, %v679_v42 }
  0x1d   : > { %1441 = vmatpush3.bf16.msra.mxu0 %v1499_v28  ;;  %1460 = vmatpush3.bf16.msra.mxu1 %v1499_v28  ;;  %vm1727_vm7 = vcmp.lt.s32.totalorder %v706_v29, 15 }
  0x1e   : > { %1442 = vmatprep.subr.bf16.mxu0 %v1500_v40  ;;  %1457 = vmatprep.subr.bf16.mxu1 %v1500_v40  ;;  %vm1768_vm8 = vcmp.ge.s32.totalorder %v727_v58, 1 }
  0x21   : > { %1443 = vmatpush3.bf16.msra.mxu0 %v1500_v40  ;;  %1461 = vmatpush3.bf16.msra.mxu1 %v1500_v40 }
  0x22   : > { %1444 = vmatprep.subr.bf16.mxu0 %v1501_v47  ;;  %1458 = vmatprep.subr.bf16.mxu1 %v1501_v47 }
  0x23   : > { %1381 = vmatmul.mubr.msk.bf16.gmra.mrb[4].mxu0 %vm450_vm0, %v319_v48  ;;  %1385 = vmatmul.mubr.msk.bf16.gmra.mrb[4].mxu1 %vm450_vm0, %v319_v48 }
  0x24   : > { %515 = vmatprep.mubr.bf16.mxu0 %v1511_v2  ;;  %588 = vmatprep.mubr.bf16.mxu1 %v1511_v2 }
  0x25   : > { %1445 = vmatpush3.bf16.msra.mxu0 %v1501_v47  ;;  %1462 = vmatpush3.bf16.msra.mxu1 %v1501_v47 }
  0x26   : > { %1446 = vmatprep.subr.bf16.mxu0 %v1502_v52  ;;  %1459 = vmatprep.subr.bf16.mxu1 %v1502_v52 }
  0x29   : > { %1447 = vmatpush3.bf16.msra.mxu0 %v1502_v52  ;;  %1463 = vmatpush3.bf16.msra.mxu1 %v1502_v52 }
  0x2b   : > { %1382 = vmatmul.mubr.msk.bf16.gmra.mrb[8].mxu0 %vm450_vm0, %v320_v57  ;;  %1386 = vmatmul.mubr.msk.bf16.gmra.mrb[8].mxu1 %vm450_vm0, %v320_v57 }
  0x2c   : > { %525 = vmatprep.mubr.bf16.mxu0 %v1511_v2  ;;  %598 = vmatprep.mubr.bf16.mxu1 %v1511_v2  ;;  %v674_v2 = vadd.s32 8, %v1667_v0 }
  0x2e   : > { %v692_v4 = vand.u32 15, %v674_v2 }
  0x30   : > { %vm1681_vm4 = vcmp.lt.s32.totalorder %v692_v4, 15 }
  0x33   : > { %1383 = vmatmul.mubr.msk.bf16.gmra.mrb[12].mxu0 %vm450_vm0, %v321_v62  ;;  %1387 = vmatmul.mubr.msk.bf16.gmra.mrb[12].mxu1 %vm450_vm0, %v321_v62 }
  0x34   : > { %1448 = vmatprep.mubr.msk.bf16.mxu0 %vm450_vm0, %v318_v39  ;;  %1452 = vmatprep.mubr.msk.bf16.mxu1 %vm450_vm0, %v320_v57 }
  0x3b   : > { %1449 = vmatmul.mubr.msk.bf16.vlgmr.msra.gmra.mrb[16].mxu0 %vm450_vm0, %v319_v48  ;;  %1453 = vmatmul.mubr.msk.bf16.vlgmr.msra.gmra.mrb[16].mxu1 %vm450_vm0, %v321_v62  ;;  %v678_v48 = vadd.s32 40, %v1667_v0 }
  0x3d   : > { %v720_v60 = vand.u32 15, %v678_v48 }
  0x3f   : > { %vm1780_vm9 = vcmp.lt.s32.totalorder %v720_v60, 15 }
  0xee   : > { %v497_v5 = vpop.f32.mrb[0].mxu0  ;;  %v1671_v6 = vpop.f32.mrb[0].mxu1 }
  0xef   : > { %v784_v7 = vrot.slane %v497_v5, 7  ;;  %v499_v8 = vpop.f32.mrb[1].mxu0  ;;  %v572_v9 = vpop.f32.mrb[1].mxu1 }
  0xf0   : > { %v1001_v12 = vrot.slane %v572_v9, 1  ;;  %v1678_v13 = vpop.f32.mrb[2].mxu1  ;;  %923 = vrot.lane.b32.xlu1 %v499_v8, %s1512_s28  ;;  %v501_v14 = vpop.f32.mrb[2].mxu0  ;;  %v680_v8 = vadd.s32 56, %v1667_v0 }
  0xf1   : > { %v785_v16 = vrot.slane %v501_v14, 7  ;;  %v576_v17 = vpop.f32.mrb[3].mxu1  ;;  %838 = vrot.lane.b32.xlu0 %v784_v7, %s1512_s28  ;;  %v503_v18 = vpop.f32.mrb[3].mxu0  ;;  %v1688_v20 = vsel %vm783_vm1, 0.0, %v784_v7 }
  0xf2   : > { %v1691_v21 = vsel %vm1000_vm2, 0.0, %v1001_v12  ;;  %v1002_v22 = vrot.slane %v576_v17, 1  ;;  %v826_v23 = vsel %vm1673_vm3, %v1688_v20, 0.0  ;;  %v886_v37 = vrot.slane %v503_v18, 7 }
  0xf3   : > { %v1697_v24 = vsel %vm783_vm1, %v784_v7, %v785_v16  ;;  %v1046_v26 = vsel %vm1681_vm4, %v1691_v21, 0.0 }
  0xf4   : > { %925 = vrot.lane.b32.xlu1 %v503_v18, %s1512_s28  ;;  %v1705_v28 = vsel %vm1000_vm2, %v1001_v12, %v1002_v22 }
  0xf6   : > { %v507_v30 = vpop.f32.mrb[4].mxu0  ;;  %v1707_v31 = vpop.f32.mrb[4].mxu1 }
  0xf7   : > { %v787_v32 = vrot.slane %v507_v30, 7  ;;  %v582_v33 = vpop.f32.mrb[5].mxu1  ;;  %964 = vrot.lane.b32.xlu0 %v1707_v31, %s1512_s28  ;;  %v509_v34 = vpop.f32.mrb[5].mxu0 }
  0xf8   : > { %v1004_v38 = vrot.slane %v582_v33, 1  ;;  %v887_v39 = vrot.slane %v509_v34, 7  ;;  %v1719_v40 = vpop.f32.mrb[6].mxu1  ;;  %840 = vrot.lane.b32.xlu1 %v1697_v24, %s1512_s28  ;;  %v511_v41 = vpop.f32.mrb[6].mxu0  ;;  %v734_v33 = vand.u32 15, %v680_v8 }
  0xf9   : > { %v586_v43 = vpop.f32.mrb[7].mxu1  ;;  %v789_v44 = vrot.slane %v511_v41, 7  ;;  %v513_v45 = vpop.f32.mrb[7].mxu0  ;;  %v1725_v46 = vsel %vm783_vm1, %v785_v16, %v787_v32 }
  0xfa   : > { %v1006_v49 = vrot.slane %v586_v43, 1  ;;  %v889_v50 = vrot.slane %v513_v45, 7  ;;  %v1733_v51 = vsel %vm1000_vm2, %v1002_v22, %v1004_v38  ;;  %v1736_v52 = vsel %vm783_vm1, %v886_v37, %v887_v39 }
  0xfb   : > { %966 = vrot.lane.b32.xlu0 %v1719_v40, %s1512_s28  ;;  %v1741_v53 = vsel %vm783_vm1, %v787_v32, %v789_v44  ;;  %v907_v54 = vsel %vm1711_vm5, %v1736_v52, 0.0  ;;  %v828_v55 = vsel %vm1715_vm6, %v1725_v46, 0.0  ;;  %v1048_v59 = vsel %vm1727_vm7, %v1733_v51, 0.0 }
  0xfc   : > { %1083 = vrot.lane.b32.xlu1 %v1705_v28, %s1512_s28  ;;  %v1752_v56 = vsel %vm1000_vm2, %v1004_v38, %v1006_v49  ;;  %v1755_v57 = vsel %vm783_vm1, %v887_v39, %v889_v50  ;;  %v1068_v11 = vsel %vm1681_vm4, %v1733_v51, 0.0  ;;  %vm1819_vm10 = vcmp.lt.s32.totalorder %v734_v33, 15 }
  0xfe   : > { %v517_v61 = vpop.f32.mrb[8].mxu0  ;;  %v1760_v62 = vpop.f32.mrb[8].mxu1 }
  0xff   : > { %v791_v63 = vrot.slane %v517_v61, 7  ;;  %v592_v1 = vpop.f32.mrb[9].mxu1  ;;  %842 = vrot.lane.b32.xlu0 %v1725_v46, %s1512_s28  ;;  %v519_v2 = vpop.f32.mrb[9].mxu0 }
 0x100   : > { %v1008_v3 = vrot.slane %v592_v1, 1  ;;  %v891_v4 = vrot.slane %v519_v2, 7  ;;  %927 = vrot.lane.b32.xlu1 %v509_v34, %s1512_s28  ;;  %v521_v5 = vpop.f32.mrb[10].mxu0  ;;  %v1765_v7 = vpop.f32.mrb[10].mxu1 }
 0x101   : > { %v793_v12 = vrot.slane %v521_v5, 7  ;;  %v1775_v14 = vpop.f32.mrb[11].mxu0  ;;  %v596_v16 = vpop.f32.mrb[11].mxu1  ;;  %v1778_v17 = vsel %vm783_vm1, %v789_v44, %v791_v63 }
 0x102   : > { %v893_v0 = vrot.slane %v1775_v14, 7  ;;  %v1010_v19 = vrot.slane %v596_v16, 1  ;;  %v1786_v22 = vsel %vm1000_vm2, %v1006_v49, %v1008_v3  ;;  %v1789_v25 = vsel %vm783_vm1, %v889_v50, %v891_v4 }
 0x103   : > { %1085 = vrot.lane.b32.xlu0 %v1068_v11, %s1512_s28  ;;  %v1793_v27 = vsel %vm783_vm1, %v791_v63, %v793_v12  ;;  %v909_v29 = vsel %vm1673_vm3, %v1789_v25, 0.0  ;;  %v830_v30 = vsel %vm1768_vm8, %v1778_v17, 0.0  ;;  %v2067_v9 = vsel %vm1780_vm9, %v1786_v22, 0.0 }
 0x104   : > { %929 = vrot.lane.b32.xlu1 %v513_v45, %s1512_s28  ;;  %v1803_v32 = vsel %vm1000_vm2, %v1008_v3, %v1010_v19  ;;  %v1806_v34 = vsel %vm783_vm1, %v891_v4, %v893_v0 }
 0x106   : > { %v527_v38 = vpop.f32.mrb[12].mxu0  ;;  %v1811_v39 = vpop.f32.mrb[12].mxu1 }
 0x107   : > { %1087 = vrot.lane.b32.xlu0 %v1752_v56, %s1512_s28  ;;  %v834_v41 = vrot.slane %v527_v38, 7  ;;  %v529_v42 = vpop.f32.mrb[13].mxu0  ;;  %v602_v43 = vpop.f32.mrb[13].mxu1 }
 0x108   : > { %844 = vrot.lane.b32.xlu1 %v1741_v53, %s1512_s28  ;;  %v895_v44 = vrot.slane %v529_v42, 7  ;;  %v1012_v45 = vrot.slane %v602_v43, 1  ;;  %v1817_v48 = vpop.f32.mrb[14].mxu1  ;;  %v531_v49 = vpop.f32.mrb[14].mxu0 }
 0x109   : > { %v836_v58 = vrot.slane %v531_v49, 7  ;;  %v606_v60 = vpop.f32.mrb[15].mxu1  ;;  %v533_v61 = vpop.f32.mrb[15].mxu0  ;;  %v835_v63 = vsel %vm783_vm1, %v793_v12, %v834_v41 }
 0x10a   : > { %v1825_v1 = vsel %vm783_vm1, %v893_v0, %v895_v44  ;;  %v1062_v3 = vrot.slane %v606_v60, 1  ;;  %v897_v4 = vrot.slane %v533_v61, 7  ;;  %v1828_v5 = vsel %vm1000_vm2, %v1010_v19, %v1012_v45 }
 0x10b   : > { %931 = vrot.lane.b32.xlu0 %v519_v2, %s1512_s28  ;;  %v837_v8 = vsel %vm783_vm1, %v834_v41, %v836_v58  ;;  %v911_v11 = vsel %vm1715_vm6, %v1825_v1, 0.0 }
 0x10c   : > { %968 = vrot.lane.b32.xlu1 %v1760_v62, %s1512_s28  ;;  %v1841_v16 = vsel %vm783_vm1, %v897_v4, 0.0  ;;  %v1063_v0 = vsel %vm1000_vm2, %v1012_v45, %v1062_v3  ;;  %v1845_v2 = vsel %vm783_vm1, %v895_v44, %v897_v4 }
 0x10e   : > { %v1450_v33 = vpop.f32.mrb[16].mxu0  ;;  %v1454_v38 = vpop.f32.mrb[16].mxu1 }
 0x10f   : > { %970 = vrot.lane.b32.xlu0 %v1765_v7, %s1512_s28  ;;  %v1121_v41 = vrot.slane %v1450_v33, 1  ;;  %v643_v42 = vpop.f32.mrb[17].mxu0  ;;  %v1128_v43 = vrot.slane %v1454_v38, 1  ;;  %v657_v49 = vpop.f32.mrb[17].mxu1 }
 0x110   : > { %972 = vrot.lane.b32.xlu1 %v1811_v39, %s1512_s28  ;;  %v1451_v45 = vpop.f32.mrb[18].mxu0  ;;  %v1124_v58 = vrot.slane %v657_v49, 1  ;;  %v1455_v44 = vpop.f32.mrb[18].mxu1 }
 0x111   : > { %v1122_v60 = vrot.slane %v1451_v45, 1  ;;  %v1130_v61 = vrot.slane %v1455_v44, 1  ;;  %v660_v4 = vpop.f32.mrb[19].mxu1  ;;  %v645_v12 = vpop.f32.mrb[19].mxu0 }
 0x112   : > { %v1126_v37 = vrot.slane %v660_v4, 1 }
 0x113   : > { %846 = vrot.lane.b32.xlu0 %v1778_v17, %s1512_s28  ;;  %v1123_v19 = vsel %vm1000_vm2, %v1121_v41, %v1122_v60  ;;  %v1125_v33 = vsel %vm1000_vm2, %v1122_v60, %v1124_v58  ;;  %v1859_v38 = vsel %vm1000_vm2, %v1130_v61, 0.0  ;;  %v1862_v42 = vsel %vm1000_vm2, %v1128_v43, %v1130_v61 }
 0x114   : > { %974 = vrot.lane.b32.xlu1 %v1817_v48, %s1512_s28  ;;  %v1140_v12 = vsel %vm1681_vm4, %v1125_v33, 0.0  ;;  %v1869_v49 = vsel %vm1000_vm2, %v1124_v58, %v1126_v37  ;;  %v1872_v45 = vsel %vm1000_vm2, %v1126_v37, %v1128_v43  ;;  %v1070_v37 = vsel %vm1727_vm7, %v1786_v22, 0.0 }
 0x115   : > { %v1513_v43 = vmov 0.0   ;;  %v2066_v17 = vsel %vm1727_vm7, %v1872_v45, 0.0  ;;  %v2068_v45 = vsel %vm1819_vm10, %v1828_v5, 0.0 }
 0x117   : > { %848 = vrot.lane.b32.xlu0 %v1793_v27, %s1512_s28 }
 0x118   : > { %933 = vrot.lane.b32.xlu1 %v1775_v14, %s1512_s28  ;;  %v1072_v14 = vsel %vm1780_vm9, %v1828_v5, 0.0 }
 0x11b   : > { %850 = vrot.lane.b32.xlu0 %v835_v63, %s1512_s28  ;;  %v1066_v63 = vsel %vm1000_vm2, %v1062_v3, 0.0 }
 0x11c   : > { %852 = vrot.lane.b32.xlu1 %v837_v8, %s1512_s28  ;;  %v1074_v8 = vsel %vm1819_vm10, %v1066_v63, 0.0 }
 0x11f   : > { %1089 = vrot.lane.b32.xlu0 %v1070_v37, %s1512_s28 }
 0x120   : > { %976 = vrot.lane.b32.xlu1 %v1513_v43, %s1512_s28 }
 0x123   : > { %1091 = vrot.lane.b32.xlu0 %v1803_v32, %s1512_s28 }
 0x124   : > { %1095 = vrot.lane.b32.xlu1 %v1063_v0, %s1512_s28 }
 0x127   : > { %1093 = vrot.lane.b32.xlu0 %v1072_v14, %s1512_s28 }
 0x12b   : > { %1097 = vrot.lane.b32.xlu0 %v1074_v8, %s1512_s28 }
 0x162   : > { %v924_v58 = vpop.permute.xlu1 %923 }
 0x163   : > { %v839_v60 = vpop.permute.xlu0 %838 }
 0x164   : > { %v862_v61 = vsel %vm783_vm1, 0.0, %v839_v60 }
 0x165   : > { %v863_v0 = vsel %vm1711_vm5, %v862_v61, 0.0 }
 0x166   : > { %v914_v4 = vadd.f32 %v907_v54, %v863_v0  ;;  %v926_v3 = vpop.permute.xlu1 %925 }
 0x168   : > { %v949_v33 = vadd.f32 %v914_v4, %v1671_v6 }
 0x169   : > { %v965_v37 = vpop.permute.xlu0 %964 }
 0x16a   : > { %v841_v43 = vpop.permute.xlu1 %840  ;;  %v985_v63 = vadd.f32 %v965_v37, %v949_v33 }
 0x16b   : > { %v915_v14 = vadd.f32 %v1755_v57, %v841_v43 }
 0x16d   : > { %v967_v8 = vpop.permute.xlu0 %966  ;;  %v950_v60 = vadd.f32 %v915_v14, %v1678_v13 }
 0x16e   : > { %v1084_v41 = vpop.permute.xlu1 %1083 }
 0x16f   : > { %v986_v44 = vadd.f32 %v967_v8, %v950_v60  ;;  %v1107_v61 = vadd.f32 %v1084_v41, %v985_v63 }
 0x171   : > { %v1145_v52 = vadd.f32 %v1123_v19, %v1107_v61  ;;  %v843_v54 = vpop.permute.xlu0 %842  ;;  %v1054_v6 = vadd.f32 %v1046_v26, %v986_v44 }
 0x172   : > { %v865_v57 = vsel %vm1673_vm3, %v843_v54, 0.0  ;;  %v928_v0 = vpop.permute.xlu1 %927 }
 0x173   : > { %v1160_v13 = vadd.f32 %v1915_v35, %v1145_v52  ;;  %v873_v41 = vadd.f32 %v865_v57, %v826_v23 }
 0x175   : > { %v1405_v15 = vpack.c.bf16 %v1160_v13, %v1160_v13  ;;  %v916_v21 = vadd.f32 %v909_v29, %v873_v41  ;;  %v1086_v26 = vpop.permute.xlu0 %1085  ;;  %v1230_v37 = vmul.f32 %v1160_v13, %v1160_v13  ;;  %v1209_v25 = vsel %vm450_vm0, %v1160_v13, 0.0 }
 0x176   : > { %v1108_v19 = vadd.f32 %v1086_v26, %v1054_v6  ;;  %v930_v44 = vpop.permute.xlu1 %929 }
 0x177   : > { %1201 = vst.msk [vmem:[%s1933_s9] sm:$0xf] %vm1200_vm11, %v1405_v15  ;;  %v943_v20 = vadd.f32 %v924_v58, %v916_v21 }
 0x178   : > { %v1146_v23 = vadd.f32 %v1140_v12, %v1108_v19  ;;  %v1238_v12 = vsel %vm450_vm0, %v1230_v37, 0.0 }
 0x179   : > { %v1088_v4 = vpop.permute.xlu0 %1087  ;;  %v951_v33 = vadd.f32 %v943_v20, %v1707_v31 }
 0x17a   : > { %v1161_v43 = vadd.f32 %v1915_v35, %v1146_v23  ;;  %v845_v14 = vpop.permute.xlu1 %844 }
 0x17b   : > { %v874_v10 = vadd.f32 %v845_v14, %v1697_v24 }
 0x17c   : > { %v1406_v29 = vpack.c.bf16 %v1161_v43, %v1161_v43  ;;  %v1210_v63 = vsel %vm450_vm0, %v1161_v43, 0.0  ;;  %v1231_v8 = vmul.f32 %v1161_v43, %v1161_v43 }
 0x17d   : > { %v1211_v60 = vadd.f32 %v1210_v63, %v1209_v25  ;;  %v917_v58 = vadd.f32 %v1806_v34, %v874_v10  ;;  %v932_v61 = vpop.permute.xlu0 %931 }
 0x17e   : > { %1202 = vst.msk [vmem:[%s1933_s9 + $0x4] sm:$0xf] %vm1200_vm11, %v1406_v29  ;;  %v1239_v31 = vsel %vm450_vm0, %v1231_v8, 0.0  ;;  %v969_v52 = vpop.permute.xlu1 %968 }
 0x17f   : > { %v1240_v54 = vadd.f32 %v1239_v31, %v1238_v12  ;;  %v987_v6 = vadd.f32 %v969_v52, %v951_v33  ;;  %v944_v24 = vadd.f32 %v926_v3, %v917_v58 }
 0x181   : > { %v1055_v57 = vadd.f32 %v1705_v28, %v987_v6  ;;  %v971_v13 = vpop.permute.xlu0 %970  ;;  %v952_v41 = vadd.f32 %v944_v24, %v1719_v40 }
 0x182   : > { %v973_v15 = vpop.permute.xlu1 %972 }
 0x183   : > { %v1109_v21 = vadd.f32 %v1088_v4, %v1055_v57  ;;  %v988_v26 = vadd.f32 %v971_v13, %v952_v41 }
 0x185   : > { %v1147_v34 = vadd.f32 %v1869_v49, %v1109_v21  ;;  %v847_v19 = vpop.permute.xlu0 %846  ;;  %v1056_v20 = vadd.f32 %v1048_v59, %v988_v26 }
 0x186   : > { %v867_v3 = vsel %vm1715_vm6, %v847_v19, 0.0  ;;  %v975_v23 = vpop.permute.xlu1 %974 }
 0x187   : > { %v1162_v28 = vadd.f32 %v1915_v35, %v1147_v34  ;;  %v875_v40 = vadd.f32 %v867_v3, %v828_v55 }
 0x189   : > { %v1407_v4 = vpack.c.bf16 %v1162_v28, %v1162_v28  ;;  %v1212_v49 = vsel %vm450_vm0, %v1162_v28, 0.0  ;;  %v1232_v33 = vmul.f32 %v1162_v28, %v1162_v28  ;;  %v918_v51 = vadd.f32 %v911_v11, %v875_v40  ;;  %v849_v59 = vpop.permute.xlu0 %848 }
 0x18a   : > { %v876_v37 = vadd.f32 %v849_v59, %v1741_v53  ;;  %v934_v43 = vpop.permute.xlu1 %933  ;;  %v1213_v14 = vadd.f32 %v1212_v49, %v1211_v60 }
 0x18b   : > { %1203 = vst.msk [vmem:[%s1933_s9 + $0x8] sm:$0xf] %vm1200_vm11, %v1407_v4  ;;  %v1241_v10 = vsel %vm450_vm0, %v1232_v33, 0.0  ;;  %v945_v46 = vadd.f32 %v928_v0, %v918_v51 }
 0x18c   : > { %v919_v55 = vadd.f32 %v1845_v2, %v876_v37  ;;  %v1242_v25 = vadd.f32 %v1241_v10, %v1240_v54  ;;  %v2065_v2 = vsel %vm1768_vm8, %v1841_v16, 0.0 }
 0x18d   : > { %v851_v29 = vpop.permute.xlu0 %850  ;;  %v953_v63 = vadd.f32 %v945_v46, %v1760_v62 }
 0x18e   : > { %v946_v36 = vadd.f32 %v930_v44, %v919_v55  ;;  %v869_v1 = vsel %vm1768_vm8, %v851_v29, 0.0  ;;  %v853_v11 = vpop.permute.xlu1 %852 }
 0x18f   : > { %v877_v53 = vadd.f32 %v869_v1, %v830_v30  ;;  %v878_v8 = vadd.f32 %v853_v11, %v1793_v27  ;;  %v989_v60 = vadd.f32 %v973_v15, %v953_v63 }
 0x190   : > { %v954_v0 = vadd.f32 %v946_v36, %v1765_v7 }
 0x191   : > { %v920_v62 = vadd.f32 %v2065_v2, %v877_v53  ;;  %v948_v44 = vadd.f32 %v934_v43, %v878_v8  ;;  %v1090_v58 = vpop.permute.xlu0 %1089  ;;  %v1057_v7 = vadd.f32 %v1752_v56, %v989_v60 }
 0x192   : > { %v1110_v12 = vadd.f32 %v1090_v58, %v1056_v20  ;;  %v990_v31 = vadd.f32 %v975_v23, %v954_v0  ;;  %v977_v30 = vpop.permute.xlu1 %976 }
 0x193   : > { %v947_v52 = vadd.f32 %v932_v61, %v920_v62  ;;  %v956_v54 = vadd.f32 %v948_v44, %v1817_v48 }
 0x194   : > { %v1148_v27 = vadd.f32 %v2066_v17, %v1110_v12  ;;  %v1058_v16 = vadd.f32 %v2067_v9, %v990_v31 }
 0x195   : > { %v955_v6 = vadd.f32 %v947_v52, %v1811_v39  ;;  %v992_v24 = vadd.f32 %v977_v30, %v956_v54  ;;  %v1092_v61 = vpop.permute.xlu0 %1091 }
 0x196   : > { %v1163_v48 = vadd.f32 %v1915_v35, %v1148_v27  ;;  %v1111_v57 = vadd.f32 %v1092_v61, %v1057_v7  ;;  %v1096_v19 = vpop.permute.xlu1 %1095 }
 0x197   : > { %v991_v47 = vadd.f32 %v977_v30, %v955_v6  ;;  %v1060_v13 = vadd.f32 %v2068_v45, %v992_v24 }
 0x198   : > { %v1408_v56 = vpack.c.bf16 %v1163_v48, %v1163_v48  ;;  %v1214_v41 = vsel %vm450_vm0, %v1163_v48, 0.0  ;;  %v1233_v15 = vmul.f32 %v1163_v48, %v1163_v48  ;;  %v1149_v22 = vadd.f32 %v1862_v42, %v1111_v57 }
 0x199   : > { %v1215_v21 = vadd.f32 %v1214_v41, %v1213_v14  ;;  %v1059_v39 = vadd.f32 %v1803_v32, %v991_v47  ;;  %v1094_v26 = vpop.permute.xlu0 %1093  ;;  %v2069_v32 = vsel %vm1780_vm9, %v1859_v38, 0.0 }
 0x19a   : > { %1204 = vst.msk [vmem:[%s1933_s9 + $0xc] sm:$0xf] %vm1200_vm11, %v1408_v56  ;;  %v1243_v34 = vsel %vm450_vm0, %v1233_v15, 0.0  ;;  %v1164_v50 = vadd.f32 %v1915_v35, %v1149_v22  ;;  %v1112_v5 = vadd.f32 %v1094_v26, %v1058_v16 }
 0x19b   : > { %v1244_v20 = vadd.f32 %v1243_v34, %v1242_v25  ;;  %v1113_v3 = vadd.f32 %v1096_v19, %v1059_v39 }
 0x19c   : > { %v1409_v23 = vpack.c.bf16 %v1164_v50, %v1164_v50  ;;  %v1216_v28 = vsel %vm450_vm0, %v1164_v50, 0.0  ;;  %v1234_v40 = vmul.f32 %v1164_v50, %v1164_v50  ;;  %v1150_v42 = vadd.f32 %v2069_v32, %v1112_v5 }
 0x19d   : > { %v1217_v4 = vadd.f32 %v1216_v28, %v1215_v21  ;;  %v1166_v49 = vadd.f32 %v1915_v35, %v1113_v3  ;;  %v1098_v33 = vpop.permute.xlu0 %1097 }
 0x19e   : > { %1205 = vst.msk [vmem:[%s1933_s9 + $0x10] sm:$0xf] %vm1200_vm11, %v1409_v23  ;;  %v1245_v51 = vsel %vm450_vm0, %v1234_v40, 0.0  ;;  %v1165_v59 = vadd.f32 %v1915_v35, %v1150_v42  ;;  %v1114_v37 = vadd.f32 %v1098_v33, %v1060_v13 }
 0x19f   : > { %v1246_v43 = vadd.f32 %v1245_v51, %v1244_v20  ;;  %v1411_v14 = vpack.c.bf16 %v1166_v49, %v1166_v49  ;;  %v1236_v18 = vmul.f32 %v1166_v49, %v1166_v49  ;;  %v1220_v29 = vsel %vm450_vm0, %v1166_v49, 0.0 }
 0x1a0   : > { %v1410_v10 = vpack.c.bf16 %v1165_v59, %v1165_v59  ;;  %v1218_v38 = vsel %vm450_vm0, %v1165_v59, 0.0  ;;  %v1235_v46 = vmul.f32 %v1165_v59, %v1165_v59  ;;  %v1167_v55 = vadd.f32 %v1915_v35, %v1114_v37 }
 0x1a1   : > { %1207 = vst.msk [vmem:[%s1933_s9 + $0x18] sm:$0xf] %vm1200_vm11, %v1411_v14  ;;  %v1219_v25 = vadd.f32 %v1218_v38, %v1217_v4  ;;  %v1249_v8 = vsel %vm450_vm0, %v1236_v18, 0.0 }
 0x1a2   : > { %1206 = vst.msk [vmem:[%s1933_s9 + $0x14] sm:$0xf] %vm1200_vm11, %v1410_v10  ;;  %v1247_v63 = vsel %vm450_vm0, %v1235_v46, 0.0  ;;  %v1412_v36 = vpack.c.bf16 %v1167_v55, %v1167_v55  ;;  %v1237_v1 = vmul.f32 %v1167_v55, %v1167_v55  ;;  %v1222_v35 = vsel %vm450_vm0, %v1167_v55, 0.0 }
 0x1a3   : > { %v1248_v11 = vadd.f32 %v1247_v63, %v1246_v43  ;;  %v1221_v53 = vadd.f32 %v1220_v29, %v1219_v25 }
 0x1a4   : > { %1208 = vst.msk [vmem:[%s1933_s9 + $0x1c] sm:$0xf] %vm1200_vm11, %v1412_v36  ;;  %v1251_v2 = vsel %vm450_vm0, %v1237_v1, 0.0 }
 0x1a5   : > { %v1223_v60 = vadd.f32 %v1222_v35, %v1221_v53  ;;  %v1250_v0 = vadd.f32 %v1249_v8, %v1248_v11 }
 0x1a7   : > { %v1224_v62 = vrot.slane %v1223_v60, 4  ;;  %v1252_v44 = vadd.f32 %v1251_v2, %v1250_v0 }
 0x1a9   : > { %v1225_v58 = vadd.f32 %v1224_v62, %v1223_v60  ;;  %v1253_v12 = vrot.slane %v1252_v44, 4 }
 0x1ab   : > { %v1226_v31 = vrot.slane %v1225_v58, 2  ;;  %v1254_v52 = vadd.f32 %v1253_v12, %v1252_v44 }
 0x1ad   : > { %v1227_v54 = vadd.f32 %v1226_v31, %v1225_v58  ;;  %v1255_v17 = vrot.slane %v1254_v52, 2 }
 0x1af   : > { %v1228_v27 = vrot.slane %v1227_v54, 1  ;;  %v1256_v30 = vadd.f32 %v1255_v17, %v1254_v52 }
 0x1b1   : > { %v1257_v7 = vrot.slane %v1256_v30, 1  ;;  %v1229_v9 = vadd.f32 %v1228_v27, %v1227_v54 }
 0x1b3   : > { %v1258_v16 = vadd.f32 %v1257_v7, %v1256_v30 }
 0x1b5   : > { %v1259_v6 = vsel %vm783_vm1, %v1229_v9, %v1258_v16 }
 0x1b6   : > { %1261 = vst.msk [vmem:[%s262_s12] sm:$0x3] %vm1260_vm12, %v1259_v6 }
 0x1b7 PF: > { %s17_s21 = sadd.s32 1, %s1509_s21  }
 0x1b8   : > { %p14_p4 = scmp.ge.s32.totalorder %s17_s21, 4  }
 0x1ba   :  { %16 = sbr.rel (!%p14_p4) target bundleno = 1 (0x1), region = 82 }

// kernel: edge_conv_forward.16
= control target key start
LH: loop header
LB: loop body
LE: loop exit
PB: predicated region body
PF: predicated region fallthrough
CT: control target
= control target key end

     0   :  { %s1170_s21 = smov 0   ;;  %s1336_s0 = inlined_call_operand.vmem [shape: bf16[2,64,64], index: 0, kind: input, shape index: {}]   ;;  %s1337_s1 = inlined_call_operand.vmem [shape: bf16[64,384], index: 1, kind: input, shape index: {}]   ;;  %s1338_s2 = inlined_call_operand.vmem [shape: f32[1,128], index: 2, kind: input, shape index: {}]   ;;  %s1339_s3 = inlined_call_operand.vmem [shape: f32[1,64], index: 3, kind: input, shape index: {}]   ;;  %s1340_s4 = inlined_call_operand.vmem [shape: f32[1,64], index: 4, kind: input, shape index: {}]   ;;  %s1341_s5 = inlined_call_operand.vmem [shape: bf16[2,64,128], index: 5, kind: output, shape index: {0}]   ;;  %s1342_s6 = inlined_call_operand.vmem [shape: f32[2,2,128], index: 6, kind: output, shape index: {1}]  }
   0x1 LB: > { %s982_s22 = sadd.s32 4294967295, %s1132_s21   ;;  %p986_p0 = scmp.ge.s32.totalorder %s1132_s21, 1  ;;  %s1132_s21 = sphi %s1170_s21, %s17_s21  }
   0x2   : > { %p215_p1 = scmp.lt.s32.totalorder %s1132_s21, 3 }
   0x4   : > { %p216_p2 = pnand %p986_p0, %p215_p1 }
   0x5   : > { %v1110_v0 = vld [vmem:[%s1337_s1 + $0x4] ss:$12 sps:$4 sm:$0xff] (!%p216_p2)   ;;  %p249_p3 = scmp.lt.s32.totalorder (!%p216_p2), %s982_s22, 1  ;;  %v1112_v1 = vld [vmem:[%s1337_s1 + $0x8] ss:$12 sps:$4 sm:$0xff] (!%p216_p2)   ;;  %v1134_v2 = vmov (!%p216_p2), 0   ;;  %v553_v55 = vlaneseq (!%p216_p2) }
   0x6   : > { %219 = sbr.rel (%p216_p2) target bundleno = 293 (0x125), region = 40  ;;  %447 = vmatprep.mubr.bf16.mxu0 (!%p216_p2), %v1134_v2  ;;  %415 = vmatprep.subr.bf16.mxu0 (!%p216_p2), %v1110_v0  ;;  %v1113_v3 = vld [vmem:[%s1337_s1] ss:$12 sps:$4 sm:$0xff] (!%p216_p2)   ;;  %v1114_v4 = vld [vmem:[%s1337_s1 + $0x1c] ss:$12 sps:$4 sm:$0xff] (!%p216_p2)   ;;  %vm402_vm0 = vcmask (!%p216_p2), 523264  }
   0x7   : > { %1085 = vmatprep.subr.bf16.mxu1 (!%p216_p2), %v1112_v1  ;;  %416 = vmatpush1.bf16.msra.mxu0 (!%p216_p2), %v1113_v3  ;;  %v1116_v5 = vld [vmem:[%s1337_s1 + $0x20] ss:$12 sps:$4 sm:$0xff] (!%p216_p2)   ;;  %v1117_v6 = vld [vmem:[%s1337_s1 + $0x18] ss:$12 sps:$4 sm:$0xff] (!%p216_p2)   ;;  %v1121_v9 = vld [vmem:[%s1337_s1 + $0x30] ss:$12 sps:$4 sm:$0xff] (!%p216_p2)  }
   0x8   : > { %1086 = vmatpush3.bf16.msra.mxu1 (!%p216_p2), %v1112_v1  ;;  %417 = vmatprep.subr.bf16.mxu0 (!%p216_p2), %v1114_v4  ;;  %v1118_v7 = vld [vmem:[%s1337_s1 + $0x34] ss:$12 sps:$4 sm:$0xff] (!%p216_p2)   ;;  %v1120_v8 = vld [vmem:[%s1337_s1 + $0x38] ss:$12 sps:$4 sm:$0xff] (!%p216_p2)   ;;  %v1124_v11 = vld [vmem:[%s1337_s1 + $0x50] ss:$12 sps:$4 sm:$0xff] (!%p216_p2)  }
   0x9   : > { %1087 = vmatprep.subr.bf16.mxu1 (!%p216_p2), %v1116_v5  ;;  %v1122_v10 = vld [vmem:[%s1337_s1 + $0x4c] ss:$12 sps:$4 sm:$0xff] (!%p216_p2)   ;;  %v992_v13 = vld [vmem:[%s1339_s3] ss:$0 sm:$0xff] (!%p216_p2)  ;;  %v1125_v24 = vld [vmem:[%s1337_s1 + $0x48] ss:$12 sps:$4 sm:$0xff] (!%p216_p2)  }
   0xa   : > { %v993_v18 = vld [vmem:[%s1340_s4] ss:$0 sm:$0xff] (!%p216_p2)  ;;  %v1240_v56 = vshrl.u32 (!%p216_p2), %v553_v55, 7  ;;  %vm666_vm1 = vcmask (!%p216_p2), 1044480   ;;  %vm739_vm3 = vcmask (!%p216_p2), 1042432   ;;  %vm893_vm11 = vcmask (!%p216_p2), 1040384  }
   0xb   : > { %418 = vmatpush1.bf16.msra.mxu0 (!%p216_p2), %v1117_v6 }
   0xc   : > { %1088 = vmatpush3.bf16.msra.mxu1 (!%p216_p2), %v1116_v5  ;;  %419 = vmatprep.subr.bf16.mxu0 (!%p216_p2), %v1118_v7  ;;  %v555_v57 = vadd.s32 (!%p216_p2), 8, %v1240_v56  ;;  %v566_v58 = vand.u32 (!%p216_p2), 15, %v1240_v56  ;;  %v556_v1 = vadd.s32 (!%p216_p2), 16, %v1240_v56  ;;  %v557_v4 = vadd.s32 (!%p216_p2), 24, %v1240_v56 }
   0xd   : > { %s1356_s22 = smov (!%p249_p3, %s982_s22), 1  ;;  %1089 = vmatprep.subr.bf16.mxu1 %v1120_v8 }
   0xe   : > { %s1025_s11 = sshll.u32 %s1356_s22, 5  ;;  %v573_v60 = vand.u32 15, %v555_v57  ;;  %vm1244_vm2 = vcmp.ge.s32.totalorder %v566_v58, 5 }
   0xf   : > { %s253_s18 = scalar_lea.vmem %s1336_s0, %s1025_s11  ;;  %420 = vmatpush1.bf16.msra.mxu0 %v1121_v9  ;;  %s1282_s14 = scalar_lea.vmem %s1341_s5, %s1025_s11 }
  0x10   : > { %v1036_v12 = vld [vmem:[%s253_s18] sm:$0xff]   ;;  %v1071_v16 = vld [vmem:[%s253_s18 + $0x8] sm:$0xff]   ;;  %v1072_v17 = vld [vmem:[%s253_s18 + $0x10] sm:$0xff]   ;;  %1090 = vmatpush3.bf16.msra.mxu1 %v1120_v8  ;;  %421 = vmatprep.subr.bf16.mxu0 %v1122_v10  ;;  %vm765_vm4 = vcmp.lt.s32.totalorder %v573_v60, 11  ;;  %s991_s11 = sshll.u32 %s1356_s22, 1 }
  0x11   : > { %v1037_v14 = vunpack.c.l.bf16 %v1036_v12  ;;  %v1038_v15 = vunpack.c.h.bf16 %v1036_v12  ;;  %v1041_v19 = vunpack.c.l.bf16 %v1071_v16  ;;  %v1042_v20 = vunpack.c.h.bf16 %v1071_v16  ;;  %v1073_v23 = vld [vmem:[%s253_s18 + $0x18] sm:$0xff]   ;;  %1091 = vmatprep.subr.bf16.mxu1 %v1124_v11  ;;  %s262_s17 = scalar_lea.vmem %s1342_s6, %s991_s11 }
  0x12   : > { %v1045_v21 = vunpack.c.l.bf16 %v1072_v17  ;;  %v1046_v22 = vunpack.c.h.bf16 %v1072_v17  ;;  %v1049_v27 = vunpack.c.l.bf16 %v1073_v23  ;;  %v1050_v28 = vunpack.c.h.bf16 %v1073_v23 }
  0x13   : > { %v287_v25 = vmul.f32 %v1037_v14, %v992_v13  ;;  %v288_v26 = vmul.f32 %v1038_v15, %v992_v13  ;;  %v289_v29 = vmul.f32 %v1041_v19, %v992_v13  ;;  %v290_v30 = vmul.f32 %v1042_v20, %v992_v13  ;;  %422 = vmatpush1.bf16.msra.mxu0 %v1125_v24  ;;  %v1261_v24 = vld [vmem:[%s1338_s2] ss:$0 sm:$0xff] }
  0x14   : > { %v291_v31 = vmul.f32 %v1045_v21, %v992_v13  ;;  %v292_v34 = vmul.f32 %v1046_v22, %v992_v13  ;;  %v293_v35 = vmul.f32 %v1049_v27, %v992_v13  ;;  %v294_v39 = vmul.f32 %v1050_v28, %v992_v13  ;;  %1092 = vmatpush3.bf16.msra.mxu1 %v1124_v11 }
  0x15   : > { %v302_v32 = vadd.f32 %v993_v18, %v287_v25  ;;  %v303_v33 = vadd.f32 %v993_v18, %v288_v26  ;;  %v304_v36 = vadd.f32 %v993_v18, %v289_v29  ;;  %v305_v37 = vadd.f32 %v993_v18, %v290_v30 }
  0x16   : > { %v306_v38 = vadd.f32 %v993_v18, %v291_v31  ;;  %v307_v42 = vadd.f32 %v993_v18, %v292_v34  ;;  %v308_v43 = vadd.f32 %v993_v18, %v293_v35  ;;  %v309_v47 = vadd.f32 %v993_v18, %v294_v39 }
  0x17   : > { %v310_v40 = vmax.f32 %v302_v32, 0.0  ;;  %v311_v41 = vmax.f32 %v303_v33, 0.0  ;;  %v312_v44 = vmax.f32 %v304_v36, 0.0  ;;  %v313_v45 = vmax.f32 %v305_v37, 0.0 }
  0x18   : > { %v314_v46 = vmax.f32 %v306_v38, 0.0  ;;  %v315_v49 = vmax.f32 %v307_v42, 0.0  ;;  %v316_v52 = vmax.f32 %v308_v43, 0.0  ;;  %v317_v53 = vmax.f32 %v309_v47, 0.0 }
  0x19   : > { %v318_v48 = vpack.c.bf16 %v311_v41, %v310_v40  ;;  %v319_v50 = vpack.c.bf16 %v313_v45, %v312_v44  ;;  %v580_v17 = vand.u32 15, %v556_v1  ;;  %v587_v20 = vand.u32 15, %v557_v4 }
  0x1a   : > { %v320_v51 = vpack.c.bf16 %v315_v49, %v314_v46  ;;  %v321_v54 = vpack.c.bf16 %v317_v53, %v316_v52  ;;  %v558_v21 = vadd.s32 32, %v1240_v56  ;;  %v559_v38 = vadd.s32 40, %v1240_v56 }
  0x1b   : > { %1093 = vmatprep.mubr.msk.bf16.mxu1 %vm402_vm0, %v318_v48  ;;  %1006 = vmatmul.mubr.msk.bf16.vlgmr.msra.gmra.mrb[0].mxu0 %vm402_vm0, %v318_v48  ;;  %vm1263_vm5 = vcmp.ge.s32.totalorder %v580_v17, 5  ;;  %vm1268_vm6 = vcmp.lt.s32.totalorder %v587_v20, 11 }
  0x1c   : > { %1094 = vmatmul.mubr.msk.bf16.vlgmr.msra.gmra.mrb[0].mxu1 %vm402_vm0, %v319_v50  ;;  %457 = vmatprep.mubr.bf16.mxu0 %v1134_v2  ;;  %v594_v37 = vand.u32 15, %v558_v21  ;;  %v601_v57 = vand.u32 15, %v559_v38 }
  0x1d   : > { %1097 = vmatprep.mubr.msk.bf16.mxu1 %vm402_vm0, %v320_v51 }
  0x1e   : > { %vm1297_vm7 = vcmp.ge.s32.totalorder %v594_v37, 5  ;;  %vm1301_vm8 = vcmp.lt.s32.totalorder %v601_v57, 11 }
  0x23   : > { %1007 = vmatmul.mubr.msk.bf16.gmra.mrb[4].mxu0 %vm402_vm0, %v319_v50 }
  0x24   : > { %1098 = vmatmul.mubr.msk.bf16.gmra.mrb[4].mxu1 %vm402_vm0, %v321_v54  ;;  %467 = vmatprep.mubr.bf16.mxu0 %v1134_v2 }
  0x2b   : > { %1008 = vmatmul.mubr.msk.bf16.gmra.mrb[8].mxu0 %vm402_vm0, %v320_v51 }
  0x2c   : > { %477 = vmatprep.mubr.bf16.mxu0 %v1134_v2 }
  0x33   : > { %1009 = vmatmul.mubr.msk.bf16.gmra.mrb[12].mxu0 %vm402_vm0, %v321_v54 }
  0xee   : > { %v449_v59 = vpop.f32.mrb[0].mxu0 }
  0xef   : > { %v667_v61 = vrot.slane %v449_v59, 3  ;;  %v1095_v62 = vpop.f32.mrb[0].mxu1  ;;  %v451_v63 = vpop.f32.mrb[1].mxu0 }
  0xf0   : > { %v522_v2 = vpop.f32.mrb[1].mxu1  ;;  %v453_v3 = vpop.f32.mrb[2].mxu0  ;;  %v743_v5 = vrot.slane %v1095_v62, 5 }
  0xf1   : > { %v690_v6 = vsel %vm666_vm1, 0.0, %v667_v61  ;;  %v740_v7 = vrot.slane %v522_v2, 5  ;;  %v668_v8 = vrot.slane %v453_v3, 3  ;;  %v1096_v9 = vpop.f32.mrb[2].mxu1  ;;  %v455_v10 = vpop.f32.mrb[3].mxu0  ;;  %v560_v2 = vadd.s32 48, %v1240_v56 }
  0xf2   : > { %v715_v11 = vsel %vm1244_vm2, %v690_v6, 0.0  ;;  %v745_v12 = vrot.slane %v1096_v9, 5  ;;  %v525_v13 = vpop.f32.mrb[3].mxu1 }
  0xf3   : > { %v723_v14 = vadd.f32 %v715_v11, %v451_v63  ;;  %v669_v15 = vsel %vm666_vm1, %v667_v61, %v668_v8  ;;  %v741_v16 = vrot.slane %v525_v13, 5  ;;  %v561_v11 = vadd.s32 56, %v1240_v56 }
  0xf4   : > { %v724_v18 = vadd.f32 %v669_v15, %v455_v10  ;;  %v746_v19 = vsel %vm739_vm3, %v743_v5, %v745_v12 }
  0xf5   : > { %v742_v22 = vsel %vm739_vm3, %v740_v7, %v741_v16  ;;  %v744_v23 = vsel %vm739_vm3, %v741_v16, %v743_v5 }
  0xf6   : > { %v789_v25 = vsel %vm765_vm4, %v744_v23, 0.0  ;;  %v796_v26 = vadd.f32 %v742_v22, %v723_v14  ;;  %v459_v27 = vpop.f32.mrb[4].mxu0 }
  0xf7   : > { %v797_v28 = vadd.f32 %v789_v25, %v724_v18  ;;  %v670_v29 = vrot.slane %v459_v27, 3  ;;  %v461_v30 = vpop.f32.mrb[5].mxu0  ;;  %v1099_v32 = vpop.f32.mrb[4].mxu1 }
  0xf8   : > { %v811_v33 = vadd.f32 %v1261_v24, %v796_v26  ;;  %v463_v34 = vpop.f32.mrb[6].mxu0  ;;  %v538_v35 = vpop.f32.mrb[5].mxu1  ;;  %v751_v47 = vrot.slane %v1099_v32, 5 }
  0xf9   : > { %v812_v39 = vadd.f32 %v1261_v24, %v797_v28  ;;  %v671_v40 = vsel %vm666_vm1, %v668_v8, %v670_v29  ;;  %v672_v41 = vrot.slane %v463_v34, 3  ;;  %v465_v42 = vpop.f32.mrb[7].mxu0  ;;  %v747_v43 = vrot.slane %v538_v35, 5  ;;  %v1275_v44 = vpop.f32.mrb[6].mxu1 }
  0xfa   : > { %v872_v45 = vmul.f32 %v811_v33, %v811_v33  ;;  %v717_v46 = vsel %vm1263_vm5, %v671_v40, 0.0  ;;  %v753_v48 = vrot.slane %v1275_v44, 5  ;;  %v541_v49 = vpop.f32.mrb[7].mxu1 }
  0xfb   : > { %v1054_v50 = vpack.c.bf16 %v812_v39, %v811_v33  ;;  %v873_v51 = vmul.f32 %v812_v39, %v812_v39  ;;  %v725_v52 = vadd.f32 %v717_v46, %v461_v30  ;;  %v859_v53 = vadd.f32 %v812_v39, %v811_v33 }
  0xfc   : > { %v673_v54 = vsel %vm666_vm1, %v670_v29, %v672_v41  ;;  %v748_v55 = vsel %vm739_vm3, %v745_v12, %v747_v43  ;;  %v749_v58 = vrot.slane %v541_v49, 5  ;;  %v754_v3 = vsel %vm739_vm3, %v751_v47, %v753_v48 }
  0xfd   : > { %1055 = vst [vmem:[%s1282_s14] sm:$0xff] %v1054_v50   ;;  %v798_v59 = vadd.f32 %v746_v19, %v725_v52  ;;  %v880_v60 = vadd.f32 %v873_v51, %v872_v45  ;;  %v726_v61 = vadd.f32 %v673_v54, %v465_v42  ;;  %v791_v62 = vsel %vm1268_vm6, %v748_v55, 0.0 }
  0xfe   : > { %v469_v63 = vpop.f32.mrb[8].mxu0  ;;  %v750_v0 = vsel %vm739_vm3, %v747_v43, %v749_v58  ;;  %v752_v1 = vsel %vm739_vm3, %v749_v58, %v751_v47  ;;  %v608_v19 = vand.u32 15, %v560_v2  ;;  %v615_v29 = vand.u32 15, %v561_v11 }
  0xff   : > { %v813_v4 = vadd.f32 %v1261_v24, %v798_v59  ;;  %v799_v5 = vadd.f32 %v791_v62, %v726_v61  ;;  %v674_v6 = vrot.slane %v469_v63, 3  ;;  %v471_v7 = vpop.f32.mrb[9].mxu0  ;;  %v793_v26 = vsel %vm1301_vm8, %v752_v1, 0.0 }
 0x100   : > { %v473_v9 = vpop.f32.mrb[10].mxu0  ;;  %vm697_vm9 = vcmp.ge.s32.totalorder %v608_v19, 5  ;;  %vm1317_vm10 = vcmp.lt.s32.totalorder %v615_v29, 11  ;;  %v763_v42 = vsel %vm739_vm3, %v753_v48, 0.0 }
 0x101   : > { %v860_v12 = vadd.f32 %v859_v53, %v813_v4  ;;  %v874_v13 = vmul.f32 %v813_v4, %v813_v4  ;;  %v814_v14 = vadd.f32 %v1261_v24, %v799_v5  ;;  %v675_v15 = vsel %vm666_vm1, %v672_v41, %v674_v6  ;;  %v475_v16 = vpop.f32.mrb[11].mxu0 }
 0x102   : > { %v719_v17 = vsel %vm1297_vm7, %v675_v15, 0.0  ;;  %v676_v18 = vrot.slane %v473_v9, 3  ;;  %v795_v55 = vsel %vm1317_vm10, %v763_v42, 0.0 }
 0x103   : > { %v881_v20 = vadd.f32 %v880_v60, %v874_v13  ;;  %v1059_v21 = vpack.c.bf16 %v814_v14, %v813_v4  ;;  %v861_v22 = vadd.f32 %v860_v12, %v814_v14  ;;  %v875_v23 = vmul.f32 %v814_v14, %v814_v14 }
 0x104   : > { %v727_v25 = vadd.f32 %v719_v17, %v471_v7  ;;  %v677_v56 = vsel %vm666_vm1, %v674_v6, %v676_v18 }
 0x105   : > { %1074 = vst [vmem:[%s1282_s14 + $0x8] sm:$0xff] %v1059_v21   ;;  %v882_v27 = vadd.f32 %v881_v20, %v875_v23  ;;  %v728_v28 = vadd.f32 %v677_v56, %v475_v16 }
 0x106   : > { %v800_v30 = vadd.f32 %v750_v0, %v727_v25  ;;  %v479_v31 = vpop.f32.mrb[12].mxu0 }
 0x107   : > { %v801_v32 = vadd.f32 %v793_v26, %v728_v28  ;;  %v678_v33 = vrot.slane %v479_v31, 3  ;;  %v481_v34 = vpop.f32.mrb[13].mxu0 }
 0x108   : > { %v815_v35 = vadd.f32 %v1261_v24, %v800_v30  ;;  %v483_v36 = vpop.f32.mrb[14].mxu0 }
 0x109   : > { %v816_v37 = vadd.f32 %v1261_v24, %v801_v32  ;;  %v679_v38 = vsel %vm666_vm1, %v676_v18, %v678_v33  ;;  %v680_v39 = vrot.slane %v483_v36, 3  ;;  %v485_v40 = vpop.f32.mrb[15].mxu0 }
 0x10a   : > { %v862_v43 = vadd.f32 %v861_v22, %v815_v35  ;;  %v876_v44 = vmul.f32 %v815_v35, %v815_v35  ;;  %v721_v45 = vsel %vm697_vm9, %v679_v38, 0.0 }
 0x10b   : > { %v1064_v46 = vpack.c.bf16 %v816_v37, %v815_v35  ;;  %v877_v47 = vmul.f32 %v816_v37, %v816_v37  ;;  %v729_v49 = vadd.f32 %v721_v45, %v481_v34  ;;  %v681_v50 = vsel %vm666_vm1, %v678_v33, %v680_v39 }
 0x10c   : > { %v883_v51 = vadd.f32 %v882_v27, %v876_v44  ;;  %v863_v52 = vadd.f32 %v862_v43, %v816_v37  ;;  %v730_v53 = vadd.f32 %v681_v50, %v485_v40 }
 0x10d   : > { %1075 = vst [vmem:[%s1282_s14 + $0x10] sm:$0xff] %v1064_v46   ;;  %v802_v54 = vadd.f32 %v754_v3, %v729_v49 }
 0x10e   : > { %v884_v57 = vadd.f32 %v883_v51, %v877_v47  ;;  %v803_v58 = vadd.f32 %v795_v55, %v730_v53 }
 0x10f   : > { %v817_v48 = vadd.f32 %v1261_v24, %v802_v54 }
 0x110   : > { %v818_v59 = vadd.f32 %v1261_v24, %v803_v58 }
 0x111   : > { %v864_v60 = vadd.f32 %v863_v52, %v817_v48  ;;  %v878_v61 = vmul.f32 %v817_v48, %v817_v48 }
 0x112   : > { %v1069_v62 = vpack.c.bf16 %v818_v59, %v817_v48  ;;  %v879_v63 = vmul.f32 %v818_v59, %v818_v59 }
 0x113   : > { %v885_v0 = vadd.f32 %v884_v57, %v878_v61  ;;  %v865_v1 = vadd.f32 %v864_v60, %v818_v59 }
 0x114   : > { %1076 = vst [vmem:[%s1282_s14 + $0x18] sm:$0xff] %v1069_v62  }
 0x115   : > { %v866_v2 = vrot.slane %v865_v1, 4  ;;  %v886_v4 = vadd.f32 %v885_v0, %v879_v63 }
 0x117   : > { %v867_v3 = vadd.f32 %v866_v2, %v865_v1  ;;  %v887_v5 = vrot.slane %v886_v4, 4 }
 0x119   : > { %v868_v6 = vrot.slane %v867_v3, 2  ;;  %v888_v7 = vadd.f32 %v887_v5, %v886_v4 }
 0x11b   : > { %v869_v8 = vadd.f32 %v868_v6, %v867_v3  ;;  %v889_v9 = vrot.slane %v888_v7, 2 }
 0x11d   : > { %v870_v10 = vrot.slane %v869_v8, 1  ;;  %v890_v11 = vadd.f32 %v889_v9, %v888_v7 }
 0x11f   : > { %v891_v24 = vrot.slane %v890_v11, 1  ;;  %v871_v12 = vadd.f32 %v870_v10, %v869_v8 }
 0x121   : > { %v892_v13 = vadd.f32 %v891_v24, %v890_v11 }
 0x123   : > { %v894_v14 = vsel %vm893_vm11, %v871_v12, %v892_v13 }
 0x124   : > { %895 = vst [vmem:[%s262_s17] sm:$0x3] %v894_v14 }
 0x125 PF: > { %s17_s21 = sadd.s32 1, %s1132_s21  }
 0x126   : > { %p14_p4 = scmp.ge.s32.totalorder %s17_s21, 4  }
 0x128   :  { %16 = sbr.rel (!%p14_p4) target bundleno = 1 (0x1), region = 82 }

// kernel: edge_conv_forward.15
= control target key start
LH: loop header
LB: loop body
LE: loop exit
PB: predicated region body
PF: predicated region fallthrough
CT: control target
= control target key end

     0   :  { %s1510_s21 = smov 0   ;;  %s1939_s0 = inlined_call_operand.vmem [shape: bf16[2,64,64], index: 0, kind: input, shape index: {}]   ;;  %s1940_s1 = inlined_call_operand.vmem [shape: bf16[64,576], index: 1, kind: input, shape index: {}]   ;;  %s1941_s2 = inlined_call_operand.vmem [shape: f32[1,64], index: 2, kind: input, shape index: {}]   ;;  %s1942_s3 = inlined_call_operand.vmem [shape: f32[1,64], index: 3, kind: input, shape index: {}]   ;;  %s1943_s4 = inlined_call_operand.vmem [shape: f32[1,64], index: 4, kind: input, shape index: {}]   ;;  %s1944_s5 = inlined_call_operand.vmem [shape: bf16[2,64,64], index: 5, kind: output, shape index: {0}]   ;;  %s1945_s6 = inlined_call_operand.vmem [shape: f32[2,2,64], index: 6, kind: output, shape index: {1}]  }
   0x1 LB: > { %s1309_s22 = sadd.s32 4294967295, %s1470_s21   ;;  %p1313_p0 = scmp.ge.s32.totalorder %s1470_s21, 1  ;;  %s1470_s21 = sphi %s1510_s21, %s17_s21  }
   0x2   : > { %p215_p1 = scmp.lt.s32.totalorder %s1470_s21, 3 }
   0x4   : > { %p216_p2 = pnand %p1313_p0, %p215_p1 }
   0x5   : > { %v1436_v0 = vld [vmem:[%s1940_s1 + $0x4] ss:$20 sps:$4 sm:$0xff] (!%p216_p2)   ;;  %p249_p3 = scmp.lt.s32.totalorder (!%p216_p2), %s1309_s22, 1  ;;  %v1438_v1 = vld [vmem:[%s1940_s1 + $0xc] ss:$20 sps:$4 sm:$0xff] (!%p216_p2)   ;;  %v1472_v2 = vmov (!%p216_p2), 0  }
   0x6   : > { %219 = sbr.rel (%p216_p2) target bundleno = 430 (0x1ae), region = 40  ;;  %495 = vmatprep.mubr.bf16.mxu0 (!%p216_p2), %v1472_v2  ;;  %568 = vmatprep.mubr.bf16.mxu1 (!%p216_p2), %v1472_v2  ;;  %v1440_v3 = vld [vmem:[%s1940_s1] ss:$20 sps:$4 sm:$0xff] (!%p216_p2)   ;;  %v1441_v4 = vld [vmem:[%s1940_s1 + $0x8] ss:$20 sps:$4 sm:$0xff] (!%p216_p2)   ;;  %v1473_v9 = vmov (!%p216_p2), 0.0  }
   0x7   : > { %463 = vmatprep.subr.bf16.mxu0 (!%p216_p2), %v1436_v0  ;;  %536 = vmatprep.subr.bf16.mxu1 (!%p216_p2), %v1438_v1  ;;  %v1442_v5 = vld [vmem:[%s1940_s1 + $0x2c] ss:$20 sps:$4 sm:$0xff] (!%p216_p2)   ;;  %v1444_v6 = vld [vmem:[%s1940_s1 + $0x34] ss:$20 sps:$4 sm:$0xff] (!%p216_p2)   ;;  %v1447_v8 = vld [vmem:[%s1940_s1 + $0x30] ss:$20 sps:$4 sm:$0xff] (!%p216_p2)   ;;  %v670_v0 = vlaneseq (!%p216_p2) }
   0x8   : > { %464 = vmatpush1.bf16.msra.mxu0 (!%p216_p2), %v1440_v3  ;;  %537 = vmatpush1.bf16.msra.mxu1 (!%p216_p2), %v1441_v4  ;;  %v1446_v7 = vld [vmem:[%s1940_s1 + $0x28] ss:$20 sps:$4 sm:$0xff] (!%p216_p2)   ;;  %s1474_s16 = smov (!%p216_p2), 64   ;;  %v1452_v12 = vld [vmem:[%s1940_s1 + $0x50] ss:$20 sps:$4 sm:$0xff] (!%p216_p2)   ;;  %vm450_vm0 = vcmask (!%p216_p2), 523264  }
   0x9   : > { %465 = vmatprep.subr.bf16.mxu0 (!%p216_p2), %v1442_v5  ;;  %950 = vrot.lane.b32.xlu0 (!%p216_p2), %v1473_v9, %s1474_s16  ;;  %v1448_v10 = vld [vmem:[%s1940_s1 + $0x54] ss:$20 sps:$4 sm:$0xff] (!%p216_p2)   ;;  %v1450_v11 = vld [vmem:[%s1940_s1 + $0x5c] ss:$20 sps:$4 sm:$0xff] (!%p216_p2)   ;;  %v1453_v13 = vld [vmem:[%s1940_s1 + $0x58] ss:$20 sps:$4 sm:$0xff] (!%p216_p2)  }
   0xa   : > { %538 = vmatprep.subr.bf16.mxu1 (!%p216_p2), %v1444_v6  ;;  %v1454_v14 = vld [vmem:[%s1940_s1 + $0x7c] ss:$20 sps:$4 sm:$0xff] (!%p216_p2)   ;;  %v1456_v15 = vld [vmem:[%s1940_s1 + $0x84] ss:$20 sps:$4 sm:$0xff] (!%p216_p2)   ;;  %v1459_v18 = vld [vmem:[%s1940_s1 + $0x80] ss:$20 sps:$4 sm:$0xff] (!%p216_p2)  }
   0xb   : > { %v1458_v16 = vld [vmem:[%s1940_s1 + $0x78] ss:$20 sps:$4 sm:$0xff] (!%p216_p2)   ;;  %v1319_v21 = vld [vmem:[%s1942_s3] ss:$0 sm:$0xff] (!%p216_p2)  ;;  %v1460_v29 = vld [vmem:[%s1940_s1 + $0x10] ss:$20 sps:$4 sm:$0xff] (!%p216_p2)  }
   0xc   : > { %466 = vmatpush1.bf16.msra.mxu0 (!%p216_p2), %v1446_v7  ;;  %539 = vmatpush1.bf16.msra.mxu1 (!%p216_p2), %v1447_v8  ;;  %v1587_v23 = vld [vmem:[%s1943_s4] ss:$0 sm:$0xff] (!%p216_p2)  ;;  %v1461_v41 = vld [vmem:[%s1940_s1 + $0x38] ss:$20 sps:$4 sm:$0xff] (!%p216_p2)   ;;  %v1463_v53 = vld [vmem:[%s1940_s1 + $0x88] ss:$20 sps:$4 sm:$0xff] (!%p216_p2)  }
   0xd   : > { %s1963_s22 = smov (!%p249_p3, %s1309_s22), 1  ;;  %467 = vmatprep.subr.bf16.mxu0 %v1448_v10  ;;  %540 = vmatprep.subr.bf16.mxu1 %v1450_v11  ;;  %v1462_v48 = vld [vmem:[%s1940_s1 + $0x60] ss:$20 sps:$4 sm:$0xff]   ;;  %v1629_v1 = vshrl.u32 %v670_v0, 7  ;;  %vm779_vm1 = vcmask 1041408   ;;  %vm970_vm2 = vcmask 1045504  }
   0xe   : > { %s1364_s13 = sshll.u32 %s1963_s22, 5  ;;  %vm1160_vm11 = vcmask 519168   ;;  %vm1219_vm12 = vcmask 1040384   ;;  %vm1221_vm13 = vcmask 517120  }
   0xf   : > { %s1565_s29 = scalar_lea.vmem %s1939_s0, %s1364_s13  ;;  %v675_v3 = vadd.s32 32, %v1629_v1  ;;  %s1851_s9 = scalar_lea.vmem %s1944_s5, %s1364_s13 }
  0x10   : > { %v1375_v17 = vld [vmem:[%s1565_s29] sm:$0xff]   ;;  %v1390_v22 = vld [vmem:[%s1565_s29 + $0x8] sm:$0xff]   ;;  %468 = vmatpush1.bf16.msra.mxu0 %v1452_v12  ;;  %541 = vmatpush1.bf16.msra.mxu1 %v1453_v13  ;;  %v1391_v26 = vld [vmem:[%s1565_s29 + $0x10] sm:$0xff]   ;;  %v677_v12 = vadd.s32 48, %v1629_v1  ;;  %s1318_s13 = sshll.u32 %s1963_s22, 1 }
  0x11   : > { %v1376_v19 = vunpack.c.l.bf16 %v1375_v17  ;;  %v1377_v20 = vunpack.c.h.bf16 %v1375_v17  ;;  %v1380_v24 = vunpack.c.l.bf16 %v1390_v22  ;;  %v1381_v25 = vunpack.c.h.bf16 %v1390_v22  ;;  %469 = vmatprep.subr.bf16.mxu0 %v1454_v14  ;;  %542 = vmatprep.subr.bf16.mxu1 %v1456_v15  ;;  %v1392_v46 = vld [vmem:[%s1565_s29 + $0x18] sm:$0xff]   ;;  %s262_s12 = scalar_lea.vmem %s1945_s6, %s1318_s13 }
  0x12   : > { %v1384_v34 = vunpack.c.l.bf16 %v1391_v26  ;;  %v1385_v35 = vunpack.c.h.bf16 %v1391_v26  ;;  %v1388_v47 = vunpack.c.l.bf16 %v1392_v46  ;;  %v1389_v52 = vunpack.c.h.bf16 %v1392_v46 }
  0x13   : > { %v287_v27 = vmul.f32 %v1376_v19, %v1319_v21  ;;  %v288_v28 = vmul.f32 %v1377_v20, %v1319_v21  ;;  %v289_v30 = vmul.f32 %v1380_v24, %v1319_v21  ;;  %v290_v31 = vmul.f32 %v1381_v25, %v1319_v21 }
  0x14   : > { %470 = vmatpush1.bf16.msra.mxu0 %v1458_v16  ;;  %543 = vmatpush1.bf16.msra.mxu1 %v1459_v18  ;;  %v291_v44 = vmul.f32 %v1384_v34, %v1319_v21  ;;  %v292_v45 = vmul.f32 %v1385_v35, %v1319_v21  ;;  %v293_v56 = vmul.f32 %v1388_v47, %v1319_v21  ;;  %v711_v4 = vand.u32 15, %v675_v3 }
  0x15   : > { %v302_v32 = vadd.f32 %v1587_v23, %v287_v27  ;;  %v303_v33 = vadd.f32 %v1587_v23, %v288_v28  ;;  %v304_v38 = vadd.f32 %v1587_v23, %v289_v30  ;;  %v305_v39 = vadd.f32 %v1587_v23, %v290_v31  ;;  %1417 = vmatprep.subr.bf16.mxu1 %v1460_v29 }
  0x16   : > { %1401 = vmatprep.subr.bf16.mxu0 %v1460_v29  ;;  %v306_v50 = vadd.f32 %v1587_v23, %v291_v44  ;;  %v307_v51 = vadd.f32 %v1587_v23, %v292_v45  ;;  %v294_v57 = vmul.f32 %v1389_v52, %v1319_v21  ;;  %v308_v59 = vadd.f32 %v1587_v23, %v293_v56 }
  0x17   : > { %v310_v36 = vmax.f32 %v302_v32, 0.0  ;;  %v311_v37 = vmax.f32 %v303_v33, 0.0  ;;  %v312_v42 = vmax.f32 %v304_v38, 0.0  ;;  %v313_v43 = vmax.f32 %v305_v39, 0.0 }
  0x18   : > { %v314_v54 = vmax.f32 %v306_v50, 0.0  ;;  %v315_v55 = vmax.f32 %v307_v51, 0.0  ;;  %v309_v60 = vadd.f32 %v1587_v23, %v294_v57  ;;  %v316_v61 = vmax.f32 %v308_v59, 0.0 }
  0x19   : > { %v318_v40 = vpack.c.bf16 %v311_v37, %v310_v36  ;;  %v319_v49 = vpack.c.bf16 %v313_v43, %v312_v42  ;;  %vm1635_vm3 = vcmp.ge.s32.totalorder %v711_v4, 2  ;;  %v676_v16 = vadd.s32 40, %v1629_v1 }
  0x1a   : > { %v320_v58 = vpack.c.bf16 %v315_v55, %v314_v54  ;;  %v317_v62 = vmax.f32 %v309_v60, 0.0  ;;  %v725_v26 = vand.u32 15, %v677_v12  ;;  %v672_v32 = vadd.s32 8, %v1629_v1 }
  0x1b   : > { %1341 = vmatmul.mubr.msk.bf16.vlgmr.msra.gmra.mrb[0].mxu0 %vm450_vm0, %v318_v40  ;;  %1345 = vmatmul.mubr.msk.bf16.vlgmr.msra.gmra.mrb[0].mxu1 %vm450_vm0, %v318_v40  ;;  %v678_v36 = vadd.s32 56, %v1629_v1  ;;  %v683_v52 = vand.u32 15, %v1629_v1 }
  0x1c   : > { %505 = vmatprep.mubr.bf16.mxu0 %v1472_v2  ;;  %578 = vmatprep.mubr.bf16.mxu1 %v1472_v2  ;;  %v321_v63 = vpack.c.bf16 %v317_v62, %v316_v61  ;;  %vm1673_vm5 = vcmp.ge.s32.totalorder %v725_v26, 2  ;;  %v690_v47 = vand.u32 15, %v672_v32 }
  0x1d   : > { %1421 = vmatpush3.bf16.msra.mxu1 %v1460_v29  ;;  %1402 = vmatpush3.bf16.msra.mxu0 %v1460_v29  ;;  %v718_v29 = vand.u32 15, %v676_v16  ;;  %v732_v51 = vand.u32 15, %v678_v36  ;;  %vm1720_vm9 = vcmp.ge.s32.totalorder %v683_v52, 2 }
  0x1e   : > { %1418 = vmatprep.subr.bf16.mxu1 %v1461_v41  ;;  %1403 = vmatprep.subr.bf16.mxu0 %v1461_v41  ;;  %vm1712_vm7 = vcmp.lt.s32.totalorder %v690_v47, 14 }
  0x1f   : > { %vm1680_vm6 = vcmp.lt.s32.totalorder %v718_v29, 14  ;;  %vm1716_vm8 = vcmp.lt.s32.totalorder %v732_v51, 14 }
  0x21   : > { %1422 = vmatpush3.bf16.msra.mxu1 %v1461_v41  ;;  %1404 = vmatpush3.bf16.msra.mxu0 %v1461_v41 }
  0x22   : > { %1419 = vmatprep.subr.bf16.mxu1 %v1462_v48  ;;  %1405 = vmatprep.subr.bf16.mxu0 %v1462_v48 }
  0x23   : > { %1342 = vmatmul.mubr.msk.bf16.gmra.mrb[4].mxu0 %vm450_vm0, %v319_v49  ;;  %1346 = vmatmul.mubr.msk.bf16.gmra.mrb[4].mxu1 %vm450_vm0, %v319_v49 }
  0x24   : > { %515 = vmatprep.mubr.bf16.mxu0 %v1472_v2  ;;  %588 = vmatprep.mubr.bf16.mxu1 %v1472_v2 }
  0x25   : > { %1423 = vmatpush3.bf16.msra.mxu1 %v1462_v48  ;;  %1406 = vmatpush3.bf16.msra.mxu0 %v1462_v48 }
  0x26   : > { %1420 = vmatprep.subr.bf16.mxu1 %v1463_v53  ;;  %1407 = vmatprep.subr.bf16.mxu0 %v1463_v53 }
  0x29   : > { %1424 = vmatpush3.bf16.msra.mxu1 %v1463_v53  ;;  %1408 = vmatpush3.bf16.msra.mxu0 %v1463_v53 }
  0x2b   : > { %1343 = vmatmul.mubr.msk.bf16.gmra.mrb[8].mxu0 %vm450_vm0, %v320_v58  ;;  %1347 = vmatmul.mubr.msk.bf16.gmra.mrb[8].mxu1 %vm450_vm0, %v320_v58 }
  0x2c   : > { %525 = vmatprep.mubr.bf16.mxu0 %v1472_v2  ;;  %598 = vmatprep.mubr.bf16.mxu1 %v1472_v2  ;;  %v674_v2 = vadd.s32 24, %v1629_v1 }
  0x2e   : > { %v704_v5 = vand.u32 15, %v674_v2 }
  0x30   : > { %vm1644_vm4 = vcmp.lt.s32.totalorder %v704_v5, 14  ;;  %v673_v5 = vadd.s32 16, %v1629_v1 }
  0x32   : > { %v697_v29 = vand.u32 15, %v673_v5 }
  0x33   : > { %1344 = vmatmul.mubr.msk.bf16.gmra.mrb[12].mxu0 %vm450_vm0, %v321_v63  ;;  %1348 = vmatmul.mubr.msk.bf16.gmra.mrb[12].mxu1 %vm450_vm0, %v321_v63 }
  0x34   : > { %1413 = vmatprep.mubr.msk.bf16.mxu1 %vm450_vm0, %v320_v58  ;;  %1409 = vmatprep.mubr.msk.bf16.mxu0 %vm450_vm0, %v318_v40  ;;  %vm1762_vm10 = vcmp.ge.s32.totalorder %v697_v29, 2 }
  0x3b   : > { %1414 = vmatmul.mubr.msk.bf16.vlgmr.msra.gmra.mrb[16].mxu1 %vm450_vm0, %v321_v63  ;;  %1410 = vmatmul.mubr.msk.bf16.vlgmr.msra.gmra.mrb[16].mxu0 %vm450_vm0, %v319_v49 }
  0x7b   : > { %v1816_v60 = vpop.permute.xlu0 %950 }
  0xee   : > { %v497_v6 = vpop.f32.mrb[0].mxu0  ;;  %v1633_v7 = vpop.f32.mrb[0].mxu1 }
  0xef   : > { %v780_v8 = vrot.slane %v497_v6, 6  ;;  %v499_v9 = vpop.f32.mrb[1].mxu0  ;;  %v572_v10 = vpop.f32.mrb[1].mxu1 }
  0xf0   : > { %v971_v13 = vrot.slane %v572_v10, 2  ;;  %v1640_v14 = vpop.f32.mrb[2].mxu1  ;;  %909 = vrot.lane.b32.xlu0 %v499_v9, %s1474_s16  ;;  %v501_v15 = vpop.f32.mrb[2].mxu0 }
  0xf1   : > { %v781_v18 = vrot.slane %v501_v15, 6  ;;  %v503_v19 = vpop.f32.mrb[3].mxu0  ;;  %v576_v20 = vpop.f32.mrb[3].mxu1  ;;  %v1649_v21 = vsel %vm779_vm1, 0.0, %v780_v8 }
  0xf2   : > { %v1652_v22 = vsel %vm970_vm2, 0.0, %v971_v13  ;;  %v972_v23 = vrot.slane %v576_v20, 2  ;;  %v816_v24 = vsel %vm1635_vm3, %v1649_v21, 0.0 }
  0xf3   : > { %v1658_v25 = vsel %vm779_vm1, %v780_v8, %v781_v18  ;;  %v1010_v27 = vsel %vm1644_vm4, %v1652_v22, 0.0 }
  0xf4   : > { %832 = vrot.lane.b32.xlu0 %v780_v8, %s1474_s16  ;;  %v1665_v28 = vsel %vm970_vm2, %v971_v13, %v972_v23 }
  0xf5   : > { %1053 = vrot.lane.b32.xlu1 %v1665_v28, %s1474_s16 }
  0xf6   : > { %v507_v30 = vpop.f32.mrb[4].mxu0  ;;  %v1669_v31 = vpop.f32.mrb[4].mxu1 }
  0xf7   : > { %v783_v33 = vrot.slane %v507_v30, 6  ;;  %v509_v34 = vpop.f32.mrb[5].mxu0  ;;  %v582_v35 = vpop.f32.mrb[5].mxu1 }
  0xf8   : > { %v974_v38 = vrot.slane %v582_v35, 2  ;;  %911 = vrot.lane.b32.xlu0 %v503_v19, %s1474_s16  ;;  %v511_v39 = vpop.f32.mrb[6].mxu0  ;;  %v1678_v40 = vpop.f32.mrb[6].mxu1 }
  0xf9   : > { %v785_v42 = vrot.slane %v511_v39, 6  ;;  %913 = vrot.lane.b32.xlu1 %v509_v34, %s1474_s16  ;;  %v1685_v43 = vpop.f32.mrb[7].mxu0  ;;  %v586_v44 = vpop.f32.mrb[7].mxu1  ;;  %v1688_v45 = vsel %vm779_vm1, %v781_v18, %v783_v33 }
  0xfa   : > { %v976_v46 = vrot.slane %v586_v44, 2  ;;  %v1691_v48 = vsel %vm970_vm2, %v972_v23, %v974_v38  ;;  %v818_v49 = vsel %vm1673_vm5, %v1688_v45, 0.0  ;;  %v878_v63 = vrot.slane %v1685_v43, 6  ;;  %v1837_v44 = vld [vmem:[%s1941_s2] ss:$0 sm:$0xff] }
  0xfb   : > { %v1697_v50 = vsel %vm779_vm1, %v783_v33, %v785_v42  ;;  %v1012_v53 = vsel %vm1680_vm6, %v1691_v48, 0.0  ;;  %v1038_v1 = vsel %vm1712_vm7, %v1691_v48, 0.0 }
  0xfc   : > { %834 = vrot.lane.b32.xlu0 %v1658_v25, %s1474_s16  ;;  %v1706_v54 = vsel %vm970_vm2, %v974_v38, %v976_v46 }
  0xfd   : > { %836 = vrot.lane.b32.xlu1 %v1688_v45, %s1474_s16 }
  0xfe   : > { %v517_v55 = vpop.f32.mrb[8].mxu0  ;;  %v1710_v56 = vpop.f32.mrb[8].mxu1 }
  0xff   : > { %v824_v57 = vrot.slane %v517_v55, 6  ;;  %v519_v58 = vpop.f32.mrb[9].mxu0  ;;  %v592_v59 = vpop.f32.mrb[9].mxu1 }
 0x100   : > { %v879_v0 = vrot.slane %v519_v58, 6  ;;  %v978_v3 = vrot.slane %v592_v59, 2  ;;  %838 = vrot.lane.b32.xlu0 %v1697_v50, %s1474_s16  ;;  %v1727_v2 = vpop.f32.mrb[10].mxu1  ;;  %v521_v4 = vpop.f32.mrb[10].mxu0 }
 0x101   : > { %1057 = vrot.lane.b32.xlu1 %v1706_v54, %s1474_s16  ;;  %v596_v6 = vpop.f32.mrb[11].mxu1  ;;  %v826_v8 = vrot.slane %v521_v4, 6  ;;  %v523_v9 = vpop.f32.mrb[11].mxu0  ;;  %v825_v10 = vsel %vm779_vm1, %v785_v42, %v824_v57 }
 0x102   : > { %v1026_v12 = vrot.slane %v596_v6, 2  ;;  %v881_v13 = vrot.slane %v523_v9, 6  ;;  %v1734_v15 = vsel %vm970_vm2, %v976_v46, %v978_v3  ;;  %v1737_v16 = vsel %vm779_vm1, %v878_v63, %v879_v0 }
 0x103   : > { %v827_v18 = vsel %vm779_vm1, %v824_v57, %v826_v8  ;;  %v893_v19 = vsel %vm1720_vm9, %v1737_v16, 0.0  ;;  %v1014_v20 = vsel %vm1716_vm8, %v1734_v15, 0.0 }
 0x104   : > { %1055 = vrot.lane.b32.xlu0 %v1038_v1, %s1474_s16  ;;  %v1027_v23 = vsel %vm970_vm2, %v978_v3, %v1026_v12  ;;  %v1752_v26 = vsel %vm779_vm1, %v879_v0, %v881_v13 }
 0x105   : > { %942 = vrot.lane.b32.xlu1 %v1710_v56, %s1474_s16 }
 0x106   : > { %v527_v30 = vpop.f32.mrb[12].mxu0  ;;  %v1756_v32 = vpop.f32.mrb[12].mxu1 }
 0x107   : > { %v828_v33 = vrot.slane %v527_v30, 6  ;;  %v529_v34 = vpop.f32.mrb[13].mxu0  ;;  %v602_v35 = vpop.f32.mrb[13].mxu1 }
 0x108   : > { %v883_v36 = vrot.slane %v529_v34, 6  ;;  %v1028_v38 = vrot.slane %v602_v35, 2  ;;  %944 = vrot.lane.b32.xlu0 %v1727_v2, %s1474_s16  ;;  %v1760_v39 = vpop.f32.mrb[14].mxu1  ;;  %v531_v42 = vpop.f32.mrb[14].mxu0 }
 0x109   : > { %840 = vrot.lane.b32.xlu1 %v825_v10, %s1474_s16  ;;  %v830_v46 = vrot.slane %v531_v42, 6  ;;  %v606_v47 = vpop.f32.mrb[15].mxu1  ;;  %v533_v51 = vpop.f32.mrb[15].mxu0  ;;  %v829_v52 = vsel %vm779_vm1, %v826_v8, %v828_v33 }
 0x10a   : > { %v1030_v55 = vrot.slane %v606_v47, 2  ;;  %v885_v57 = vrot.slane %v533_v51, 6  ;;  %v1029_v58 = vsel %vm970_vm2, %v1026_v12, %v1028_v38  ;;  %v884_v59 = vsel %vm779_vm1, %v881_v13, %v883_v36 }
 0x10b   : > { %v831_v63 = vsel %vm779_vm1, %v828_v33, %v830_v46  ;;  %v895_v0 = vsel %vm1762_vm10, %v884_v59, 0.0 }
 0x10c   : > { %948 = vrot.lane.b32.xlu0 %v1760_v39, %s1474_s16  ;;  %v1776_v3 = vsel %vm779_vm1, %v885_v57, 0.0  ;;  %v1031_v4 = vsel %vm970_vm2, %v1028_v38, %v1030_v55  ;;  %v886_v5 = vsel %vm779_vm1, %v883_v36, %v885_v57  ;;  %v1042_v57 = vsel %vm1680_vm6, %v1029_v58, 0.0 }
 0x10d   : > { %842 = vrot.lane.b32.xlu1 %v827_v18, %s1474_s16  ;;  %v897_v6 = vsel %vm1635_vm3, %v1776_v3, 0.0  ;;  %v1036_v59 = vsel %vm970_vm2, %v1030_v55, 0.0 }
 0x10e   : > { %v1415_v8 = vpop.f32.mrb[16].mxu1  ;;  %v1411_v9 = vpop.f32.mrb[16].mxu0 }
 0x10f   : > { %v655_v10 = vpop.f32.mrb[17].mxu1  ;;  %v643_v12 = vpop.f32.mrb[17].mxu0  ;;  %v1092_v13 = vrot.slane %v1415_v8, 2 }
 0x110   : > { %846 = vrot.lane.b32.xlu0 %v831_v63, %s1474_s16  ;;  %v1089_v1 = vrot.slane %v655_v10, 2  ;;  %v1416_v29 = vpop.f32.mrb[18].mxu1  ;;  %v1412_v30 = vpop.f32.mrb[18].mxu0  ;;  %v1044_v63 = vsel %vm1716_vm8, %v1036_v59, 0.0 }
 0x111   : > { %946 = vrot.lane.b32.xlu1 %v1756_v32, %s1474_s16  ;;  %v1094_v33 = vrot.slane %v1416_v29, 2  ;;  %v658_v34 = vpop.f32.mrb[19].mxu1  ;;  %v645_v18 = vpop.f32.mrb[19].mxu0 }
 0x112   : > { %v1090_v35 = vrot.slane %v658_v34, 2 }
 0x113   : > { %v1788_v36 = vsel %vm970_vm2, %v1092_v13, %v1094_v33  ;;  %v1791_v38 = vsel %vm970_vm2, %v1094_v33, 0.0 }
 0x114   : > { %915 = vrot.lane.b32.xlu0 %v1685_v43, %s1474_s16  ;;  %v1091_v42 = vsel %vm970_vm2, %v1089_v1, %v1090_v35  ;;  %v1093_v46 = vsel %vm970_vm2, %v1090_v35, %v1092_v13  ;;  %v1104_v47 = vsel %vm1644_vm4, %v1791_v38, 0.0  ;;  %v1040_v43 = vsel %vm1644_vm4, %v1734_v15, 0.0 }
 0x115   : > { %844 = vrot.lane.b32.xlu1 %v829_v52, %s1474_s16  ;;  %v1102_v51 = vsel %vm1712_vm7, %v1093_v46, 0.0 }
 0x118   : > { %1063 = vrot.lane.b32.xlu0 %v1042_v57, %s1474_s16 }
 0x119   : > { %1059 = vrot.lane.b32.xlu1 %v1040_v43, %s1474_s16 }
 0x11c   : > { %1067 = vrot.lane.b32.xlu0 %v1044_v63, %s1474_s16 }
 0x11d   : > { %1061 = vrot.lane.b32.xlu1 %v1027_v23, %s1474_s16 }
 0x121   : > { %1065 = vrot.lane.b32.xlu1 %v1031_v4, %s1474_s16 }
 0x162   : > { %v910_v52 = vpop.permute.xlu0 %909 }
 0x166   : > { %v833_v55 = vpop.permute.xlu0 %832 }
 0x167   : > { %v856_v58 = vsel %vm779_vm1, 0.0, %v833_v55  ;;  %v1054_v8 = vpop.permute.xlu1 %1053 }
 0x168   : > { %v857_v9 = vsel %vm1720_vm9, %v856_v58, 0.0 }
 0x169   : > { %v898_v10 = vadd.f32 %v893_v19, %v857_v9 }
 0x16a   : > { %v912_v12 = vpop.permute.xlu0 %911 }
 0x16b   : > { %v1825_v13 = vpop.permute.xlu1 %913  ;;  %v929_v23 = vadd.f32 %v898_v10, %v1633_v7 }
 0x16e   : > { %v835_v4 = vpop.permute.xlu0 %834 }
 0x16f   : > { %v899_v1 = vadd.f32 %v1752_v26, %v835_v4  ;;  %v837_v29 = vpop.permute.xlu1 %836 }
 0x170   : > { %v859_v30 = vsel %vm1762_vm10, %v837_v29, 0.0 }
 0x171   : > { %v900_v33 = vadd.f32 %v895_v0, %v859_v30  ;;  %v930_v34 = vadd.f32 %v899_v1, %v1640_v14 }
 0x172   : > { %v839_v18 = vpop.permute.xlu0 %838 }
 0x173   : > { %v901_v62 = vadd.f32 %v886_v5, %v839_v18  ;;  %v1058_v35 = vpop.permute.xlu1 %1057  ;;  %v931_v16 = vadd.f32 %v900_v33, %v1669_v31 }
 0x175   : > { %v932_v19 = vadd.f32 %v901_v62, %v1678_v40 }
 0x176   : > { %v1056_v46 = vpop.permute.xlu0 %1055 }
 0x177   : > { %v943_v7 = vpop.permute.xlu1 %942 }
 0x178   : > { %v957_v57 = vadd.f32 %v943_v7, %v929_v23 }
 0x17a   : > { %v1077_v59 = vadd.f32 %v1054_v8, %v957_v57  ;;  %v945_v26 = vpop.permute.xlu0 %944 }
 0x17b   : > { %v958_v0 = vadd.f32 %v945_v26, %v930_v34  ;;  %v841_v14 = vpop.permute.xlu1 %840 }
 0x17c   : > { %v1105_v43 = vadd.f32 %v1091_v42, %v1077_v59  ;;  %v861_v5 = vsel %vm1635_vm3, %v841_v14, 0.0 }
 0x17d   : > { %v1078_v31 = vadd.f32 %v1056_v46, %v958_v0  ;;  %v869_v40 = vadd.f32 %v861_v5, %v816_v24 }
 0x17e   : > { %v1120_v63 = vadd.f32 %v1837_v44, %v1105_v43  ;;  %v949_v55 = vpop.permute.xlu0 %948 }
 0x17f   : > { %v1106_v42 = vadd.f32 %v1102_v51, %v1078_v31  ;;  %v902_v58 = vadd.f32 %v897_v6, %v869_v40  ;;  %v960_v8 = vadd.f32 %v949_v55, %v932_v19  ;;  %v843_v21 = vpop.permute.xlu1 %842 }
 0x180   : > { %v1366_v24 = vpack.c.bf16 %v1120_v63, %v1120_v63  ;;  %v870_v9 = vadd.f32 %v843_v21, %v1658_v25  ;;  %v1190_v10 = vmul.f32 %v1120_v63, %v1120_v63  ;;  %v1169_v6 = vsel %vm450_vm0, %v1120_v63, 0.0 }
 0x181   : > { %v1121_v23 = vadd.f32 %v1837_v44, %v1106_v42  ;;  %v925_v4 = vadd.f32 %v910_v52, %v902_v58  ;;  %v1018_v51 = vadd.f32 %v1010_v27, %v960_v8 }
 0x182   : > { %1161 = vst.msk [vmem:[%s1851_s9] sm:$0xf] %vm1160_vm11, %v1366_v24  ;;  %v926_v11 = vadd.f32 %v912_v12, %v870_v9  ;;  %v847_v3 = vpop.permute.xlu0 %846  ;;  %v1198_v22 = vsel %vm450_vm0, %v1190_v10, 0.0 }
 0x183   : > { %v1367_v1 = vpack.c.bf16 %v1121_v23, %v1121_v23  ;;  %v1170_v29 = vsel %vm450_vm0, %v1121_v23, 0.0  ;;  %v1191_v25 = vmul.f32 %v1121_v23, %v1121_v23  ;;  %v947_v30 = vpop.permute.xlu1 %946  ;;  %v933_v18 = vadd.f32 %v925_v4, %v1710_v56 }
 0x184   : > { %v1171_v33 = vadd.f32 %v1170_v29, %v1169_v6  ;;  %v934_v34 = vadd.f32 %v926_v11, %v1727_v2  ;;  %v959_v52 = vadd.f32 %v947_v30, %v931_v16  ;;  %v872_v12 = vadd.f32 %v847_v3, %v1697_v50 }
 0x185   : > { %1162 = vst.msk [vmem:[%s1851_s9 + $0x4] sm:$0xf] %vm1160_vm11, %v1367_v1  ;;  %v1199_v27 = vsel %vm450_vm0, %v1191_v25, 0.0 }
 0x186   : > { %v1200_v62 = vadd.f32 %v1199_v27, %v1198_v22  ;;  %v1079_v19 = vadd.f32 %v1058_v35, %v959_v52  ;;  %v916_v46 = vpop.permute.xlu0 %915  ;;  %v962_v7 = vadd.f32 %v1816_v60, %v934_v34 }
 0x187   : > { %v928_v57 = vadd.f32 %v916_v46, %v872_v12  ;;  %v845_v59 = vpop.permute.xlu1 %844 }
 0x188   : > { %v1107_v2 = vadd.f32 %v1788_v36, %v1079_v19  ;;  %v863_v56 = vsel %vm1673_vm5, %v845_v59, 0.0  ;;  %v1020_v16 = vadd.f32 %v1012_v53, %v962_v7  ;;  %v961_v36 = vadd.f32 %v1816_v60, %v933_v18 }
 0x189   : > { %v936_v26 = vadd.f32 %v928_v57, %v1760_v39  ;;  %v871_v50 = vadd.f32 %v863_v56, %v818_v49 }
 0x18a   : > { %v1122_v35 = vadd.f32 %v1837_v44, %v1107_v2  ;;  %v1064_v0 = vpop.permute.xlu0 %1063 }
 0x18b   : > { %v927_v14 = vadd.f32 %v1825_v13, %v871_v50  ;;  %v1082_v43 = vadd.f32 %v1064_v0, %v1020_v16  ;;  %v1060_v41 = vpop.permute.xlu1 %1059  ;;  %v964_v48 = vadd.f32 %v1816_v60, %v936_v26 }
 0x18c   : > { %v1368_v53 = vpack.c.bf16 %v1122_v35, %v1122_v35  ;;  %v1172_v39 = vsel %vm450_vm0, %v1122_v35, 0.0  ;;  %v1192_v5 = vmul.f32 %v1122_v35, %v1122_v35  ;;  %v1080_v37 = vadd.f32 %v1060_v41, %v1018_v51 }
 0x18d   : > { %v935_v45 = vadd.f32 %v927_v14, %v1756_v32  ;;  %v1125_v49 = vadd.f32 %v1837_v44, %v1082_v43  ;;  %v1022_v31 = vadd.f32 %v1014_v20, %v964_v48  ;;  %v1173_v13 = vadd.f32 %v1172_v39, %v1171_v33 }
 0x18e   : > { %1163 = vst.msk [vmem:[%s1851_s9 + $0x8] sm:$0xf] %vm1160_vm11, %v1368_v53  ;;  %v1201_v40 = vsel %vm450_vm0, %v1192_v5, 0.0  ;;  %v1108_v63 = vadd.f32 %v1104_v47, %v1080_v37  ;;  %v1068_v55 = vpop.permute.xlu0 %1067  ;;  %v1019_v32 = vadd.f32 %v1665_v28, %v961_v36 }
 0x18f   : > { %v1371_v42 = vpack.c.bf16 %v1125_v49, %v1125_v49  ;;  %v1084_v58 = vadd.f32 %v1068_v55, %v1022_v31  ;;  %v1062_v61 = vpop.permute.xlu1 %1061  ;;  %v1202_v8 = vadd.f32 %v1201_v40, %v1200_v62  ;;  %v963_v17 = vadd.f32 %v1816_v60, %v935_v45 }
 0x190   : > { %v1123_v15 = vadd.f32 %v1837_v44, %v1108_v63  ;;  %v1081_v20 = vadd.f32 %v1062_v61, %v1019_v32  ;;  %v1195_v9 = vmul.f32 %v1125_v49, %v1125_v49  ;;  %v1178_v25 = vsel %vm450_vm0, %v1125_v49, 0.0 }
 0x191   : > { %1166 = vst.msk [vmem:[%s1851_s9 + $0x14] sm:$0xf] %vm1160_vm11, %v1371_v42  ;;  %v1127_v21 = vadd.f32 %v1837_v44, %v1084_v58  ;;  %v1021_v29 = vadd.f32 %v1706_v54, %v963_v17 }
 0x192   : > { %v1369_v38 = vpack.c.bf16 %v1123_v15, %v1123_v15  ;;  %v1174_v47 = vsel %vm450_vm0, %v1123_v15, 0.0  ;;  %v1193_v24 = vmul.f32 %v1123_v15, %v1123_v15  ;;  %v1124_v28 = vadd.f32 %v1837_v44, %v1081_v20 }
 0x193   : > { %v1373_v10 = vpack.c.bf16 %v1127_v21, %v1127_v21  ;;  %v1175_v23 = vadd.f32 %v1174_v47, %v1173_v13  ;;  %v1066_v6 = vpop.permute.xlu1 %1065  ;;  %v1207_v18 = vsel %vm450_vm0, %v1195_v9, 0.0  ;;  %v1197_v12 = vmul.f32 %v1127_v21, %v1127_v21 }
 0x194   : > { %1164 = vst.msk [vmem:[%s1851_s9 + $0xc] sm:$0xf] %vm1160_vm11, %v1369_v38  ;;  %v1203_v4 = vsel %vm450_vm0, %v1193_v24, 0.0  ;;  %v1370_v51 = vpack.c.bf16 %v1124_v28, %v1124_v28  ;;  %v1176_v11 = vsel %vm450_vm0, %v1124_v28, 0.0  ;;  %v1194_v3 = vmul.f32 %v1124_v28, %v1124_v28 }
 0x195   : > { %1168 = vst.msk [vmem:[%s1851_s9 + $0x1c] sm:$0xf] %vm1160_vm11, %v1373_v10  ;;  %v1177_v60 = vadd.f32 %v1176_v11, %v1175_v23  ;;  %v1204_v1 = vadd.f32 %v1203_v4, %v1202_v8  ;;  %v1083_v34 = vadd.f32 %v1066_v6, %v1021_v29  ;;  %v1182_v7 = vsel %vm450_vm0, %v1127_v21, 0.0 }
 0x196   : > { %1165 = vst.msk [vmem:[%s1851_s9 + $0x10] sm:$0xf] %vm1160_vm11, %v1370_v51  ;;  %v1205_v30 = vsel %vm450_vm0, %v1194_v3, 0.0  ;;  %v1211_v56 = vsel %vm450_vm0, %v1197_v12, 0.0 }
 0x197   : > { %v1206_v33 = vadd.f32 %v1205_v30, %v1204_v1  ;;  %v1179_v52 = vadd.f32 %v1178_v25, %v1177_v60  ;;  %v1126_v22 = vadd.f32 %v1837_v44, %v1083_v34 }
 0x199   : > { %v1208_v27 = vadd.f32 %v1207_v18, %v1206_v33  ;;  %v1372_v62 = vpack.c.bf16 %v1126_v22, %v1126_v22  ;;  %v1180_v19 = vsel %vm450_vm0, %v1126_v22, 0.0  ;;  %v1196_v54 = vmul.f32 %v1126_v22, %v1126_v22 }
 0x19a   : > { %v1181_v46 = vadd.f32 %v1180_v19, %v1179_v52 }
 0x19b   : > { %1167 = vst.msk [vmem:[%s1851_s9 + $0x18] sm:$0xf] %vm1160_vm11, %v1372_v62  ;;  %v1209_v57 = vsel %vm450_vm0, %v1196_v54, 0.0 }
 0x19c   : > { %v1183_v59 = vadd.f32 %v1182_v7, %v1181_v46  ;;  %v1210_v2 = vadd.f32 %v1209_v57, %v1208_v27 }
 0x19e   : > { %v1184_v16 = vrot.slane %v1183_v59, 4  ;;  %v1212_v44 = vadd.f32 %v1211_v56, %v1210_v2 }
 0x1a0   : > { %v1185_v26 = vadd.f32 %v1184_v16, %v1183_v59  ;;  %v1213_v50 = vrot.slane %v1212_v44, 4 }
 0x1a2   : > { %v1186_v35 = vrot.slane %v1185_v26, 2  ;;  %v1214_v0 = vadd.f32 %v1213_v50, %v1212_v44 }
 0x1a4   : > { %v1187_v36 = vadd.f32 %v1186_v35, %v1185_v26  ;;  %v1215_v14 = vrot.slane %v1214_v0, 2 }
 0x1a6   : > { %v1188_v43 = vrot.slane %v1187_v36, 1  ;;  %v1216_v41 = vadd.f32 %v1215_v14, %v1214_v0 }
 0x1a8   : > { %v1217_v48 = vrot.slane %v1216_v41, 1  ;;  %v1189_v53 = vadd.f32 %v1188_v43, %v1187_v36 }
 0x1aa   : > { %v1218_v39 = vadd.f32 %v1217_v48, %v1216_v41 }
 0x1ac   : > { %v1220_v5 = vsel %vm1219_vm12, %v1189_v53, %v1218_v39 }
 0x1ad   : > { %1222 = vst.msk [vmem:[%s262_s12] sm:$0x3] %vm1221_vm13, %v1220_v5 }
 0x1ae PF: > { %s17_s21 = sadd.s32 1, %s1470_s21  }
 0x1af   : > { %p14_p4 = scmp.ge.s32.totalorder %s17_s21, 4  }
 0x1b1   :  { %16 = sbr.rel (!%p14_p4) target bundleno = 1 (0x1), region = 82 }

</bundles_post_ra>
